<compile_context>
chip_gen: v5e
topology: v5e:2x2
jax: 0.10.0
libtpu: 0.0.40
codegen_flags: <defaults>
</compile_context>

<pallas_src>
import functools

import jax
import jax.numpy as jnp
from jax.experimental import pallas as pl
from jax.experimental.pallas import tpu as pltpu

LANE = 128


# --------------------------------------------------------------------------- #
# Pallas kernel: K-streamed GEMM with fused bias / residual / activation       #
# --------------------------------------------------------------------------- #
def _gemm_kernel(*refs, has_bias, has_residual, activation):
    a_ref, w_ref = refs[0], refs[1]
    pos = 2
    b_ref = r_ref = None
    if has_bias:
        b_ref, pos = refs[pos], pos + 1
    if has_residual:
        r_ref, pos = refs[pos], pos + 1
    o_ref = refs[pos]

    k = pl.program_id(2)
    prod = jnp.dot(a_ref[...], w_ref[0], preferred_element_type=jnp.float32)

    @pl.when(k == 0)
    def _init():
        o_ref[...] = prod

    @pl.when(k > 0)
    def _accumulate():
        o_ref[...] += prod

    if has_bias or has_residual or activation != "none":
        @pl.when(k == pl.num_programs(2) - 1)
        def _epilogue():
            acc = o_ref[...]
            if has_bias:
                acc = acc + b_ref[...]
            if has_residual:
                acc = acc + r_ref[...]
            if activation == "relu":
                acc = jnp.maximum(acc, 0.0)
            elif activation == "sigmoid":
                acc = pl.reciprocal(1.0 + jnp.exp(-acc), approx=True)
            o_ref[...] = acc


# --------------------------------------------------------------------------- #
# pallas_call plumbing                                                          #
# --------------------------------------------------------------------------- #
def _pick_tm(m, cap=128):
    if m <= cap:
        return m
    for tm in (128, 64, 32, 16, 8):
        if m % tm == 0:
            return tm
    return m


def _pick_tk(k, cap=512):
    if k <= cap:
        return k
    for tk in (512, 384, 256, 128):     # multiples of 128 (v5e-friendly)
        if k % tk == 0:
            return tk
    return k


def _gemm(a, w3, bias=None, residual=None, activation="none", groups=1):
    """Grouped GEMM: out[g*M:(g+1)*M] = epilogue(a[g*M:(g+1)*M] @ w3[g]).

    a:        (groups*M, K)  bf16 (im2col'd activation)
    w3:       (groups, K, N) bf16 (BN-folded conv weight, N lane-dense)
    bias:     (1, N) f32 or None
    residual: (groups*M, N) f32 or None
    returns:  (groups*M, N) f32
    """
    gm, kdim = a.shape
    g_, kw, n = w3.shape
    assert g_ == groups and kw == kdim
    m = gm // groups
    tm = _pick_tm(m)
    nm = m // tm
    tk = _pick_tk(kdim)
    nk = kdim // tk

    in_specs = [
        pl.BlockSpec((tm, tk), lambda g, i, k: (g * nm + i, k)),
        pl.BlockSpec((1, tk, n), lambda g, i, k: (g, k, 0)),
    ]
    args = [a, w3]
    if bias is not None:
        in_specs.append(pl.BlockSpec((1, n), lambda g, i, k: (0, 0)))
        args.append(bias)
    if residual is not None:
        in_specs.append(pl.BlockSpec((tm, n), lambda g, i, k: (g * nm + i, 0)))
        args.append(residual)

    # Right-sized VMEM limit: double-buffered per-step blocks + headroom.
    blk_bytes = (tm * tk * 2 + tk * n * 2 + tm * n * 4 + n * 4
                 + (tm * n * 4 if residual is not None else 0))
    kernel = functools.partial(_gemm_kernel,
                               has_bias=bias is not None,
                               has_residual=residual is not None,
                               activation=activation)
    return pl.pallas_call(
        kernel,
        grid=(groups, nm, nk),
        in_specs=in_specs,
        out_specs=pl.BlockSpec((tm, n), lambda g, i, k: (g * nm + i, 0)),
        out_shape=jax.ShapeDtypeStruct((gm, n), jnp.float32),
        compiler_params=pltpu.CompilerParams(
            dimension_semantics=("parallel", "parallel", "arbitrary"),
            vmem_limit_bytes=int(2 * blk_bytes + (8 << 20))),
    )(*args)


# --------------------------------------------------------------------------- #
# XLA-side layout glue (im2col, phase windows)                                  #
# --------------------------------------------------------------------------- #
def _im2col3x3(x):
    """(n, h, w, c) f32 -> (n*h*w, 9*c) bf16, K ordered [3*dy+dx, c]."""
    n, h, w, c = x.shape
    xp = jnp.pad(x, ((0, 0), (1, 1), (1, 1), (0, 0)))
    taps = [xp[:, dy:dy + h, dx:dx + w, :] for dy in range(3) for dx in range(3)]
    a = jnp.concatenate(taps, axis=-1)
    return a.reshape(n * h * w, 9 * c).astype(jnp.bfloat16)


def _im2col_phase(h1, x):
    """Per-phase 2x2-tap im2col of [h1 ; x] for the upsample-folded conv.

    Returns (4*n*h*w, 8*c) bf16; rows ordered [phase=2a+b, n, h, w],
    K ordered [h1 taps (2i+j), x taps (2i+j)], c contiguous per tap."""
    n, h, w, c = h1.shape
    hp = jnp.pad(h1, ((0, 0), (1, 1), (1, 1), (0, 0)))
    xp = jnp.pad(x, ((0, 0), (1, 1), (1, 1), (0, 0)))
    phases = []
    for a in range(2):
        for b in range(2):
            taps = [hp[:, a + i:a + i + h, b + j:b + j + w, :]
                    for i in range(2) for j in range(2)]
            taps += [xp[:, a + i:a + i + h, b + j:b + j + w, :]
                     for i in range(2) for j in range(2)]
            phases.append(
                jnp.concatenate(taps, axis=-1).reshape(n * h * w, 8 * c))
    return jnp.concatenate(phases, axis=0).astype(jnp.bfloat16)


# --------------------------------------------------------------------------- #
# Decoder forward                                                               #
# --------------------------------------------------------------------------- #
def forward_pallas(z, kp):
    n, hz, wz, dl = z.shape
    # conv_first (1x1) output: needed only for the first block's residual path
    # (its conv2 contribution is folded into that block's conv2 weight).
    x = _gemm(z.reshape(n * hz * wz, dl).astype(jnp.bfloat16),
              kp["conv_first_w"]).reshape(n, hz, wz, -1)

    first = True
    for blocks in kp["layers"]:
        for blk in blocks:
            cin = blk["cin"]
            nb, hh, ww = x.shape[0], x.shape[1], x.shape[2]
            # conv2 + BN2 + ReLU (BN folded into weight/bias).
            a2 = _im2col3x3(z) if first else _im2col3x3(x[..., :cin])
            first = False
            h1 = _gemm(a2, blk["conv2_w"], bias=blk["conv2_b"],
                       activation="relu").reshape(nb, hh, ww, -1)
            if blk["stride"] == 1:
                # conv1 + BN1 + identity residual + ReLU.
                a1 = _im2col3x3(h1[..., :cin])
                x = _gemm(a1, blk["conv1_w"], bias=blk["conv1_b"],
                          residual=x.reshape(nb * hh * ww, -1),
                          activation="relu").reshape(nb, hh, ww, -1)
            else:
                # x2-upsample-folded conv1+BN1 and BN'd shortcut fused into a
                # single grouped GEMM over the 4 output phases.
                a1 = _im2col_phase(h1[..., :cin], x[..., :cin])
                out = _gemm(a1, blk["conv1_w"], bias=blk["conv1_b"],
                            activation="relu", groups=4)
                cp = out.shape[-1]
                out = out.reshape(2, 2, nb, hh, ww, cp)
                x = out.transpose(2, 3, 0, 4, 1, 5).reshape(
                    nb, 2 * hh, 2 * ww, cp)

    # final ResizeConv2d(scale=1): 3x3 conv + bias, then sigmoid.
    nb, hh, ww = x.shape[0], x.shape[1], x.shape[2]
    a = _im2col3x3(x[..., :kp["final_cin"]])
    y = _gemm(a, kp["conv_last_w"], bias=kp["conv_last_b"],
              activation="sigmoid")
    return y.reshape(nb, hh, ww, -1)[..., :kp["nc"]]


# --------------------------------------------------------------------------- #
# Parameters (deterministic), BN folding, upsample-folded phase weights        #
# --------------------------------------------------------------------------- #
def init_params(key, dim_latent=10, nc=3, num_blocks=(2, 2, 2, 2)):
    ks = iter(jax.random.split(key, 128))

    def conv_w(kh, kw, cin, cout):
        std = (2.0 / (kh * kw * cin)) ** 0.5
        return std * jax.random.normal(next(ks), (kh, kw, cin, cout),
                                       jnp.float32)

    def bn(c):
        return dict(
            gamma=jax.random.uniform(next(ks), (c,), jnp.float32, 0.5, 0.9),
            beta=0.1 * jax.random.normal(next(ks), (c,), jnp.float32),
            mean=0.1 * jax.random.normal(next(ks), (c,), jnp.float32),
            var=jax.random.uniform(next(ks), (c,), jnp.float32, 0.8, 1.2))

    def bias(c):
        return 0.05 * jax.random.normal(next(ks), (c,), jnp.float32)

    params = {"conv_first_w": conv_w(1, 1, dim_latent, 512)}
    in_planes = 512
    layers = []
    # Decoder order: layer4 (->256), layer3 (->128), layer2 (->64),
    # layer1 (->64); inside a layer the strides run reversed([s0, 1, ...]).
    for planes, nb, s0 in ((256, num_blocks[3], 2), (128, num_blocks[2], 2),
                           (64, num_blocks[1], 2), (64, num_blocks[0], 1)):
        blocks = []
        for s in reversed([s0] + [1] * (nb - 1)):
            p = in_planes // s
            blk = {"stride": s,
                   "conv2_w": conv_w(3, 3, in_planes, in_planes),
                   "bn2": bn(in_planes),
                   "conv1_w": conv_w(3, 3, in_planes, p),
                   "bn1": bn(p)}
            if s != 1:
                blk["conv1_b"] = bias(p)
                blk["sc_w"] = conv_w(3, 3, in_planes, p)
                blk["sc_b"] = bias(p)
                blk["sc_bn"] = bn(p)
            blocks.append(blk)
        in_planes = planes
        layers.append(blocks)
    params["layers"] = layers
    params["conv_last_w"] = conv_w(3, 3, 64, nc)
    params["conv_last_b"] = bias(nc)
    return params


def _bn_scale_bias(bnp, conv_bias=None, eps=1e-5):
    s = bnp["gamma"] / jnp.sqrt(bnp["var"] + eps)
    b = bnp["beta"] - bnp["mean"] * s
    if conv_bias is not None:
        b = b + conv_bias * s
    return s, b


def _pad_lanes(w, n_pad):
    """Zero-pad the last (output-channel) dim up to n_pad lanes."""
    c = w.shape[-1]
    if c == n_pad:
        return w
    pad = [(0, 0)] * (w.ndim - 1) + [(0, n_pad - c)]
    return jnp.pad(w, pad)


def _cpad(c):
    return max(c, LANE)


def _phase_weights(w):
    """Fold the x2 nearest upsample into the 3x3 conv weights.

    Returns (4, 4, cin, cout): pw[2a+b, 2i+j] multiplies h_pad[p+a+i, q+b+j]
    in output pixel (2p+a, 2q+b)."""
    cin, cout = w.shape[2], w.shape[3]
    pw = jnp.zeros((2, 2, 2, 2, cin, cout), jnp.float32)
    for a in range(2):
        for b in range(2):
            for dy in range(3):
                i = (a + dy + 1) // 2 - a
                for dx in range(3):
                    j = (b + dx + 1) // 2 - b
                    pw = pw.at[a, b, i, j].add(w[dy, dx])
    return pw.reshape(4, 4, cin, cout)


def prepare_kernel_params(params, nc=3):
    wf = params["conv_first_w"][0, 0]                       # (dim_latent, 512)
    kp = {"conv_first_w": wf.astype(jnp.bfloat16)[None], "nc": nc}
    layers = []
    first = True
    for blocks in params["layers"]:
        kblocks = []
        for blk in blocks:
            cin = blk["conv2_w"].shape[2]
            s2, b2 = _bn_scale_bias(blk["bn2"])
            w2 = blk["conv2_w"]
            if first:
                # Fold conv_first (1x1) into the first conv2: K 9*512 -> 9*dl.
                w2 = jnp.einsum("io,yxoc->yxic", wf, w2, precision="highest")
                first = False
            w2 = (w2 * s2).reshape(-1, cin)
            np2 = _cpad(cin)
            kb = {"stride": blk["stride"], "cin": cin,
                  "conv2_w": _pad_lanes(w2, np2).astype(jnp.bfloat16)[None],
                  "conv2_b": _pad_lanes(b2, np2).reshape(1, -1)}
            if blk["stride"] == 1:
                cout = blk["conv1_w"].shape[3]
                s1, b1 = _bn_scale_bias(blk["bn1"])
                w1 = (blk["conv1_w"] * s1).reshape(9 * cin, cout)
                np1 = _cpad(cout)
                kb["conv1_w"] = _pad_lanes(w1, np1).astype(jnp.bfloat16)[None]
                kb["conv1_b"] = _pad_lanes(b1, np1).reshape(1, -1)
            else:
                cout = blk["conv1_w"].shape[3]
                s1, b1 = _bn_scale_bias(blk["bn1"], blk["conv1_b"])
                ss, bs = _bn_scale_bias(blk["sc_bn"], blk["sc_b"])
                pw1 = _phase_weights(blk["conv1_w"]) * s1    # (4,4,cin,cout)
                pws = _phase_weights(blk["sc_w"]) * ss
                wph = jnp.concatenate([pw1, pws], axis=1)    # (4,8,cin,cout)
                wph = wph.reshape(4, 8 * cin, cout)
                np1 = _cpad(cout)
                kb["conv1_w"] = _pad_lanes(wph, np1).astype(jnp.bfloat16)
                kb["conv1_b"] = _pad_lanes(b1 + bs, np1).reshape(1, -1)
            kblocks.append(kb)
        layers.append(kblocks)
    kp["layers"] = layers
    w = params["conv_last_w"]
    cin = w.shape[2]
    npl = _cpad(nc)
    kp["conv_last_w"] = _pad_lanes(w.reshape(9 * cin, nc),
                                   npl).astype(jnp.bfloat16)[None]
    kp["conv_last_b"] = _pad_lanes(params["conv_last_b"], npl).reshape(1, -1)
    kp["final_cin"] = cin
    return kp


# --------------------------------------------------------------------------- #
# Pure-JAX f32 reference (used only for verification)                          #
# --------------------------------------------------------------------------- #
def forward_ref(z, params):
    def conv(x, w, pad=1):
        return jax.lax.conv_general_dilated(
            x, w, (1, 1), ((pad, pad), (pad, pad)),
            dimension_numbers=("NHWC", "HWIO", "NHWC"))

    def bn(x, p, conv_bias=None, eps=1e-5):
        s = p["gamma"] / jnp.sqrt(p["var"] + eps)
        b = p["beta"] - p["mean"] * s
        if conv_bias is not None:
            b = b + conv_bias * s
        return x * s + b

    def up2(x):
        return jnp.repeat(jnp.repeat(x, 2, axis=1), 2, axis=2)

    x = conv(z, params["conv_first_w"], pad=0)
    for blocks in params["layers"]:
        for blk in blocks:
            h1 = jax.nn.relu(bn(conv(x, blk["conv2_w"]), blk["bn2"]))
            if blk["stride"] == 1:
                out = bn(conv(h1, blk["conv1_w"]), blk["bn1"]) + x
            else:
                out = (bn(conv(up2(h1), blk["conv1_w"]), blk["bn1"],
                          blk["conv1_b"]) +
                       bn(conv(up2(x), blk["sc_w"]), blk["sc_bn"],
                          blk["sc_b"]))
            x = jax.nn.relu(out)
    y = conv(x, params["conv_last_w"]) + params["conv_last_b"]
    return jax.nn.sigmoid(y)


# --------------------------------------------------------------------------- #
if __name__ == "__main__":
    key = jax.random.PRNGKey(0)
    kz, kparam = jax.random.split(key)

    # Small shapes consistent with the module: batch=2, dim_latent=10, 2x2
    # latent spatial -> decoded to (2, 3, 16, 16).
    N, DIM_LATENT, HZ, WZ, NC = 2, 10, 2, 2, 3
    z_nchw = jax.random.normal(kz, (N, DIM_LATENT, HZ, WZ), jnp.float32)

    params = init_params(kparam, dim_latent=DIM_LATENT, nc=NC)
    kparams = prepare_kernel_params(params, nc=NC)

    z_nhwc = jnp.transpose(z_nchw, (0, 2, 3, 1))
    fwd = jax.jit(functools.partial(forward_pallas, kp=kparams))
    out_nhwc = fwd(z_nhwc)
    out = jnp.transpose(out_nhwc, (0, 3, 1, 2))          # NCHW like PyTorch
    jax.block_until_ready(out)

    ref_nhwc = forward_ref(z_nhwc, params)
    ref = jnp.transpose(ref_nhwc, (0, 3, 1, 2))
    err = float(jnp.max(jnp.abs(out - ref)))

    assert out.shape == (N, NC, 16, 16), out.shape
    # bf16 matmul operands / BN-folded bf16 weights vs. the f32 reference.
    assert err < 5e-2, f"max abs error vs reference: {err}"
    print("KERNEL_OK")
</pallas_src>

<mosaic_0001>
module attributes {stable_mosaic.version = 11 : i64} {
  func.func @_gemm_kernel(%arg0: i32, %arg1: i32, %arg2: i32, %arg3: memref<8x10xbf16, #tpu.memory_space<vmem>>, %arg4: memref<1x10x512xbf16, #tpu.memory_space<vmem>>, %arg5: memref<8x512xf32, #tpu.memory_space<vmem>>) attributes {dimension_semantics = [#tpu.dimension_semantics<parallel>, #tpu.dimension_semantics<parallel>, #tpu.dimension_semantics<arbitrary>], iteration_bounds = array<i64: 1, 1, 1>, scalar_prefetch = 0 : i64, scratch_operands = 0 : i64, tpu.core_type = #tpu.core_type<tc>, window_params = [{transform_indices = @transform_0, window_bounds = array<i64: 8, 10>}, {transform_indices = @transform_1, window_bounds = array<i64: 1, 10, 512>}, {transform_indices = @transform_2, window_bounds = array<i64: 8, 512>}]} {
    %c0 = arith.constant 0 : index
    %c0_0 = arith.constant 0 : index
    %0 = vector.load %arg3[%c0, %c0_0] : memref<8x10xbf16, #tpu.memory_space<vmem>>, vector<8x10xbf16>
    %c0_1 = arith.constant 0 : index
    %c0_2 = arith.constant 0 : index
    %c0_3 = arith.constant 0 : index
    %1 = vector.load %arg4[%c0_1, %c0_2, %c0_3] : memref<1x10x512xbf16, #tpu.memory_space<vmem>>, vector<1x10x512xbf16>
    %2 = vector.shape_cast %1 : vector<1x10x512xbf16> to vector<10x512xbf16>
    %cst = arith.constant dense<0.000000e+00> : vector<8x512xf32>
    %3 = tpu.matmul %0, %2, %cst {dimension_numbers = #tpu.dot_dimension_numbers<[1], [0], [0], [1], [0, 0, 1, 1], [], []>} : vector<8x10xbf16>, vector<10x512xbf16>, vector<8x512xf32> -> vector<8x512xf32>
    %c0_i32 = arith.constant 0 : i32
    %4 = arith.cmpi eq, %arg2, %c0_i32 : i32
    %5 = arith.extui %4 : i1 to i32
    %c0_i32_4 = arith.constant 0 : i32
    %6 = arith.cmpi ne, %5, %c0_i32_4 : i32
    scf.if %6 {
      %c0_7 = arith.constant 0 : index
      %c0_8 = arith.constant 0 : index
      %10 = vector.load %arg5[%c0_7, %c0_8] : memref<8x512xf32, #tpu.memory_space<vmem>>, vector<8x512xf32>
      tpu.vector_store %arg5[%c0_7, %c0_8], %3 {strides = array<i32>} : memref<8x512xf32, #tpu.memory_space<vmem>>, vector<8x512xf32>,
    } else {
    }
    %c0_i32_5 = arith.constant 0 : i32
    %7 = arith.cmpi sgt, %arg2, %c0_i32_5 : i32
    %8 = arith.extui %7 : i1 to i32
    %c0_i32_6 = arith.constant 0 : i32
    %9 = arith.cmpi ne, %8, %c0_i32_6 : i32
    scf.if %9 {
      %c0_7 = arith.constant 0 : index
      %c0_8 = arith.constant 0 : index
      %10 = vector.load %arg5[%c0_7, %c0_8] : memref<8x512xf32, #tpu.memory_space<vmem>>, vector<8x512xf32>
      %11 = arith.addf %10, %3 : vector<8x512xf32>
      %c0_9 = arith.constant 0 : index
      %c0_10 = arith.constant 0 : index
      %12 = vector.load %arg5[%c0_9, %c0_10] : memref<8x512xf32, #tpu.memory_space<vmem>>, vector<8x512xf32>
      tpu.vector_store %arg5[%c0_9, %c0_10], %11 {strides = array<i32>} : memref<8x512xf32, #tpu.memory_space<vmem>>, vector<8x512xf32>,
    } else {
    }
    return
  }
  func.func @transform_0(%arg0: i32, %arg1: i32, %arg2: i32) -> (i32, i32) {
    %c1_i32 = arith.constant 1 : i32
    %0 = arith.muli %arg0, %c1_i32 : i32
    %1 = arith.addi %0, %arg1 : i32
    %c0_i32 = arith.constant 0 : i32
    return %1, %arg2 : i32, i32
  }
  func.func @transform_1(%arg0: i32, %arg1: i32, %arg2: i32) -> (i32, i32, i32) {
    %c0_i32 = arith.constant 0 : i32
    %c0_i32_0 = arith.constant 0 : i32
    return %arg0, %arg2, %c0_i32 : i32, i32, i32
  }
  func.func @transform_2(%arg0: i32, %arg1: i32, %arg2: i32) -> (i32, i32) {
    %c1_i32 = arith.constant 1 : i32
    %0 = arith.muli %arg0, %c1_i32 : i32
    %1 = arith.addi %0, %arg1 : i32
    %c0_i32 = arith.constant 0 : i32
    %c0_i32_0 = arith.constant 0 : i32
    return %1, %c0_i32 : i32, i32
  }
}

module attributes {stable_mosaic.version = 11 : i64} {
  func.func @_gemm_kernel(%arg0: i32, %arg1: i32, %arg2: i32, %arg3: memref<8x90xbf16, #tpu.memory_space<vmem>>, %arg4: memref<1x90x512xbf16, #tpu.memory_space<vmem>>, %arg5: memref<1x512xf32, #tpu.memory_space<vmem>>, %arg6: memref<8x512xf32, #tpu.memory_space<vmem>>) attributes {dimension_semantics = [#tpu.dimension_semantics<parallel>, #tpu.dimension_semantics<parallel>, #tpu.dimension_semantics<arbitrary>], iteration_bounds = array<i64: 1, 1, 1>, scalar_prefetch = 0 : i64, scratch_operands = 0 : i64, tpu.core_type = #tpu.core_type<tc>, window_params = [{transform_indices = @transform_0, window_bounds = array<i64: 8, 90>}, {transform_indices = @transform_1, window_bounds = array<i64: 1, 90, 512>}, {pipeline_mode = #tpu.pipeline_mode<synchronous>, transform_indices = @transform_2, window_bounds = array<i64: 1, 512>}, {transform_indices = @transform_3, window_bounds = array<i64: 8, 512>}]} {
    %c0 = arith.constant 0 : index
    %c0_0 = arith.constant 0 : index
    %0 = vector.load %arg3[%c0, %c0_0] : memref<8x90xbf16, #tpu.memory_space<vmem>>, vector<8x90xbf16>
    %c0_1 = arith.constant 0 : index
    %c0_2 = arith.constant 0 : index
    %c0_3 = arith.constant 0 : index
    %1 = vector.load %arg4[%c0_1, %c0_2, %c0_3] : memref<1x90x512xbf16, #tpu.memory_space<vmem>>, vector<1x90x512xbf16>
    %2 = vector.shape_cast %1 : vector<1x90x512xbf16> to vector<90x512xbf16>
    %cst = arith.constant dense<0.000000e+00> : vector<8x512xf32>
    %3 = tpu.matmul %0, %2, %cst {dimension_numbers = #tpu.dot_dimension_numbers<[1], [0], [0], [1], [0, 0, 1, 1], [], []>} : vector<8x90xbf16>, vector<90x512xbf16>, vector<8x512xf32> -> vector<8x512xf32>
    %c0_i32 = arith.constant 0 : i32
    %4 = arith.cmpi eq, %arg2, %c0_i32 : i32
    %5 = arith.extui %4 : i1 to i32
    %c0_i32_4 = arith.constant 0 : i32
    %6 = arith.cmpi ne, %5, %c0_i32_4 : i32
    scf.if %6 {
      %c0_9 = arith.constant 0 : index
      %c0_10 = arith.constant 0 : index
      %13 = vector.load %arg6[%c0_9, %c0_10] : memref<8x512xf32, #tpu.memory_space<vmem>>, vector<8x512xf32>
      tpu.vector_store %arg6[%c0_9, %c0_10], %3 {strides = array<i32>} : memref<8x512xf32, #tpu.memory_space<vmem>>, vector<8x512xf32>,
    } else {
    }
    %c0_i32_5 = arith.constant 0 : i32
    %7 = arith.cmpi sgt, %arg2, %c0_i32_5 : i32
    %8 = arith.extui %7 : i1 to i32
    %c0_i32_6 = arith.constant 0 : i32
    %9 = arith.cmpi ne, %8, %c0_i32_6 : i32
    scf.if %9 {
      %c0_9 = arith.constant 0 : index
      %c0_10 = arith.constant 0 : index
      %13 = vector.load %arg6[%c0_9, %c0_10] : memref<8x512xf32, #tpu.memory_space<vmem>>, vector<8x512xf32>
      %14 = arith.addf %13, %3 : vector<8x512xf32>
      %c0_11 = arith.constant 0 : index
      %c0_12 = arith.constant 0 : index
      %15 = vector.load %arg6[%c0_11, %c0_12] : memref<8x512xf32, #tpu.memory_space<vmem>>, vector<8x512xf32>
      tpu.vector_store %arg6[%c0_11, %c0_12], %14 {strides = array<i32>} : memref<8x512xf32, #tpu.memory_space<vmem>>, vector<8x512xf32>,
    } else {
    }
    %c0_i32_7 = arith.constant 0 : i32
    %10 = arith.cmpi eq, %arg2, %c0_i32_7 : i32
    %11 = arith.extui %10 : i1 to i32
    %c0_i32_8 = arith.constant 0 : i32
    %12 = arith.cmpi ne, %11, %c0_i32_8 : i32
    scf.if %12 {
      %c0_9 = arith.constant 0 : index
      %c0_10 = arith.constant 0 : index
      %13 = vector.load %arg6[%c0_9, %c0_10] : memref<8x512xf32, #tpu.memory_space<vmem>>, vector<8x512xf32>
      %c0_11 = arith.constant 0 : index
      %c0_12 = arith.constant 0 : index
      %14 = vector.load %arg5[%c0_11, %c0_12] : memref<1x512xf32, #tpu.memory_space<vmem>>, vector<1x512xf32>
      %15 = vector.broadcast %14 : vector<1x512xf32> to vector<8x512xf32>
      %16 = arith.addf %13, %15 : vector<8x512xf32>
      %cst_13 = arith.constant 0.000000e+00 : f32
      %17 = vector.broadcast %cst_13 : f32 to vector<8x512xf32>
      %18 = arith.maximumf %16, %17 : vector<8x512xf32>
      %c0_14 = arith.constant 0 : index
      %c0_15 = arith.constant 0 : index
      %19 = vector.load %arg6[%c0_14, %c0_15] : memref<8x512xf32, #tpu.memory_space<vmem>>, vector<8x512xf32>
      tpu.vector_store %arg6[%c0_14, %c0_15], %18 {strides = array<i32>} : memref<8x512xf32, #tpu.memory_space<vmem>>, vector<8x512xf32>,
    } else {
    }
    return
  }
  func.func @transform_0(%arg0: i32, %arg1: i32, %arg2: i32) -> (i32, i32) {
    %c1_i32 = arith.constant 1 : i32
    %0 = arith.muli %arg0, %c1_i32 : i32
    %1 = arith.addi %0, %arg1 : i32
    %c0_i32 = arith.constant 0 : i32
    return %1, %arg2 : i32, i32
  }
  func.func @transform_1(%arg0: i32, %arg1: i32, %arg2: i32) -> (i32, i32, i32) {
    %c0_i32 = arith.constant 0 : i32
    %c0_i32_0 = arith.constant 0 : i32
    return %arg0, %arg2, %c0_i32 : i32, i32, i32
  }
  func.func @transform_2(%arg0: i32, %arg1: i32, %arg2: i32) -> (i32, i32) {
    %c0_i32 = arith.constant 0 : i32
    %c0_i32_0 = arith.constant 0 : i32
    %c0_i32_1 = arith.constant 0 : i32
    return %c0_i32, %c0_i32_0 : i32, i32
  }
  func.func @transform_3(%arg0: i32, %arg1: i32, %arg2: i32) -> (i32, i32) {
    %c1_i32 = arith.constant 1 : i32
    %0 = arith.muli %arg0, %c1_i32 : i32
    %1 = arith.addi %0, %arg1 : i32
    %c0_i32 = arith.constant 0 : i32
    %c0_i32_0 = arith.constant 0 : i32
    return %1, %c0_i32 : i32, i32
  }
}

module attributes {stable_mosaic.version = 11 : i64} {
  func.func @_gemm_kernel(%arg0: i32, %arg1: i32, %arg2: i32, %arg3: memref<8x512xbf16, #tpu.memory_space<vmem>>, %arg4: memref<1x512x512xbf16, #tpu.memory_space<vmem>>, %arg5: memref<1x512xf32, #tpu.memory_space<vmem>>, %arg6: memref<8x512xf32, #tpu.memory_space<vmem>>) attributes {dimension_semantics = [#tpu.dimension_semantics<parallel>, #tpu.dimension_semantics<parallel>, #tpu.dimension_semantics<arbitrary>], iteration_bounds = array<i64: 1, 1, 9>, scalar_prefetch = 0 : i64, scratch_operands = 0 : i64, tpu.core_type = #tpu.core_type<tc>, window_params = [{transform_indices = @transform_0, window_bounds = array<i64: 8, 512>}, {transform_indices = @transform_1, window_bounds = array<i64: 1, 512, 512>}, {pipeline_mode = #tpu.pipeline_mode<synchronous>, transform_indices = @transform_2, window_bounds = array<i64: 1, 512>}, {transform_indices = @transform_3, window_bounds = array<i64: 8, 512>}]} {
    %c0 = arith.constant 0 : index
    %c0_0 = arith.constant 0 : index
    %0 = vector.load %arg3[%c0, %c0_0] : memref<8x512xbf16, #tpu.memory_space<vmem>>, vector<8x512xbf16>
    %c0_1 = arith.constant 0 : index
    %c0_2 = arith.constant 0 : index
    %c0_3 = arith.constant 0 : index
    %1 = vector.load %arg4[%c0_1, %c0_2, %c0_3] : memref<1x512x512xbf16, #tpu.memory_space<vmem>>, vector<1x512x512xbf16>
    %2 = vector.shape_cast %1 : vector<1x512x512xbf16> to vector<512x512xbf16>
    %cst = arith.constant dense<0.000000e+00> : vector<8x512xf32>
    %3 = tpu.matmul %0, %2, %cst {dimension_numbers = #tpu.dot_dimension_numbers<[1], [0], [0], [1], [0, 0, 1, 1], [], []>} : vector<8x512xbf16>, vector<512x512xbf16>, vector<8x512xf32> -> vector<8x512xf32>
    %c0_i32 = arith.constant 0 : i32
    %4 = arith.cmpi eq, %arg2, %c0_i32 : i32
    %5 = arith.extui %4 : i1 to i32
    %c0_i32_4 = arith.constant 0 : i32
    %6 = arith.cmpi ne, %5, %c0_i32_4 : i32
    scf.if %6 {
      %c0_8 = arith.constant 0 : index
      %c0_9 = arith.constant 0 : index
      %13 = vector.load %arg6[%c0_8, %c0_9] : memref<8x512xf32, #tpu.memory_space<vmem>>, vector<8x512xf32>
      tpu.vector_store %arg6[%c0_8, %c0_9], %3 {strides = array<i32>} : memref<8x512xf32, #tpu.memory_space<vmem>>, vector<8x512xf32>,
    } else {
    }
    %c0_i32_5 = arith.constant 0 : i32
    %7 = arith.cmpi sgt, %arg2, %c0_i32_5 : i32
    %8 = arith.extui %7 : i1 to i32
    %c0_i32_6 = arith.constant 0 : i32
    %9 = arith.cmpi ne, %8, %c0_i32_6 : i32
    scf.if %9 {
      %c0_8 = arith.constant 0 : index
      %c0_9 = arith.constant 0 : index
      %13 = vector.load %arg6[%c0_8, %c0_9] : memref<8x512xf32, #tpu.memory_space<vmem>>, vector<8x512xf32>
      %14 = arith.addf %13, %3 : vector<8x512xf32>
      %c0_10 = arith.constant 0 : index
      %c0_11 = arith.constant 0 : index
      %15 = vector.load %arg6[%c0_10, %c0_11] : memref<8x512xf32, #tpu.memory_space<vmem>>, vector<8x512xf32>
      tpu.vector_store %arg6[%c0_10, %c0_11], %14 {strides = array<i32>} : memref<8x512xf32, #tpu.memory_space<vmem>>, vector<8x512xf32>,
    } else {
    }
    %c8_i32 = arith.constant 8 : i32
    %10 = arith.cmpi eq, %arg2, %c8_i32 : i32
    %11 = arith.extui %10 : i1 to i32
    %c0_i32_7 = arith.constant 0 : i32
    %12 = arith.cmpi ne, %11, %c0_i32_7 : i32
    scf.if %12 {
      %c0_8 = arith.constant 0 : index
      %c0_9 = arith.constant 0 : index
      %13 = vector.load %arg6[%c0_8, %c0_9] : memref<8x512xf32, #tpu.memory_space<vmem>>, vector<8x512xf32>
      %c0_10 = arith.constant 0 : index
      %c0_11 = arith.constant 0 : index
      %14 = vector.load %arg5[%c0_10, %c0_11] : memref<1x512xf32, #tpu.memory_space<vmem>>, vector<1x512xf32>
      %15 = vector.broadcast %14 : vector<1x512xf32> to vector<8x512xf32>
      %16 = arith.addf %13, %15 : vector<8x512xf32>
      %cst_12 = arith.constant 0.000000e+00 : f32
      %17 = vector.broadcast %cst_12 : f32 to vector<8x512xf32>
      %18 = arith.maximumf %16, %17 : vector<8x512xf32>
      %c0_13 = arith.constant 0 : index
      %c0_14 = arith.constant 0 : index
      %19 = vector.load %arg6[%c0_13, %c0_14] : memref<8x512xf32, #tpu.memory_space<vmem>>, vector<8x512xf32>
      tpu.vector_store %arg6[%c0_13, %c0_14], %18 {strides = array<i32>} : memref<8x512xf32, #tpu.memory_space<vmem>>, vector<8x512xf32>,
    } else {
    }
    return
  }
  func.func @transform_0(%arg0: i32, %arg1: i32, %arg2: i32) -> (i32, i32) {
    %c1_i32 = arith.constant 1 : i32
    %0 = arith.muli %arg0, %c1_i32 : i32
    %1 = arith.addi %0, %arg1 : i32
    %c0_i32 = arith.constant 0 : i32
    return %1, %arg2 : i32, i32
  }
  func.func @transform_1(%arg0: i32, %arg1: i32, %arg2: i32) -> (i32, i32, i32) {
    %c0_i32 = arith.constant 0 : i32
    %c0_i32_0 = arith.constant 0 : i32
    return %arg0, %arg2, %c0_i32 : i32, i32, i32
  }
  func.func @transform_2(%arg0: i32, %arg1: i32, %arg2: i32) -> (i32, i32) {
    %c0_i32 = arith.constant 0 : i32
    %c0_i32_0 = arith.constant 0 : i32
    %c0_i32_1 = arith.constant 0 : i32
    return %c0_i32, %c0_i32_0 : i32, i32
  }
  func.func @transform_3(%arg0: i32, %arg1: i32, %arg2: i32) -> (i32, i32) {
    %c1_i32 = arith.constant 1 : i32
    %0 = arith.muli %arg0, %c1_i32 : i32
    %1 = arith.addi %0, %arg1 : i32
    %c0_i32 = arith.constant 0 : i32
    %c0_i32_0 = arith.constant 0 : i32
    return %1, %c0_i32 : i32, i32
  }
}

module attributes {stable_mosaic.version = 11 : i64} {
  func.func @_gemm_kernel(%arg0: i32, %arg1: i32, %arg2: i32, %arg3: memref<8x512xbf16, #tpu.memory_space<vmem>>, %arg4: memref<1x512x512xbf16, #tpu.memory_space<vmem>>, %arg5: memref<1x512xf32, #tpu.memory_space<vmem>>, %arg6: memref<8x512xf32, #tpu.memory_space<vmem>>, %arg7: memref<8x512xf32, #tpu.memory_space<vmem>>) attributes {dimension_semantics = [#tpu.dimension_semantics<parallel>, #tpu.dimension_semantics<parallel>, #tpu.dimension_semantics<arbitrary>], iteration_bounds = array<i64: 1, 1, 9>, scalar_prefetch = 0 : i64, scratch_operands = 0 : i64, tpu.core_type = #tpu.core_type<tc>, window_params = [{transform_indices = @transform_0, window_bounds = array<i64: 8, 512>}, {transform_indices = @transform_1, window_bounds = array<i64: 1, 512, 512>}, {pipeline_mode = #tpu.pipeline_mode<synchronous>, transform_indices = @transform_2, window_bounds = array<i64: 1, 512>}, {transform_indices = @transform_3, window_bounds = array<i64: 8, 512>}, {transform_indices = @transform_4, window_bounds = array<i64: 8, 512>}]} {
    %c0 = arith.constant 0 : index
    %c0_0 = arith.constant 0 : index
    %0 = vector.load %arg3[%c0, %c0_0] : memref<8x512xbf16, #tpu.memory_space<vmem>>, vector<8x512xbf16>
    %c0_1 = arith.constant 0 : index
    %c0_2 = arith.constant 0 : index
    %c0_3 = arith.constant 0 : index
    %1 = vector.load %arg4[%c0_1, %c0_2, %c0_3] : memref<1x512x512xbf16, #tpu.memory_space<vmem>>, vector<1x512x512xbf16>
    %2 = vector.shape_cast %1 : vector<1x512x512xbf16> to vector<512x512xbf16>
    %cst = arith.constant dense<0.000000e+00> : vector<8x512xf32>
    %3 = tpu.matmul %0, %2, %cst {dimension_numbers = #tpu.dot_dimension_numbers<[1], [0], [0], [1], [0, 0, 1, 1], [], []>} : vector<8x512xbf16>, vector<512x512xbf16>, vector<8x512xf32> -> vector<8x512xf32>
    %c0_i32 = arith.constant 0 : i32
    %4 = arith.cmpi eq, %arg2, %c0_i32 : i32
    %5 = arith.extui %4 : i1 to i32
    %c0_i32_4 = arith.constant 0 : i32
    %6 = arith.cmpi ne, %5, %c0_i32_4 : i32
    scf.if %6 {
      %c0_8 = arith.constant 0 : index
      %c0_9 = arith.constant 0 : index
      %13 = vector.load %arg7[%c0_8, %c0_9] : memref<8x512xf32, #tpu.memory_space<vmem>>, vector<8x512xf32>
      tpu.vector_store %arg7[%c0_8, %c0_9], %3 {strides = array<i32>} : memref<8x512xf32, #tpu.memory_space<vmem>>, vector<8x512xf32>,
    } else {
    }
    %c0_i32_5 = arith.constant 0 : i32
    %7 = arith.cmpi sgt, %arg2, %c0_i32_5 : i32
    %8 = arith.extui %7 : i1 to i32
    %c0_i32_6 = arith.constant 0 : i32
    %9 = arith.cmpi ne, %8, %c0_i32_6 : i32
    scf.if %9 {
      %c0_8 = arith.constant 0 : index
      %c0_9 = arith.constant 0 : index
      %13 = vector.load %arg7[%c0_8, %c0_9] : memref<8x512xf32, #tpu.memory_space<vmem>>, vector<8x512xf32>
      %14 = arith.addf %13, %3 : vector<8x512xf32>
      %c0_10 = arith.constant 0 : index
      %c0_11 = arith.constant 0 : index
      %15 = vector.load %arg7[%c0_10, %c0_11] : memref<8x512xf32, #tpu.memory_space<vmem>>, vector<8x512xf32>
      tpu.vector_store %arg7[%c0_10, %c0_11], %14 {strides = array<i32>} : memref<8x512xf32, #tpu.memory_space<vmem>>, vector<8x512xf32>,
    } else {
    }
    %c8_i32 = arith.constant 8 : i32
    %10 = arith.cmpi eq, %arg2, %c8_i32 : i32
    %11 = arith.extui %10 : i1 to i32
    %c0_i32_7 = arith.constant 0 : i32
    %12 = arith.cmpi ne, %11, %c0_i32_7 : i32
    scf.if %12 {
      %c0_8 = arith.constant 0 : index
      %c0_9 = arith.constant 0 : index
      %13 = vector.load %arg7[%c0_8, %c0_9] : memref<8x512xf32, #tpu.memory_space<vmem>>, vector<8x512xf32>
      %c0_10 = arith.constant 0 : index
      %c0_11 = arith.constant 0 : index
      %14 = vector.load %arg5[%c0_10, %c0_11] : memref<1x512xf32, #tpu.memory_space<vmem>>, vector<1x512xf32>
      %15 = vector.broadcast %14 : vector<1x512xf32> to vector<8x512xf32>
      %16 = arith.addf %13, %15 : vector<8x512xf32>
      %c0_12 = arith.constant 0 : index
      %c0_13 = arith.constant 0 : index
      %17 = vector.load %arg6[%c0_12, %c0_13] : memref<8x512xf32, #tpu.memory_space<vmem>>, vector<8x512xf32>
      %18 = arith.addf %16, %17 : vector<8x512xf32>
      %cst_14 = arith.constant 0.000000e+00 : f32
      %19 = vector.broadcast %cst_14 : f32 to vector<8x512xf32>
      %20 = arith.maximumf %18, %19 : vector<8x512xf32>
      %c0_15 = arith.constant 0 : index
      %c0_16 = arith.constant 0 : index
      %21 = vector.load %arg7[%c0_15, %c0_16] : memref<8x512xf32, #tpu.memory_space<vmem>>, vector<8x512xf32>
      tpu.vector_store %arg7[%c0_15, %c0_16], %20 {strides = array<i32>} : memref<8x512xf32, #tpu.memory_space<vmem>>, vector<8x512xf32>,
    } else {
    }
    return
  }
  func.func @transform_0(%arg0: i32, %arg1: i32, %arg2: i32) -> (i32, i32) {
    %c1_i32 = arith.constant 1 : i32
    %0 = arith.muli %arg0, %c1_i32 : i32
    %1 = arith.addi %0, %arg1 : i32
    %c0_i32 = arith.constant 0 : i32
    return %1, %arg2 : i32, i32
  }
  func.func @transform_1(%arg0: i32, %arg1: i32, %arg2: i32) -> (i32, i32, i32) {
    %c0_i32 = arith.constant 0 : i32
    %c0_i32_0 = arith.constant 0 : i32
    return %arg0, %arg2, %c0_i32 : i32, i32, i32
  }
  func.func @transform_2(%arg0: i32, %arg1: i32, %arg2: i32) -> (i32, i32) {
    %c0_i32 = arith.constant 0 : i32
    %c0_i32_0 = arith.constant 0 : i32
    %c0_i32_1 = arith.constant 0 : i32
    return %c0_i32, %c0_i32_0 : i32, i32
  }
  func.func @transform_3(%arg0: i32, %arg1: i32, %arg2: i32) -> (i32, i32) {
    %c1_i32 = arith.constant 1 : i32
    %0 = arith.muli %arg0, %c1_i32 : i32
    %1 = arith.addi %0, %arg1 : i32
    %c0_i32 = arith.constant 0 : i32
    %c0_i32_0 = arith.constant 0 : i32
    return %1, %c0_i32 : i32, i32
  }
  func.func @transform_4(%arg0: i32, %arg1: i32, %arg2: i32) -> (i32, i32) {
    %c1_i32 = arith.constant 1 : i32
    %0 = arith.muli %arg0, %c1_i32 : i32
    %1 = arith.addi %0, %arg1 : i32
    %c0_i32 = arith.constant 0 : i32
    %c0_i32_0 = arith.constant 0 : i32
    return %1, %c0_i32 : i32, i32
  }
}

module attributes {stable_mosaic.version = 11 : i64} {
  func.func @_gemm_kernel(%arg0: i32, %arg1: i32, %arg2: i32, %arg3: memref<8x512xbf16, #tpu.memory_space<vmem>>, %arg4: memref<1x512x256xbf16, #tpu.memory_space<vmem>>, %arg5: memref<1x256xf32, #tpu.memory_space<vmem>>, %arg6: memref<8x256xf32, #tpu.memory_space<vmem>>) attributes {dimension_semantics = [#tpu.dimension_semantics<parallel>, #tpu.dimension_semantics<parallel>, #tpu.dimension_semantics<arbitrary>], iteration_bounds = array<i64: 4, 1, 8>, scalar_prefetch = 0 : i64, scratch_operands = 0 : i64, tpu.core_type = #tpu.core_type<tc>, window_params = [{transform_indices = @transform_0, window_bounds = array<i64: 8, 512>}, {transform_indices = @transform_1, window_bounds = array<i64: 1, 512, 256>}, {pipeline_mode = #tpu.pipeline_mode<synchronous>, transform_indices = @transform_2, window_bounds = array<i64: 1, 256>}, {transform_indices = @transform_3, window_bounds = array<i64: 8, 256>}]} {
    %c0 = arith.constant 0 : index
    %c0_0 = arith.constant 0 : index
    %0 = vector.load %arg3[%c0, %c0_0] : memref<8x512xbf16, #tpu.memory_space<vmem>>, vector<8x512xbf16>
    %c0_1 = arith.constant 0 : index
    %c0_2 = arith.constant 0 : index
    %c0_3 = arith.constant 0 : index
    %1 = vector.load %arg4[%c0_1, %c0_2, %c0_3] : memref<1x512x256xbf16, #tpu.memory_space<vmem>>, vector<1x512x256xbf16>
    %2 = vector.shape_cast %1 : vector<1x512x256xbf16> to vector<512x256xbf16>
    %cst = arith.constant dense<0.000000e+00> : vector<8x256xf32>
    %3 = tpu.matmul %0, %2, %cst {dimension_numbers = #tpu.dot_dimension_numbers<[1], [0], [0], [1], [0, 0, 1, 1], [], []>} : vector<8x512xbf16>, vector<512x256xbf16>, vector<8x256xf32> -> vector<8x256xf32>
    %c0_i32 = arith.constant 0 : i32
    %4 = arith.cmpi eq, %arg2, %c0_i32 : i32
    %5 = arith.extui %4 : i1 to i32
    %c0_i32_4 = arith.constant 0 : i32
    %6 = arith.cmpi ne, %5, %c0_i32_4 : i32
    scf.if %6 {
      %c0_8 = arith.constant 0 : index
      %c0_9 = arith.constant 0 : index
      %13 = vector.load %arg6[%c0_8, %c0_9] : memref<8x256xf32, #tpu.memory_space<vmem>>, vector<8x256xf32>
      tpu.vector_store %arg6[%c0_8, %c0_9], %3 {strides = array<i32>} : memref<8x256xf32, #tpu.memory_space<vmem>>, vector<8x256xf32>,
    } else {
    }
    %c0_i32_5 = arith.constant 0 : i32
    %7 = arith.cmpi sgt, %arg2, %c0_i32_5 : i32
    %8 = arith.extui %7 : i1 to i32
    %c0_i32_6 = arith.constant 0 : i32
    %9 = arith.cmpi ne, %8, %c0_i32_6 : i32
    scf.if %9 {
      %c0_8 = arith.constant 0 : index
      %c0_9 = arith.constant 0 : index
      %13 = vector.load %arg6[%c0_8, %c0_9] : memref<8x256xf32, #tpu.memory_space<vmem>>, vector<8x256xf32>
      %14 = arith.addf %13, %3 : vector<8x256xf32>
      %c0_10 = arith.constant 0 : index
      %c0_11 = arith.constant 0 : index
      %15 = vector.load %arg6[%c0_10, %c0_11] : memref<8x256xf32, #tpu.memory_space<vmem>>, vector<8x256xf32>
      tpu.vector_store %arg6[%c0_10, %c0_11], %14 {strides = array<i32>} : memref<8x256xf32, #tpu.memory_space<vmem>>, vector<8x256xf32>,
    } else {
    }
    %c7_i32 = arith.constant 7 : i32
    %10 = arith.cmpi eq, %arg2, %c7_i32 : i32
    %11 = arith.extui %10 : i1 to i32
    %c0_i32_7 = arith.constant 0 : i32
    %12 = arith.cmpi ne, %11, %c0_i32_7 : i32
    scf.if %12 {
      %c0_8 = arith.constant 0 : index
      %c0_9 = arith.constant 0 : index
      %13 = vector.load %arg6[%c0_8, %c0_9] : memref<8x256xf32, #tpu.memory_space<vmem>>, vector<8x256xf32>
      %c0_10 = arith.constant 0 : index
      %c0_11 = arith.constant 0 : index
      %14 = vector.load %arg5[%c0_10, %c0_11] : memref<1x256xf32, #tpu.memory_space<vmem>>, vector<1x256xf32>
      %15 = vector.broadcast %14 : vector<1x256xf32> to vector<8x256xf32>
      %16 = arith.addf %13, %15 : vector<8x256xf32>
      %cst_12 = arith.constant 0.000000e+00 : f32
      %17 = vector.broadcast %cst_12 : f32 to vector<8x256xf32>
      %18 = arith.maximumf %16, %17 : vector<8x256xf32>
      %c0_13 = arith.constant 0 : index
      %c0_14 = arith.constant 0 : index
      %19 = vector.load %arg6[%c0_13, %c0_14] : memref<8x256xf32, #tpu.memory_space<vmem>>, vector<8x256xf32>
      tpu.vector_store %arg6[%c0_13, %c0_14], %18 {strides = array<i32>} : memref<8x256xf32, #tpu.memory_space<vmem>>, vector<8x256xf32>,
    } else {
    }
    return
  }
  func.func @transform_0(%arg0: i32, %arg1: i32, %arg2: i32) -> (i32, i32) {
    %c1_i32 = arith.constant 1 : i32
    %0 = arith.muli %arg0, %c1_i32 : i32
    %1 = arith.addi %0, %arg1 : i32
    %c0_i32 = arith.constant 0 : i32
    return %1, %arg2 : i32, i32
  }
  func.func @transform_1(%arg0: i32, %arg1: i32, %arg2: i32) -> (i32, i32, i32) {
    %c0_i32 = arith.constant 0 : i32
    %c0_i32_0 = arith.constant 0 : i32
    return %arg0, %arg2, %c0_i32 : i32, i32, i32
  }
  func.func @transform_2(%arg0: i32, %arg1: i32, %arg2: i32) -> (i32, i32) {
    %c0_i32 = arith.constant 0 : i32
    %c0_i32_0 = arith.constant 0 : i32
    %c0_i32_1 = arith.constant 0 : i32
    return %c0_i32, %c0_i32_0 : i32, i32
  }
  func.func @transform_3(%arg0: i32, %arg1: i32, %arg2: i32) -> (i32, i32) {
    %c1_i32 = arith.constant 1 : i32
    %0 = arith.muli %arg0, %c1_i32 : i32
    %1 = arith.addi %0, %arg1 : i32
    %c0_i32 = arith.constant 0 : i32
    %c0_i32_0 = arith.constant 0 : i32
    return %1, %c0_i32 : i32, i32
  }
}

module attributes {stable_mosaic.version = 11 : i64} {
  func.func @_gemm_kernel(%arg0: i32, %arg1: i32, %arg2: i32, %arg3: memref<32x384xbf16, #tpu.memory_space<vmem>>, %arg4: memref<1x384x256xbf16, #tpu.memory_space<vmem>>, %arg5: memref<1x256xf32, #tpu.memory_space<vmem>>, %arg6: memref<32x256xf32, #tpu.memory_space<vmem>>) attributes {dimension_semantics = [#tpu.dimension_semantics<parallel>, #tpu.dimension_semantics<parallel>, #tpu.dimension_semantics<arbitrary>], iteration_bounds = array<i64: 1, 1, 6>, scalar_prefetch = 0 : i64, scratch_operands = 0 : i64, tpu.core_type = #tpu.core_type<tc>, window_params = [{transform_indices = @transform_0, window_bounds = array<i64: 32, 384>}, {transform_indices = @transform_1, window_bounds = array<i64: 1, 384, 256>}, {pipeline_mode = #tpu.pipeline_mode<synchronous>, transform_indices = @transform_2, window_bounds = array<i64: 1, 256>}, {transform_indices = @transform_3, window_bounds = array<i64: 32, 256>}]} {
    %c0 = arith.constant 0 : index
    %c0_0 = arith.constant 0 : index
    %0 = vector.load %arg3[%c0, %c0_0] : memref<32x384xbf16, #tpu.memory_space<vmem>>, vector<32x384xbf16>
    %c0_1 = arith.constant 0 : index
    %c0_2 = arith.constant 0 : index
    %c0_3 = arith.constant 0 : index
    %1 = vector.load %arg4[%c0_1, %c0_2, %c0_3] : memref<1x384x256xbf16, #tpu.memory_space<vmem>>, vector<1x384x256xbf16>
    %2 = vector.shape_cast %1 : vector<1x384x256xbf16> to vector<384x256xbf16>
    %cst = arith.constant dense<0.000000e+00> : vector<32x256xf32>
    %3 = tpu.matmul %0, %2, %cst {dimension_numbers = #tpu.dot_dimension_numbers<[1], [0], [0], [1], [0, 0, 1, 1], [], []>} : vector<32x384xbf16>, vector<384x256xbf16>, vector<32x256xf32> -> vector<32x256xf32>
    %c0_i32 = arith.constant 0 : i32
    %4 = arith.cmpi eq, %arg2, %c0_i32 : i32
    %5 = arith.extui %4 : i1 to i32
    %c0_i32_4 = arith.constant 0 : i32
    %6 = arith.cmpi ne, %5, %c0_i32_4 : i32
    scf.if %6 {
      %c0_8 = arith.constant 0 : index
      %c0_9 = arith.constant 0 : index
      %13 = vector.load %arg6[%c0_8, %c0_9] : memref<32x256xf32, #tpu.memory_space<vmem>>, vector<32x256xf32>
      tpu.vector_store %arg6[%c0_8, %c0_9], %3 {strides = array<i32>} : memref<32x256xf32, #tpu.memory_space<vmem>>, vector<32x256xf32>,
    } else {
    }
    %c0_i32_5 = arith.constant 0 : i32
    %7 = arith.cmpi sgt, %arg2, %c0_i32_5 : i32
    %8 = arith.extui %7 : i1 to i32
    %c0_i32_6 = arith.constant 0 : i32
    %9 = arith.cmpi ne, %8, %c0_i32_6 : i32
    scf.if %9 {
      %c0_8 = arith.constant 0 : index
      %c0_9 = arith.constant 0 : index
      %13 = vector.load %arg6[%c0_8, %c0_9] : memref<32x256xf32, #tpu.memory_space<vmem>>, vector<32x256xf32>
      %14 = arith.addf %13, %3 : vector<32x256xf32>
      %c0_10 = arith.constant 0 : index
      %c0_11 = arith.constant 0 : index
      %15 = vector.load %arg6[%c0_10, %c0_11] : memref<32x256xf32, #tpu.memory_space<vmem>>, vector<32x256xf32>
      tpu.vector_store %arg6[%c0_10, %c0_11], %14 {strides = array<i32>} : memref<32x256xf32, #tpu.memory_space<vmem>>, vector<32x256xf32>,
    } else {
    }
    %c5_i32 = arith.constant 5 : i32
    %10 = arith.cmpi eq, %arg2, %c5_i32 : i32
    %11 = arith.extui %10 : i1 to i32
    %c0_i32_7 = arith.constant 0 : i32
    %12 = arith.cmpi ne, %11, %c0_i32_7 : i32
    scf.if %12 {
      %c0_8 = arith.constant 0 : index
      %c0_9 = arith.constant 0 : index
      %13 = vector.load %arg6[%c0_8, %c0_9] : memref<32x256xf32, #tpu.memory_space<vmem>>, vector<32x256xf32>
      %c0_10 = arith.constant 0 : index
      %c0_11 = arith.constant 0 : index
      %14 = vector.load %arg5[%c0_10, %c0_11] : memref<1x256xf32, #tpu.memory_space<vmem>>, vector<1x256xf32>
      %15 = vector.broadcast %14 : vector<1x256xf32> to vector<32x256xf32>
      %16 = arith.addf %13, %15 : vector<32x256xf32>
      %cst_12 = arith.constant 0.000000e+00 : f32
      %17 = vector.broadcast %cst_12 : f32 to vector<32x256xf32>
      %18 = arith.maximumf %16, %17 : vector<32x256xf32>
      %c0_13 = arith.constant 0 : index
      %c0_14 = arith.constant 0 : index
      %19 = vector.load %arg6[%c0_13, %c0_14] : memref<32x256xf32, #tpu.memory_space<vmem>>, vector<32x256xf32>
      tpu.vector_store %arg6[%c0_13, %c0_14], %18 {strides = array<i32>} : memref<32x256xf32, #tpu.memory_space<vmem>>, vector<32x256xf32>,
    } else {
    }
    return
  }
  func.func @transform_0(%arg0: i32, %arg1: i32, %arg2: i32) -> (i32, i32) {
    %c1_i32 = arith.constant 1 : i32
    %0 = arith.muli %arg0, %c1_i32 : i32
    %1 = arith.addi %0, %arg1 : i32
    %c0_i32 = arith.constant 0 : i32
    return %1, %arg2 : i32, i32
  }
  func.func @transform_1(%arg0: i32, %arg1: i32, %arg2: i32) -> (i32, i32, i32) {
    %c0_i32 = arith.constant 0 : i32
    %c0_i32_0 = arith.constant 0 : i32
    return %arg0, %arg2, %c0_i32 : i32, i32, i32
  }
  func.func @transform_2(%arg0: i32, %arg1: i32, %arg2: i32) -> (i32, i32) {
    %c0_i32 = arith.constant 0 : i32
    %c0_i32_0 = arith.constant 0 : i32
    %c0_i32_1 = arith.constant 0 : i32
    return %c0_i32, %c0_i32_0 : i32, i32
  }
  func.func @transform_3(%arg0: i32, %arg1: i32, %arg2: i32) -> (i32, i32) {
    %c1_i32 = arith.constant 1 : i32
    %0 = arith.muli %arg0, %c1_i32 : i32
    %1 = arith.addi %0, %arg1 : i32
    %c0_i32 = arith.constant 0 : i32
    %c0_i32_0 = arith.constant 0 : i32
    return %1, %c0_i32 : i32, i32
  }
}

module attributes {stable_mosaic.version = 11 : i64} {
  func.func @_gemm_kernel(%arg0: i32, %arg1: i32, %arg2: i32, %arg3: memref<32x384xbf16, #tpu.memory_space<vmem>>, %arg4: memref<1x384x256xbf16, #tpu.memory_space<vmem>>, %arg5: memref<1x256xf32, #tpu.memory_space<vmem>>, %arg6: memref<32x256xf32, #tpu.memory_space<vmem>>, %arg7: memref<32x256xf32, #tpu.memory_space<vmem>>) attributes {dimension_semantics = [#tpu.dimension_semantics<parallel>, #tpu.dimension_semantics<parallel>, #tpu.dimension_semantics<arbitrary>], iteration_bounds = array<i64: 1, 1, 6>, scalar_prefetch = 0 : i64, scratch_operands = 0 : i64, tpu.core_type = #tpu.core_type<tc>, window_params = [{transform_indices = @transform_0, window_bounds = array<i64: 32, 384>}, {transform_indices = @transform_1, window_bounds = array<i64: 1, 384, 256>}, {pipeline_mode = #tpu.pipeline_mode<synchronous>, transform_indices = @transform_2, window_bounds = array<i64: 1, 256>}, {transform_indices = @transform_3, window_bounds = array<i64: 32, 256>}, {transform_indices = @transform_4, window_bounds = array<i64: 32, 256>}]} {
    %c0 = arith.constant 0 : index
    %c0_0 = arith.constant 0 : index
    %0 = vector.load %arg3[%c0, %c0_0] : memref<32x384xbf16, #tpu.memory_space<vmem>>, vector<32x384xbf16>
    %c0_1 = arith.constant 0 : index
    %c0_2 = arith.constant 0 : index
    %c0_3 = arith.constant 0 : index
    %1 = vector.load %arg4[%c0_1, %c0_2, %c0_3] : memref<1x384x256xbf16, #tpu.memory_space<vmem>>, vector<1x384x256xbf16>
    %2 = vector.shape_cast %1 : vector<1x384x256xbf16> to vector<384x256xbf16>
    %cst = arith.constant dense<0.000000e+00> : vector<32x256xf32>
    %3 = tpu.matmul %0, %2, %cst {dimension_numbers = #tpu.dot_dimension_numbers<[1], [0], [0], [1], [0, 0, 1, 1], [], []>} : vector<32x384xbf16>, vector<384x256xbf16>, vector<32x256xf32> -> vector<32x256xf32>
    %c0_i32 = arith.constant 0 : i32
    %4 = arith.cmpi eq, %arg2, %c0_i32 : i32
    %5 = arith.extui %4 : i1 to i32
    %c0_i32_4 = arith.constant 0 : i32
    %6 = arith.cmpi ne, %5, %c0_i32_4 : i32
    scf.if %6 {
      %c0_8 = arith.constant 0 : index
      %c0_9 = arith.constant 0 : index
      %13 = vector.load %arg7[%c0_8, %c0_9] : memref<32x256xf32, #tpu.memory_space<vmem>>, vector<32x256xf32>
      tpu.vector_store %arg7[%c0_8, %c0_9], %3 {strides = array<i32>} : memref<32x256xf32, #tpu.memory_space<vmem>>, vector<32x256xf32>,
    } else {
    }
    %c0_i32_5 = arith.constant 0 : i32
    %7 = arith.cmpi sgt, %arg2, %c0_i32_5 : i32
    %8 = arith.extui %7 : i1 to i32
    %c0_i32_6 = arith.constant 0 : i32
    %9 = arith.cmpi ne, %8, %c0_i32_6 : i32
    scf.if %9 {
      %c0_8 = arith.constant 0 : index
      %c0_9 = arith.constant 0 : index
      %13 = vector.load %arg7[%c0_8, %c0_9] : memref<32x256xf32, #tpu.memory_space<vmem>>, vector<32x256xf32>
      %14 = arith.addf %13, %3 : vector<32x256xf32>
      %c0_10 = arith.constant 0 : index
      %c0_11 = arith.constant 0 : index
      %15 = vector.load %arg7[%c0_10, %c0_11] : memref<32x256xf32, #tpu.memory_space<vmem>>, vector<32x256xf32>
      tpu.vector_store %arg7[%c0_10, %c0_11], %14 {strides = array<i32>} : memref<32x256xf32, #tpu.memory_space<vmem>>, vector<32x256xf32>,
    } else {
    }
    %c5_i32 = arith.constant 5 : i32
    %10 = arith.cmpi eq, %arg2, %c5_i32 : i32
    %11 = arith.extui %10 : i1 to i32
    %c0_i32_7 = arith.constant 0 : i32
    %12 = arith.cmpi ne, %11, %c0_i32_7 : i32
    scf.if %12 {
      %c0_8 = arith.constant 0 : index
      %c0_9 = arith.constant 0 : index
      %13 = vector.load %arg7[%c0_8, %c0_9] : memref<32x256xf32, #tpu.memory_space<vmem>>, vector<32x256xf32>
      %c0_10 = arith.constant 0 : index
      %c0_11 = arith.constant 0 : index
      %14 = vector.load %arg5[%c0_10, %c0_11] : memref<1x256xf32, #tpu.memory_space<vmem>>, vector<1x256xf32>
      %15 = vector.broadcast %14 : vector<1x256xf32> to vector<32x256xf32>
      %16 = arith.addf %13, %15 : vector<32x256xf32>
      %c0_12 = arith.constant 0 : index
      %c0_13 = arith.constant 0 : index
      %17 = vector.load %arg6[%c0_12, %c0_13] : memref<32x256xf32, #tpu.memory_space<vmem>>, vector<32x256xf32>
      %18 = arith.addf %16, %17 : vector<32x256xf32>
      %cst_14 = arith.constant 0.000000e+00 : f32
      %19 = vector.broadcast %cst_14 : f32 to vector<32x256xf32>
      %20 = arith.maximumf %18, %19 : vector<32x256xf32>
      %c0_15 = arith.constant 0 : index
      %c0_16 = arith.constant 0 : index
      %21 = vector.load %arg7[%c0_15, %c0_16] : memref<32x256xf32, #tpu.memory_space<vmem>>, vector<32x256xf32>
      tpu.vector_store %arg7[%c0_15, %c0_16], %20 {strides = array<i32>} : memref<32x256xf32, #tpu.memory_space<vmem>>, vector<32x256xf32>,
    } else {
    }
    return
  }
  func.func @transform_0(%arg0: i32, %arg1: i32, %arg2: i32) -> (i32, i32) {
    %c1_i32 = arith.constant 1 : i32
    %0 = arith.muli %arg0, %c1_i32 : i32
    %1 = arith.addi %0, %arg1 : i32
    %c0_i32 = arith.constant 0 : i32
    return %1, %arg2 : i32, i32
  }
  func.func @transform_1(%arg0: i32, %arg1: i32, %arg2: i32) -> (i32, i32, i32) {
    %c0_i32 = arith.constant 0 : i32
    %c0_i32_0 = arith.constant 0 : i32
    return %arg0, %arg2, %c0_i32 : i32, i32, i32
  }
  func.func @transform_2(%arg0: i32, %arg1: i32, %arg2: i32) -> (i32, i32) {
    %c0_i32 = arith.constant 0 : i32
    %c0_i32_0 = arith.constant 0 : i32
    %c0_i32_1 = arith.constant 0 : i32
    return %c0_i32, %c0_i32_0 : i32, i32
  }
  func.func @transform_3(%arg0: i32, %arg1: i32, %arg2: i32) -> (i32, i32) {
    %c1_i32 = arith.constant 1 : i32
    %0 = arith.muli %arg0, %c1_i32 : i32
    %1 = arith.addi %0, %arg1 : i32
    %c0_i32 = arith.constant 0 : i32
    %c0_i32_0 = arith.constant 0 : i32
    return %1, %c0_i32 : i32, i32
  }
  func.func @transform_4(%arg0: i32, %arg1: i32, %arg2: i32) -> (i32, i32) {
    %c1_i32 = arith.constant 1 : i32
    %0 = arith.muli %arg0, %c1_i32 : i32
    %1 = arith.addi %0, %arg1 : i32
    %c0_i32 = arith.constant 0 : i32
    %c0_i32_0 = arith.constant 0 : i32
    return %1, %c0_i32 : i32, i32
  }
}

module attributes {stable_mosaic.version = 11 : i64} {
  func.func @_gemm_kernel(%arg0: i32, %arg1: i32, %arg2: i32, %arg3: memref<32x512xbf16, #tpu.memory_space<vmem>>, %arg4: memref<1x512x128xbf16, #tpu.memory_space<vmem>>, %arg5: memref<1x128xf32, #tpu.memory_space<vmem>>, %arg6: memref<32x128xf32, #tpu.memory_space<vmem>>) attributes {dimension_semantics = [#tpu.dimension_semantics<parallel>, #tpu.dimension_semantics<parallel>, #tpu.dimension_semantics<arbitrary>], iteration_bounds = array<i64: 4, 1, 4>, scalar_prefetch = 0 : i64, scratch_operands = 0 : i64, tpu.core_type = #tpu.core_type<tc>, window_params = [{transform_indices = @transform_0, window_bounds = array<i64: 32, 512>}, {transform_indices = @transform_1, window_bounds = array<i64: 1, 512, 128>}, {pipeline_mode = #tpu.pipeline_mode<synchronous>, transform_indices = @transform_2, window_bounds = array<i64: 1, 128>}, {transform_indices = @transform_3, window_bounds = array<i64: 32, 128>}]} {
    %c0 = arith.constant 0 : index
    %c0_0 = arith.constant 0 : index
    %0 = vector.load %arg3[%c0, %c0_0] : memref<32x512xbf16, #tpu.memory_space<vmem>>, vector<32x512xbf16>
    %c0_1 = arith.constant 0 : index
    %c0_2 = arith.constant 0 : index
    %c0_3 = arith.constant 0 : index
    %1 = vector.load %arg4[%c0_1, %c0_2, %c0_3] : memref<1x512x128xbf16, #tpu.memory_space<vmem>>, vector<1x512x128xbf16>
    %2 = vector.shape_cast %1 : vector<1x512x128xbf16> to vector<512x128xbf16>
    %cst = arith.constant dense<0.000000e+00> : vector<32x128xf32>
    %3 = tpu.matmul %0, %2, %cst {dimension_numbers = #tpu.dot_dimension_numbers<[1], [0], [0], [1], [0, 0, 1, 1], [], []>} : vector<32x512xbf16>, vector<512x128xbf16>, vector<32x128xf32> -> vector<32x128xf32>
    %c0_i32 = arith.constant 0 : i32
    %4 = arith.cmpi eq, %arg2, %c0_i32 : i32
    %5 = arith.extui %4 : i1 to i32
    %c0_i32_4 = arith.constant 0 : i32
    %6 = arith.cmpi ne, %5, %c0_i32_4 : i32
    scf.if %6 {
      %c0_8 = arith.constant 0 : index
      %c0_9 = arith.constant 0 : index
      %13 = vector.load %arg6[%c0_8, %c0_9] : memref<32x128xf32, #tpu.memory_space<vmem>>, vector<32x128xf32>
      tpu.vector_store %arg6[%c0_8, %c0_9], %3 {strides = array<i32>} : memref<32x128xf32, #tpu.memory_space<vmem>>, vector<32x128xf32>,
    } else {
    }
    %c0_i32_5 = arith.constant 0 : i32
    %7 = arith.cmpi sgt, %arg2, %c0_i32_5 : i32
    %8 = arith.extui %7 : i1 to i32
    %c0_i32_6 = arith.constant 0 : i32
    %9 = arith.cmpi ne, %8, %c0_i32_6 : i32
    scf.if %9 {
      %c0_8 = arith.constant 0 : index
      %c0_9 = arith.constant 0 : index
      %13 = vector.load %arg6[%c0_8, %c0_9] : memref<32x128xf32, #tpu.memory_space<vmem>>, vector<32x128xf32>
      %14 = arith.addf %13, %3 : vector<32x128xf32>
      %c0_10 = arith.constant 0 : index
      %c0_11 = arith.constant 0 : index
      %15 = vector.load %arg6[%c0_10, %c0_11] : memref<32x128xf32, #tpu.memory_space<vmem>>, vector<32x128xf32>
      tpu.vector_store %arg6[%c0_10, %c0_11], %14 {strides = array<i32>} : memref<32x128xf32, #tpu.memory_space<vmem>>, vector<32x128xf32>,
    } else {
    }
    %c3_i32 = arith.constant 3 : i32
    %10 = arith.cmpi eq, %arg2, %c3_i32 : i32
    %11 = arith.extui %10 : i1 to i32
    %c0_i32_7 = arith.constant 0 : i32
    %12 = arith.cmpi ne, %11, %c0_i32_7 : i32
    scf.if %12 {
      %c0_8 = arith.constant 0 : index
      %c0_9 = arith.constant 0 : index
      %13 = vector.load %arg6[%c0_8, %c0_9] : memref<32x128xf32, #tpu.memory_space<vmem>>, vector<32x128xf32>
      %c0_10 = arith.constant 0 : index
      %c0_11 = arith.constant 0 : index
      %14 = vector.load %arg5[%c0_10, %c0_11] : memref<1x128xf32, #tpu.memory_space<vmem>>, vector<1x128xf32>
      %15 = vector.broadcast %14 : vector<1x128xf32> to vector<32x128xf32>
      %16 = arith.addf %13, %15 : vector<32x128xf32>
      %cst_12 = arith.constant 0.000000e+00 : f32
      %17 = vector.broadcast %cst_12 : f32 to vector<32x128xf32>
      %18 = arith.maximumf %16, %17 : vector<32x128xf32>
      %c0_13 = arith.constant 0 : index
      %c0_14 = arith.constant 0 : index
      %19 = vector.load %arg6[%c0_13, %c0_14] : memref<32x128xf32, #tpu.memory_space<vmem>>, vector<32x128xf32>
      tpu.vector_store %arg6[%c0_13, %c0_14], %18 {strides = array<i32>} : memref<32x128xf32, #tpu.memory_space<vmem>>, vector<32x128xf32>,
    } else {
    }
    return
  }
  func.func @transform_0(%arg0: i32, %arg1: i32, %arg2: i32) -> (i32, i32) {
    %c1_i32 = arith.constant 1 : i32
    %0 = arith.muli %arg0, %c1_i32 : i32
    %1 = arith.addi %0, %arg1 : i32
    %c0_i32 = arith.constant 0 : i32
    return %1, %arg2 : i32, i32
  }
  func.func @transform_1(%arg0: i32, %arg1: i32, %arg2: i32) -> (i32, i32, i32) {
    %c0_i32 = arith.constant 0 : i32
    %c0_i32_0 = arith.constant 0 : i32
    return %arg0, %arg2, %c0_i32 : i32, i32, i32
  }
  func.func @transform_2(%arg0: i32, %arg1: i32, %arg2: i32) -> (i32, i32) {
    %c0_i32 = arith.constant 0 : i32
    %c0_i32_0 = arith.constant 0 : i32
    %c0_i32_1 = arith.constant 0 : i32
    return %c0_i32, %c0_i32_0 : i32, i32
  }
  func.func @transform_3(%arg0: i32, %arg1: i32, %arg2: i32) -> (i32, i32) {
    %c1_i32 = arith.constant 1 : i32
    %0 = arith.muli %arg0, %c1_i32 : i32
    %1 = arith.addi %0, %arg1 : i32
    %c0_i32 = arith.constant 0 : i32
    %c0_i32_0 = arith.constant 0 : i32
    return %1, %c0_i32 : i32, i32
  }
}

module attributes {stable_mosaic.version = 11 : i64} {
  func.func @_gemm_kernel(%arg0: i32, %arg1: i32, %arg2: i32, %arg3: memref<128x384xbf16, #tpu.memory_space<vmem>>, %arg4: memref<1x384x128xbf16, #tpu.memory_space<vmem>>, %arg5: memref<1x128xf32, #tpu.memory_space<vmem>>, %arg6: memref<128x128xf32, #tpu.memory_space<vmem>>, %arg7: memref<128x128xf32, #tpu.memory_space<vmem>>) attributes {dimension_semantics = [#tpu.dimension_semantics<parallel>, #tpu.dimension_semantics<parallel>, #tpu.dimension_semantics<arbitrary>], iteration_bounds = array<i64: 1, 1, 3>, scalar_prefetch = 0 : i64, scratch_operands = 0 : i64, tpu.core_type = #tpu.core_type<tc>, window_params = [{transform_indices = @transform_0, window_bounds = array<i64: 128, 384>}, {transform_indices = @transform_1, window_bounds = array<i64: 1, 384, 128>}, {pipeline_mode = #tpu.pipeline_mode<synchronous>, transform_indices = @transform_2, window_bounds = array<i64: 1, 128>}, {transform_indices = @transform_3, window_bounds = array<i64: 128, 128>}, {transform_indices = @transform_4, window_bounds = array<i64: 128, 128>}]} {
    %c0 = arith.constant 0 : index
    %c0_0 = arith.constant 0 : index
    %0 = vector.load %arg3[%c0, %c0_0] : memref<128x384xbf16, #tpu.memory_space<vmem>>, vector<128x384xbf16>
    %c0_1 = arith.constant 0 : index
    %c0_2 = arith.constant 0 : index
    %c0_3 = arith.constant 0 : index
    %1 = vector.load %arg4[%c0_1, %c0_2, %c0_3] : memref<1x384x128xbf16, #tpu.memory_space<vmem>>, vector<1x384x128xbf16>
    %2 = vector.shape_cast %1 : vector<1x384x128xbf16> to vector<384x128xbf16>
    %cst = arith.constant dense<0.000000e+00> : vector<128x128xf32>
    %3 = tpu.matmul %0, %2, %cst {dimension_numbers = #tpu.dot_dimension_numbers<[1], [0], [0], [1], [0, 0, 1, 1], [], []>} : vector<128x384xbf16>, vector<384x128xbf16>, vector<128x128xf32> -> vector<128x128xf32>
    %c0_i32 = arith.constant 0 : i32
    %4 = arith.cmpi eq, %arg2, %c0_i32 : i32
    %5 = arith.extui %4 : i1 to i32
    %c0_i32_4 = arith.constant 0 : i32
    %6 = arith.cmpi ne, %5, %c0_i32_4 : i32
    scf.if %6 {
      %c0_8 = arith.constant 0 : index
      %c0_9 = arith.constant 0 : index
      %13 = vector.load %arg7[%c0_8, %c0_9] : memref<128x128xf32, #tpu.memory_space<vmem>>, vector<128x128xf32>
      tpu.vector_store %arg7[%c0_8, %c0_9], %3 {strides = array<i32>} : memref<128x128xf32, #tpu.memory_space<vmem>>, vector<128x128xf32>,
    } else {
    }
    %c0_i32_5 = arith.constant 0 : i32
    %7 = arith.cmpi sgt, %arg2, %c0_i32_5 : i32
    %8 = arith.extui %7 : i1 to i32
    %c0_i32_6 = arith.constant 0 : i32
    %9 = arith.cmpi ne, %8, %c0_i32_6 : i32
    scf.if %9 {
      %c0_8 = arith.constant 0 : index
      %c0_9 = arith.constant 0 : index
      %13 = vector.load %arg7[%c0_8, %c0_9] : memref<128x128xf32, #tpu.memory_space<vmem>>, vector<128x128xf32>
      %14 = arith.addf %13, %3 : vector<128x128xf32>
      %c0_10 = arith.constant 0 : index
      %c0_11 = arith.constant 0 : index
      %15 = vector.load %arg7[%c0_10, %c0_11] : memref<128x128xf32, #tpu.memory_space<vmem>>, vector<128x128xf32>
      tpu.vector_store %arg7[%c0_10, %c0_11], %14 {strides = array<i32>} : memref<128x128xf32, #tpu.memory_space<vmem>>, vector<128x128xf32>,
    } else {
    }
    %c2_i32 = arith.constant 2 : i32
    %10 = arith.cmpi eq, %arg2, %c2_i32 : i32
    %11 = arith.extui %10 : i1 to i32
    %c0_i32_7 = arith.constant 0 : i32
    %12 = arith.cmpi ne, %11, %c0_i32_7 : i32
    scf.if %12 {
      %c0_8 = arith.constant 0 : index
      %c0_9 = arith.constant 0 : index
      %13 = vector.load %arg7[%c0_8, %c0_9] : memref<128x128xf32, #tpu.memory_space<vmem>>, vector<128x128xf32>
      %c0_10 = arith.constant 0 : index
      %c0_11 = arith.constant 0 : index
      %14 = vector.load %arg5[%c0_10, %c0_11] : memref<1x128xf32, #tpu.memory_space<vmem>>, vector<1x128xf32>
      %15 = vector.broadcast %14 : vector<1x128xf32> to vector<128x128xf32>
      %16 = arith.addf %13, %15 : vector<128x128xf32>
      %c0_12 = arith.constant 0 : index
      %c0_13 = arith.constant 0 : index
      %17 = vector.load %arg6[%c0_12, %c0_13] : memref<128x128xf32, #tpu.memory_space<vmem>>, vector<128x128xf32>
      %18 = arith.addf %16, %17 : vector<128x128xf32>
      %cst_14 = arith.constant 0.000000e+00 : f32
      %19 = vector.broadcast %cst_14 : f32 to vector<128x128xf32>
      %20 = arith.maximumf %18, %19 : vector<128x128xf32>
      %c0_15 = arith.constant 0 : index
      %c0_16 = arith.constant 0 : index
      %21 = vector.load %arg7[%c0_15, %c0_16] : memref<128x128xf32, #tpu.memory_space<vmem>>, vector<128x128xf32>
      tpu.vector_store %arg7[%c0_15, %c0_16], %20 {strides = array<i32>} : memref<128x128xf32, #tpu.memory_space<vmem>>, vector<128x128xf32>,
    } else {
    }
    return
  }
  func.func @transform_0(%arg0: i32, %arg1: i32, %arg2: i32) -> (i32, i32) {
    %c1_i32 = arith.constant 1 : i32
    %0 = arith.muli %arg0, %c1_i32 : i32
    %1 = arith.addi %0, %arg1 : i32
    %c0_i32 = arith.constant 0 : i32
    return %1, %arg2 : i32, i32
  }
  func.func @transform_1(%arg0: i32, %arg1: i32, %arg2: i32) -> (i32, i32, i32) {
    %c0_i32 = arith.constant 0 : i32
    %c0_i32_0 = arith.constant 0 : i32
    return %arg0, %arg2, %c0_i32 : i32, i32, i32
  }
  func.func @transform_2(%arg0: i32, %arg1: i32, %arg2: i32) -> (i32, i32) {
    %c0_i32 = arith.constant 0 : i32
    %c0_i32_0 = arith.constant 0 : i32
    %c0_i32_1 = arith.constant 0 : i32
    return %c0_i32, %c0_i32_0 : i32, i32
  }
  func.func @transform_3(%arg0: i32, %arg1: i32, %arg2: i32) -> (i32, i32) {
    %c1_i32 = arith.constant 1 : i32
    %0 = arith.muli %arg0, %c1_i32 : i32
    %1 = arith.addi %0, %arg1 : i32
    %c0_i32 = arith.constant 0 : i32
    %c0_i32_0 = arith.constant 0 : i32
    return %1, %c0_i32 : i32, i32
  }
  func.func @transform_4(%arg0: i32, %arg1: i32, %arg2: i32) -> (i32, i32) {
    %c1_i32 = arith.constant 1 : i32
    %0 = arith.muli %arg0, %c1_i32 : i32
    %1 = arith.addi %0, %arg1 : i32
    %c0_i32 = arith.constant 0 : i32
    %c0_i32_0 = arith.constant 0 : i32
    return %1, %c0_i32 : i32, i32
  }
}

module attributes {stable_mosaic.version = 11 : i64} {
  func.func @_gemm_kernel(%arg0: i32, %arg1: i32, %arg2: i32, %arg3: memref<128x384xbf16, #tpu.memory_space<vmem>>, %arg4: memref<1x384x128xbf16, #tpu.memory_space<vmem>>, %arg5: memref<1x128xf32, #tpu.memory_space<vmem>>, %arg6: memref<128x128xf32, #tpu.memory_space<vmem>>) attributes {dimension_semantics = [#tpu.dimension_semantics<parallel>, #tpu.dimension_semantics<parallel>, #tpu.dimension_semantics<arbitrary>], iteration_bounds = array<i64: 1, 1, 3>, scalar_prefetch = 0 : i64, scratch_operands = 0 : i64, tpu.core_type = #tpu.core_type<tc>, window_params = [{transform_indices = @transform_0, window_bounds = array<i64: 128, 384>}, {transform_indices = @transform_1, window_bounds = array<i64: 1, 384, 128>}, {pipeline_mode = #tpu.pipeline_mode<synchronous>, transform_indices = @transform_2, window_bounds = array<i64: 1, 128>}, {transform_indices = @transform_3, window_bounds = array<i64: 128, 128>}]} {
    %c0 = arith.constant 0 : index
    %c0_0 = arith.constant 0 : index
    %0 = vector.load %arg3[%c0, %c0_0] : memref<128x384xbf16, #tpu.memory_space<vmem>>, vector<128x384xbf16>
    %c0_1 = arith.constant 0 : index
    %c0_2 = arith.constant 0 : index
    %c0_3 = arith.constant 0 : index
    %1 = vector.load %arg4[%c0_1, %c0_2, %c0_3] : memref<1x384x128xbf16, #tpu.memory_space<vmem>>, vector<1x384x128xbf16>
    %2 = vector.shape_cast %1 : vector<1x384x128xbf16> to vector<384x128xbf16>
    %cst = arith.constant dense<0.000000e+00> : vector<128x128xf32>
    %3 = tpu.matmul %0, %2, %cst {dimension_numbers = #tpu.dot_dimension_numbers<[1], [0], [0], [1], [0, 0, 1, 1], [], []>} : vector<128x384xbf16>, vector<384x128xbf16>, vector<128x128xf32> -> vector<128x128xf32>
    %c0_i32 = arith.constant 0 : i32
    %4 = arith.cmpi eq, %arg2, %c0_i32 : i32
    %5 = arith.extui %4 : i1 to i32
    %c0_i32_4 = arith.constant 0 : i32
    %6 = arith.cmpi ne, %5, %c0_i32_4 : i32
    scf.if %6 {
      %c0_8 = arith.constant 0 : index
      %c0_9 = arith.constant 0 : index
      %13 = vector.load %arg6[%c0_8, %c0_9] : memref<128x128xf32, #tpu.memory_space<vmem>>, vector<128x128xf32>
      tpu.vector_store %arg6[%c0_8, %c0_9], %3 {strides = array<i32>} : memref<128x128xf32, #tpu.memory_space<vmem>>, vector<128x128xf32>,
    } else {
    }
    %c0_i32_5 = arith.constant 0 : i32
    %7 = arith.cmpi sgt, %arg2, %c0_i32_5 : i32
    %8 = arith.extui %7 : i1 to i32
    %c0_i32_6 = arith.constant 0 : i32
    %9 = arith.cmpi ne, %8, %c0_i32_6 : i32
    scf.if %9 {
      %c0_8 = arith.constant 0 : index
      %c0_9 = arith.constant 0 : index
      %13 = vector.load %arg6[%c0_8, %c0_9] : memref<128x128xf32, #tpu.memory_space<vmem>>, vector<128x128xf32>
      %14 = arith.addf %13, %3 : vector<128x128xf32>
      %c0_10 = arith.constant 0 : index
      %c0_11 = arith.constant 0 : index
      %15 = vector.load %arg6[%c0_10, %c0_11] : memref<128x128xf32, #tpu.memory_space<vmem>>, vector<128x128xf32>
      tpu.vector_store %arg6[%c0_10, %c0_11], %14 {strides = array<i32>} : memref<128x128xf32, #tpu.memory_space<vmem>>, vector<128x128xf32>,
    } else {
    }
    %c2_i32 = arith.constant 2 : i32
    %10 = arith.cmpi eq, %arg2, %c2_i32 : i32
    %11 = arith.extui %10 : i1 to i32
    %c0_i32_7 = arith.constant 0 : i32
    %12 = arith.cmpi ne, %11, %c0_i32_7 : i32
    scf.if %12 {
      %c0_8 = arith.constant 0 : index
      %c0_9 = arith.constant 0 : index
      %13 = vector.load %arg6[%c0_8, %c0_9] : memref<128x128xf32, #tpu.memory_space<vmem>>, vector<128x128xf32>
      %c0_10 = arith.constant 0 : index
      %c0_11 = arith.constant 0 : index
      %14 = vector.load %arg5[%c0_10, %c0_11] : memref<1x128xf32, #tpu.memory_space<vmem>>, vector<1x128xf32>
      %15 = vector.broadcast %14 : vector<1x128xf32> to vector<128x128xf32>
      %16 = arith.addf %13, %15 : vector<128x128xf32>
      %cst_12 = arith.constant 0.000000e+00 : f32
      %17 = vector.broadcast %cst_12 : f32 to vector<128x128xf32>
      %18 = arith.maximumf %16, %17 : vector<128x128xf32>
      %c0_13 = arith.constant 0 : index
      %c0_14 = arith.constant 0 : index
      %19 = vector.load %arg6[%c0_13, %c0_14] : memref<128x128xf32, #tpu.memory_space<vmem>>, vector<128x128xf32>
      tpu.vector_store %arg6[%c0_13, %c0_14], %18 {strides = array<i32>} : memref<128x128xf32, #tpu.memory_space<vmem>>, vector<128x128xf32>,
    } else {
    }
    return
  }
  func.func @transform_0(%arg0: i32, %arg1: i32, %arg2: i32) -> (i32, i32) {
    %c1_i32 = arith.constant 1 : i32
    %0 = arith.muli %arg0, %c1_i32 : i32
    %1 = arith.addi %0, %arg1 : i32
    %c0_i32 = arith.constant 0 : i32
    return %1, %arg2 : i32, i32
  }
  func.func @transform_1(%arg0: i32, %arg1: i32, %arg2: i32) -> (i32, i32, i32) {
    %c0_i32 = arith.constant 0 : i32
    %c0_i32_0 = arith.constant 0 : i32
    return %arg0, %arg2, %c0_i32 : i32, i32, i32
  }
  func.func @transform_2(%arg0: i32, %arg1: i32, %arg2: i32) -> (i32, i32) {
    %c0_i32 = arith.constant 0 : i32
    %c0_i32_0 = arith.constant 0 : i32
    %c0_i32_1 = arith.constant 0 : i32
    return %c0_i32, %c0_i32_0 : i32, i32
  }
  func.func @transform_3(%arg0: i32, %arg1: i32, %arg2: i32) -> (i32, i32) {
    %c1_i32 = arith.constant 1 : i32
    %0 = arith.muli %arg0, %c1_i32 : i32
    %1 = arith.addi %0, %arg1 : i32
    %c0_i32 = arith.constant 0 : i32
    %c0_i32_0 = arith.constant 0 : i32
    return %1, %c0_i32 : i32, i32
  }
}

module attributes {stable_mosaic.version = 11 : i64} {
  func.func @_gemm_kernel(%arg0: i32, %arg1: i32, %arg2: i32, %arg3: memref<128x512xbf16, #tpu.memory_space<vmem>>, %arg4: memref<1x512x128xbf16, #tpu.memory_space<vmem>>, %arg5: memref<1x128xf32, #tpu.memory_space<vmem>>, %arg6: memref<128x128xf32, #tpu.memory_space<vmem>>) attributes {dimension_semantics = [#tpu.dimension_semantics<parallel>, #tpu.dimension_semantics<parallel>, #tpu.dimension_semantics<arbitrary>], iteration_bounds = array<i64: 4, 1, 2>, scalar_prefetch = 0 : i64, scratch_operands = 0 : i64, tpu.core_type = #tpu.core_type<tc>, window_params = [{transform_indices = @transform_0, window_bounds = array<i64: 128, 512>}, {transform_indices = @transform_1, window_bounds = array<i64: 1, 512, 128>}, {pipeline_mode = #tpu.pipeline_mode<synchronous>, transform_indices = @transform_2, window_bounds = array<i64: 1, 128>}, {transform_indices = @transform_3, window_bounds = array<i64: 128, 128>}]} {
    %c0 = arith.constant 0 : index
    %c0_0 = arith.constant 0 : index
    %0 = vector.load %arg3[%c0, %c0_0] : memref<128x512xbf16, #tpu.memory_space<vmem>>, vector<128x512xbf16>
    %c0_1 = arith.constant 0 : index
    %c0_2 = arith.constant 0 : index
    %c0_3 = arith.constant 0 : index
    %1 = vector.load %arg4[%c0_1, %c0_2, %c0_3] : memref<1x512x128xbf16, #tpu.memory_space<vmem>>, vector<1x512x128xbf16>
    %2 = vector.shape_cast %1 : vector<1x512x128xbf16> to vector<512x128xbf16>
    %cst = arith.constant dense<0.000000e+00> : vector<128x128xf32>
    %3 = tpu.matmul %0, %2, %cst {dimension_numbers = #tpu.dot_dimension_numbers<[1], [0], [0], [1], [0, 0, 1, 1], [], []>} : vector<128x512xbf16>, vector<512x128xbf16>, vector<128x128xf32> -> vector<128x128xf32>
    %c0_i32 = arith.constant 0 : i32
    %4 = arith.cmpi eq, %arg2, %c0_i32 : i32
    %5 = arith.extui %4 : i1 to i32
    %c0_i32_4 = arith.constant 0 : i32
    %6 = arith.cmpi ne, %5, %c0_i32_4 : i32
    scf.if %6 {
      %c0_8 = arith.constant 0 : index
      %c0_9 = arith.constant 0 : index
      %13 = vector.load %arg6[%c0_8, %c0_9] : memref<128x128xf32, #tpu.memory_space<vmem>>, vector<128x128xf32>
      tpu.vector_store %arg6[%c0_8, %c0_9], %3 {strides = array<i32>} : memref<128x128xf32, #tpu.memory_space<vmem>>, vector<128x128xf32>,
    } else {
    }
    %c0_i32_5 = arith.constant 0 : i32
    %7 = arith.cmpi sgt, %arg2, %c0_i32_5 : i32
    %8 = arith.extui %7 : i1 to i32
    %c0_i32_6 = arith.constant 0 : i32
    %9 = arith.cmpi ne, %8, %c0_i32_6 : i32
    scf.if %9 {
      %c0_8 = arith.constant 0 : index
      %c0_9 = arith.constant 0 : index
      %13 = vector.load %arg6[%c0_8, %c0_9] : memref<128x128xf32, #tpu.memory_space<vmem>>, vector<128x128xf32>
      %14 = arith.addf %13, %3 : vector<128x128xf32>
      %c0_10 = arith.constant 0 : index
      %c0_11 = arith.constant 0 : index
      %15 = vector.load %arg6[%c0_10, %c0_11] : memref<128x128xf32, #tpu.memory_space<vmem>>, vector<128x128xf32>
      tpu.vector_store %arg6[%c0_10, %c0_11], %14 {strides = array<i32>} : memref<128x128xf32, #tpu.memory_space<vmem>>, vector<128x128xf32>,
    } else {
    }
    %c1_i32 = arith.constant 1 : i32
    %10 = arith.cmpi eq, %arg2, %c1_i32 : i32
    %11 = arith.extui %10 : i1 to i32
    %c0_i32_7 = arith.constant 0 : i32
    %12 = arith.cmpi ne, %11, %c0_i32_7 : i32
    scf.if %12 {
      %c0_8 = arith.constant 0 : index
      %c0_9 = arith.constant 0 : index
      %13 = vector.load %arg6[%c0_8, %c0_9] : memref<128x128xf32, #tpu.memory_space<vmem>>, vector<128x128xf32>
      %c0_10 = arith.constant 0 : index
      %c0_11 = arith.constant 0 : index
      %14 = vector.load %arg5[%c0_10, %c0_11] : memref<1x128xf32, #tpu.memory_space<vmem>>, vector<1x128xf32>
      %15 = vector.broadcast %14 : vector<1x128xf32> to vector<128x128xf32>
      %16 = arith.addf %13, %15 : vector<128x128xf32>
      %cst_12 = arith.constant 0.000000e+00 : f32
      %17 = vector.broadcast %cst_12 : f32 to vector<128x128xf32>
      %18 = arith.maximumf %16, %17 : vector<128x128xf32>
      %c0_13 = arith.constant 0 : index
      %c0_14 = arith.constant 0 : index
      %19 = vector.load %arg6[%c0_13, %c0_14] : memref<128x128xf32, #tpu.memory_space<vmem>>, vector<128x128xf32>
      tpu.vector_store %arg6[%c0_13, %c0_14], %18 {strides = array<i32>} : memref<128x128xf32, #tpu.memory_space<vmem>>, vector<128x128xf32>,
    } else {
    }
    return
  }
  func.func @transform_0(%arg0: i32, %arg1: i32, %arg2: i32) -> (i32, i32) {
    %c1_i32 = arith.constant 1 : i32
    %0 = arith.muli %arg0, %c1_i32 : i32
    %1 = arith.addi %0, %arg1 : i32
    %c0_i32 = arith.constant 0 : i32
    return %1, %arg2 : i32, i32
  }
  func.func @transform_1(%arg0: i32, %arg1: i32, %arg2: i32) -> (i32, i32, i32) {
    %c0_i32 = arith.constant 0 : i32
    %c0_i32_0 = arith.constant 0 : i32
    return %arg0, %arg2, %c0_i32 : i32, i32, i32
  }
  func.func @transform_2(%arg0: i32, %arg1: i32, %arg2: i32) -> (i32, i32) {
    %c0_i32 = arith.constant 0 : i32
    %c0_i32_0 = arith.constant 0 : i32
    %c0_i32_1 = arith.constant 0 : i32
    return %c0_i32, %c0_i32_0 : i32, i32
  }
  func.func @transform_3(%arg0: i32, %arg1: i32, %arg2: i32) -> (i32, i32) {
    %c1_i32 = arith.constant 1 : i32
    %0 = arith.muli %arg0, %c1_i32 : i32
    %1 = arith.addi %0, %arg1 : i32
    %c0_i32 = arith.constant 0 : i32
    %c0_i32_0 = arith.constant 0 : i32
    return %1, %c0_i32 : i32, i32
  }
}

module attributes {stable_mosaic.version = 11 : i64} {
  func.func @_gemm_kernel(%arg0: i32, %arg1: i32, %arg2: i32, %arg3: memref<128x576xbf16, #tpu.memory_space<vmem>>, %arg4: memref<1x576x128xbf16, #tpu.memory_space<vmem>>, %arg5: memref<1x128xf32, #tpu.memory_space<vmem>>, %arg6: memref<128x128xf32, #tpu.memory_space<vmem>>) attributes {dimension_semantics = [#tpu.dimension_semantics<parallel>, #tpu.dimension_semantics<parallel>, #tpu.dimension_semantics<arbitrary>], iteration_bounds = array<i64: 1, 4, 1>, scalar_prefetch = 0 : i64, scratch_operands = 0 : i64, tpu.core_type = #tpu.core_type<tc>, window_params = [{transform_indices = @transform_0, window_bounds = array<i64: 128, 576>}, {transform_indices = @transform_1, window_bounds = array<i64: 1, 576, 128>}, {pipeline_mode = #tpu.pipeline_mode<synchronous>, transform_indices = @transform_2, window_bounds = array<i64: 1, 128>}, {transform_indices = @transform_3, window_bounds = array<i64: 128, 128>}]} {
    %c0 = arith.constant 0 : index
    %c0_0 = arith.constant 0 : index
    %0 = vector.load %arg3[%c0, %c0_0] : memref<128x576xbf16, #tpu.memory_space<vmem>>, vector<128x576xbf16>
    %c0_1 = arith.constant 0 : index
    %c0_2 = arith.constant 0 : index
    %c0_3 = arith.constant 0 : index
    %1 = vector.load %arg4[%c0_1, %c0_2, %c0_3] : memref<1x576x128xbf16, #tpu.memory_space<vmem>>, vector<1x576x128xbf16>
    %2 = vector.shape_cast %1 : vector<1x576x128xbf16> to vector<576x128xbf16>
    %cst = arith.constant dense<0.000000e+00> : vector<128x128xf32>
    %3 = tpu.matmul %0, %2, %cst {dimension_numbers = #tpu.dot_dimension_numbers<[1], [0], [0], [1], [0, 0, 1, 1], [], []>} : vector<128x576xbf16>, vector<576x128xbf16>, vector<128x128xf32> -> vector<128x128xf32>
    %c0_i32 = arith.constant 0 : i32
    %4 = arith.cmpi eq, %arg2, %c0_i32 : i32
    %5 = arith.extui %4 : i1 to i32
    %c0_i32_4 = arith.constant 0 : i32
    %6 = arith.cmpi ne, %5, %c0_i32_4 : i32
    scf.if %6 {
      %c0_9 = arith.constant 0 : index
      %c0_10 = arith.constant 0 : index
      %13 = vector.load %arg6[%c0_9, %c0_10] : memref<128x128xf32, #tpu.memory_space<vmem>>, vector<128x128xf32>
      tpu.vector_store %arg6[%c0_9, %c0_10], %3 {strides = array<i32>} : memref<128x128xf32, #tpu.memory_space<vmem>>, vector<128x128xf32>,
    } else {
    }
    %c0_i32_5 = arith.constant 0 : i32
    %7 = arith.cmpi sgt, %arg2, %c0_i32_5 : i32
    %8 = arith.extui %7 : i1 to i32
    %c0_i32_6 = arith.constant 0 : i32
    %9 = arith.cmpi ne, %8, %c0_i32_6 : i32
    scf.if %9 {
      %c0_9 = arith.constant 0 : index
      %c0_10 = arith.constant 0 : index
      %13 = vector.load %arg6[%c0_9, %c0_10] : memref<128x128xf32, #tpu.memory_space<vmem>>, vector<128x128xf32>
      %14 = arith.addf %13, %3 : vector<128x128xf32>
      %c0_11 = arith.constant 0 : index
      %c0_12 = arith.constant 0 : index
      %15 = vector.load %arg6[%c0_11, %c0_12] : memref<128x128xf32, #tpu.memory_space<vmem>>, vector<128x128xf32>
      tpu.vector_store %arg6[%c0_11, %c0_12], %14 {strides = array<i32>} : memref<128x128xf32, #tpu.memory_space<vmem>>, vector<128x128xf32>,
    } else {
    }
    %c0_i32_7 = arith.constant 0 : i32
    %10 = arith.cmpi eq, %arg2, %c0_i32_7 : i32
    %11 = arith.extui %10 : i1 to i32
    %c0_i32_8 = arith.constant 0 : i32
    %12 = arith.cmpi ne, %11, %c0_i32_8 : i32
    scf.if %12 {
      %c0_9 = arith.constant 0 : index
      %c0_10 = arith.constant 0 : index
      %13 = vector.load %arg6[%c0_9, %c0_10] : memref<128x128xf32, #tpu.memory_space<vmem>>, vector<128x128xf32>
      %c0_11 = arith.constant 0 : index
      %c0_12 = arith.constant 0 : index
      %14 = vector.load %arg5[%c0_11, %c0_12] : memref<1x128xf32, #tpu.memory_space<vmem>>, vector<1x128xf32>
      %15 = vector.broadcast %14 : vector<1x128xf32> to vector<128x128xf32>
      %16 = arith.addf %13, %15 : vector<128x128xf32>
      %cst_13 = arith.constant 0.000000e+00 : f32
      %17 = vector.broadcast %cst_13 : f32 to vector<128x128xf32>
      %18 = arith.maximumf %16, %17 : vector<128x128xf32>
      %c0_14 = arith.constant 0 : index
      %c0_15 = arith.constant 0 : index
      %19 = vector.load %arg6[%c0_14, %c0_15] : memref<128x128xf32, #tpu.memory_space<vmem>>, vector<128x128xf32>
      tpu.vector_store %arg6[%c0_14, %c0_15], %18 {strides = array<i32>} : memref<128x128xf32, #tpu.memory_space<vmem>>, vector<128x128xf32>,
    } else {
    }
    return
  }
  func.func @transform_0(%arg0: i32, %arg1: i32, %arg2: i32) -> (i32, i32) {
    %c4_i32 = arith.constant 4 : i32
    %0 = arith.muli %arg0, %c4_i32 : i32
    %1 = arith.addi %0, %arg1 : i32
    %c0_i32 = arith.constant 0 : i32
    return %1, %arg2 : i32, i32
  }
  func.func @transform_1(%arg0: i32, %arg1: i32, %arg2: i32) -> (i32, i32, i32) {
    %c0_i32 = arith.constant 0 : i32
    %c0_i32_0 = arith.constant 0 : i32
    return %arg0, %arg2, %c0_i32 : i32, i32, i32
  }
  func.func @transform_2(%arg0: i32, %arg1: i32, %arg2: i32) -> (i32, i32) {
    %c0_i32 = arith.constant 0 : i32
    %c0_i32_0 = arith.constant 0 : i32
    %c0_i32_1 = arith.constant 0 : i32
    return %c0_i32, %c0_i32_0 : i32, i32
  }
  func.func @transform_3(%arg0: i32, %arg1: i32, %arg2: i32) -> (i32, i32) {
    %c4_i32 = arith.constant 4 : i32
    %0 = arith.muli %arg0, %c4_i32 : i32
    %1 = arith.addi %0, %arg1 : i32
    %c0_i32 = arith.constant 0 : i32
    %c0_i32_0 = arith.constant 0 : i32
    return %1, %c0_i32 : i32, i32
  }
}

module attributes {stable_mosaic.version = 11 : i64} {
  func.func @_gemm_kernel(%arg0: i32, %arg1: i32, %arg2: i32, %arg3: memref<128x576xbf16, #tpu.memory_space<vmem>>, %arg4: memref<1x576x128xbf16, #tpu.memory_space<vmem>>, %arg5: memref<1x128xf32, #tpu.memory_space<vmem>>, %arg6: memref<128x128xf32, #tpu.memory_space<vmem>>, %arg7: memref<128x128xf32, #tpu.memory_space<vmem>>) attributes {dimension_semantics = [#tpu.dimension_semantics<parallel>, #tpu.dimension_semantics<parallel>, #tpu.dimension_semantics<arbitrary>], iteration_bounds = array<i64: 1, 4, 1>, scalar_prefetch = 0 : i64, scratch_operands = 0 : i64, tpu.core_type = #tpu.core_type<tc>, window_params = [{transform_indices = @transform_0, window_bounds = array<i64: 128, 576>}, {transform_indices = @transform_1, window_bounds = array<i64: 1, 576, 128>}, {pipeline_mode = #tpu.pipeline_mode<synchronous>, transform_indices = @transform_2, window_bounds = array<i64: 1, 128>}, {transform_indices = @transform_3, window_bounds = array<i64: 128, 128>}, {transform_indices = @transform_4, window_bounds = array<i64: 128, 128>}]} {
    %c0 = arith.constant 0 : index
    %c0_0 = arith.constant 0 : index
    %0 = vector.load %arg3[%c0, %c0_0] : memref<128x576xbf16, #tpu.memory_space<vmem>>, vector<128x576xbf16>
    %c0_1 = arith.constant 0 : index
    %c0_2 = arith.constant 0 : index
    %c0_3 = arith.constant 0 : index
    %1 = vector.load %arg4[%c0_1, %c0_2, %c0_3] : memref<1x576x128xbf16, #tpu.memory_space<vmem>>, vector<1x576x128xbf16>
    %2 = vector.shape_cast %1 : vector<1x576x128xbf16> to vector<576x128xbf16>
    %cst = arith.constant dense<0.000000e+00> : vector<128x128xf32>
    %3 = tpu.matmul %0, %2, %cst {dimension_numbers = #tpu.dot_dimension_numbers<[1], [0], [0], [1], [0, 0, 1, 1], [], []>} : vector<128x576xbf16>, vector<576x128xbf16>, vector<128x128xf32> -> vector<128x128xf32>
    %c0_i32 = arith.constant 0 : i32
    %4 = arith.cmpi eq, %arg2, %c0_i32 : i32
    %5 = arith.extui %4 : i1 to i32
    %c0_i32_4 = arith.constant 0 : i32
    %6 = arith.cmpi ne, %5, %c0_i32_4 : i32
    scf.if %6 {
      %c0_9 = arith.constant 0 : index
      %c0_10 = arith.constant 0 : index
      %13 = vector.load %arg7[%c0_9, %c0_10] : memref<128x128xf32, #tpu.memory_space<vmem>>, vector<128x128xf32>
      tpu.vector_store %arg7[%c0_9, %c0_10], %3 {strides = array<i32>} : memref<128x128xf32, #tpu.memory_space<vmem>>, vector<128x128xf32>,
    } else {
    }
    %c0_i32_5 = arith.constant 0 : i32
    %7 = arith.cmpi sgt, %arg2, %c0_i32_5 : i32
    %8 = arith.extui %7 : i1 to i32
    %c0_i32_6 = arith.constant 0 : i32
    %9 = arith.cmpi ne, %8, %c0_i32_6 : i32
    scf.if %9 {
      %c0_9 = arith.constant 0 : index
      %c0_10 = arith.constant 0 : index
      %13 = vector.load %arg7[%c0_9, %c0_10] : memref<128x128xf32, #tpu.memory_space<vmem>>, vector<128x128xf32>
      %14 = arith.addf %13, %3 : vector<128x128xf32>
      %c0_11 = arith.constant 0 : index
      %c0_12 = arith.constant 0 : index
      %15 = vector.load %arg7[%c0_11, %c0_12] : memref<128x128xf32, #tpu.memory_space<vmem>>, vector<128x128xf32>
      tpu.vector_store %arg7[%c0_11, %c0_12], %14 {strides = array<i32>} : memref<128x128xf32, #tpu.memory_space<vmem>>, vector<128x128xf32>,
    } else {
    }
    %c0_i32_7 = arith.constant 0 : i32
    %10 = arith.cmpi eq, %arg2, %c0_i32_7 : i32
    %11 = arith.extui %10 : i1 to i32
    %c0_i32_8 = arith.constant 0 : i32
    %12 = arith.cmpi ne, %11, %c0_i32_8 : i32
    scf.if %12 {
      %c0_9 = arith.constant 0 : index
      %c0_10 = arith.constant 0 : index
      %13 = vector.load %arg7[%c0_9, %c0_10] : memref<128x128xf32, #tpu.memory_space<vmem>>, vector<128x128xf32>
      %c0_11 = arith.constant 0 : index
      %c0_12 = arith.constant 0 : index
      %14 = vector.load %arg5[%c0_11, %c0_12] : memref<1x128xf32, #tpu.memory_space<vmem>>, vector<1x128xf32>
      %15 = vector.broadcast %14 : vector<1x128xf32> to vector<128x128xf32>
      %16 = arith.addf %13, %15 : vector<128x128xf32>
      %c0_13 = arith.constant 0 : index
      %c0_14 = arith.constant 0 : index
      %17 = vector.load %arg6[%c0_13, %c0_14] : memref<128x128xf32, #tpu.memory_space<vmem>>, vector<128x128xf32>
      %18 = arith.addf %16, %17 : vector<128x128xf32>
      %cst_15 = arith.constant 0.000000e+00 : f32
      %19 = vector.broadcast %cst_15 : f32 to vector<128x128xf32>
      %20 = arith.maximumf %18, %19 : vector<128x128xf32>
      %c0_16 = arith.constant 0 : index
      %c0_17 = arith.constant 0 : index
      %21 = vector.load %arg7[%c0_16, %c0_17] : memref<128x128xf32, #tpu.memory_space<vmem>>, vector<128x128xf32>
      tpu.vector_store %arg7[%c0_16, %c0_17], %20 {strides = array<i32>} : memref<128x128xf32, #tpu.memory_space<vmem>>, vector<128x128xf32>,
    } else {
    }
    return
  }
  func.func @transform_0(%arg0: i32, %arg1: i32, %arg2: i32) -> (i32, i32) {
    %c4_i32 = arith.constant 4 : i32
    %0 = arith.muli %arg0, %c4_i32 : i32
    %1 = arith.addi %0, %arg1 : i32
    %c0_i32 = arith.constant 0 : i32
    return %1, %arg2 : i32, i32
  }
  func.func @transform_1(%arg0: i32, %arg1: i32, %arg2: i32) -> (i32, i32, i32) {
    %c0_i32 = arith.constant 0 : i32
    %c0_i32_0 = arith.constant 0 : i32
    return %arg0, %arg2, %c0_i32 : i32, i32, i32
  }
  func.func @transform_2(%arg0: i32, %arg1: i32, %arg2: i32) -> (i32, i32) {
    %c0_i32 = arith.constant 0 : i32
    %c0_i32_0 = arith.constant 0 : i32
    %c0_i32_1 = arith.constant 0 : i32
    return %c0_i32, %c0_i32_0 : i32, i32
  }
  func.func @transform_3(%arg0: i32, %arg1: i32, %arg2: i32) -> (i32, i32) {
    %c4_i32 = arith.constant 4 : i32
    %0 = arith.muli %arg0, %c4_i32 : i32
    %1 = arith.addi %0, %arg1 : i32
    %c0_i32 = arith.constant 0 : i32
    %c0_i32_0 = arith.constant 0 : i32
    return %1, %c0_i32 : i32, i32
  }
  func.func @transform_4(%arg0: i32, %arg1: i32, %arg2: i32) -> (i32, i32) {
    %c4_i32 = arith.constant 4 : i32
    %0 = arith.muli %arg0, %c4_i32 : i32
    %1 = arith.addi %0, %arg1 : i32
    %c0_i32 = arith.constant 0 : i32
    %c0_i32_0 = arith.constant 0 : i32
    return %1, %c0_i32 : i32, i32
  }
}

module attributes {stable_mosaic.version = 11 : i64} {
  func.func @_gemm_kernel(%arg0: i32, %arg1: i32, %arg2: i32, %arg3: memref<128x576xbf16, #tpu.memory_space<vmem>>, %arg4: memref<1x576x128xbf16, #tpu.memory_space<vmem>>, %arg5: memref<1x128xf32, #tpu.memory_space<vmem>>, %arg6: memref<128x128xf32, #tpu.memory_space<vmem>>) attributes {dimension_semantics = [#tpu.dimension_semantics<parallel>, #tpu.dimension_semantics<parallel>, #tpu.dimension_semantics<arbitrary>], iteration_bounds = array<i64: 1, 4, 1>, scalar_prefetch = 0 : i64, scratch_operands = 0 : i64, tpu.core_type = #tpu.core_type<tc>, window_params = [{transform_indices = @transform_0, window_bounds = array<i64: 128, 576>}, {transform_indices = @transform_1, window_bounds = array<i64: 1, 576, 128>}, {pipeline_mode = #tpu.pipeline_mode<synchronous>, transform_indices = @transform_2, window_bounds = array<i64: 1, 128>}, {transform_indices = @transform_3, window_bounds = array<i64: 128, 128>}]} {
    %c0 = arith.constant 0 : index
    %c0_0 = arith.constant 0 : index
    %0 = vector.load %arg3[%c0, %c0_0] : memref<128x576xbf16, #tpu.memory_space<vmem>>, vector<128x576xbf16>
    %c0_1 = arith.constant 0 : index
    %c0_2 = arith.constant 0 : index
    %c0_3 = arith.constant 0 : index
    %1 = vector.load %arg4[%c0_1, %c0_2, %c0_3] : memref<1x576x128xbf16, #tpu.memory_space<vmem>>, vector<1x576x128xbf16>
    %2 = vector.shape_cast %1 : vector<1x576x128xbf16> to vector<576x128xbf16>
    %cst = arith.constant dense<0.000000e+00> : vector<128x128xf32>
    %3 = tpu.matmul %0, %2, %cst {dimension_numbers = #tpu.dot_dimension_numbers<[1], [0], [0], [1], [0, 0, 1, 1], [], []>} : vector<128x576xbf16>, vector<576x128xbf16>, vector<128x128xf32> -> vector<128x128xf32>
    %c0_i32 = arith.constant 0 : i32
    %4 = arith.cmpi eq, %arg2, %c0_i32 : i32
    %5 = arith.extui %4 : i1 to i32
    %c0_i32_4 = arith.constant 0 : i32
    %6 = arith.cmpi ne, %5, %c0_i32_4 : i32
    scf.if %6 {
      %c0_9 = arith.constant 0 : index
      %c0_10 = arith.constant 0 : index
      %13 = vector.load %arg6[%c0_9, %c0_10] : memref<128x128xf32, #tpu.memory_space<vmem>>, vector<128x128xf32>
      tpu.vector_store %arg6[%c0_9, %c0_10], %3 {strides = array<i32>} : memref<128x128xf32, #tpu.memory_space<vmem>>, vector<128x128xf32>,
    } else {
    }
    %c0_i32_5 = arith.constant 0 : i32
    %7 = arith.cmpi sgt, %arg2, %c0_i32_5 : i32
    %8 = arith.extui %7 : i1 to i32
    %c0_i32_6 = arith.constant 0 : i32
    %9 = arith.cmpi ne, %8, %c0_i32_6 : i32
    scf.if %9 {
      %c0_9 = arith.constant 0 : index
      %c0_10 = arith.constant 0 : index
      %13 = vector.load %arg6[%c0_9, %c0_10] : memref<128x128xf32, #tpu.memory_space<vmem>>, vector<128x128xf32>
      %14 = arith.addf %13, %3 : vector<128x128xf32>
      %c0_11 = arith.constant 0 : index
      %c0_12 = arith.constant 0 : index
      %15 = vector.load %arg6[%c0_11, %c0_12] : memref<128x128xf32, #tpu.memory_space<vmem>>, vector<128x128xf32>
      tpu.vector_store %arg6[%c0_11, %c0_12], %14 {strides = array<i32>} : memref<128x128xf32, #tpu.memory_space<vmem>>, vector<128x128xf32>,
    } else {
    }
    %c0_i32_7 = arith.constant 0 : i32
    %10 = arith.cmpi eq, %arg2, %c0_i32_7 : i32
    %11 = arith.extui %10 : i1 to i32
    %c0_i32_8 = arith.constant 0 : i32
    %12 = arith.cmpi ne, %11, %c0_i32_8 : i32
    scf.if %12 {
      %c0_9 = arith.constant 0 : index
      %c0_10 = arith.constant 0 : index
      %13 = vector.load %arg6[%c0_9, %c0_10] : memref<128x128xf32, #tpu.memory_space<vmem>>, vector<128x128xf32>
      %c0_11 = arith.constant 0 : index
      %c0_12 = arith.constant 0 : index
      %14 = vector.load %arg5[%c0_11, %c0_12] : memref<1x128xf32, #tpu.memory_space<vmem>>, vector<1x128xf32>
      %15 = vector.broadcast %14 : vector<1x128xf32> to vector<128x128xf32>
      %16 = arith.addf %13, %15 : vector<128x128xf32>
      %cst_13 = arith.constant 0.000000e+00 : f32
      %17 = vector.broadcast %cst_13 : f32 to vector<128x128xf32>
      %18 = arith.subf %17, %16 : vector<128x128xf32>
      %19 = math.exp %18 : vector<128x128xf32>
      %cst_14 = arith.constant 1.000000e+00 : f32
      %20 = vector.broadcast %cst_14 : f32 to vector<128x128xf32>
      %21 = arith.addf %20, %19 : vector<128x128xf32>
      %22 = tpu.reciprocal %21 {approx = true} : vector<128x128xf32> -> vector<128x128xf32>
      %c0_15 = arith.constant 0 : index
      %c0_16 = arith.constant 0 : index
      %23 = vector.load %arg6[%c0_15, %c0_16] : memref<128x128xf32, #tpu.memory_space<vmem>>, vector<128x128xf32>
      tpu.vector_store %arg6[%c0_15, %c0_16], %22 {strides = array<i32>} : memref<128x128xf32, #tpu.memory_space<vmem>>, vector<128x128xf32>,
    } else {
    }
    return
  }
  func.func @transform_0(%arg0: i32, %arg1: i32, %arg2: i32) -> (i32, i32) {
    %c4_i32 = arith.constant 4 : i32
    %0 = arith.muli %arg0, %c4_i32 : i32
    %1 = arith.addi %0, %arg1 : i32
    %c0_i32 = arith.constant 0 : i32
    return %1, %arg2 : i32, i32
  }
  func.func @transform_1(%arg0: i32, %arg1: i32, %arg2: i32) -> (i32, i32, i32) {
    %c0_i32 = arith.constant 0 : i32
    %c0_i32_0 = arith.constant 0 : i32
    return %arg0, %arg2, %c0_i32 : i32, i32, i32
  }
  func.func @transform_2(%arg0: i32, %arg1: i32, %arg2: i32) -> (i32, i32) {
    %c0_i32 = arith.constant 0 : i32
    %c0_i32_0 = arith.constant 0 : i32
    %c0_i32_1 = arith.constant 0 : i32
    return %c0_i32, %c0_i32_0 : i32, i32
  }
  func.func @transform_3(%arg0: i32, %arg1: i32, %arg2: i32) -> (i32, i32) {
    %c4_i32 = arith.constant 4 : i32
    %0 = arith.muli %arg0, %c4_i32 : i32
    %1 = arith.addi %0, %arg1 : i32
    %c0_i32 = arith.constant 0 : i32
    %c0_i32_0 = arith.constant 0 : i32
    return %1, %c0_i32 : i32, i32
  }
}

</mosaic_0001>

<bundles_post_ra>
// kernel: forward_pallas.18
= control target key start
LH: loop header
LB: loop body
LE: loop exit
PB: predicated region body
PF: predicated region fallthrough
CT: control target
= control target key end

     0   :  { %7 = vsyncpa [#allocation3], 0  ;;  %s257_s12 = smov [#allocation2]   ;;  %s258_s14 = smov 256   ;;  %s297_s0 = inlined_call_operand.vmem [shape: bf16[8,10], index: 0, kind: input, shape index: {}]   ;;  %s298_s1 = inlined_call_operand.hbm [shape: bf16[1,10,512], index: 1, kind: input, shape index: {}]   ;;  %s299_s2 = inlined_call_operand.vmem [shape: f32[8,512], index: 2, kind: output, shape index: {}]  }
   0x1   :  { %s20_s11 = sshll.u32 %s298_s1, 4  ;;  %s22_s13 = sshll.u32 %s257_s12, 4  ;;  %s21_s11 = int_to_ptr.hbm [resolvable:$true] %s20_s11  ;;  %s23_s13 = int_to_ptr.vmem [resolvable:$true] %s22_s13 }
   0x2   :  { %s259_s15 = smov 16  }
   0x3   :  { %28 = dma.hbm_to_vmem [thread:$0]  %s21_s11, 512, %s23_s13, [#allocation3], %s258_s14, %s258_s14, %s259_s15  }
   0x4   :  { %255 = dma.done.wait [#allocation3], 512  }
   0x5   :  { %256 = vsyncadd [#allocation3], 4294966784  ;;  %vm83_vm0 = vcmask 1044480   ;;  %v206_v0 = vld [vmem:[#allocation2] sm:$0xf]  ;;  %vm79_vm1 = vcmask 80896  }
   0x6   :  { %v226_v1 = vld [vmem:[#allocation2 + $0xc] sm:$0x10]  ;;  %v224_v2 = vld [vmem:[#allocation2 + $0x4] sm:$0xf]  ;;  %v208_v4 = vld [vmem:[#allocation2 + $0x10] sm:$0x10] }
   0x7   :  { %v207_v3 = vor.u32 %v226_v1, %v206_v0  ;;  %v214_v5 = vld [vmem:[#allocation2 + $0x8] sm:$0xf]  ;;  %v227_v6 = vld [vmem:[#allocation2 + $0x14] sm:$0x10]  ;;  %v211_v7 = vor.u32 %v224_v2, %v208_v4  ;;  %v225_v9 = vld [vmem:[#allocation2 + $0xc] sm:$0xf] }
   0x8   :  { %v215_v8 = vor.u32 %v227_v6, %v214_v5  ;;  %v216_v10 = vld [vmem:[#allocation2 + $0x18] sm:$0x10]  ;;  %v58_v15 = vld [vmem:[%s297_s0] sm:$0xf] }
   0x9   :  { %v85_v11 = vsel %vm83_vm0, %v207_v3, 0  ;;  %v219_v12 = vor.u32 %v225_v9, %v216_v10  ;;  %v88_v13 = vsel %vm83_vm0, %v211_v7, 0 }
   0xa   :  { %103 = vmatpush.bf16.msra.mxu0 %v85_v11  ;;  %v91_v14 = vsel %vm83_vm0, %v215_v8, 0  ;;  %116 = vmatpush.bf16.msra.mxu1 %v88_v13 }
   0xb   :  { %129 = vmatpush.bf16.msra.mxu2 %v91_v14  ;;  %v94_v16 = vsel %vm83_vm0, %v219_v12, 0 }
   0xc   :  { %142 = vmatpush.bf16.msra.mxu3 %v94_v16 }
   0xd   :  { %220 = vmatmul.msk.bf16.vlgmr.msra.gmra.mxu0 %vm79_vm1, %v58_v15  ;;  %221 = vmatmul.msk.bf16.vlgmr.msra.gmra.mxu1 %vm79_vm1, %v58_v15 }
   0xe   :  { %222 = vmatmul.msk.bf16.vlgmr.msra.gmra.mxu2 %vm79_vm1, %v58_v15 }
   0xf   :  { %223 = vmatmul.msk.bf16.vlgmr.msra.gmra.mxu3 %vm79_vm1, %v58_v15 }
  0x8a   :  { %v105_v17 = vpop.f32.mrf.mxu0  ;;  %v118_v18 = vpop.f32.mrf.mxu1 }
  0x8b   :  { %152 = vst [vmem:[%s299_s2] sm:$0xff] %v105_v17 }
  0x8c   :  { %153 = vst [vmem:[%s299_s2 + $0x8] sm:$0xff] %v118_v18 }
  0x91   :  { %v131_v19 = vpop.f32.mrf.mxu2 }
  0x92   :  { %154 = vst [vmem:[%s299_s2 + $0x10] sm:$0xff] %v131_v19  ;;  %v144_v20 = vpop.f32.mrf.mxu3  ;;  %v107_v21 = vpop.f32.mrf.mxu0 }
  0x93   :  { %155 = vst [vmem:[%s299_s2 + $0x18] sm:$0xff] %v144_v20  ;;  %v120_v22 = vpop.f32.mrf.mxu1 }
  0x99   :  { %v133_v23 = vpop.f32.mrf.mxu2 }
  0x9a   :  { %v146_v24 = vpop.f32.mrf.mxu3 }
  0x9b   :  { %189 = vsyncpa [#allocation3], 1 }

// kernel: forward_pallas.19
= control target key start
LH: loop header
LB: loop body
LE: loop exit
PB: predicated region body
PF: predicated region fallthrough
CT: control target
= control target key end

     0   :  { %8 = vsyncpa [#allocation3], 0  ;;  %s600_s0 = inlined_call_operand.vmem [shape: bf16[8,90], index: 0, kind: input, shape index: {}]   ;;  %s601_s1 = inlined_call_operand.hbm [shape: bf16[1,90,512], index: 1, kind: input, shape index: {}]   ;;  %s602_s2 = inlined_call_operand.hbm [shape: f32[1,512], index: 2, kind: input, shape index: {}]   ;;  %s603_s3 = inlined_call_operand.vmem [shape: f32[8,512], index: 3, kind: output, shape index: {}]  }
   0x1   :  { %s22_s14 = sshll.u32 %s601_s1, 4  ;;  %s23_s14 = int_to_ptr.hbm [resolvable:$true] %s22_s14 }
   0x2   :  { %9 = vsyncpa [#allocation5], 0  ;;  %s551_s15 = smov [#allocation2]   ;;  %s36_s19 = sshll.u32 %s602_s2, 4  ;;  %s37_s19 = int_to_ptr.hbm [resolvable:$true] %s36_s19 }
   0x3   :  { %s24_s16 = sshll.u32 %s551_s15, 4  ;;  %s552_s20 = smov 256   ;;  %s25_s16 = int_to_ptr.vmem [resolvable:$true] %s24_s16 }
   0x4   :  { %s553_s21 = smov 16   ;;  %s554_s22 = smov [#allocation4]  }
   0x5   :  { %30 = dma.hbm_to_vmem [thread:$0]  %s23_s14, 3072, %s25_s16, [#allocation3], %s552_s20, %s552_s20, %s553_s21  }
   0x6   :  { %s38_s23 = sshll.u32 %s554_s22, 4  ;;  %s39_s23 = int_to_ptr.vmem [resolvable:$true] %s38_s23 }
   0x7   :  { %41 = dma.hbm_to_vmem [thread:$0]  %s37_s19, 64, %s39_s23, [#allocation5]  }
   0x8   :  { %547 = dma.done.wait [#allocation3], 3072  }
   0x9   :  { %548 = vsyncadd [#allocation3], 4294964224 }
   0xa   :  { %549 = dma.done.wait [#allocation5], 64  }
   0xb   :  { %550 = vsyncadd [#allocation5], 4294967232  ;;  %vm220_vm0 = vcmask 1044480   ;;  %v453_v0 = vld [vmem:[#allocation2 + $0xa0] sm:$0xf]  ;;  %vm216_vm1 = vcmask 736256  }
   0xc   :  { %v493_v1 = vld [vmem:[#allocation2 + $0xac] sm:$0x10]  ;;  %v491_v2 = vld [vmem:[#allocation2 + $0xa4] sm:$0xf]  ;;  %v455_v4 = vld [vmem:[#allocation2 + $0xb0] sm:$0x10] }
   0xd   :  { %v454_v3 = vor.u32 %v493_v1, %v453_v0  ;;  %v461_v5 = vld [vmem:[#allocation2 + $0xa8] sm:$0xf]  ;;  %v494_v6 = vld [vmem:[#allocation2 + $0xb4] sm:$0x10]  ;;  %v458_v7 = vor.u32 %v491_v2, %v455_v4  ;;  %v492_v9 = vld [vmem:[#allocation2 + $0xac] sm:$0xf] }
   0xe   :  { %v462_v8 = vor.u32 %v494_v6, %v461_v5  ;;  %v463_v10 = vld [vmem:[#allocation2 + $0xb8] sm:$0x10]  ;;  %v437_v11 = vld [vmem:[#allocation2 + $0x80] sm:$0xf]  ;;  %v489_v14 = vld [vmem:[#allocation2 + $0x8c] sm:$0xf0] }
   0xf   :  { %v222_v12 = vsel %vm220_vm0, %v454_v3, 0  ;;  %v466_v13 = vor.u32 %v492_v9, %v463_v10  ;;  %v487_v15 = vld [vmem:[#allocation2 + $0x84] sm:$0xf]  ;;  %v225_v16 = vsel %vm220_vm0, %v458_v7, 0  ;;  %v438_v18 = vor.u32 %v489_v14, %v437_v11  ;;  %v439_v19 = vld [vmem:[#allocation2 + $0x90] sm:$0xf0] }
  0x10   :  { %235 = vmatpush.bf16.msra.mxu0 %v222_v12  ;;  %v228_v17 = vsel %vm220_vm0, %v462_v8, 0  ;;  %v445_v20 = vld [vmem:[#allocation2 + $0x88] sm:$0xf]  ;;  %248 = vmatpush.bf16.msra.mxu1 %v225_v16  ;;  %v442_v22 = vor.u32 %v487_v15, %v439_v19  ;;  %v490_v23 = vld [vmem:[#allocation2 + $0x94] sm:$0xf0] }
  0x11   :  { %261 = vmatpush.bf16.msra.mxu2 %v228_v17  ;;  %v231_v21 = vsel %vm220_vm0, %v466_v13, 0  ;;  %v488_v24 = vld [vmem:[#allocation2 + $0x8c] sm:$0xf]  ;;  %v446_v25 = vor.u32 %v490_v23, %v445_v20  ;;  %v447_v26 = vld [vmem:[#allocation2 + $0x98] sm:$0xf0] }
  0x12   :  { %274 = vmatpush.bf16.msra.mxu3 %v231_v21  ;;  %v421_v27 = vld [vmem:[#allocation2 + $0x60] sm:$0xf]  ;;  %v485_v28 = vld [vmem:[#allocation2 + $0x6c] sm:$0xf0]  ;;  %v450_v29 = vor.u32 %v488_v24, %v447_v26  ;;  %v483_v30 = vld [vmem:[#allocation2 + $0x64] sm:$0xf] }
  0x13   :  { %v423_v31 = vld [vmem:[#allocation2 + $0x70] sm:$0xf0]  ;;  %v429_v32 = vld [vmem:[#allocation2 + $0x68] sm:$0xf]  ;;  %v422_v33 = vor.u32 %v485_v28, %v421_v27  ;;  %v486_v34 = vld [vmem:[#allocation2 + $0x74] sm:$0xf0] }
  0x14   :  { %236 = vmatpush.bf16.msra.mxu0 %v438_v18  ;;  %v484_v35 = vld [vmem:[#allocation2 + $0x6c] sm:$0xf]  ;;  %v431_v36 = vld [vmem:[#allocation2 + $0x78] sm:$0xf0]  ;;  %249 = vmatpush.bf16.msra.mxu1 %v442_v22  ;;  %v426_v37 = vor.u32 %v483_v30, %v423_v31  ;;  %v430_v38 = vor.u32 %v486_v34, %v429_v32  ;;  %v405_v39 = vld [vmem:[#allocation2 + $0x40] sm:$0xf] }
  0x15   :  { %262 = vmatpush.bf16.msra.mxu2 %v446_v25  ;;  %v481_v40 = vld [vmem:[#allocation2 + $0x4c] sm:$0xf0]  ;;  %v479_v41 = vld [vmem:[#allocation2 + $0x44] sm:$0xf]  ;;  %v434_v42 = vor.u32 %v484_v35, %v431_v36  ;;  %v407_v43 = vld [vmem:[#allocation2 + $0x50] sm:$0xf0] }
  0x16   :  { %275 = vmatpush.bf16.msra.mxu3 %v450_v29  ;;  %v413_v44 = vld [vmem:[#allocation2 + $0x48] sm:$0xf]  ;;  %v482_v45 = vld [vmem:[#allocation2 + $0x54] sm:$0xf0]  ;;  %v480_v46 = vld [vmem:[#allocation2 + $0x4c] sm:$0xf]  ;;  %v406_v48 = vor.u32 %v481_v40, %v405_v39  ;;  %v410_v49 = vor.u32 %v479_v41, %v407_v43 }
  0x17   :  { %v415_v47 = vld [vmem:[#allocation2 + $0x58] sm:$0xf0]  ;;  %v414_v50 = vor.u32 %v482_v45, %v413_v44  ;;  %v389_v51 = vld [vmem:[#allocation2 + $0x20] sm:$0xf]  ;;  %v477_v52 = vld [vmem:[#allocation2 + $0x2c] sm:$0xf0] }
  0x18   :  { %237 = vmatpush.bf16.msra.mxu0 %v422_v33  ;;  %250 = vmatpush.bf16.msra.mxu1 %v426_v37  ;;  %v475_v53 = vld [vmem:[#allocation2 + $0x24] sm:$0xf]  ;;  %v418_v54 = vor.u32 %v480_v46, %v415_v47  ;;  %v391_v55 = vld [vmem:[#allocation2 + $0x30] sm:$0xf0]  ;;  %v397_v56 = vld [vmem:[#allocation2 + $0x28] sm:$0xf]  ;;  %v390_v60 = vor.u32 %v477_v52, %v389_v51 }
  0x19   :  { %263 = vmatpush.bf16.msra.mxu2 %v430_v38  ;;  %v478_v57 = vld [vmem:[#allocation2 + $0x34] sm:$0xf0]  ;;  %v476_v58 = vld [vmem:[#allocation2 + $0x2c] sm:$0xf]  ;;  %v399_v59 = vld [vmem:[#allocation2 + $0x38] sm:$0xf0]  ;;  %v394_v61 = vor.u32 %v475_v53, %v391_v55 }
  0x1a   :  { %276 = vmatpush.bf16.msra.mxu3 %v434_v42  ;;  %v398_v62 = vor.u32 %v478_v57, %v397_v56  ;;  %v373_v63 = vld [vmem:[#allocation2] sm:$0xf]  ;;  %v473_v0 = vld [vmem:[#allocation2 + $0xc] sm:$0xf0]  ;;  %v471_v1 = vld [vmem:[#allocation2 + $0x4] sm:$0xf]  ;;  %v402_v2 = vor.u32 %v476_v58, %v399_v59 }
  0x1b   :  { %v375_v3 = vld [vmem:[#allocation2 + $0x10] sm:$0xf0]  ;;  %v381_v4 = vld [vmem:[#allocation2 + $0x8] sm:$0xf]  ;;  %v474_v5 = vld [vmem:[#allocation2 + $0x14] sm:$0xf0]  ;;  %v374_v8 = vor.u32 %v473_v0, %v373_v63 }
  0x1c   :  { %238 = vmatpush.bf16.msra.mxu0 %v406_v48  ;;  %251 = vmatpush.bf16.msra.mxu1 %v410_v49  ;;  %v472_v6 = vld [vmem:[#allocation2 + $0xc] sm:$0xf]  ;;  %v383_v7 = vld [vmem:[#allocation2 + $0x18] sm:$0xf0]  ;;  %v378_v9 = vor.u32 %v471_v1, %v375_v3  ;;  %v382_v10 = vor.u32 %v474_v5, %v381_v4  ;;  %v75_v12 = vld [vmem:[%s600_s0] sm:$0xf] }
  0x1d   :  { %264 = vmatpush.bf16.msra.mxu2 %v414_v50  ;;  %v386_v11 = vor.u32 %v472_v6, %v383_v7  ;;  %v316_v13 = vld [vmem:[#allocation4] sm:$0xf] }
  0x1e   :  { %277 = vmatpush.bf16.msra.mxu3 %v418_v54  ;;  %v318_v14 = vperm.slane %v316_v13, 0  ;;  %v319_v15 = vperm.slane %v316_v13, 1  ;;  %v320_v22 = vperm.slane %v316_v13, 2  ;;  %v321_v23 = vperm.slane %v316_v13, 3 }
  0x20   :  { %239 = vmatpush.bf16.msra.mxu0 %v390_v60  ;;  %252 = vmatpush.bf16.msra.mxu1 %v394_v61 }
  0x21   :  { %265 = vmatpush.bf16.msra.mxu2 %v398_v62 }
  0x22   :  { %278 = vmatpush.bf16.msra.mxu3 %v402_v2 }
  0x24   :  { %240 = vmatpush.bf16.msra.mxu0 %v374_v8  ;;  %253 = vmatpush.bf16.msra.mxu1 %v378_v9 }
  0x25   :  { %266 = vmatpush.bf16.msra.mxu2 %v382_v10 }
  0x26   :  { %279 = vmatpush.bf16.msra.mxu3 %v386_v11 }
  0x27   :  { %467 = vmatmul.msk.bf16.vlgmr.msra.gmra.mxu0 %vm216_vm1, %v75_v12  ;;  %468 = vmatmul.msk.bf16.vlgmr.msra.gmra.mxu1 %vm216_vm1, %v75_v12 }
  0x28   :  { %469 = vmatmul.msk.bf16.vlgmr.msra.gmra.mxu2 %vm216_vm1, %v75_v12 }
  0x29   :  { %470 = vmatmul.msk.bf16.vlgmr.msra.gmra.mxu3 %vm216_vm1, %v75_v12 }
  0xa4   :  { %v242_v16 = vpop.f32.mrf.mxu0  ;;  %v255_v18 = vpop.f32.mrf.mxu1 }
  0xa5   :  { %v326_v17 = vadd.f32 %v318_v14, %v242_v16  ;;  %v327_v19 = vadd.f32 %v319_v15, %v255_v18 }
  0xa7   :  { %v330_v20 = vmax.f32 %v326_v17, 0.0  ;;  %v331_v21 = vmax.f32 %v327_v19, 0.0 }
  0xa9   :  { %334 = vst [vmem:[%s603_s3] sm:$0xff] %v330_v20 }
  0xaa   :  { %335 = vst [vmem:[%s603_s3 + $0x8] sm:$0xff] %v331_v21 }
  0xab   :  { %v268_v24 = vpop.f32.mrf.mxu2 }
  0xac   :  { %v328_v25 = vadd.f32 %v320_v22, %v268_v24  ;;  %v281_v26 = vpop.f32.mrf.mxu3  ;;  %v244_v27 = vpop.f32.mrf.mxu0 }
  0xad   :  { %v329_v28 = vadd.f32 %v321_v23, %v281_v26  ;;  %v257_v29 = vpop.f32.mrf.mxu1 }
  0xae   :  { %v332_v30 = vmax.f32 %v328_v25, 0.0 }
  0xaf   :  { %v333_v31 = vmax.f32 %v329_v28, 0.0 }
  0xb0   :  { %336 = vst [vmem:[%s603_s3 + $0x10] sm:$0xff] %v332_v30 }
  0xb1   :  { %337 = vst [vmem:[%s603_s3 + $0x18] sm:$0xff] %v333_v31 }
  0xb3   :  { %v270_v32 = vpop.f32.mrf.mxu2 }
  0xb4   :  { %v283_v33 = vpop.f32.mrf.mxu3 }
  0xb5   :  { %355 = vsyncpa [#allocation3], 1 }
  0xb6   :  { %356 = vsyncpa [#allocation5], 1 }

// kernel: forward_pallas.21
= control target key start
LH: loop header
LB: loop body
LE: loop exit
PB: predicated region body
PF: predicated region fallthrough
CT: control target
= control target key end

     0   :  { %8 = vsyncpa [#allocation3], 0  ;;  %s2781_s0 = inlined_call_operand.vmem [shape: bf16[8,4608], index: 0, kind: input, shape index: {}]   ;;  %s2782_s1 = inlined_call_operand.hbm [shape: bf16[1,4608,512], index: 1, kind: input, shape index: {}]   ;;  %s2783_s2 = inlined_call_operand.hbm [shape: f32[1,512], index: 2, kind: input, shape index: {}]   ;;  %s2784_s3 = inlined_call_operand.vmem [shape: f32[8,512], index: 3, kind: output, shape index: {}]  }
   0x1   :  { %10 = vsyncpa [#allocation3 + $0x1], 0 }
   0x2   :  { %11 = vsyncpa [#allocation5], 0  ;;  %s2305_s12 = smov 0   ;;  %s2307_s13 = smov 0  }
   0x3   :  { %s2309_s14 = smov 0   ;;  %s2311_s15 = smov 0  }
   0x4   :  { %s2313_s16 = smov 0   ;;  %s2315_s17 = smov 0  }
   0x5 LB: > { %s1436_s18 = sadd.s32 4294967295, %s2280_s17   ;;  %s75_s19 = sadd.s32 1, %s2268_s14  ;;  %s2280_s17 = sphi %s2315_s17, %s17_s17   ;;  %s2276_s16 = sphi %s2313_s16, %s2795_s16   ;;  %s2272_s15 = sphi %s2311_s15, %s2794_s15   ;;  %s2268_s14 = sphi %s2309_s14, %s2793_s14   ;;  %s2264_s13 = sphi %s2307_s13, %s2792_s13   ;;  %s2260_s12 = sphi %s2305_s12, %s2791_s12  }
   0x6   : > { %p82_p0 = scmp.ne.s32.totalorder %s2268_s14, %s2264_s13  ;;  %p83_p1 = scmp.eq.s32.totalorder %s2280_s17, 0 }
   0x7   : > { %p88_p2 = scmp.ne.s32.totalorder %s2264_s13, %s2260_s12  ;;  %p2339_p3 = scmp.eq.s32.totalorder %s1436_s18, 0 }
   0x8   : > { %p2343_p4 = por %p83_p1, %p82_p0  ;;  %p1437_p5 = scmp.ge.s32.totalorder %s2280_s17, 1 }
   0x9   : > { %p2350_p6 = por %p2339_p3, %p88_p2  ;;  %p148_p7 = scmp.lt.s32.totalorder %s2280_s17, 10 }
   0xa   : > { %s160_s25 = sshll.u32 %s2783_s2, 4  ;;  %s2282_s27 = smov [#allocation4]   ;;  %s161_s25 = int_to_ptr.hbm [resolvable:$true] %s160_s25 }
   0xb   : > { %p2358_p8 = pnand %p1437_p5, %p148_p7  ;;  %s162_s28 = sshll.u32 %s2282_s27, 4  ;;  %s163_s28 = int_to_ptr.vmem [resolvable:$true] %s162_s28 }
   0xc   : > { %p2113_p10 = scmp.lt.s32.totalorder %s2280_s17, 9  ;;  %s29_s30 = sadd.s32 1, %s2276_s16 }
   0xd   : > { %p2104_p9 = pneg %p2358_p8  ;;  %p30_p13 = scmp.ge.s32.totalorder %s29_s30, 9 }
   0xe   : > { %p2369_p12 = pnand %p2113_p10, %p2343_p4  ;;  %s188_s4 = sand.u32 1, %s2268_s14  }
   0xf   : > { %p2105_p11 = pnand %p2104_p9, %p2339_p3  ;;  %s1969_s5 = sshll.u32 %s2276_s16, 10 }
  0x10   : > { %s2797_s30 = smov (%p30_p13, %s29_s30), 0  ;;  %s1440_s6 = sshll.u32 %s188_s4, 10 }
  0x11   : > { %2107 = dma.hbm_to_vmem [thread:$0]  (!%p2105_p11), %s161_s25, 64, %s163_s28, [#allocation5]  }
  0x12   : > { %s71_s7 = ssub.s32 %s2276_s16, %s2797_s30  ;;  %s200_s10 = scalar_lea.hbm %s2782_s1, %s1969_s5 }
  0x13   : > { %p73_p0 = scmp.eq.s32.totalorder %s71_s7, 0  ;;  %s201_s11 = sshll.u32 %s200_s10, 4  ;;  %s202_s11 = int_to_ptr.hbm [resolvable:$true] %s201_s11 }
  0x14   : > { %s192_s12 = scalar_lea.vmem [#allocation2], %s1440_s6  ;;  %s189_s23 = scalar_lea.sflag [#allocation3], %s188_s4 }
  0x15   : > { %s203_s18 = sshll.u32 %s192_s12, 4  ;;  %s2283_s24 = smov 256   ;;  %s204_s18 = int_to_ptr.vmem [resolvable:$true] %s203_s18 }
  0x16   : > { %s2386_s21 = scalar_select %p73_p0, %s2268_s14, %s75_s19  }
  0x17   : > { %s2284_s25 = smov 16   ;;  %215 = sbr.rel (%p2358_p8) target bundleno = 341 (0x155), region = 32 }
  0x18   : > { %2111 = dma.hbm_to_vmem [thread:$0]  (!%p2369_p12), %s202_s11, 16384, %s204_s18, %s189_s23, %s2283_s24, %s2283_s24, %s2284_s25  }
  0x19   : > { %s217_s27 = sand.u32 (!%p2358_p8), 1, %s2264_s13  }
  0x1a   : > { %s1445_s28 = sshll.u32 (!%p2358_p8), %s217_s27, 10  ;;  %s218_s5 = scalar_lea.sflag (!%p2358_p8), [#allocation3], %s217_s27 }
  0x1b   : > { %s2393_s6 = scalar_lea.vmem (!%p2358_p8), [#allocation2], %s1445_s28 }
  0x1c   : > { %2251 = dma.done.wait (%p2350_p6), %s218_s5, 16384  }
  0x1d   : > { %2253 = vsyncadd (%p2350_p6), %s218_s5, 4294950912 }
  0x1e   : > { %2255 = dma.done.wait (%p2339_p3), [#allocation5], 64  }
  0x1f   : > { %2257 = vsyncadd (%p2339_p3), [#allocation5], 4294967232  ;;  %v1563_v0 = vld [vmem:[%s2393_s6 + $0xe0] sm:$0xf]  ;;  %v2000_v1 = vld [vmem:[%s2393_s6 + $0xec] sm:$0xf0] }
  0x20   : > { %v1691_v2 = vld [vmem:[%s2393_s6 + $0x1e0] sm:$0xf]  ;;  %v1564_v3 = vor.u32 %v2000_v1, %v1563_v0  ;;  %v2032_v4 = vld [vmem:[%s2393_s6 + $0x1ec] sm:$0xf0]  ;;  %s1447_s19 = sshll.u32 %s2272_s15, 2  ;;  %p1961_p2 = scmp.ne.s32.totalorder %s2272_s15, 0 }
  0x21   : > { %v1819_v5 = vld [vmem:[%s2393_s6 + $0x2e0] sm:$0xf]  ;;  %v2064_v6 = vld [vmem:[%s2393_s6 + $0x2ec] sm:$0xf0]  ;;  %v1692_v7 = vor.u32 %v2032_v4, %v1691_v2  ;;  %p2454_p1 = scmp.lt.s32.totalorder %s1447_s19, 35 }
  0x22   : > { %v1820_v8 = vor.u32 %v2064_v6, %v1819_v5  ;;  %v1947_v9 = vld [vmem:[%s2393_s6 + $0x3e0] sm:$0xf]  ;;  %v2096_v10 = vld [vmem:[%s2393_s6 + $0x3ec] sm:$0xf0]  ;;  %1065 = vmatpush.bf16.msra.mxu0 %v1564_v3 }
  0x23   : > { %v1547_v11 = vld [vmem:[%s2393_s6 + $0xc0] sm:$0xf]  ;;  %v1948_v12 = vor.u32 %v2096_v10, %v1947_v9  ;;  %v1996_v13 = vld [vmem:[%s2393_s6 + $0xcc] sm:$0xf0]  ;;  %1078 = vmatpush.bf16.msra.mxu1 %v1692_v7  ;;  %s2799_s19 = smov (!%p2454_p1, %s1447_s19), 35 }
  0x24   : > { %v1675_v14 = vld [vmem:[%s2393_s6 + $0x1c0] sm:$0xf]  ;;  %v2028_v15 = vld [vmem:[%s2393_s6 + $0x1cc] sm:$0xf0]  ;;  %1091 = vmatpush.bf16.msra.mxu2 %v1820_v8  ;;  %v1548_v16 = vor.u32 %v1996_v13, %v1547_v11  ;;  %s1448_s22 = sshll.u32 %s2799_s19, 2 }
  0x25   : > { %v1676_v17 = vor.u32 %v2028_v15, %v1675_v14  ;;  %v1803_v18 = vld [vmem:[%s2393_s6 + $0x2c0] sm:$0xf]  ;;  %v2060_v19 = vld [vmem:[%s2393_s6 + $0x2cc] sm:$0xf0]  ;;  %1104 = vmatpush.bf16.msra.mxu3 %v1948_v12  ;;  %s270_s4 = scalar_lea.vmem %s2781_s0, %s1448_s22 }
  0x26   : > { %v1931_v20 = vld [vmem:[%s2393_s6 + $0x3c0] sm:$0xf]  ;;  %v1804_v21 = vor.u32 %v2060_v19, %v1803_v18  ;;  %v2092_v22 = vld [vmem:[%s2393_s6 + $0x3cc] sm:$0xf0]  ;;  %1066 = vmatpush.bf16.msra.mxu0 %v1548_v16 }
  0x27   : > { %v1531_v23 = vld [vmem:[%s2393_s6 + $0xa0] sm:$0xf]  ;;  %v1992_v24 = vld [vmem:[%s2393_s6 + $0xac] sm:$0xf0]  ;;  %v1932_v25 = vor.u32 %v2092_v22, %v1931_v20  ;;  %1079 = vmatpush.bf16.msra.mxu1 %v1676_v17 }
  0x28   : > { %v1659_v26 = vld [vmem:[%s2393_s6 + $0x1a0] sm:$0xf]  ;;  %v2024_v27 = vld [vmem:[%s2393_s6 + $0x1ac] sm:$0xf0]  ;;  %v1532_v29 = vor.u32 %v1992_v24, %v1531_v23  ;;  %1092 = vmatpush.bf16.msra.mxu2 %v1804_v21 }
  0x29   : > { %v1787_v28 = vld [vmem:[%s2393_s6 + $0x2a0] sm:$0xf]  ;;  %v2056_v30 = vld [vmem:[%s2393_s6 + $0x2ac] sm:$0xf0]  ;;  %v1660_v33 = vor.u32 %v2024_v27, %v1659_v26  ;;  %1105 = vmatpush.bf16.msra.mxu3 %v1932_v25 }
  0x2a   : > { %v1915_v31 = vld [vmem:[%s2393_s6 + $0x3a0] sm:$0xf]  ;;  %v2088_v32 = vld [vmem:[%s2393_s6 + $0x3ac] sm:$0xf0]  ;;  %v1788_v34 = vor.u32 %v2056_v30, %v1787_v28  ;;  %1067 = vmatpush.bf16.msra.mxu0 %v1532_v29  ;;  %v1998_v28 = vld [vmem:[%s2393_s6 + $0xe4] sm:$0xf] }
  0x2b   : > { %v1515_v35 = vld [vmem:[%s2393_s6 + $0x80] sm:$0xf]  ;;  %v1988_v36 = vld [vmem:[%s2393_s6 + $0x8c] sm:$0xf0]  ;;  %v1916_v38 = vor.u32 %v2088_v32, %v1915_v31  ;;  %1080 = vmatpush.bf16.msra.mxu1 %v1660_v33  ;;  %v1565_v29 = vld [vmem:[%s2393_s6 + $0xf0] sm:$0xf0] }
  0x2c   : > { %v1643_v37 = vld [vmem:[%s2393_s6 + $0x180] sm:$0xf]  ;;  %v2020_v39 = vld [vmem:[%s2393_s6 + $0x18c] sm:$0xf0]  ;;  %v1516_v44 = vor.u32 %v1988_v36, %v1515_v35  ;;  %1093 = vmatpush.bf16.msra.mxu2 %v1788_v34  ;;  %v2030_v30 = vld [vmem:[%s2393_s6 + $0x1e4] sm:$0xf] }
  0x2d   : > { %v1771_v40 = vld [vmem:[%s2393_s6 + $0x280] sm:$0xf]  ;;  %v2052_v41 = vld [vmem:[%s2393_s6 + $0x28c] sm:$0xf0]  ;;  %v1644_v45 = vor.u32 %v2020_v39, %v1643_v37  ;;  %1106 = vmatpush.bf16.msra.mxu3 %v1916_v38  ;;  %v1693_v32 = vld [vmem:[%s2393_s6 + $0x1f0] sm:$0xf0] }
  0x2e   : > { %v1899_v42 = vld [vmem:[%s2393_s6 + $0x380] sm:$0xf]  ;;  %v2084_v43 = vld [vmem:[%s2393_s6 + $0x38c] sm:$0xf0]  ;;  %v1772_v46 = vor.u32 %v2052_v41, %v1771_v40  ;;  %1068 = vmatpush.bf16.msra.mxu0 %v1516_v44  ;;  %v2062_v33 = vld [vmem:[%s2393_s6 + $0x2e4] sm:$0xf]  ;;  %v1568_v40 = vor.u32 %v1998_v28, %v1565_v29  ;;  %v1696_v41 = vor.u32 %v2030_v30, %v1693_v32 }
  0x2f   : > { %v1499_v47 = vld [vmem:[%s2393_s6 + $0x60] sm:$0xf]  ;;  %v1984_v48 = vld [vmem:[%s2393_s6 + $0x6c] sm:$0xf0]  ;;  %v1900_v50 = vor.u32 %v2084_v43, %v1899_v42  ;;  %1081 = vmatpush.bf16.msra.mxu1 %v1644_v45  ;;  %v1821_v34 = vld [vmem:[%s2393_s6 + $0x2f0] sm:$0xf0] }
  0x30   : > { %v1627_v49 = vld [vmem:[%s2393_s6 + $0x160] sm:$0xf]  ;;  %v2016_v51 = vld [vmem:[%s2393_s6 + $0x16c] sm:$0xf0]  ;;  %v1500_v56 = vor.u32 %v1984_v48, %v1499_v47  ;;  %1094 = vmatpush.bf16.msra.mxu2 %v1772_v46  ;;  %v2094_v37 = vld [vmem:[%s2393_s6 + $0x3e4] sm:$0xf]  ;;  %v1824_v42 = vor.u32 %v2062_v33, %v1821_v34 }
  0x31   : > { %v1755_v52 = vld [vmem:[%s2393_s6 + $0x260] sm:$0xf]  ;;  %v2048_v53 = vld [vmem:[%s2393_s6 + $0x26c] sm:$0xf0]  ;;  %v1628_v57 = vor.u32 %v2016_v51, %v1627_v49  ;;  %1107 = vmatpush.bf16.msra.mxu3 %v1900_v50  ;;  %v1949_v38 = vld [vmem:[%s2393_s6 + $0x3f0] sm:$0xf0] }
  0x32   : > { %v1883_v54 = vld [vmem:[%s2393_s6 + $0x360] sm:$0xf]  ;;  %v2080_v55 = vld [vmem:[%s2393_s6 + $0x36c] sm:$0xf0]  ;;  %v1756_v58 = vor.u32 %v2048_v53, %v1755_v52  ;;  %1069 = vmatpush.bf16.msra.mxu0 %v1500_v56  ;;  %v1994_v43 = vld [vmem:[%s2393_s6 + $0xc4] sm:$0xf]  ;;  %v1952_v46 = vor.u32 %v2094_v37, %v1949_v38 }
  0x33   : > { %v1483_v59 = vld [vmem:[%s2393_s6 + $0x40] sm:$0xf]  ;;  %v1980_v60 = vld [vmem:[%s2393_s6 + $0x4c] sm:$0xf0]  ;;  %v1884_v62 = vor.u32 %v2080_v55, %v1883_v54  ;;  %1082 = vmatpush.bf16.msra.mxu1 %v1628_v57  ;;  %v1549_v44 = vld [vmem:[%s2393_s6 + $0xd0] sm:$0xf0] }
  0x34   : > { %v1611_v61 = vld [vmem:[%s2393_s6 + $0x140] sm:$0xf]  ;;  %v2012_v63 = vld [vmem:[%s2393_s6 + $0x14c] sm:$0xf0]  ;;  %v1484_v4 = vor.u32 %v1980_v60, %v1483_v59  ;;  %1095 = vmatpush.bf16.msra.mxu2 %v1756_v58  ;;  %v2026_v45 = vld [vmem:[%s2393_s6 + $0x1c4] sm:$0xf]  ;;  %v1552_v52 = vor.u32 %v1994_v43, %v1549_v44 }
  0x35   : > { %v1739_v0 = vld [vmem:[%s2393_s6 + $0x240] sm:$0xf]  ;;  %v2044_v1 = vld [vmem:[%s2393_s6 + $0x24c] sm:$0xf0]  ;;  %v1612_v5 = vor.u32 %v2012_v63, %v1611_v61  ;;  %1108 = vmatpush.bf16.msra.mxu3 %v1884_v62  ;;  %v1677_v47 = vld [vmem:[%s2393_s6 + $0x1d0] sm:$0xf0] }
  0x36   : > { %v1867_v2 = vld [vmem:[%s2393_s6 + $0x340] sm:$0xf]  ;;  %v2076_v3 = vld [vmem:[%s2393_s6 + $0x34c] sm:$0xf0]  ;;  %v1740_v6 = vor.u32 %v2044_v1, %v1739_v0  ;;  %1070 = vmatpush.bf16.msra.mxu0 %v1484_v4  ;;  %v2058_v48 = vld [vmem:[%s2393_s6 + $0x2c4] sm:$0xf]  ;;  %v1680_v53 = vor.u32 %v2026_v45, %v1677_v47 }
  0x37   : > { %v1467_v7 = vld [vmem:[%s2393_s6 + $0x20] sm:$0xf]  ;;  %v1976_v8 = vld [vmem:[%s2393_s6 + $0x2c] sm:$0xf0]  ;;  %v1868_v10 = vor.u32 %v2076_v3, %v1867_v2  ;;  %1083 = vmatpush.bf16.msra.mxu1 %v1612_v5  ;;  %v1805_v49 = vld [vmem:[%s2393_s6 + $0x2d0] sm:$0xf0] }
  0x38   : > { %v1595_v9 = vld [vmem:[%s2393_s6 + $0x120] sm:$0xf]  ;;  %v2008_v11 = vld [vmem:[%s2393_s6 + $0x12c] sm:$0xf0]  ;;  %v1468_v16 = vor.u32 %v1976_v8, %v1467_v7  ;;  %1096 = vmatpush.bf16.msra.mxu2 %v1740_v6  ;;  %v2090_v50 = vld [vmem:[%s2393_s6 + $0x3c4] sm:$0xf]  ;;  %v1808_v54 = vor.u32 %v2058_v48, %v1805_v49 }
  0x39   : > { %v1723_v12 = vld [vmem:[%s2393_s6 + $0x220] sm:$0xf]  ;;  %v2040_v13 = vld [vmem:[%s2393_s6 + $0x22c] sm:$0xf0]  ;;  %v1596_v19 = vor.u32 %v2008_v11, %v1595_v9  ;;  %1109 = vmatpush.bf16.msra.mxu3 %v1868_v10  ;;  %v1933_v51 = vld [vmem:[%s2393_s6 + $0x3d0] sm:$0xf0] }
  0x3a   : > { %v1851_v14 = vld [vmem:[%s2393_s6 + $0x320] sm:$0xf]  ;;  %v2072_v15 = vld [vmem:[%s2393_s6 + $0x32c] sm:$0xf0]  ;;  %v1724_v20 = vor.u32 %v2040_v13, %v1723_v12  ;;  %1071 = vmatpush.bf16.msra.mxu0 %v1468_v16  ;;  %v1990_v55 = vld [vmem:[%s2393_s6 + $0xa4] sm:$0xf]  ;;  %v1936_v58 = vor.u32 %v2090_v50, %v1933_v51 }
  0x3b   : > { %v1451_v17 = vld [vmem:[%s2393_s6] sm:$0xf]  ;;  %v1972_v18 = vld [vmem:[%s2393_s6 + $0xc] sm:$0xf0]  ;;  %v1852_v24 = vor.u32 %v2072_v15, %v1851_v14  ;;  %1084 = vmatpush.bf16.msra.mxu1 %v1596_v19  ;;  %v1533_v56 = vld [vmem:[%s2393_s6 + $0xb0] sm:$0xf0] }
  0x3c   : > { %v1579_v21 = vld [vmem:[%s2393_s6 + $0x100] sm:$0xf]  ;;  %v2004_v22 = vld [vmem:[%s2393_s6 + $0x10c] sm:$0xf0]  ;;  %v1452_v31 = vor.u32 %v1972_v18, %v1451_v17  ;;  %1097 = vmatpush.bf16.msra.mxu2 %v1724_v20  ;;  %v2022_v57 = vld [vmem:[%s2393_s6 + $0x1a4] sm:$0xf]  ;;  %v1536_v0 = vor.u32 %v1990_v55, %v1533_v56 }
  0x3d   : > { %v1707_v23 = vld [vmem:[%s2393_s6 + $0x200] sm:$0xf]  ;;  %v2036_v25 = vld [vmem:[%s2393_s6 + $0x20c] sm:$0xf0]  ;;  %v1580_v35 = vor.u32 %v2004_v22, %v1579_v21  ;;  %1110 = vmatpush.bf16.msra.mxu3 %v1852_v24  ;;  %v1661_v59 = vld [vmem:[%s2393_s6 + $0x1b0] sm:$0xf0] }
  0x3e   : > { %v1835_v26 = vld [vmem:[%s2393_s6 + $0x300] sm:$0xf]  ;;  %v2068_v27 = vld [vmem:[%s2393_s6 + $0x30c] sm:$0xf0]  ;;  %v1708_v36 = vor.u32 %v2036_v25, %v1707_v23  ;;  %1072 = vmatpush.bf16.msra.mxu0 %v1452_v31  ;;  %v2054_v60 = vld [vmem:[%s2393_s6 + $0x2a4] sm:$0xf]  ;;  %v1664_v2 = vor.u32 %v2022_v57, %v1661_v59 }
  0x3f   : > { %v1836_v39 = vor.u32 %v2068_v27, %v1835_v26  ;;  %1085 = vmatpush.bf16.msra.mxu1 %v1580_v35  ;;  %v1789_v61 = vld [vmem:[%s2393_s6 + $0x2b0] sm:$0xf0]  ;;  %v2086_v62 = vld [vmem:[%s2393_s6 + $0x3a4] sm:$0xf]  ;;  %v282_v1 = vld [vmem:[%s270_s4 + $0x8] sm:$0xff] }
  0x40   : > { %1098 = vmatpush.bf16.msra.mxu2 %v1708_v36  ;;  %v1917_v63 = vld [vmem:[%s2393_s6 + $0x3b0] sm:$0xf0]  ;;  %v1792_v3 = vor.u32 %v2054_v60, %v1789_v61  ;;  %v1986_v4 = vld [vmem:[%s2393_s6 + $0x84] sm:$0xf]  ;;  %v415_v7 = vunpack.c.l.b16 %v282_v1  ;;  %v416_v8 = vunpack.c.h.b16 %v282_v1 }
  0x41   : > { %1111 = vmatpush.bf16.msra.mxu3 %v1836_v39  ;;  %v1517_v5 = vld [vmem:[%s2393_s6 + $0x90] sm:$0xf0]  ;;  %v2018_v6 = vld [vmem:[%s2393_s6 + $0x184] sm:$0xf]  ;;  %v1920_v9 = vor.u32 %v2086_v62, %v1917_v63 }
  0x42   : > { %1117 = vmatpush.bf16.msrb.mxu0 %v1568_v40  ;;  %v1645_v10 = vld [vmem:[%s2393_s6 + $0x190] sm:$0xf0]  ;;  %v2050_v11 = vld [vmem:[%s2393_s6 + $0x284] sm:$0xf]  ;;  %v2516_v15 = vpack.c.b16 %v415_v7, %v415_v7  ;;  %v2518_v16 = vpack.c.b16 %v416_v8, %v416_v8  ;;  %v1520_v18 = vor.u32 %v1986_v4, %v1517_v5  ;;  %v2001_v7 = vld [vmem:[%s2393_s6 + $0xf4] sm:$0xf0] }
  0x43   : > { %1130 = vmatpush.bf16.msrb.mxu1 %v1696_v41  ;;  %v1773_v12 = vld [vmem:[%s2393_s6 + $0x290] sm:$0xf0]  ;;  %v2082_v13 = vld [vmem:[%s2393_s6 + $0x384] sm:$0xf]  ;;  %v1648_v21 = vor.u32 %v2018_v6, %v1645_v10  ;;  %v1571_v6 = vld [vmem:[%s2393_s6 + $0xe8] sm:$0xf] }
  0x44   : > { %1143 = vmatpush.bf16.msrb.mxu2 %v1824_v42  ;;  %v1901_v14 = vld [vmem:[%s2393_s6 + $0x390] sm:$0xf0]  ;;  %v281_v17 = vld [vmem:[%s270_s4] sm:$0xff]  ;;  %v1776_v22 = vor.u32 %v2050_v11, %v1773_v12  ;;  %1112 = vmatmul.bf16.vlgmr.msra.gmra.mxu3 %v2518_v16  ;;  %v1699_v8 = vld [vmem:[%s2393_s6 + $0x1e8] sm:$0xf] }
  0x45   : > { %1156 = vmatpush.bf16.msrb.mxu3 %v1952_v46  ;;  %v413_v19 = vunpack.c.l.b16 %v281_v17  ;;  %v414_v20 = vunpack.c.h.b16 %v281_v17  ;;  %v1982_v23 = vld [vmem:[%s2393_s6 + $0x64] sm:$0xf]  ;;  %v1501_v24 = vld [vmem:[%s2393_s6 + $0x70] sm:$0xf0]  ;;  %v1904_v26 = vor.u32 %v2082_v13, %v1901_v14  ;;  %1099 = vmatmul.bf16.vlgmr.msra.gmra.mxu2 %v2516_v15  ;;  %v2033_v10 = vld [vmem:[%s2393_s6 + $0x1f4] sm:$0xf0] }
  0x46   : > { %1118 = vmatpush.bf16.msrb.mxu0 %v1552_v52  ;;  %v2014_v25 = vld [vmem:[%s2393_s6 + $0x164] sm:$0xf]  ;;  %v1629_v27 = vld [vmem:[%s2393_s6 + $0x170] sm:$0xf0]  ;;  %v1504_v34 = vor.u32 %v1982_v23, %v1501_v24  ;;  %v1827_v11 = vld [vmem:[%s2393_s6 + $0x2e8] sm:$0xf] }
  0x47   : > { %1131 = vmatpush.bf16.msrb.mxu1 %v1680_v53  ;;  %v2046_v28 = vld [vmem:[%s2393_s6 + $0x264] sm:$0xf]  ;;  %v1757_v29 = vld [vmem:[%s2393_s6 + $0x270] sm:$0xf0]  ;;  %v2527_v30 = vpack.c.b16 %v413_v19, %v413_v19  ;;  %v2529_v31 = vpack.c.b16 %v414_v20, %v414_v20  ;;  %v1632_v35 = vor.u32 %v2014_v25, %v1629_v27  ;;  %v2065_v12 = vld [vmem:[%s2393_s6 + $0x2f4] sm:$0xf0]  ;;  %v1572_v20 = vor.u32 %v2001_v7, %v1571_v6 }
  0x48   : > { %1144 = vmatpush.bf16.msrb.mxu2 %v1808_v54  ;;  %v2078_v32 = vld [vmem:[%s2393_s6 + $0x364] sm:$0xf]  ;;  %v1885_v33 = vld [vmem:[%s2393_s6 + $0x370] sm:$0xf0]  ;;  %v1760_v36 = vor.u32 %v2046_v28, %v1757_v29  ;;  %v1955_v17 = vld [vmem:[%s2393_s6 + $0x3e8] sm:$0xf] }
  0x49   : > { %1157 = vmatpush.bf16.msrb.mxu3 %v1936_v58  ;;  %1086 = vmatmul.bf16.vlgmr.msra.gmra.mxu1 %v2529_v31  ;;  %v1978_v37 = vld [vmem:[%s2393_s6 + $0x44] sm:$0xf]  ;;  %v1485_v38 = vld [vmem:[%s2393_s6 + $0x50] sm:$0xf0]  ;;  %v1888_v40 = vor.u32 %v2078_v32, %v1885_v33  ;;  %v1555_v23 = vld [vmem:[%s2393_s6 + $0xc8] sm:$0xf] }
  0x4a   : > { %1119 = vmatpush.bf16.msrb.mxu0 %v1536_v0  ;;  %v2010_v39 = vld [vmem:[%s2393_s6 + $0x144] sm:$0xf]  ;;  %v1613_v41 = vld [vmem:[%s2393_s6 + $0x150] sm:$0xf0]  ;;  %v1488_v46 = vor.u32 %v1978_v37, %v1485_v38  ;;  %v1997_v24 = vld [vmem:[%s2393_s6 + $0xd4] sm:$0xf0] }
  0x4b   : > { %1132 = vmatpush.bf16.msrb.mxu1 %v1664_v2  ;;  %v2042_v42 = vld [vmem:[%s2393_s6 + $0x244] sm:$0xf]  ;;  %v1741_v43 = vld [vmem:[%s2393_s6 + $0x250] sm:$0xf0]  ;;  %1073 = vmatmul.bf16.vlgmr.msra.gmra.mxu0 %v2527_v30  ;;  %v1616_v47 = vor.u32 %v2010_v39, %v1613_v41  ;;  %v1683_v25 = vld [vmem:[%s2393_s6 + $0x1c8] sm:$0xf] }
  0x4c   : > { %1145 = vmatpush.bf16.msrb.mxu2 %v1792_v3  ;;  %v2074_v44 = vld [vmem:[%s2393_s6 + $0x344] sm:$0xf]  ;;  %v1869_v45 = vld [vmem:[%s2393_s6 + $0x350] sm:$0xf0]  ;;  %v1744_v48 = vor.u32 %v2042_v42, %v1741_v43  ;;  %v2029_v27 = vld [vmem:[%s2393_s6 + $0x1d4] sm:$0xf0] }
  0x4d   : > { %1158 = vmatpush.bf16.msrb.mxu3 %v1920_v9  ;;  %v1974_v49 = vld [vmem:[%s2393_s6 + $0x24] sm:$0xf]  ;;  %v1469_v50 = vld [vmem:[%s2393_s6 + $0x30] sm:$0xf0]  ;;  %v1872_v52 = vor.u32 %v2074_v44, %v1869_v45  ;;  %v1811_v28 = vld [vmem:[%s2393_s6 + $0x2c8] sm:$0xf] }
  0x4e   : > { %1120 = vmatpush.bf16.msrb.mxu0 %v1520_v18  ;;  %v2006_v51 = vld [vmem:[%s2393_s6 + $0x124] sm:$0xf]  ;;  %v1597_v53 = vld [vmem:[%s2393_s6 + $0x130] sm:$0xf0]  ;;  %v1472_v58 = vor.u32 %v1974_v49, %v1469_v50  ;;  %v2097_v18 = vld [vmem:[%s2393_s6 + $0x3f4] sm:$0xf0] }
  0x4f   : > { %1133 = vmatpush.bf16.msrb.mxu1 %v1648_v21  ;;  %v2038_v54 = vld [vmem:[%s2393_s6 + $0x224] sm:$0xf]  ;;  %v1725_v55 = vld [vmem:[%s2393_s6 + $0x230] sm:$0xf0]  ;;  %v1600_v61 = vor.u32 %v2006_v51, %v1597_v53  ;;  %v1700_v21 = vor.u32 %v2033_v10, %v1699_v8  ;;  %v2061_v29 = vld [vmem:[%s2393_s6 + $0x2d4] sm:$0xf0] }
  0x50   : > { %1146 = vmatpush.bf16.msrb.mxu2 %v1776_v22  ;;  %v2070_v56 = vld [vmem:[%s2393_s6 + $0x324] sm:$0xf]  ;;  %v1853_v57 = vld [vmem:[%s2393_s6 + $0x330] sm:$0xf0]  ;;  %v1728_v62 = vor.u32 %v2038_v54, %v1725_v55  ;;  %v1828_v22 = vor.u32 %v2065_v12, %v1827_v11  ;;  %v1939_v32 = vld [vmem:[%s2393_s6 + $0x3c8] sm:$0xf] }
  0x51   : > { %1159 = vmatpush.bf16.msrb.mxu3 %v1904_v26  ;;  %v1970_v59 = vld [vmem:[%s2393_s6 + $0x4] sm:$0xf]  ;;  %v1453_v60 = vld [vmem:[%s2393_s6 + $0x10] sm:$0xf0]  ;;  %v1856_v2 = vor.u32 %v2070_v56, %v1853_v57  ;;  %v1956_v26 = vor.u32 %v2097_v18, %v1955_v17  ;;  %v2093_v33 = vld [vmem:[%s2393_s6 + $0x3d4] sm:$0xf0] }
  0x52   : > { %1121 = vmatpush.bf16.msrb.mxu0 %v1504_v34  ;;  %v2002_v63 = vld [vmem:[%s2393_s6 + $0x104] sm:$0xf]  ;;  %v1581_v0 = vld [vmem:[%s2393_s6 + $0x110] sm:$0xf0]  ;;  %v1456_v9 = vor.u32 %v1970_v59, %v1453_v60  ;;  %v1556_v34 = vor.u32 %v1997_v24, %v1555_v23  ;;  %v1539_v37 = vld [vmem:[%s2393_s6 + $0xa8] sm:$0xf] }
  0x53   : > { %1134 = vmatpush.bf16.msrb.mxu1 %v1632_v35  ;;  %v2034_v1 = vld [vmem:[%s2393_s6 + $0x204] sm:$0xf]  ;;  %v1709_v3 = vld [vmem:[%s2393_s6 + $0x210] sm:$0xf0]  ;;  %v1584_v13 = vor.u32 %v2002_v63, %v1581_v0  ;;  %v1684_v35 = vor.u32 %v2029_v27, %v1683_v25  ;;  %v1993_v38 = vld [vmem:[%s2393_s6 + $0xb4] sm:$0xf0] }
  0x54   : > { %1147 = vmatpush.bf16.msrb.mxu2 %v1760_v36  ;;  %v2066_v4 = vld [vmem:[%s2393_s6 + $0x304] sm:$0xf]  ;;  %v1837_v5 = vld [vmem:[%s2393_s6 + $0x310] sm:$0xf0]  ;;  %v1712_v14 = vor.u32 %v2034_v1, %v1709_v3  ;;  %v1812_v36 = vor.u32 %v2061_v29, %v1811_v28  ;;  %v1667_v39 = vld [vmem:[%s2393_s6 + $0x1a8] sm:$0xf] }
  0x55   : > { %1160 = vmatpush.bf16.msrb.mxu3 %v1888_v40  ;;  %v1840_v19 = vor.u32 %v2066_v4, %v1837_v5  ;;  %v1940_v40 = vor.u32 %v2093_v33, %v1939_v32  ;;  %v2025_v41 = vld [vmem:[%s2393_s6 + $0x1b4] sm:$0xf0]  ;;  %v1795_v42 = vld [vmem:[%s2393_s6 + $0x2a8] sm:$0xf] }
  0x56   : > { %1122 = vmatpush.bf16.msrb.mxu0 %v1488_v46  ;;  %v2057_v43 = vld [vmem:[%s2393_s6 + $0x2b4] sm:$0xf0]  ;;  %v1923_v44 = vld [vmem:[%s2393_s6 + $0x3a8] sm:$0xf]  ;;  %v1540_v46 = vor.u32 %v1993_v38, %v1539_v37 }
  0x57   : > { %1135 = vmatpush.bf16.msrb.mxu1 %v1616_v47  ;;  %v2089_v45 = vld [vmem:[%s2393_s6 + $0x3b4] sm:$0xf0]  ;;  %v1668_v47 = vor.u32 %v2025_v41, %v1667_v39  ;;  %v1523_v49 = vld [vmem:[%s2393_s6 + $0x88] sm:$0xf] }
  0x58   : > { %1148 = vmatpush.bf16.msrb.mxu2 %v1744_v48  ;;  %v1796_v48 = vor.u32 %v2057_v43, %v1795_v42  ;;  %v1989_v50 = vld [vmem:[%s2393_s6 + $0x94] sm:$0xf0]  ;;  %v1651_v51 = vld [vmem:[%s2393_s6 + $0x188] sm:$0xf] }
  0x59   : > { %1161 = vmatpush.bf16.msrb.mxu3 %v1872_v52  ;;  %v1924_v52 = vor.u32 %v2089_v45, %v1923_v44  ;;  %v2021_v53 = vld [vmem:[%s2393_s6 + $0x194] sm:$0xf0]  ;;  %v1779_v54 = vld [vmem:[%s2393_s6 + $0x288] sm:$0xf] }
  0x5a   : > { %1123 = vmatpush.bf16.msrb.mxu0 %v1472_v58  ;;  %v2053_v55 = vld [vmem:[%s2393_s6 + $0x294] sm:$0xf0]  ;;  %v1907_v56 = vld [vmem:[%s2393_s6 + $0x388] sm:$0xf]  ;;  %v1524_v58 = vor.u32 %v1989_v50, %v1523_v49  ;;  %v1652_v59 = vor.u32 %v2021_v53, %v1651_v51  ;;  %v1701_v50 = vld [vmem:[%s2393_s6 + $0x1f8] sm:$0xf0] }
  0x5b   : > { %1136 = vmatpush.bf16.msrb.mxu1 %v1600_v61  ;;  %v2085_v57 = vld [vmem:[%s2393_s6 + $0x394] sm:$0xf0]  ;;  %v1780_v60 = vor.u32 %v2053_v55, %v1779_v54  ;;  %v1507_v61 = vld [vmem:[%s2393_s6 + $0x68] sm:$0xf]  ;;  %v2063_v51 = vld [vmem:[%s2393_s6 + $0x2ec] sm:$0xf] }
  0x5c   : > { %1149 = vmatpush.bf16.msrb.mxu2 %v1728_v62  ;;  %v1985_v62 = vld [vmem:[%s2393_s6 + $0x74] sm:$0xf0]  ;;  %v1635_v63 = vld [vmem:[%s2393_s6 + $0x168] sm:$0xf]  ;;  %v1908_v0 = vor.u32 %v2085_v57, %v1907_v56  ;;  %v2095_v55 = vld [vmem:[%s2393_s6 + $0x3ec] sm:$0xf] }
  0x5d   : > { %1162 = vmatpush.bf16.msrb.mxu3 %v1856_v2  ;;  %v2017_v1 = vld [vmem:[%s2393_s6 + $0x174] sm:$0xf0]  ;;  %v1763_v2 = vld [vmem:[%s2393_s6 + $0x268] sm:$0xf]  ;;  %v1508_v6 = vor.u32 %v1985_v62, %v1507_v61  ;;  %v1957_v56 = vld [vmem:[%s2393_s6 + $0x3f8] sm:$0xf0] }
  0x5e   : > { %1124 = vmatpush.bf16.msrb.mxu0 %v1456_v9  ;;  %v2049_v3 = vld [vmem:[%s2393_s6 + $0x274] sm:$0xf0]  ;;  %v1891_v4 = vld [vmem:[%s2393_s6 + $0x368] sm:$0xf]  ;;  %v1636_v7 = vor.u32 %v2017_v1, %v1635_v63  ;;  %v1995_v61 = vld [vmem:[%s2393_s6 + $0xcc] sm:$0xf] }
  0x5f   : > { %1137 = vmatpush.bf16.msrb.mxu1 %v1584_v13  ;;  %v2081_v5 = vld [vmem:[%s2393_s6 + $0x374] sm:$0xf0]  ;;  %v1764_v8 = vor.u32 %v2049_v3, %v1763_v2  ;;  %v1491_v9 = vld [vmem:[%s2393_s6 + $0x48] sm:$0xf]  ;;  %v1557_v62 = vld [vmem:[%s2393_s6 + $0xd8] sm:$0xf0] }
  0x60   : > { %1150 = vmatpush.bf16.msrb.mxu2 %v1712_v14  ;;  %v1981_v10 = vld [vmem:[%s2393_s6 + $0x54] sm:$0xf0]  ;;  %v1619_v11 = vld [vmem:[%s2393_s6 + $0x148] sm:$0xf]  ;;  %v1892_v12 = vor.u32 %v2081_v5, %v1891_v4  ;;  %v2027_v63 = vld [vmem:[%s2393_s6 + $0x1cc] sm:$0xf] }
  0x61   : > { %1163 = vmatpush.bf16.msrb.mxu3 %v1840_v19  ;;  %1125 = vmatmul.bf16.vlgmr.msrb.gmra.mxu0 %v2527_v30  ;;  %v2013_v13 = vld [vmem:[%s2393_s6 + $0x154] sm:$0xf0]  ;;  %v1747_v14 = vld [vmem:[%s2393_s6 + $0x248] sm:$0xf]  ;;  %v1685_v1 = vld [vmem:[%s2393_s6 + $0x1d8] sm:$0xf0] }
  0x62   : > { %1169 = vmatpush.bf16.msra.mxu0 %v1572_v20  ;;  %1138 = vmatmul.bf16.vlgmr.msrb.gmra.mxu1 %v2529_v31  ;;  %v2045_v17 = vld [vmem:[%s2393_s6 + $0x254] sm:$0xf0]  ;;  %v1875_v18 = vld [vmem:[%s2393_s6 + $0x348] sm:$0xf]  ;;  %v1492_v20 = vor.u32 %v1981_v10, %v1491_v9  ;;  %v2059_v2 = vld [vmem:[%s2393_s6 + $0x2cc] sm:$0xf] }
  0x63   : > { %1182 = vmatpush.bf16.msra.mxu1 %v1700_v21  ;;  %1151 = vmatmul.bf16.vlgmr.msrb.gmra.mxu2 %v2516_v15  ;;  %v2077_v19 = vld [vmem:[%s2393_s6 + $0x354] sm:$0xf0]  ;;  %v1620_v21 = vor.u32 %v2013_v13, %v1619_v11  ;;  %v1475_v23 = vld [vmem:[%s2393_s6 + $0x28] sm:$0xf]  ;;  %v1813_v3 = vld [vmem:[%s2393_s6 + $0x2d8] sm:$0xf0] }
  0x64   : > { %1195 = vmatpush.bf16.msra.mxu2 %v1828_v22  ;;  %1164 = vmatmul.bf16.vlgmr.msrb.gmra.mxu3 %v2518_v16  ;;  %v1748_v22 = vor.u32 %v2045_v17, %v1747_v14  ;;  %v1977_v24 = vld [vmem:[%s2393_s6 + $0x34] sm:$0xf0]  ;;  %v1603_v25 = vld [vmem:[%s2393_s6 + $0x128] sm:$0xf]  ;;  %v2091_v4 = vld [vmem:[%s2393_s6 + $0x3cc] sm:$0xf] }
  0x65   : > { %1208 = vmatpush.bf16.msra.mxu3 %v1956_v26  ;;  %v1876_v26 = vor.u32 %v2077_v19, %v1875_v18  ;;  %v2009_v27 = vld [vmem:[%s2393_s6 + $0x134] sm:$0xf0]  ;;  %v1731_v28 = vld [vmem:[%s2393_s6 + $0x228] sm:$0xf]  ;;  %v1941_v5 = vld [vmem:[%s2393_s6 + $0x3d8] sm:$0xf0] }
  0x66   : > { %1170 = vmatpush.bf16.msra.mxu0 %v1556_v34  ;;  %v2041_v29 = vld [vmem:[%s2393_s6 + $0x234] sm:$0xf0]  ;;  %v1859_v32 = vld [vmem:[%s2393_s6 + $0x328] sm:$0xf]  ;;  %v1476_v34 = vor.u32 %v1977_v24, %v1475_v23  ;;  %v1604_v37 = vor.u32 %v2009_v27, %v1603_v25  ;;  %v1991_v9 = vld [vmem:[%s2393_s6 + $0xac] sm:$0xf] }
  0x67   : > { %1183 = vmatpush.bf16.msra.mxu1 %v1684_v35  ;;  %v2073_v33 = vld [vmem:[%s2393_s6 + $0x334] sm:$0xf0]  ;;  %v1459_v35 = vld [vmem:[%s2393_s6 + $0x8] sm:$0xf]  ;;  %v1732_v38 = vor.u32 %v2041_v29, %v1731_v28  ;;  %v1541_v10 = vld [vmem:[%s2393_s6 + $0xb8] sm:$0xf0] }
  0x68   : > { %1196 = vmatpush.bf16.msra.mxu2 %v1812_v36  ;;  %v1973_v36 = vld [vmem:[%s2393_s6 + $0x14] sm:$0xf0]  ;;  %v1587_v39 = vld [vmem:[%s2393_s6 + $0x108] sm:$0xf]  ;;  %v1860_v42 = vor.u32 %v2073_v33, %v1859_v32  ;;  %v2023_v11 = vld [vmem:[%s2393_s6 + $0x1ac] sm:$0xf] }
  0x69   : > { %1209 = vmatpush.bf16.msra.mxu3 %v1940_v40  ;;  %v2005_v40 = vld [vmem:[%s2393_s6 + $0x114] sm:$0xf0]  ;;  %v1715_v41 = vld [vmem:[%s2393_s6 + $0x208] sm:$0xf]  ;;  %v1460_v49 = vor.u32 %v1973_v36, %v1459_v35  ;;  %v1669_v13 = vld [vmem:[%s2393_s6 + $0x1b8] sm:$0xf0] }
  0x6a   : > { %1171 = vmatpush.bf16.msra.mxu0 %v1540_v46  ;;  %v2037_v43 = vld [vmem:[%s2393_s6 + $0x214] sm:$0xf0]  ;;  %v1843_v44 = vld [vmem:[%s2393_s6 + $0x308] sm:$0xf]  ;;  %v1999_v46 = vld [vmem:[%s2393_s6 + $0xec] sm:$0xf]  ;;  %v1588_v53 = vor.u32 %v2005_v40, %v1587_v39 }
  0x6b   : > { %1184 = vmatpush.bf16.msra.mxu1 %v1668_v47  ;;  %v2069_v45 = vld [vmem:[%s2393_s6 + $0x314] sm:$0xf0]  ;;  %v1573_v47 = vld [vmem:[%s2393_s6 + $0xf8] sm:$0xf0]  ;;  %v1716_v54 = vor.u32 %v2037_v43, %v1715_v41  ;;  %v2055_v14 = vld [vmem:[%s2393_s6 + $0x2ac] sm:$0xf] }
  0x6c   : > { %1197 = vmatpush.bf16.msra.mxu2 %v1796_v48  ;;  %v2031_v48 = vld [vmem:[%s2393_s6 + $0x1ec] sm:$0xf]  ;;  %v1844_v57 = vor.u32 %v2069_v45, %v1843_v44  ;;  %v1797_v17 = vld [vmem:[%s2393_s6 + $0x2b8] sm:$0xf0] }
  0x6d   : > { %1210 = vmatpush.bf16.msra.mxu3 %v1924_v52  ;;  %v1829_v52 = vld [vmem:[%s2393_s6 + $0x2f8] sm:$0xf0]  ;;  %v2087_v18 = vld [vmem:[%s2393_s6 + $0x3ac] sm:$0xf] }
  0x6e   : > { %1172 = vmatpush.bf16.msra.mxu0 %v1524_v58  ;;  %v1576_v58 = vor.u32 %v1999_v46, %v1573_v47  ;;  %v1925_v19 = vld [vmem:[%s2393_s6 + $0x3b8] sm:$0xf0]  ;;  %v1987_v23 = vld [vmem:[%s2393_s6 + $0x8c] sm:$0xf] }
  0x6f   : > { %1185 = vmatpush.bf16.msra.mxu1 %v1652_v59  ;;  %v1704_v59 = vor.u32 %v2031_v48, %v1701_v50  ;;  %v1525_v24 = vld [vmem:[%s2393_s6 + $0x98] sm:$0xf0]  ;;  %v2019_v25 = vld [vmem:[%s2393_s6 + $0x18c] sm:$0xf] }
  0x70   : > { %1198 = vmatpush.bf16.msra.mxu2 %v1780_v60  ;;  %v1832_v60 = vor.u32 %v2063_v51, %v1829_v52  ;;  %v1653_v27 = vld [vmem:[%s2393_s6 + $0x198] sm:$0xf0]  ;;  %v2051_v28 = vld [vmem:[%s2393_s6 + $0x28c] sm:$0xf] }
  0x71   : > { %1211 = vmatpush.bf16.msra.mxu3 %v1908_v0  ;;  %v1960_v0 = vor.u32 %v2095_v55, %v1957_v56  ;;  %v1781_v29 = vld [vmem:[%s2393_s6 + $0x298] sm:$0xf0]  ;;  %v2083_v32 = vld [vmem:[%s2393_s6 + $0x38c] sm:$0xf]  ;;  %v1656_v35 = vor.u32 %v2019_v25, %v1653_v27 }
  0x72   : > { %1173 = vmatpush.bf16.msra.mxu0 %v1508_v6  ;;  %v1560_v6 = vor.u32 %v1995_v61, %v1557_v62  ;;  %v1909_v33 = vld [vmem:[%s2393_s6 + $0x398] sm:$0xf0]  ;;  %v1784_v36 = vor.u32 %v2051_v28, %v1781_v29  ;;  %v2015_v39 = vld [vmem:[%s2393_s6 + $0x16c] sm:$0xf] }
  0x73   : > { %1186 = vmatpush.bf16.msra.mxu1 %v1636_v7  ;;  %v1688_v7 = vor.u32 %v2027_v63, %v1685_v1  ;;  %v1912_v40 = vor.u32 %v2083_v32, %v1909_v33  ;;  %v1637_v41 = vld [vmem:[%s2393_s6 + $0x178] sm:$0xf0]  ;;  %v2079_v44 = vld [vmem:[%s2393_s6 + $0x36c] sm:$0xf] }
  0x74   : > { %1199 = vmatpush.bf16.msra.mxu2 %v1764_v8  ;;  %v1816_v8 = vor.u32 %v2059_v2, %v1813_v3  ;;  %v1765_v43 = vld [vmem:[%s2393_s6 + $0x278] sm:$0xf0]  ;;  %v1640_v47 = vor.u32 %v2015_v39, %v1637_v41  ;;  %v2011_v51 = vld [vmem:[%s2393_s6 + $0x14c] sm:$0xf] }
  0x75   : > { %1212 = vmatpush.bf16.msra.mxu3 %v1892_v12  ;;  %v1944_v12 = vor.u32 %v2091_v4, %v1941_v5  ;;  %v1893_v45 = vld [vmem:[%s2393_s6 + $0x378] sm:$0xf0]  ;;  %v2075_v56 = vld [vmem:[%s2393_s6 + $0x34c] sm:$0xf] }
  0x76   : > { %1174 = vmatpush.bf16.msra.mxu0 %v1492_v20  ;;  %v1544_v20 = vor.u32 %v1991_v9, %v1541_v10  ;;  %v1493_v50 = vld [vmem:[%s2393_s6 + $0x58] sm:$0xf0]  ;;  %v1896_v52 = vor.u32 %v2079_v44, %v1893_v45  ;;  %v1975_v61 = vld [vmem:[%s2393_s6 + $0x2c] sm:$0xf] }
  0x77   : > { %1187 = vmatpush.bf16.msra.mxu1 %v1620_v21  ;;  %v1672_v21 = vor.u32 %v2023_v11, %v1669_v13  ;;  %v1749_v55 = vld [vmem:[%s2393_s6 + $0x258] sm:$0xf0]  ;;  %v2007_v63 = vld [vmem:[%s2393_s6 + $0x12c] sm:$0xf] }
  0x78   : > { %1200 = vmatpush.bf16.msra.mxu2 %v1748_v22  ;;  %v1800_v22 = vor.u32 %v2055_v14, %v1797_v17  ;;  %v1477_v62 = vld [vmem:[%s2393_s6 + $0x38] sm:$0xf0]  ;;  %v2039_v2 = vld [vmem:[%s2393_s6 + $0x22c] sm:$0xf] }
  0x79   : > { %1213 = vmatpush.bf16.msra.mxu3 %v1876_v26  ;;  %v1928_v26 = vor.u32 %v2087_v18, %v1925_v19  ;;  %v1605_v1 = vld [vmem:[%s2393_s6 + $0x138] sm:$0xf0]  ;;  %v2071_v4 = vld [vmem:[%s2393_s6 + $0x32c] sm:$0xf] }
  0x7a   : > { %1175 = vmatpush.bf16.msra.mxu0 %v1476_v34  ;;  %v1528_v34 = vor.u32 %v1987_v23, %v1525_v24  ;;  %v1733_v3 = vld [vmem:[%s2393_s6 + $0x238] sm:$0xf0]  ;;  %v1971_v9 = vld [vmem:[%s2393_s6 + $0xc] sm:$0xf] }
  0x7b   : > { %1188 = vmatpush.bf16.msra.mxu1 %v1604_v37  ;;  %v1983_v37 = vld [vmem:[%s2393_s6 + $0x6c] sm:$0xf]  ;;  %v1861_v5 = vld [vmem:[%s2393_s6 + $0x338] sm:$0xf0] }
  0x7c   : > { %1201 = vmatpush.bf16.msra.mxu2 %v1732_v38  ;;  %v1509_v38 = vld [vmem:[%s2393_s6 + $0x78] sm:$0xf0]  ;;  %v2003_v11 = vld [vmem:[%s2393_s6 + $0x10c] sm:$0xf] }
  0x7d   : > { %1214 = vmatpush.bf16.msra.mxu3 %v1860_v42  ;;  %v2047_v42 = vld [vmem:[%s2393_s6 + $0x26c] sm:$0xf]  ;;  %v1512_v46 = vor.u32 %v1983_v37, %v1509_v38  ;;  %v1461_v10 = vld [vmem:[%s2393_s6 + $0x18] sm:$0xf0] }
  0x7e   : > { %1176 = vmatpush.bf16.msra.mxu0 %v1460_v49  ;;  %v1768_v48 = vor.u32 %v2047_v42, %v1765_v43  ;;  %v1979_v49 = vld [vmem:[%s2393_s6 + $0x4c] sm:$0xf]  ;;  %v1589_v13 = vld [vmem:[%s2393_s6 + $0x118] sm:$0xf0] }
  0x7f   : > { %1189 = vmatpush.bf16.msra.mxu1 %v1588_v53  ;;  %v1621_v53 = vld [vmem:[%s2393_s6 + $0x158] sm:$0xf0]  ;;  %v2035_v14 = vld [vmem:[%s2393_s6 + $0x20c] sm:$0xf] }
  0x80   : > { %1202 = vmatpush.bf16.msra.mxu2 %v1716_v54  ;;  %v2043_v54 = vld [vmem:[%s2393_s6 + $0x24c] sm:$0xf]  ;;  %v1717_v17 = vld [vmem:[%s2393_s6 + $0x218] sm:$0xf0] }
  0x81   : > { %1215 = vmatpush.bf16.msra.mxu3 %v1844_v57  ;;  %1177 = vmatmul.bf16.vlgmr.msra.gmra.mxu0 %v2527_v30  ;;  %v1877_v57 = vld [vmem:[%s2393_s6 + $0x358] sm:$0xf0]  ;;  %v2067_v18 = vld [vmem:[%s2393_s6 + $0x30c] sm:$0xf] }
  0x82   : > { %1221 = vmatpush.bf16.msrb.mxu0 %v1576_v58  ;;  %1190 = vmatmul.bf16.vlgmr.msra.gmra.mxu1 %v2529_v31  ;;  %v1496_v58 = vor.u32 %v1979_v49, %v1493_v50  ;;  %v1845_v19 = vld [vmem:[%s2393_s6 + $0x318] sm:$0xf0] }
  0x83   : > { %1234 = vmatpush.bf16.msrb.mxu1 %v1704_v59  ;;  %1203 = vmatmul.bf16.vlgmr.msra.gmra.mxu2 %v2516_v15  ;;  %v1624_v59 = vor.u32 %v2011_v51, %v1621_v53  ;;  %v1848_v23 = vor.u32 %v2067_v18, %v1845_v19 }
  0x84   : > { %1247 = vmatpush.bf16.msrb.mxu2 %v1832_v60  ;;  %1216 = vmatmul.bf16.vlgmr.msra.gmra.mxu3 %v2518_v16  ;;  %v1752_v60 = vor.u32 %v2043_v54, %v1749_v55 }
  0x85   : > { %1260 = vmatpush.bf16.msrb.mxu3 %v1960_v0  ;;  %v1880_v0 = vor.u32 %v2075_v56, %v1877_v57 }
  0x86   : > { %1222 = vmatpush.bf16.msrb.mxu0 %v1560_v6  ;;  %v1480_v6 = vor.u32 %v1975_v61, %v1477_v62 }
  0x87   : > { %1235 = vmatpush.bf16.msrb.mxu1 %v1688_v7  ;;  %v1608_v7 = vor.u32 %v2007_v63, %v1605_v1 }
  0x88   : > { %1248 = vmatpush.bf16.msrb.mxu2 %v1816_v8  ;;  %v1736_v8 = vor.u32 %v2039_v2, %v1733_v3 }
  0x89   : > { %1261 = vmatpush.bf16.msrb.mxu3 %v1944_v12  ;;  %v1864_v12 = vor.u32 %v2071_v4, %v1861_v5 }
  0x8a   : > { %1223 = vmatpush.bf16.msrb.mxu0 %v1544_v20  ;;  %v1464_v20 = vor.u32 %v1971_v9, %v1461_v10 }
  0x8b   : > { %1236 = vmatpush.bf16.msrb.mxu1 %v1672_v21  ;;  %v1592_v21 = vor.u32 %v2003_v11, %v1589_v13 }
  0x8c   : > { %1249 = vmatpush.bf16.msrb.mxu2 %v1800_v22  ;;  %v1720_v22 = vor.u32 %v2035_v14, %v1717_v17 }
  0x8d   : > { %1262 = vmatpush.bf16.msrb.mxu3 %v1928_v26 }
  0x8e   : > { %1224 = vmatpush.bf16.msrb.mxu0 %v1528_v34 }
  0x8f   : > { %1237 = vmatpush.bf16.msrb.mxu1 %v1656_v35 }
  0x90   : > { %1250 = vmatpush.bf16.msrb.mxu2 %v1784_v36 }
  0x91   : > { %1263 = vmatpush.bf16.msrb.mxu3 %v1912_v40 }
  0x92   : > { %1225 = vmatpush.bf16.msrb.mxu0 %v1512_v46 }
  0x93   : > { %1238 = vmatpush.bf16.msrb.mxu1 %v1640_v47 }
  0x94   : > { %1251 = vmatpush.bf16.msrb.mxu2 %v1768_v48 }
  0x95   : > { %1264 = vmatpush.bf16.msrb.mxu3 %v1896_v52 }
  0x96   : > { %1226 = vmatpush.bf16.msrb.mxu0 %v1496_v58 }
  0x97   : > { %1239 = vmatpush.bf16.msrb.mxu1 %v1624_v59 }
  0x98   : > { %1252 = vmatpush.bf16.msrb.mxu2 %v1752_v60 }
  0x99   : > { %1265 = vmatpush.bf16.msrb.mxu3 %v1880_v0 }
  0x9a   : > { %1227 = vmatpush.bf16.msrb.mxu0 %v1480_v6 }
  0x9b   : > { %1240 = vmatpush.bf16.msrb.mxu1 %v1608_v7 }
  0x9c   : > { %1253 = vmatpush.bf16.msrb.mxu2 %v1736_v8 }
  0x9d   : > { %1266 = vmatpush.bf16.msrb.mxu3 %v1864_v12 }
  0x9e   : > { %1228 = vmatpush.bf16.msrb.mxu0 %v1464_v20 }
  0x9f   : > { %1241 = vmatpush.bf16.msrb.mxu1 %v1592_v21 }
  0xa0   : > { %1254 = vmatpush.bf16.msrb.mxu2 %v1720_v22 }
  0xa1   : > { %1267 = vmatpush.bf16.msrb.mxu3 %v1848_v23  ;;  %1229 = vmatmul.bf16.vlgmr.msrb.gmra.mxu0 %v2527_v30 }
  0xa2   : > { %1242 = vmatmul.bf16.vlgmr.msrb.gmra.mxu1 %v2529_v31 }
  0xa3   : > { %1255 = vmatmul.bf16.vlgmr.msrb.gmra.mxu2 %v2516_v15 }
  0xa4   : > { %1268 = vmatmul.bf16.vlgmr.msrb.gmra.mxu3 %v2518_v16 }
  0xc6   : > { %v1087_v24 = vpop.f32.mrf.mxu1 }
  0xc7   : > { %v1113_v29 = vpop.f32.mrf.mxu3 }
  0xc8   : > { %v1074_v25 = vpop.f32.mrf.mxu0  ;;  %v1100_v27 = vpop.f32.mrf.mxu2 }
  0xc9   : > { %v1088_v26 = vadd.f32 %v1087_v24, %v1074_v25 }
  0xcb   : > { %v1101_v28 = vadd.f32 %v1100_v27, %v1088_v26 }
  0xcd   : > { %v1114_v32 = vadd.f32 %v1113_v29, %v1101_v28 }
  0xce   : > { %v1089_v33 = vpop.f32.mrf.mxu1 }
  0xcf   : > { %v1115_v36 = vpop.f32.mrf.mxu3 }
  0xd0   : > { %v1076_v34 = vpop.f32.mrf.mxu0  ;;  %v1102_v35 = vpop.f32.mrf.mxu2 }
  0xde   : > { %v1126_v37 = vpop.f32.mrf.mxu0 }
  0xdf   : > { %v1139_v38 = vpop.f32.mrf.mxu1 }
  0xe0   : > { %v1140_v30 = vadd.f32 %v1139_v38, %v1126_v37 }
  0xe6   : > { %v1152_v39 = vpop.f32.mrf.mxu2  ;;  %v1128_v41 = vpop.f32.mrf.mxu0 }
  0xe7   : > { %v1153_v31 = vadd.f32 %v1152_v39, %v1140_v30  ;;  %v1165_v40 = vpop.f32.mrf.mxu3  ;;  %v1141_v16 = vpop.f32.mrf.mxu1 }
  0xe9   : > { %v1166_v15 = vadd.f32 %v1165_v40, %v1153_v31 }
  0xee   : > { %v1154_v42 = vpop.f32.mrf.mxu2 }
  0xef   : > { %v1167_v43 = vpop.f32.mrf.mxu3 }
  0xfe   : > { %v1178_v44 = vpop.f32.mrf.mxu0 }
  0xff   : > { %v1191_v45 = vpop.f32.mrf.mxu1 }
 0x100   : > { %v1192_v46 = vadd.f32 %v1191_v45, %v1178_v44 }
 0x106   : > { %v1204_v47 = vpop.f32.mrf.mxu2  ;;  %v1180_v51 = vpop.f32.mrf.mxu0 }
 0x107   : > { %v1205_v48 = vadd.f32 %v1204_v47, %v1192_v46  ;;  %v1217_v49 = vpop.f32.mrf.mxu3  ;;  %v1193_v52 = vpop.f32.mrf.mxu1 }
 0x109   : > { %v1218_v50 = vadd.f32 %v1217_v49, %v1205_v48 }
 0x10e   : > { %v1206_v53 = vpop.f32.mrf.mxu2 }
 0x10f   : > { %v1219_v54 = vpop.f32.mrf.mxu3 }
 0x11e   : > { %v1230_v55 = vpop.f32.mrf.mxu0 }
 0x11f   : > { %v1243_v56 = vpop.f32.mrf.mxu1 }
 0x120   : > { %v1244_v57 = vadd.f32 %v1243_v56, %v1230_v55 }
 0x126   : > { %v1256_v58 = vpop.f32.mrf.mxu2  ;;  %v1232_v61 = vpop.f32.mrf.mxu0 }
 0x127   : > { %v1257_v59 = vadd.f32 %v1256_v58, %v1244_v57  ;;  %v1269_v60 = vpop.f32.mrf.mxu3  ;;  %v1245_v62 = vpop.f32.mrf.mxu1 }
 0x129   : > { %v1270_v63 = vadd.f32 %v1269_v60, %v1257_v59 }
 0x12b   : > { %1276 = sbr.rel (%p1961_p2) target bundleno = 308 (0x134), region = 44 }
 0x12e   : > { %v1258_v0 = vpop.f32.mrf.mxu2 }
 0x12f   : > { %v1271_v1 = vpop.f32.mrf.mxu3 }
 0x130   : > { %1277 = vst [vmem:[%s2784_s3] sm:$0xff] %v1114_v32 }
 0x131   : > { %1278 = vst [vmem:[%s2784_s3 + $0x8] sm:$0xff] %v1166_v15 }
 0x132   : > { %1279 = vst [vmem:[%s2784_s3 + $0x10] sm:$0xff] %v1218_v50 }
 0x133   : > { %1280 = vst [vmem:[%s2784_s3 + $0x18] sm:$0xff] %v1270_v63 }
 0x134 PF: > { %p1962_p3 = scmp.le.s32.totalorder %s2272_s15, 0 }
 0x136   : > { %1284 = sbr.rel (%p1962_p3) target bundleno = 322 (0x142), region = 48 }
 0x13b   : > { %v1285_v2 = vld [vmem:[%s2784_s3] sm:$0xff]  ;;  %v1286_v3 = vld [vmem:[%s2784_s3 + $0x8] sm:$0xff]  ;;  %v1287_v4 = vld [vmem:[%s2784_s3 + $0x10] sm:$0xff] }
 0x13c   : > { %v1289_v5 = vadd.f32 %v1285_v2, %v1114_v32  ;;  %v1290_v6 = vadd.f32 %v1286_v3, %v1166_v15  ;;  %v1291_v7 = vadd.f32 %v1287_v4, %v1218_v50  ;;  %v1288_v8 = vld [vmem:[%s2784_s3 + $0x18] sm:$0xff] }
 0x13d   : > { %v1292_v9 = vadd.f32 %v1288_v8, %v1270_v63 }
 0x13e   : > { %1293 = vst [vmem:[%s2784_s3] sm:$0xff] %v1289_v5 }
 0x13f   : > { %1294 = vst [vmem:[%s2784_s3 + $0x8] sm:$0xff] %v1290_v6 }
 0x140   : > { %1295 = vst [vmem:[%s2784_s3 + $0x10] sm:$0xff] %v1291_v7 }
 0x141   : > { %1296 = vst [vmem:[%s2784_s3 + $0x18] sm:$0xff] %v1292_v9 }
 0x142 PF: > { %p1963_p4 = scmp.ne.s32.totalorder %s2272_s15, 8 }
 0x144   : > { %1300 = sbr.rel (%p1963_p4) target bundleno = 341 (0x155), region = 52 }
 0x149   : > { %v1301_v10 = vld [vmem:[%s2784_s3] sm:$0xff]  ;;  %v1302_v12 = vld [vmem:[%s2784_s3 + $0x8] sm:$0xff]  ;;  %v1303_v17 = vld [vmem:[%s2784_s3 + $0x10] sm:$0xff] }
 0x14a   : > { %v1305_v11 = vld [vmem:[#allocation4] sm:$0xf]  ;;  %v1304_v19 = vld [vmem:[%s2784_s3 + $0x18] sm:$0xff] }
 0x14b   : > { %v1307_v13 = vperm.slane %v1305_v11, 0  ;;  %v1308_v14 = vperm.slane %v1305_v11, 1  ;;  %v1309_v18 = vperm.slane %v1305_v11, 2  ;;  %v1310_v20 = vperm.slane %v1305_v11, 3 }
 0x14d   : > { %v1315_v21 = vadd.f32 %v1307_v13, %v1301_v10  ;;  %v1316_v22 = vadd.f32 %v1308_v14, %v1302_v12  ;;  %v1317_v23 = vadd.f32 %v1309_v18, %v1303_v17  ;;  %v1318_v24 = vadd.f32 %v1310_v20, %v1304_v19 }
 0x14f   : > { %v1319_v25 = vmax.f32 %v1315_v21, 0.0  ;;  %v1320_v26 = vmax.f32 %v1316_v22, 0.0  ;;  %v1321_v27 = vmax.f32 %v1317_v23, 0.0  ;;  %v1322_v28 = vmax.f32 %v1318_v24, 0.0 }
 0x151   : > { %1323 = vst [vmem:[%s2784_s3] sm:$0xff] %v1319_v25 }
 0x152   : > { %1324 = vst [vmem:[%s2784_s3 + $0x8] sm:$0xff] %v1320_v26 }
 0x153   : > { %1325 = vst [vmem:[%s2784_s3 + $0x10] sm:$0xff] %v1321_v27 }
 0x154   : > { %1326 = vst [vmem:[%s2784_s3 + $0x18] sm:$0xff] %v1322_v28 }
 0x155 PF: > { %s17_s17 = sadd.s32 1, %s2280_s17   ;;  %s2791_s12 = smov %s2264_s13 }
 0x156   : > { %p14_p5 = scmp.ge.s32.totalorder %s17_s17, 11   ;;  %s2792_s13 = smov %s2268_s14 }
 0x157   : > { %s2793_s14 = smov %s2386_s21  ;;  %s2794_s15 = smov %s2276_s16 }
 0x158   : > { %s2795_s16 = smov %s2797_s30  ;;  %16 = sbr.rel (!%p14_p5) target bundleno = 5 (0x5), region = 91 }
 0x15d   :  { %1351 = vsyncpa [#allocation3], 1 }
 0x15e   :  { %1353 = vsyncpa [#allocation3 + $0x1], 1 }
 0x15f   :  { %1354 = vsyncpa [#allocation5], 1 }

// kernel: forward_pallas.20
= control target key start
LH: loop header
LB: loop body
LE: loop exit
PB: predicated region body
PF: predicated region fallthrough
CT: control target
= control target key end

     0   :  { %9 = vsyncpa [#allocation3], 0  ;;  %s2876_s0 = inlined_call_operand.vmem [shape: bf16[8,4608], index: 0, kind: input, shape index: {}]   ;;  %s2877_s1 = inlined_call_operand.hbm [shape: bf16[1,4608,512], index: 1, kind: input, shape index: {}]   ;;  %s2878_s2 = inlined_call_operand.hbm [shape: f32[1,512], index: 2, kind: input, shape index: {}]   ;;  %s2879_s3 = inlined_call_operand.vmem [shape: f32[8,512], index: 3, kind: input, shape index: {}]   ;;  %s2880_s4 = inlined_call_operand.vmem [shape: f32[8,512], index: 4, kind: output, shape index: {}]  }
   0x1   :  { %11 = vsyncpa [#allocation3 + $0x1], 0 }
   0x2   :  { %12 = vsyncpa [#allocation5], 0  ;;  %s2388_s15 = smov 0   ;;  %s2390_s16 = smov 0  }
   0x3   :  { %s2392_s17 = smov 0   ;;  %s2394_s18 = smov 0  }
   0x4   :  { %s2396_s19 = smov 0   ;;  %s2398_s20 = smov 0  }
   0x5 LB: > { %s1513_s21 = sadd.s32 4294967295, %s2358_s20   ;;  %s76_s22 = sadd.s32 1, %s2346_s17  ;;  %s2358_s20 = sphi %s2398_s20, %s18_s20   ;;  %s2354_s19 = sphi %s2396_s19, %s2891_s19   ;;  %s2350_s18 = sphi %s2394_s18, %s2890_s18   ;;  %s2346_s17 = sphi %s2392_s17, %s2889_s17   ;;  %s2342_s16 = sphi %s2390_s16, %s2888_s16   ;;  %s2338_s15 = sphi %s2388_s15, %s2887_s15  }
   0x6   : > { %p83_p0 = scmp.ne.s32.totalorder %s2346_s17, %s2342_s16  ;;  %p84_p1 = scmp.eq.s32.totalorder %s2358_s20, 0 }
   0x7   : > { %p89_p2 = scmp.ne.s32.totalorder %s2342_s16, %s2338_s15  ;;  %p2422_p3 = scmp.eq.s32.totalorder %s1513_s21, 0 }
   0x8   : > { %p2426_p4 = por %p84_p1, %p83_p0  ;;  %p1514_p5 = scmp.ge.s32.totalorder %s2358_s20, 1 }
   0x9   : > { %p2433_p6 = por %p2422_p3, %p89_p2  ;;  %p177_p7 = scmp.lt.s32.totalorder %s2358_s20, 10 }
   0xa   : > { %s189_s28 = sshll.u32 %s2878_s2, 4  ;;  %s2360_s30 = smov [#allocation4]   ;;  %s190_s28 = int_to_ptr.hbm [resolvable:$true] %s189_s28 }
   0xb   : > { %p2441_p8 = pnand %p1514_p5, %p177_p7  ;;  %s191_s5 = sshll.u32 %s2360_s30, 4  ;;  %s192_s5 = int_to_ptr.vmem [resolvable:$true] %s191_s5 }
   0xc   : > { %p2191_p10 = scmp.lt.s32.totalorder %s2358_s20, 9  ;;  %s30_s7 = sadd.s32 1, %s2354_s19 }
   0xd   : > { %p2182_p9 = pneg %p2441_p8  ;;  %p31_p13 = scmp.ge.s32.totalorder %s30_s7, 9 }
   0xe   : > { %p2452_p12 = pnand %p2191_p10, %p2426_p4  ;;  %s227_s8 = sand.u32 1, %s2346_s17  }
   0xf   : > { %p2183_p11 = pnand %p2182_p9, %p2422_p3  ;;  %s2047_s9 = sshll.u32 %s2354_s19, 10 }
  0x10   : > { %s2893_s7 = smov (%p31_p13, %s30_s7), 0  ;;  %s1518_s10 = sshll.u32 %s227_s8, 10 }
  0x11   : > { %2185 = dma.hbm_to_vmem [thread:$0]  (!%p2183_p11), %s190_s28, 64, %s192_s5, [#allocation5]  }
  0x12   : > { %s72_s11 = ssub.s32 %s2354_s19, %s2893_s7  ;;  %s239_s14 = scalar_lea.hbm %s2877_s1, %s2047_s9 }
  0x13   : > { %p74_p0 = scmp.eq.s32.totalorder %s72_s11, 0  ;;  %s240_s15 = sshll.u32 %s239_s14, 4  ;;  %s241_s15 = int_to_ptr.hbm [resolvable:$true] %s240_s15 }
  0x14   : > { %s231_s21 = scalar_lea.vmem [#allocation2], %s1518_s10  ;;  %s228_s27 = scalar_lea.sflag [#allocation3], %s227_s8 }
  0x15   : > { %s242_s24 = sshll.u32 %s231_s21, 4  ;;  %s2361_s28 = smov 256   ;;  %s243_s24 = int_to_ptr.vmem [resolvable:$true] %s242_s24 }
  0x16   : > { %s2469_s26 = scalar_select %p74_p0, %s2346_s17, %s76_s22  }
  0x17   : > { %s2362_s30 = smov 16   ;;  %254 = sbr.rel (%p2441_p8) target bundleno = 343 (0x157), region = 36 }
  0x18   : > { %2189 = dma.hbm_to_vmem [thread:$0]  (!%p2452_p12), %s241_s15, 16384, %s243_s24, %s228_s27, %s2361_s28, %s2361_s28, %s2362_s30  }
  0x19   : > { %s256_s5 = sand.u32 (!%p2441_p8), 1, %s2342_s16  }
  0x1a   : > { %s1523_s9 = sshll.u32 (!%p2441_p8), %s256_s5, 10  ;;  %s257_s11 = scalar_lea.sflag (!%p2441_p8), [#allocation3], %s256_s5 }
  0x1b   : > { %s2476_s10 = scalar_lea.vmem (!%p2441_p8), [#allocation2], %s1523_s9 }
  0x1c   : > { %2329 = dma.done.wait (%p2433_p6), %s257_s11, 16384  }
  0x1d   : > { %2331 = vsyncadd (%p2433_p6), %s257_s11, 4294950912 }
  0x1e   : > { %2333 = dma.done.wait (%p2422_p3), [#allocation5], 64  }
  0x1f   : > { %2335 = vsyncadd (%p2422_p3), [#allocation5], 4294967232  ;;  %v1641_v0 = vld [vmem:[%s2476_s10 + $0xe0] sm:$0xf]  ;;  %v2078_v1 = vld [vmem:[%s2476_s10 + $0xec] sm:$0xf0] }
  0x20   : > { %v1769_v2 = vld [vmem:[%s2476_s10 + $0x1e0] sm:$0xf]  ;;  %v1642_v3 = vor.u32 %v2078_v1, %v1641_v0  ;;  %v2110_v4 = vld [vmem:[%s2476_s10 + $0x1ec] sm:$0xf0]  ;;  %s1525_s22 = sshll.u32 %s2350_s18, 2  ;;  %p2039_p2 = scmp.ne.s32.totalorder %s2350_s18, 0 }
  0x21   : > { %v1897_v5 = vld [vmem:[%s2476_s10 + $0x2e0] sm:$0xf]  ;;  %v2142_v6 = vld [vmem:[%s2476_s10 + $0x2ec] sm:$0xf0]  ;;  %v1770_v7 = vor.u32 %v2110_v4, %v1769_v2  ;;  %p2537_p1 = scmp.lt.s32.totalorder %s1525_s22, 35 }
  0x22   : > { %v1898_v8 = vor.u32 %v2142_v6, %v1897_v5  ;;  %v2025_v9 = vld [vmem:[%s2476_s10 + $0x3e0] sm:$0xf]  ;;  %v2174_v10 = vld [vmem:[%s2476_s10 + $0x3ec] sm:$0xf0]  ;;  %1119 = vmatpush.bf16.msra.mxu0 %v1642_v3 }
  0x23   : > { %v1625_v11 = vld [vmem:[%s2476_s10 + $0xc0] sm:$0xf]  ;;  %v2026_v12 = vor.u32 %v2174_v10, %v2025_v9  ;;  %v2074_v13 = vld [vmem:[%s2476_s10 + $0xcc] sm:$0xf0]  ;;  %1132 = vmatpush.bf16.msra.mxu1 %v1770_v7  ;;  %s2895_s22 = smov (!%p2537_p1, %s1525_s22), 35 }
  0x24   : > { %v1753_v14 = vld [vmem:[%s2476_s10 + $0x1c0] sm:$0xf]  ;;  %v2106_v15 = vld [vmem:[%s2476_s10 + $0x1cc] sm:$0xf0]  ;;  %1145 = vmatpush.bf16.msra.mxu2 %v1898_v8  ;;  %v1626_v16 = vor.u32 %v2074_v13, %v1625_v11  ;;  %s1526_s25 = sshll.u32 %s2895_s22, 2 }
  0x25   : > { %v1754_v17 = vor.u32 %v2106_v15, %v1753_v14  ;;  %v1881_v18 = vld [vmem:[%s2476_s10 + $0x2c0] sm:$0xf]  ;;  %v2138_v19 = vld [vmem:[%s2476_s10 + $0x2cc] sm:$0xf0]  ;;  %1158 = vmatpush.bf16.msra.mxu3 %v2026_v12  ;;  %s317_s8 = scalar_lea.vmem %s2876_s0, %s1526_s25 }
  0x26   : > { %v2009_v20 = vld [vmem:[%s2476_s10 + $0x3c0] sm:$0xf]  ;;  %v1882_v21 = vor.u32 %v2138_v19, %v1881_v18  ;;  %v2170_v22 = vld [vmem:[%s2476_s10 + $0x3cc] sm:$0xf0]  ;;  %1120 = vmatpush.bf16.msra.mxu0 %v1626_v16 }
  0x27   : > { %v1609_v23 = vld [vmem:[%s2476_s10 + $0xa0] sm:$0xf]  ;;  %v2070_v24 = vld [vmem:[%s2476_s10 + $0xac] sm:$0xf0]  ;;  %v2010_v25 = vor.u32 %v2170_v22, %v2009_v20  ;;  %1133 = vmatpush.bf16.msra.mxu1 %v1754_v17 }
  0x28   : > { %v1737_v26 = vld [vmem:[%s2476_s10 + $0x1a0] sm:$0xf]  ;;  %v2102_v27 = vld [vmem:[%s2476_s10 + $0x1ac] sm:$0xf0]  ;;  %v1610_v29 = vor.u32 %v2070_v24, %v1609_v23  ;;  %1146 = vmatpush.bf16.msra.mxu2 %v1882_v21 }
  0x29   : > { %v1865_v28 = vld [vmem:[%s2476_s10 + $0x2a0] sm:$0xf]  ;;  %v2134_v30 = vld [vmem:[%s2476_s10 + $0x2ac] sm:$0xf0]  ;;  %v1738_v33 = vor.u32 %v2102_v27, %v1737_v26  ;;  %1159 = vmatpush.bf16.msra.mxu3 %v2010_v25 }
  0x2a   : > { %v1993_v31 = vld [vmem:[%s2476_s10 + $0x3a0] sm:$0xf]  ;;  %v2166_v32 = vld [vmem:[%s2476_s10 + $0x3ac] sm:$0xf0]  ;;  %v1866_v34 = vor.u32 %v2134_v30, %v1865_v28  ;;  %1121 = vmatpush.bf16.msra.mxu0 %v1610_v29  ;;  %v2076_v28 = vld [vmem:[%s2476_s10 + $0xe4] sm:$0xf] }
  0x2b   : > { %v1593_v35 = vld [vmem:[%s2476_s10 + $0x80] sm:$0xf]  ;;  %v2066_v36 = vld [vmem:[%s2476_s10 + $0x8c] sm:$0xf0]  ;;  %v1994_v38 = vor.u32 %v2166_v32, %v1993_v31  ;;  %1134 = vmatpush.bf16.msra.mxu1 %v1738_v33  ;;  %v1643_v29 = vld [vmem:[%s2476_s10 + $0xf0] sm:$0xf0] }
  0x2c   : > { %v1721_v37 = vld [vmem:[%s2476_s10 + $0x180] sm:$0xf]  ;;  %v2098_v39 = vld [vmem:[%s2476_s10 + $0x18c] sm:$0xf0]  ;;  %v1594_v44 = vor.u32 %v2066_v36, %v1593_v35  ;;  %1147 = vmatpush.bf16.msra.mxu2 %v1866_v34  ;;  %v2108_v30 = vld [vmem:[%s2476_s10 + $0x1e4] sm:$0xf] }
  0x2d   : > { %v1849_v40 = vld [vmem:[%s2476_s10 + $0x280] sm:$0xf]  ;;  %v2130_v41 = vld [vmem:[%s2476_s10 + $0x28c] sm:$0xf0]  ;;  %v1722_v45 = vor.u32 %v2098_v39, %v1721_v37  ;;  %1160 = vmatpush.bf16.msra.mxu3 %v1994_v38  ;;  %v1771_v32 = vld [vmem:[%s2476_s10 + $0x1f0] sm:$0xf0] }
  0x2e   : > { %v1977_v42 = vld [vmem:[%s2476_s10 + $0x380] sm:$0xf]  ;;  %v2162_v43 = vld [vmem:[%s2476_s10 + $0x38c] sm:$0xf0]  ;;  %v1850_v46 = vor.u32 %v2130_v41, %v1849_v40  ;;  %1122 = vmatpush.bf16.msra.mxu0 %v1594_v44  ;;  %v2140_v33 = vld [vmem:[%s2476_s10 + $0x2e4] sm:$0xf]  ;;  %v1646_v40 = vor.u32 %v2076_v28, %v1643_v29  ;;  %v1774_v41 = vor.u32 %v2108_v30, %v1771_v32 }
  0x2f   : > { %v1577_v47 = vld [vmem:[%s2476_s10 + $0x60] sm:$0xf]  ;;  %v2062_v48 = vld [vmem:[%s2476_s10 + $0x6c] sm:$0xf0]  ;;  %v1978_v50 = vor.u32 %v2162_v43, %v1977_v42  ;;  %1135 = vmatpush.bf16.msra.mxu1 %v1722_v45  ;;  %v1899_v34 = vld [vmem:[%s2476_s10 + $0x2f0] sm:$0xf0] }
  0x30   : > { %v1705_v49 = vld [vmem:[%s2476_s10 + $0x160] sm:$0xf]  ;;  %v2094_v51 = vld [vmem:[%s2476_s10 + $0x16c] sm:$0xf0]  ;;  %v1578_v56 = vor.u32 %v2062_v48, %v1577_v47  ;;  %1148 = vmatpush.bf16.msra.mxu2 %v1850_v46  ;;  %v2172_v37 = vld [vmem:[%s2476_s10 + $0x3e4] sm:$0xf]  ;;  %v1902_v42 = vor.u32 %v2140_v33, %v1899_v34 }
  0x31   : > { %v1833_v52 = vld [vmem:[%s2476_s10 + $0x260] sm:$0xf]  ;;  %v2126_v53 = vld [vmem:[%s2476_s10 + $0x26c] sm:$0xf0]  ;;  %v1706_v57 = vor.u32 %v2094_v51, %v1705_v49  ;;  %1161 = vmatpush.bf16.msra.mxu3 %v1978_v50  ;;  %v2027_v38 = vld [vmem:[%s2476_s10 + $0x3f0] sm:$0xf0] }
  0x32   : > { %v1961_v54 = vld [vmem:[%s2476_s10 + $0x360] sm:$0xf]  ;;  %v2158_v55 = vld [vmem:[%s2476_s10 + $0x36c] sm:$0xf0]  ;;  %v1834_v58 = vor.u32 %v2126_v53, %v1833_v52  ;;  %1123 = vmatpush.bf16.msra.mxu0 %v1578_v56  ;;  %v2072_v43 = vld [vmem:[%s2476_s10 + $0xc4] sm:$0xf]  ;;  %v2030_v46 = vor.u32 %v2172_v37, %v2027_v38 }
  0x33   : > { %v1561_v59 = vld [vmem:[%s2476_s10 + $0x40] sm:$0xf]  ;;  %v2058_v60 = vld [vmem:[%s2476_s10 + $0x4c] sm:$0xf0]  ;;  %v1962_v62 = vor.u32 %v2158_v55, %v1961_v54  ;;  %1136 = vmatpush.bf16.msra.mxu1 %v1706_v57  ;;  %v1627_v44 = vld [vmem:[%s2476_s10 + $0xd0] sm:$0xf0] }
  0x34   : > { %v1689_v61 = vld [vmem:[%s2476_s10 + $0x140] sm:$0xf]  ;;  %v2090_v63 = vld [vmem:[%s2476_s10 + $0x14c] sm:$0xf0]  ;;  %v1562_v4 = vor.u32 %v2058_v60, %v1561_v59  ;;  %1149 = vmatpush.bf16.msra.mxu2 %v1834_v58  ;;  %v2104_v45 = vld [vmem:[%s2476_s10 + $0x1c4] sm:$0xf]  ;;  %v1630_v52 = vor.u32 %v2072_v43, %v1627_v44 }
  0x35   : > { %v1817_v0 = vld [vmem:[%s2476_s10 + $0x240] sm:$0xf]  ;;  %v2122_v1 = vld [vmem:[%s2476_s10 + $0x24c] sm:$0xf0]  ;;  %v1690_v5 = vor.u32 %v2090_v63, %v1689_v61  ;;  %1162 = vmatpush.bf16.msra.mxu3 %v1962_v62  ;;  %v1755_v47 = vld [vmem:[%s2476_s10 + $0x1d0] sm:$0xf0] }
  0x36   : > { %v1945_v2 = vld [vmem:[%s2476_s10 + $0x340] sm:$0xf]  ;;  %v2154_v3 = vld [vmem:[%s2476_s10 + $0x34c] sm:$0xf0]  ;;  %v1818_v6 = vor.u32 %v2122_v1, %v1817_v0  ;;  %1124 = vmatpush.bf16.msra.mxu0 %v1562_v4  ;;  %v2136_v48 = vld [vmem:[%s2476_s10 + $0x2c4] sm:$0xf]  ;;  %v1758_v53 = vor.u32 %v2104_v45, %v1755_v47 }
  0x37   : > { %v1545_v7 = vld [vmem:[%s2476_s10 + $0x20] sm:$0xf]  ;;  %v2054_v8 = vld [vmem:[%s2476_s10 + $0x2c] sm:$0xf0]  ;;  %v1946_v10 = vor.u32 %v2154_v3, %v1945_v2  ;;  %1137 = vmatpush.bf16.msra.mxu1 %v1690_v5  ;;  %v1883_v49 = vld [vmem:[%s2476_s10 + $0x2d0] sm:$0xf0] }
  0x38   : > { %v1673_v9 = vld [vmem:[%s2476_s10 + $0x120] sm:$0xf]  ;;  %v2086_v11 = vld [vmem:[%s2476_s10 + $0x12c] sm:$0xf0]  ;;  %v1546_v16 = vor.u32 %v2054_v8, %v1545_v7  ;;  %1150 = vmatpush.bf16.msra.mxu2 %v1818_v6  ;;  %v2168_v50 = vld [vmem:[%s2476_s10 + $0x3c4] sm:$0xf]  ;;  %v1886_v54 = vor.u32 %v2136_v48, %v1883_v49 }
  0x39   : > { %v1801_v12 = vld [vmem:[%s2476_s10 + $0x220] sm:$0xf]  ;;  %v2118_v13 = vld [vmem:[%s2476_s10 + $0x22c] sm:$0xf0]  ;;  %v1674_v19 = vor.u32 %v2086_v11, %v1673_v9  ;;  %1163 = vmatpush.bf16.msra.mxu3 %v1946_v10  ;;  %v2011_v51 = vld [vmem:[%s2476_s10 + $0x3d0] sm:$0xf0] }
  0x3a   : > { %v1929_v14 = vld [vmem:[%s2476_s10 + $0x320] sm:$0xf]  ;;  %v2150_v15 = vld [vmem:[%s2476_s10 + $0x32c] sm:$0xf0]  ;;  %v1802_v20 = vor.u32 %v2118_v13, %v1801_v12  ;;  %1125 = vmatpush.bf16.msra.mxu0 %v1546_v16  ;;  %v2068_v55 = vld [vmem:[%s2476_s10 + $0xa4] sm:$0xf]  ;;  %v2014_v58 = vor.u32 %v2168_v50, %v2011_v51 }
  0x3b   : > { %v1529_v17 = vld [vmem:[%s2476_s10] sm:$0xf]  ;;  %v2050_v18 = vld [vmem:[%s2476_s10 + $0xc] sm:$0xf0]  ;;  %v1930_v24 = vor.u32 %v2150_v15, %v1929_v14  ;;  %1138 = vmatpush.bf16.msra.mxu1 %v1674_v19  ;;  %v1611_v56 = vld [vmem:[%s2476_s10 + $0xb0] sm:$0xf0] }
  0x3c   : > { %v1657_v21 = vld [vmem:[%s2476_s10 + $0x100] sm:$0xf]  ;;  %v2082_v22 = vld [vmem:[%s2476_s10 + $0x10c] sm:$0xf0]  ;;  %v1530_v31 = vor.u32 %v2050_v18, %v1529_v17  ;;  %1151 = vmatpush.bf16.msra.mxu2 %v1802_v20  ;;  %v2100_v57 = vld [vmem:[%s2476_s10 + $0x1a4] sm:$0xf]  ;;  %v1614_v0 = vor.u32 %v2068_v55, %v1611_v56 }
  0x3d   : > { %v1785_v23 = vld [vmem:[%s2476_s10 + $0x200] sm:$0xf]  ;;  %v2114_v25 = vld [vmem:[%s2476_s10 + $0x20c] sm:$0xf0]  ;;  %v1658_v35 = vor.u32 %v2082_v22, %v1657_v21  ;;  %1164 = vmatpush.bf16.msra.mxu3 %v1930_v24  ;;  %v1739_v59 = vld [vmem:[%s2476_s10 + $0x1b0] sm:$0xf0] }
  0x3e   : > { %v1913_v26 = vld [vmem:[%s2476_s10 + $0x300] sm:$0xf]  ;;  %v2146_v27 = vld [vmem:[%s2476_s10 + $0x30c] sm:$0xf0]  ;;  %v1786_v36 = vor.u32 %v2114_v25, %v1785_v23  ;;  %1126 = vmatpush.bf16.msra.mxu0 %v1530_v31  ;;  %v2132_v60 = vld [vmem:[%s2476_s10 + $0x2a4] sm:$0xf]  ;;  %v1742_v2 = vor.u32 %v2100_v57, %v1739_v59 }
  0x3f   : > { %v1914_v39 = vor.u32 %v2146_v27, %v1913_v26  ;;  %1139 = vmatpush.bf16.msra.mxu1 %v1658_v35  ;;  %v1867_v61 = vld [vmem:[%s2476_s10 + $0x2b0] sm:$0xf0]  ;;  %v2164_v62 = vld [vmem:[%s2476_s10 + $0x3a4] sm:$0xf]  ;;  %v336_v1 = vld [vmem:[%s317_s8 + $0x8] sm:$0xff] }
  0x40   : > { %1152 = vmatpush.bf16.msra.mxu2 %v1786_v36  ;;  %v1995_v63 = vld [vmem:[%s2476_s10 + $0x3b0] sm:$0xf0]  ;;  %v1870_v3 = vor.u32 %v2132_v60, %v1867_v61  ;;  %v2064_v4 = vld [vmem:[%s2476_s10 + $0x84] sm:$0xf]  ;;  %v469_v7 = vunpack.c.l.b16 %v336_v1  ;;  %v470_v8 = vunpack.c.h.b16 %v336_v1 }
  0x41   : > { %1165 = vmatpush.bf16.msra.mxu3 %v1914_v39  ;;  %v1595_v5 = vld [vmem:[%s2476_s10 + $0x90] sm:$0xf0]  ;;  %v2096_v6 = vld [vmem:[%s2476_s10 + $0x184] sm:$0xf]  ;;  %v1998_v9 = vor.u32 %v2164_v62, %v1995_v63 }
  0x42   : > { %1171 = vmatpush.bf16.msrb.mxu0 %v1646_v40  ;;  %v1723_v10 = vld [vmem:[%s2476_s10 + $0x190] sm:$0xf0]  ;;  %v2128_v11 = vld [vmem:[%s2476_s10 + $0x284] sm:$0xf]  ;;  %v2599_v15 = vpack.c.b16 %v469_v7, %v469_v7  ;;  %v2601_v16 = vpack.c.b16 %v470_v8, %v470_v8  ;;  %v1598_v18 = vor.u32 %v2064_v4, %v1595_v5  ;;  %v2079_v7 = vld [vmem:[%s2476_s10 + $0xf4] sm:$0xf0] }
  0x43   : > { %1184 = vmatpush.bf16.msrb.mxu1 %v1774_v41  ;;  %v1851_v12 = vld [vmem:[%s2476_s10 + $0x290] sm:$0xf0]  ;;  %v2160_v13 = vld [vmem:[%s2476_s10 + $0x384] sm:$0xf]  ;;  %v1726_v21 = vor.u32 %v2096_v6, %v1723_v10  ;;  %v1649_v6 = vld [vmem:[%s2476_s10 + $0xe8] sm:$0xf] }
  0x44   : > { %1197 = vmatpush.bf16.msrb.mxu2 %v1902_v42  ;;  %v1979_v14 = vld [vmem:[%s2476_s10 + $0x390] sm:$0xf0]  ;;  %v335_v17 = vld [vmem:[%s317_s8] sm:$0xff]  ;;  %v1854_v22 = vor.u32 %v2128_v11, %v1851_v12  ;;  %1166 = vmatmul.bf16.vlgmr.msra.gmra.mxu3 %v2601_v16  ;;  %v1777_v8 = vld [vmem:[%s2476_s10 + $0x1e8] sm:$0xf] }
  0x45   : > { %1210 = vmatpush.bf16.msrb.mxu3 %v2030_v46  ;;  %v467_v19 = vunpack.c.l.b16 %v335_v17  ;;  %v468_v20 = vunpack.c.h.b16 %v335_v17  ;;  %v2060_v23 = vld [vmem:[%s2476_s10 + $0x64] sm:$0xf]  ;;  %v1579_v24 = vld [vmem:[%s2476_s10 + $0x70] sm:$0xf0]  ;;  %v1982_v26 = vor.u32 %v2160_v13, %v1979_v14  ;;  %1153 = vmatmul.bf16.vlgmr.msra.gmra.mxu2 %v2599_v15  ;;  %v2111_v10 = vld [vmem:[%s2476_s10 + $0x1f4] sm:$0xf0] }
  0x46   : > { %1172 = vmatpush.bf16.msrb.mxu0 %v1630_v52  ;;  %v2092_v25 = vld [vmem:[%s2476_s10 + $0x164] sm:$0xf]  ;;  %v1707_v27 = vld [vmem:[%s2476_s10 + $0x170] sm:$0xf0]  ;;  %v1582_v34 = vor.u32 %v2060_v23, %v1579_v24  ;;  %v1905_v11 = vld [vmem:[%s2476_s10 + $0x2e8] sm:$0xf] }
  0x47   : > { %1185 = vmatpush.bf16.msrb.mxu1 %v1758_v53  ;;  %v2124_v28 = vld [vmem:[%s2476_s10 + $0x264] sm:$0xf]  ;;  %v1835_v29 = vld [vmem:[%s2476_s10 + $0x270] sm:$0xf0]  ;;  %v2610_v30 = vpack.c.b16 %v467_v19, %v467_v19  ;;  %v2612_v31 = vpack.c.b16 %v468_v20, %v468_v20  ;;  %v1710_v35 = vor.u32 %v2092_v25, %v1707_v27  ;;  %v2143_v12 = vld [vmem:[%s2476_s10 + $0x2f4] sm:$0xf0]  ;;  %v1650_v20 = vor.u32 %v2079_v7, %v1649_v6 }
  0x48   : > { %1198 = vmatpush.bf16.msrb.mxu2 %v1886_v54  ;;  %v2156_v32 = vld [vmem:[%s2476_s10 + $0x364] sm:$0xf]  ;;  %v1963_v33 = vld [vmem:[%s2476_s10 + $0x370] sm:$0xf0]  ;;  %v1838_v36 = vor.u32 %v2124_v28, %v1835_v29  ;;  %v2033_v17 = vld [vmem:[%s2476_s10 + $0x3e8] sm:$0xf] }
  0x49   : > { %1211 = vmatpush.bf16.msrb.mxu3 %v2014_v58  ;;  %1140 = vmatmul.bf16.vlgmr.msra.gmra.mxu1 %v2612_v31  ;;  %v2056_v37 = vld [vmem:[%s2476_s10 + $0x44] sm:$0xf]  ;;  %v1563_v38 = vld [vmem:[%s2476_s10 + $0x50] sm:$0xf0]  ;;  %v1966_v40 = vor.u32 %v2156_v32, %v1963_v33  ;;  %v1633_v23 = vld [vmem:[%s2476_s10 + $0xc8] sm:$0xf] }
  0x4a   : > { %1173 = vmatpush.bf16.msrb.mxu0 %v1614_v0  ;;  %v2088_v39 = vld [vmem:[%s2476_s10 + $0x144] sm:$0xf]  ;;  %v1691_v41 = vld [vmem:[%s2476_s10 + $0x150] sm:$0xf0]  ;;  %v1566_v46 = vor.u32 %v2056_v37, %v1563_v38  ;;  %v2075_v24 = vld [vmem:[%s2476_s10 + $0xd4] sm:$0xf0] }
  0x4b   : > { %1186 = vmatpush.bf16.msrb.mxu1 %v1742_v2  ;;  %v2120_v42 = vld [vmem:[%s2476_s10 + $0x244] sm:$0xf]  ;;  %v1819_v43 = vld [vmem:[%s2476_s10 + $0x250] sm:$0xf0]  ;;  %1127 = vmatmul.bf16.vlgmr.msra.gmra.mxu0 %v2610_v30  ;;  %v1694_v47 = vor.u32 %v2088_v39, %v1691_v41  ;;  %v1761_v25 = vld [vmem:[%s2476_s10 + $0x1c8] sm:$0xf] }
  0x4c   : > { %1199 = vmatpush.bf16.msrb.mxu2 %v1870_v3  ;;  %v2152_v44 = vld [vmem:[%s2476_s10 + $0x344] sm:$0xf]  ;;  %v1947_v45 = vld [vmem:[%s2476_s10 + $0x350] sm:$0xf0]  ;;  %v1822_v48 = vor.u32 %v2120_v42, %v1819_v43  ;;  %v2107_v27 = vld [vmem:[%s2476_s10 + $0x1d4] sm:$0xf0] }
  0x4d   : > { %1212 = vmatpush.bf16.msrb.mxu3 %v1998_v9  ;;  %v2052_v49 = vld [vmem:[%s2476_s10 + $0x24] sm:$0xf]  ;;  %v1547_v50 = vld [vmem:[%s2476_s10 + $0x30] sm:$0xf0]  ;;  %v1950_v52 = vor.u32 %v2152_v44, %v1947_v45  ;;  %v1889_v28 = vld [vmem:[%s2476_s10 + $0x2c8] sm:$0xf] }
  0x4e   : > { %1174 = vmatpush.bf16.msrb.mxu0 %v1598_v18  ;;  %v2084_v51 = vld [vmem:[%s2476_s10 + $0x124] sm:$0xf]  ;;  %v1675_v53 = vld [vmem:[%s2476_s10 + $0x130] sm:$0xf0]  ;;  %v1550_v58 = vor.u32 %v2052_v49, %v1547_v50  ;;  %v2175_v18 = vld [vmem:[%s2476_s10 + $0x3f4] sm:$0xf0] }
  0x4f   : > { %1187 = vmatpush.bf16.msrb.mxu1 %v1726_v21  ;;  %v2116_v54 = vld [vmem:[%s2476_s10 + $0x224] sm:$0xf]  ;;  %v1803_v55 = vld [vmem:[%s2476_s10 + $0x230] sm:$0xf0]  ;;  %v1678_v61 = vor.u32 %v2084_v51, %v1675_v53  ;;  %v1778_v21 = vor.u32 %v2111_v10, %v1777_v8  ;;  %v2139_v29 = vld [vmem:[%s2476_s10 + $0x2d4] sm:$0xf0] }
  0x50   : > { %1200 = vmatpush.bf16.msrb.mxu2 %v1854_v22  ;;  %v2148_v56 = vld [vmem:[%s2476_s10 + $0x324] sm:$0xf]  ;;  %v1931_v57 = vld [vmem:[%s2476_s10 + $0x330] sm:$0xf0]  ;;  %v1806_v62 = vor.u32 %v2116_v54, %v1803_v55  ;;  %v1906_v22 = vor.u32 %v2143_v12, %v1905_v11  ;;  %v2017_v32 = vld [vmem:[%s2476_s10 + $0x3c8] sm:$0xf] }
  0x51   : > { %1213 = vmatpush.bf16.msrb.mxu3 %v1982_v26  ;;  %v2048_v59 = vld [vmem:[%s2476_s10 + $0x4] sm:$0xf]  ;;  %v1531_v60 = vld [vmem:[%s2476_s10 + $0x10] sm:$0xf0]  ;;  %v1934_v2 = vor.u32 %v2148_v56, %v1931_v57  ;;  %v2034_v26 = vor.u32 %v2175_v18, %v2033_v17  ;;  %v2171_v33 = vld [vmem:[%s2476_s10 + $0x3d4] sm:$0xf0] }
  0x52   : > { %1175 = vmatpush.bf16.msrb.mxu0 %v1582_v34  ;;  %v2080_v63 = vld [vmem:[%s2476_s10 + $0x104] sm:$0xf]  ;;  %v1659_v0 = vld [vmem:[%s2476_s10 + $0x110] sm:$0xf0]  ;;  %v1534_v9 = vor.u32 %v2048_v59, %v1531_v60  ;;  %v1634_v34 = vor.u32 %v2075_v24, %v1633_v23  ;;  %v1617_v37 = vld [vmem:[%s2476_s10 + $0xa8] sm:$0xf] }
  0x53   : > { %1188 = vmatpush.bf16.msrb.mxu1 %v1710_v35  ;;  %v2112_v1 = vld [vmem:[%s2476_s10 + $0x204] sm:$0xf]  ;;  %v1787_v3 = vld [vmem:[%s2476_s10 + $0x210] sm:$0xf0]  ;;  %v1662_v13 = vor.u32 %v2080_v63, %v1659_v0  ;;  %v1762_v35 = vor.u32 %v2107_v27, %v1761_v25  ;;  %v2071_v38 = vld [vmem:[%s2476_s10 + $0xb4] sm:$0xf0] }
  0x54   : > { %1201 = vmatpush.bf16.msrb.mxu2 %v1838_v36  ;;  %v2144_v4 = vld [vmem:[%s2476_s10 + $0x304] sm:$0xf]  ;;  %v1915_v5 = vld [vmem:[%s2476_s10 + $0x310] sm:$0xf0]  ;;  %v1790_v14 = vor.u32 %v2112_v1, %v1787_v3  ;;  %v1890_v36 = vor.u32 %v2139_v29, %v1889_v28  ;;  %v1745_v39 = vld [vmem:[%s2476_s10 + $0x1a8] sm:$0xf] }
  0x55   : > { %1214 = vmatpush.bf16.msrb.mxu3 %v1966_v40  ;;  %v1918_v19 = vor.u32 %v2144_v4, %v1915_v5  ;;  %v2018_v40 = vor.u32 %v2171_v33, %v2017_v32  ;;  %v2103_v41 = vld [vmem:[%s2476_s10 + $0x1b4] sm:$0xf0]  ;;  %v1873_v42 = vld [vmem:[%s2476_s10 + $0x2a8] sm:$0xf] }
  0x56   : > { %1176 = vmatpush.bf16.msrb.mxu0 %v1566_v46  ;;  %v2135_v43 = vld [vmem:[%s2476_s10 + $0x2b4] sm:$0xf0]  ;;  %v2001_v44 = vld [vmem:[%s2476_s10 + $0x3a8] sm:$0xf]  ;;  %v1618_v46 = vor.u32 %v2071_v38, %v1617_v37 }
  0x57   : > { %1189 = vmatpush.bf16.msrb.mxu1 %v1694_v47  ;;  %v2167_v45 = vld [vmem:[%s2476_s10 + $0x3b4] sm:$0xf0]  ;;  %v1746_v47 = vor.u32 %v2103_v41, %v1745_v39  ;;  %v1601_v49 = vld [vmem:[%s2476_s10 + $0x88] sm:$0xf] }
  0x58   : > { %1202 = vmatpush.bf16.msrb.mxu2 %v1822_v48  ;;  %v1874_v48 = vor.u32 %v2135_v43, %v1873_v42  ;;  %v2067_v50 = vld [vmem:[%s2476_s10 + $0x94] sm:$0xf0]  ;;  %v1729_v51 = vld [vmem:[%s2476_s10 + $0x188] sm:$0xf] }
  0x59   : > { %1215 = vmatpush.bf16.msrb.mxu3 %v1950_v52  ;;  %v2002_v52 = vor.u32 %v2167_v45, %v2001_v44  ;;  %v2099_v53 = vld [vmem:[%s2476_s10 + $0x194] sm:$0xf0]  ;;  %v1857_v54 = vld [vmem:[%s2476_s10 + $0x288] sm:$0xf] }
  0x5a   : > { %1177 = vmatpush.bf16.msrb.mxu0 %v1550_v58  ;;  %v2131_v55 = vld [vmem:[%s2476_s10 + $0x294] sm:$0xf0]  ;;  %v1985_v56 = vld [vmem:[%s2476_s10 + $0x388] sm:$0xf]  ;;  %v1602_v58 = vor.u32 %v2067_v50, %v1601_v49  ;;  %v1730_v59 = vor.u32 %v2099_v53, %v1729_v51  ;;  %v1779_v50 = vld [vmem:[%s2476_s10 + $0x1f8] sm:$0xf0] }
  0x5b   : > { %1190 = vmatpush.bf16.msrb.mxu1 %v1678_v61  ;;  %v2163_v57 = vld [vmem:[%s2476_s10 + $0x394] sm:$0xf0]  ;;  %v1858_v60 = vor.u32 %v2131_v55, %v1857_v54  ;;  %v1585_v61 = vld [vmem:[%s2476_s10 + $0x68] sm:$0xf]  ;;  %v2141_v51 = vld [vmem:[%s2476_s10 + $0x2ec] sm:$0xf] }
  0x5c   : > { %1203 = vmatpush.bf16.msrb.mxu2 %v1806_v62  ;;  %v2063_v62 = vld [vmem:[%s2476_s10 + $0x74] sm:$0xf0]  ;;  %v1713_v63 = vld [vmem:[%s2476_s10 + $0x168] sm:$0xf]  ;;  %v1986_v0 = vor.u32 %v2163_v57, %v1985_v56  ;;  %v2173_v55 = vld [vmem:[%s2476_s10 + $0x3ec] sm:$0xf] }
  0x5d   : > { %1216 = vmatpush.bf16.msrb.mxu3 %v1934_v2  ;;  %v2095_v1 = vld [vmem:[%s2476_s10 + $0x174] sm:$0xf0]  ;;  %v1841_v2 = vld [vmem:[%s2476_s10 + $0x268] sm:$0xf]  ;;  %v1586_v6 = vor.u32 %v2063_v62, %v1585_v61  ;;  %v2035_v56 = vld [vmem:[%s2476_s10 + $0x3f8] sm:$0xf0] }
  0x5e   : > { %1178 = vmatpush.bf16.msrb.mxu0 %v1534_v9  ;;  %v2127_v3 = vld [vmem:[%s2476_s10 + $0x274] sm:$0xf0]  ;;  %v1969_v4 = vld [vmem:[%s2476_s10 + $0x368] sm:$0xf]  ;;  %v1714_v7 = vor.u32 %v2095_v1, %v1713_v63  ;;  %v2073_v61 = vld [vmem:[%s2476_s10 + $0xcc] sm:$0xf] }
  0x5f   : > { %1191 = vmatpush.bf16.msrb.mxu1 %v1662_v13  ;;  %v2159_v5 = vld [vmem:[%s2476_s10 + $0x374] sm:$0xf0]  ;;  %v1842_v8 = vor.u32 %v2127_v3, %v1841_v2  ;;  %v1569_v9 = vld [vmem:[%s2476_s10 + $0x48] sm:$0xf]  ;;  %v1635_v62 = vld [vmem:[%s2476_s10 + $0xd8] sm:$0xf0] }
  0x60   : > { %1204 = vmatpush.bf16.msrb.mxu2 %v1790_v14  ;;  %v2059_v10 = vld [vmem:[%s2476_s10 + $0x54] sm:$0xf0]  ;;  %v1697_v11 = vld [vmem:[%s2476_s10 + $0x148] sm:$0xf]  ;;  %v1970_v12 = vor.u32 %v2159_v5, %v1969_v4  ;;  %v2105_v63 = vld [vmem:[%s2476_s10 + $0x1cc] sm:$0xf] }
  0x61   : > { %1217 = vmatpush.bf16.msrb.mxu3 %v1918_v19  ;;  %1179 = vmatmul.bf16.vlgmr.msrb.gmra.mxu0 %v2610_v30  ;;  %v2091_v13 = vld [vmem:[%s2476_s10 + $0x154] sm:$0xf0]  ;;  %v1825_v14 = vld [vmem:[%s2476_s10 + $0x248] sm:$0xf]  ;;  %v1763_v1 = vld [vmem:[%s2476_s10 + $0x1d8] sm:$0xf0] }
  0x62   : > { %1223 = vmatpush.bf16.msra.mxu0 %v1650_v20  ;;  %1192 = vmatmul.bf16.vlgmr.msrb.gmra.mxu1 %v2612_v31  ;;  %v2123_v17 = vld [vmem:[%s2476_s10 + $0x254] sm:$0xf0]  ;;  %v1953_v18 = vld [vmem:[%s2476_s10 + $0x348] sm:$0xf]  ;;  %v1570_v20 = vor.u32 %v2059_v10, %v1569_v9  ;;  %v2137_v2 = vld [vmem:[%s2476_s10 + $0x2cc] sm:$0xf] }
  0x63   : > { %1236 = vmatpush.bf16.msra.mxu1 %v1778_v21  ;;  %1205 = vmatmul.bf16.vlgmr.msrb.gmra.mxu2 %v2599_v15  ;;  %v2155_v19 = vld [vmem:[%s2476_s10 + $0x354] sm:$0xf0]  ;;  %v1698_v21 = vor.u32 %v2091_v13, %v1697_v11  ;;  %v1553_v23 = vld [vmem:[%s2476_s10 + $0x28] sm:$0xf]  ;;  %v1891_v3 = vld [vmem:[%s2476_s10 + $0x2d8] sm:$0xf0] }
  0x64   : > { %1249 = vmatpush.bf16.msra.mxu2 %v1906_v22  ;;  %1218 = vmatmul.bf16.vlgmr.msrb.gmra.mxu3 %v2601_v16  ;;  %v1826_v22 = vor.u32 %v2123_v17, %v1825_v14  ;;  %v2055_v24 = vld [vmem:[%s2476_s10 + $0x34] sm:$0xf0]  ;;  %v1681_v25 = vld [vmem:[%s2476_s10 + $0x128] sm:$0xf]  ;;  %v2169_v4 = vld [vmem:[%s2476_s10 + $0x3cc] sm:$0xf] }
  0x65   : > { %1262 = vmatpush.bf16.msra.mxu3 %v2034_v26  ;;  %v1954_v26 = vor.u32 %v2155_v19, %v1953_v18  ;;  %v2087_v27 = vld [vmem:[%s2476_s10 + $0x134] sm:$0xf0]  ;;  %v1809_v28 = vld [vmem:[%s2476_s10 + $0x228] sm:$0xf]  ;;  %v2019_v5 = vld [vmem:[%s2476_s10 + $0x3d8] sm:$0xf0] }
  0x66   : > { %1224 = vmatpush.bf16.msra.mxu0 %v1634_v34  ;;  %v2119_v29 = vld [vmem:[%s2476_s10 + $0x234] sm:$0xf0]  ;;  %v1937_v32 = vld [vmem:[%s2476_s10 + $0x328] sm:$0xf]  ;;  %v1554_v34 = vor.u32 %v2055_v24, %v1553_v23  ;;  %v1682_v37 = vor.u32 %v2087_v27, %v1681_v25  ;;  %v2069_v9 = vld [vmem:[%s2476_s10 + $0xac] sm:$0xf] }
  0x67   : > { %1237 = vmatpush.bf16.msra.mxu1 %v1762_v35  ;;  %v2151_v33 = vld [vmem:[%s2476_s10 + $0x334] sm:$0xf0]  ;;  %v1537_v35 = vld [vmem:[%s2476_s10 + $0x8] sm:$0xf]  ;;  %v1810_v38 = vor.u32 %v2119_v29, %v1809_v28  ;;  %v1619_v10 = vld [vmem:[%s2476_s10 + $0xb8] sm:$0xf0] }
  0x68   : > { %1250 = vmatpush.bf16.msra.mxu2 %v1890_v36  ;;  %v2051_v36 = vld [vmem:[%s2476_s10 + $0x14] sm:$0xf0]  ;;  %v1665_v39 = vld [vmem:[%s2476_s10 + $0x108] sm:$0xf]  ;;  %v1938_v42 = vor.u32 %v2151_v33, %v1937_v32  ;;  %v2101_v11 = vld [vmem:[%s2476_s10 + $0x1ac] sm:$0xf] }
  0x69   : > { %1263 = vmatpush.bf16.msra.mxu3 %v2018_v40  ;;  %v2083_v40 = vld [vmem:[%s2476_s10 + $0x114] sm:$0xf0]  ;;  %v1793_v41 = vld [vmem:[%s2476_s10 + $0x208] sm:$0xf]  ;;  %v1538_v49 = vor.u32 %v2051_v36, %v1537_v35  ;;  %v1747_v13 = vld [vmem:[%s2476_s10 + $0x1b8] sm:$0xf0] }
  0x6a   : > { %1225 = vmatpush.bf16.msra.mxu0 %v1618_v46  ;;  %v2115_v43 = vld [vmem:[%s2476_s10 + $0x214] sm:$0xf0]  ;;  %v1921_v44 = vld [vmem:[%s2476_s10 + $0x308] sm:$0xf]  ;;  %v2077_v46 = vld [vmem:[%s2476_s10 + $0xec] sm:$0xf]  ;;  %v1666_v53 = vor.u32 %v2083_v40, %v1665_v39 }
  0x6b   : > { %1238 = vmatpush.bf16.msra.mxu1 %v1746_v47  ;;  %v2147_v45 = vld [vmem:[%s2476_s10 + $0x314] sm:$0xf0]  ;;  %v1651_v47 = vld [vmem:[%s2476_s10 + $0xf8] sm:$0xf0]  ;;  %v1794_v54 = vor.u32 %v2115_v43, %v1793_v41  ;;  %v2133_v14 = vld [vmem:[%s2476_s10 + $0x2ac] sm:$0xf] }
  0x6c   : > { %1251 = vmatpush.bf16.msra.mxu2 %v1874_v48  ;;  %v2109_v48 = vld [vmem:[%s2476_s10 + $0x1ec] sm:$0xf]  ;;  %v1922_v57 = vor.u32 %v2147_v45, %v1921_v44  ;;  %v1875_v17 = vld [vmem:[%s2476_s10 + $0x2b8] sm:$0xf0] }
  0x6d   : > { %1264 = vmatpush.bf16.msra.mxu3 %v2002_v52  ;;  %v1907_v52 = vld [vmem:[%s2476_s10 + $0x2f8] sm:$0xf0]  ;;  %v2165_v18 = vld [vmem:[%s2476_s10 + $0x3ac] sm:$0xf] }
  0x6e   : > { %1226 = vmatpush.bf16.msra.mxu0 %v1602_v58  ;;  %v1654_v58 = vor.u32 %v2077_v46, %v1651_v47  ;;  %v2003_v19 = vld [vmem:[%s2476_s10 + $0x3b8] sm:$0xf0]  ;;  %v2065_v23 = vld [vmem:[%s2476_s10 + $0x8c] sm:$0xf] }
  0x6f   : > { %1239 = vmatpush.bf16.msra.mxu1 %v1730_v59  ;;  %v1782_v59 = vor.u32 %v2109_v48, %v1779_v50  ;;  %v1603_v24 = vld [vmem:[%s2476_s10 + $0x98] sm:$0xf0]  ;;  %v2097_v25 = vld [vmem:[%s2476_s10 + $0x18c] sm:$0xf] }
  0x70   : > { %1252 = vmatpush.bf16.msra.mxu2 %v1858_v60  ;;  %v1910_v60 = vor.u32 %v2141_v51, %v1907_v52  ;;  %v1731_v27 = vld [vmem:[%s2476_s10 + $0x198] sm:$0xf0]  ;;  %v2129_v28 = vld [vmem:[%s2476_s10 + $0x28c] sm:$0xf] }
  0x71   : > { %1265 = vmatpush.bf16.msra.mxu3 %v1986_v0  ;;  %v2038_v0 = vor.u32 %v2173_v55, %v2035_v56  ;;  %v1859_v29 = vld [vmem:[%s2476_s10 + $0x298] sm:$0xf0]  ;;  %v2161_v32 = vld [vmem:[%s2476_s10 + $0x38c] sm:$0xf]  ;;  %v1734_v35 = vor.u32 %v2097_v25, %v1731_v27 }
  0x72   : > { %1227 = vmatpush.bf16.msra.mxu0 %v1586_v6  ;;  %v1638_v6 = vor.u32 %v2073_v61, %v1635_v62  ;;  %v1987_v33 = vld [vmem:[%s2476_s10 + $0x398] sm:$0xf0]  ;;  %v1862_v36 = vor.u32 %v2129_v28, %v1859_v29  ;;  %v2093_v39 = vld [vmem:[%s2476_s10 + $0x16c] sm:$0xf] }
  0x73   : > { %1240 = vmatpush.bf16.msra.mxu1 %v1714_v7  ;;  %v1766_v7 = vor.u32 %v2105_v63, %v1763_v1  ;;  %v1990_v40 = vor.u32 %v2161_v32, %v1987_v33  ;;  %v1715_v41 = vld [vmem:[%s2476_s10 + $0x178] sm:$0xf0]  ;;  %v2157_v44 = vld [vmem:[%s2476_s10 + $0x36c] sm:$0xf] }
  0x74   : > { %1253 = vmatpush.bf16.msra.mxu2 %v1842_v8  ;;  %v1894_v8 = vor.u32 %v2137_v2, %v1891_v3  ;;  %v1843_v43 = vld [vmem:[%s2476_s10 + $0x278] sm:$0xf0]  ;;  %v1718_v47 = vor.u32 %v2093_v39, %v1715_v41  ;;  %v2089_v51 = vld [vmem:[%s2476_s10 + $0x14c] sm:$0xf] }
  0x75   : > { %1266 = vmatpush.bf16.msra.mxu3 %v1970_v12  ;;  %v2022_v12 = vor.u32 %v2169_v4, %v2019_v5  ;;  %v1971_v45 = vld [vmem:[%s2476_s10 + $0x378] sm:$0xf0]  ;;  %v2153_v56 = vld [vmem:[%s2476_s10 + $0x34c] sm:$0xf] }
  0x76   : > { %1228 = vmatpush.bf16.msra.mxu0 %v1570_v20  ;;  %v1622_v20 = vor.u32 %v2069_v9, %v1619_v10  ;;  %v1571_v50 = vld [vmem:[%s2476_s10 + $0x58] sm:$0xf0]  ;;  %v1974_v52 = vor.u32 %v2157_v44, %v1971_v45  ;;  %v2053_v61 = vld [vmem:[%s2476_s10 + $0x2c] sm:$0xf] }
  0x77   : > { %1241 = vmatpush.bf16.msra.mxu1 %v1698_v21  ;;  %v1750_v21 = vor.u32 %v2101_v11, %v1747_v13  ;;  %v1827_v55 = vld [vmem:[%s2476_s10 + $0x258] sm:$0xf0]  ;;  %v2085_v63 = vld [vmem:[%s2476_s10 + $0x12c] sm:$0xf] }
  0x78   : > { %1254 = vmatpush.bf16.msra.mxu2 %v1826_v22  ;;  %v1878_v22 = vor.u32 %v2133_v14, %v1875_v17  ;;  %v1555_v62 = vld [vmem:[%s2476_s10 + $0x38] sm:$0xf0]  ;;  %v2117_v2 = vld [vmem:[%s2476_s10 + $0x22c] sm:$0xf] }
  0x79   : > { %1267 = vmatpush.bf16.msra.mxu3 %v1954_v26  ;;  %v2006_v26 = vor.u32 %v2165_v18, %v2003_v19  ;;  %v1683_v1 = vld [vmem:[%s2476_s10 + $0x138] sm:$0xf0]  ;;  %v2149_v4 = vld [vmem:[%s2476_s10 + $0x32c] sm:$0xf] }
  0x7a   : > { %1229 = vmatpush.bf16.msra.mxu0 %v1554_v34  ;;  %v1606_v34 = vor.u32 %v2065_v23, %v1603_v24  ;;  %v1811_v3 = vld [vmem:[%s2476_s10 + $0x238] sm:$0xf0]  ;;  %v2049_v9 = vld [vmem:[%s2476_s10 + $0xc] sm:$0xf] }
  0x7b   : > { %1242 = vmatpush.bf16.msra.mxu1 %v1682_v37  ;;  %v2061_v37 = vld [vmem:[%s2476_s10 + $0x6c] sm:$0xf]  ;;  %v1939_v5 = vld [vmem:[%s2476_s10 + $0x338] sm:$0xf0] }
  0x7c   : > { %1255 = vmatpush.bf16.msra.mxu2 %v1810_v38  ;;  %v1587_v38 = vld [vmem:[%s2476_s10 + $0x78] sm:$0xf0]  ;;  %v2081_v11 = vld [vmem:[%s2476_s10 + $0x10c] sm:$0xf] }
  0x7d   : > { %1268 = vmatpush.bf16.msra.mxu3 %v1938_v42  ;;  %v2125_v42 = vld [vmem:[%s2476_s10 + $0x26c] sm:$0xf]  ;;  %v1590_v46 = vor.u32 %v2061_v37, %v1587_v38  ;;  %v1539_v10 = vld [vmem:[%s2476_s10 + $0x18] sm:$0xf0] }
  0x7e   : > { %1230 = vmatpush.bf16.msra.mxu0 %v1538_v49  ;;  %v1846_v48 = vor.u32 %v2125_v42, %v1843_v43  ;;  %v2057_v49 = vld [vmem:[%s2476_s10 + $0x4c] sm:$0xf]  ;;  %v1667_v13 = vld [vmem:[%s2476_s10 + $0x118] sm:$0xf0] }
  0x7f   : > { %1243 = vmatpush.bf16.msra.mxu1 %v1666_v53  ;;  %v1699_v53 = vld [vmem:[%s2476_s10 + $0x158] sm:$0xf0]  ;;  %v2113_v14 = vld [vmem:[%s2476_s10 + $0x20c] sm:$0xf] }
  0x80   : > { %1256 = vmatpush.bf16.msra.mxu2 %v1794_v54  ;;  %v2121_v54 = vld [vmem:[%s2476_s10 + $0x24c] sm:$0xf]  ;;  %v1795_v17 = vld [vmem:[%s2476_s10 + $0x218] sm:$0xf0] }
  0x81   : > { %1269 = vmatpush.bf16.msra.mxu3 %v1922_v57  ;;  %1231 = vmatmul.bf16.vlgmr.msra.gmra.mxu0 %v2610_v30  ;;  %v1955_v57 = vld [vmem:[%s2476_s10 + $0x358] sm:$0xf0]  ;;  %v2145_v18 = vld [vmem:[%s2476_s10 + $0x30c] sm:$0xf] }
  0x82   : > { %1275 = vmatpush.bf16.msrb.mxu0 %v1654_v58  ;;  %1244 = vmatmul.bf16.vlgmr.msra.gmra.mxu1 %v2612_v31  ;;  %v1574_v58 = vor.u32 %v2057_v49, %v1571_v50  ;;  %v1923_v19 = vld [vmem:[%s2476_s10 + $0x318] sm:$0xf0] }
  0x83   : > { %1288 = vmatpush.bf16.msrb.mxu1 %v1782_v59  ;;  %1257 = vmatmul.bf16.vlgmr.msra.gmra.mxu2 %v2599_v15  ;;  %v1702_v59 = vor.u32 %v2089_v51, %v1699_v53  ;;  %v1926_v23 = vor.u32 %v2145_v18, %v1923_v19 }
  0x84   : > { %1301 = vmatpush.bf16.msrb.mxu2 %v1910_v60  ;;  %1270 = vmatmul.bf16.vlgmr.msra.gmra.mxu3 %v2601_v16  ;;  %v1830_v60 = vor.u32 %v2121_v54, %v1827_v55 }
  0x85   : > { %1314 = vmatpush.bf16.msrb.mxu3 %v2038_v0  ;;  %v1958_v0 = vor.u32 %v2153_v56, %v1955_v57 }
  0x86   : > { %1276 = vmatpush.bf16.msrb.mxu0 %v1638_v6  ;;  %v1558_v6 = vor.u32 %v2053_v61, %v1555_v62 }
  0x87   : > { %1289 = vmatpush.bf16.msrb.mxu1 %v1766_v7  ;;  %v1686_v7 = vor.u32 %v2085_v63, %v1683_v1 }
  0x88   : > { %1302 = vmatpush.bf16.msrb.mxu2 %v1894_v8  ;;  %v1814_v8 = vor.u32 %v2117_v2, %v1811_v3 }
  0x89   : > { %1315 = vmatpush.bf16.msrb.mxu3 %v2022_v12  ;;  %v1942_v12 = vor.u32 %v2149_v4, %v1939_v5 }
  0x8a   : > { %1277 = vmatpush.bf16.msrb.mxu0 %v1622_v20  ;;  %v1542_v20 = vor.u32 %v2049_v9, %v1539_v10 }
  0x8b   : > { %1290 = vmatpush.bf16.msrb.mxu1 %v1750_v21  ;;  %v1670_v21 = vor.u32 %v2081_v11, %v1667_v13 }
  0x8c   : > { %1303 = vmatpush.bf16.msrb.mxu2 %v1878_v22  ;;  %v1798_v22 = vor.u32 %v2113_v14, %v1795_v17 }
  0x8d   : > { %1316 = vmatpush.bf16.msrb.mxu3 %v2006_v26 }
  0x8e   : > { %1278 = vmatpush.bf16.msrb.mxu0 %v1606_v34 }
  0x8f   : > { %1291 = vmatpush.bf16.msrb.mxu1 %v1734_v35 }
  0x90   : > { %1304 = vmatpush.bf16.msrb.mxu2 %v1862_v36 }
  0x91   : > { %1317 = vmatpush.bf16.msrb.mxu3 %v1990_v40 }
  0x92   : > { %1279 = vmatpush.bf16.msrb.mxu0 %v1590_v46 }
  0x93   : > { %1292 = vmatpush.bf16.msrb.mxu1 %v1718_v47 }
  0x94   : > { %1305 = vmatpush.bf16.msrb.mxu2 %v1846_v48 }
  0x95   : > { %1318 = vmatpush.bf16.msrb.mxu3 %v1974_v52 }
  0x96   : > { %1280 = vmatpush.bf16.msrb.mxu0 %v1574_v58 }
  0x97   : > { %1293 = vmatpush.bf16.msrb.mxu1 %v1702_v59 }
  0x98   : > { %1306 = vmatpush.bf16.msrb.mxu2 %v1830_v60 }
  0x99   : > { %1319 = vmatpush.bf16.msrb.mxu3 %v1958_v0 }
  0x9a   : > { %1281 = vmatpush.bf16.msrb.mxu0 %v1558_v6 }
  0x9b   : > { %1294 = vmatpush.bf16.msrb.mxu1 %v1686_v7 }
  0x9c   : > { %1307 = vmatpush.bf16.msrb.mxu2 %v1814_v8 }
  0x9d   : > { %1320 = vmatpush.bf16.msrb.mxu3 %v1942_v12 }
  0x9e   : > { %1282 = vmatpush.bf16.msrb.mxu0 %v1542_v20 }
  0x9f   : > { %1295 = vmatpush.bf16.msrb.mxu1 %v1670_v21 }
  0xa0   : > { %1308 = vmatpush.bf16.msrb.mxu2 %v1798_v22 }
  0xa1   : > { %1321 = vmatpush.bf16.msrb.mxu3 %v1926_v23  ;;  %1283 = vmatmul.bf16.vlgmr.msrb.gmra.mxu0 %v2610_v30 }
  0xa2   : > { %1296 = vmatmul.bf16.vlgmr.msrb.gmra.mxu1 %v2612_v31 }
  0xa3   : > { %1309 = vmatmul.bf16.vlgmr.msrb.gmra.mxu2 %v2599_v15 }
  0xa4   : > { %1322 = vmatmul.bf16.vlgmr.msrb.gmra.mxu3 %v2601_v16 }
  0xc6   : > { %v1141_v24 = vpop.f32.mrf.mxu1 }
  0xc7   : > { %v1167_v29 = vpop.f32.mrf.mxu3 }
  0xc8   : > { %v1128_v25 = vpop.f32.mrf.mxu0  ;;  %v1154_v27 = vpop.f32.mrf.mxu2 }
  0xc9   : > { %v1142_v26 = vadd.f32 %v1141_v24, %v1128_v25 }
  0xcb   : > { %v1155_v28 = vadd.f32 %v1154_v27, %v1142_v26 }
  0xcd   : > { %v1168_v32 = vadd.f32 %v1167_v29, %v1155_v28 }
  0xce   : > { %v1143_v33 = vpop.f32.mrf.mxu1 }
  0xcf   : > { %v1169_v36 = vpop.f32.mrf.mxu3 }
  0xd0   : > { %v1130_v34 = vpop.f32.mrf.mxu0  ;;  %v1156_v35 = vpop.f32.mrf.mxu2 }
  0xde   : > { %v1180_v37 = vpop.f32.mrf.mxu0 }
  0xdf   : > { %v1193_v38 = vpop.f32.mrf.mxu1 }
  0xe0   : > { %v1194_v30 = vadd.f32 %v1193_v38, %v1180_v37 }
  0xe6   : > { %v1206_v39 = vpop.f32.mrf.mxu2  ;;  %v1182_v41 = vpop.f32.mrf.mxu0 }
  0xe7   : > { %v1207_v31 = vadd.f32 %v1206_v39, %v1194_v30  ;;  %v1219_v40 = vpop.f32.mrf.mxu3  ;;  %v1195_v16 = vpop.f32.mrf.mxu1 }
  0xe9   : > { %v1220_v15 = vadd.f32 %v1219_v40, %v1207_v31 }
  0xee   : > { %v1208_v42 = vpop.f32.mrf.mxu2 }
  0xef   : > { %v1221_v43 = vpop.f32.mrf.mxu3 }
  0xfe   : > { %v1232_v44 = vpop.f32.mrf.mxu0 }
  0xff   : > { %v1245_v45 = vpop.f32.mrf.mxu1 }
 0x100   : > { %v1246_v46 = vadd.f32 %v1245_v45, %v1232_v44 }
 0x106   : > { %v1258_v47 = vpop.f32.mrf.mxu2  ;;  %v1234_v51 = vpop.f32.mrf.mxu0 }
 0x107   : > { %v1259_v48 = vadd.f32 %v1258_v47, %v1246_v46  ;;  %v1271_v49 = vpop.f32.mrf.mxu3  ;;  %v1247_v52 = vpop.f32.mrf.mxu1 }
 0x109   : > { %v1272_v50 = vadd.f32 %v1271_v49, %v1259_v48 }
 0x10e   : > { %v1260_v53 = vpop.f32.mrf.mxu2 }
 0x10f   : > { %v1273_v54 = vpop.f32.mrf.mxu3 }
 0x11e   : > { %v1284_v55 = vpop.f32.mrf.mxu0 }
 0x11f   : > { %v1297_v56 = vpop.f32.mrf.mxu1 }
 0x120   : > { %v1298_v57 = vadd.f32 %v1297_v56, %v1284_v55 }
 0x126   : > { %v1310_v58 = vpop.f32.mrf.mxu2  ;;  %v1286_v61 = vpop.f32.mrf.mxu0 }
 0x127   : > { %v1311_v59 = vadd.f32 %v1310_v58, %v1298_v57  ;;  %v1323_v60 = vpop.f32.mrf.mxu3  ;;  %v1299_v62 = vpop.f32.mrf.mxu1 }
 0x129   : > { %v1324_v63 = vadd.f32 %v1323_v60, %v1311_v59 }
 0x12b   : > { %1330 = sbr.rel (%p2039_p2) target bundleno = 308 (0x134), region = 48 }
 0x12e   : > { %v1312_v0 = vpop.f32.mrf.mxu2 }
 0x12f   : > { %v1325_v1 = vpop.f32.mrf.mxu3 }
 0x130   : > { %1331 = vst [vmem:[%s2880_s4] sm:$0xff] %v1168_v32 }
 0x131   : > { %1332 = vst [vmem:[%s2880_s4 + $0x8] sm:$0xff] %v1220_v15 }
 0x132   : > { %1333 = vst [vmem:[%s2880_s4 + $0x10] sm:$0xff] %v1272_v50 }
 0x133   : > { %1334 = vst [vmem:[%s2880_s4 + $0x18] sm:$0xff] %v1324_v63 }
 0x134 PF: > { %p2040_p3 = scmp.le.s32.totalorder %s2350_s18, 0 }
 0x136   : > { %1338 = sbr.rel (%p2040_p3) target bundleno = 322 (0x142), region = 52 }
 0x13b   : > { %v1339_v2 = vld [vmem:[%s2880_s4] sm:$0xff]  ;;  %v1340_v3 = vld [vmem:[%s2880_s4 + $0x8] sm:$0xff]  ;;  %v1341_v4 = vld [vmem:[%s2880_s4 + $0x10] sm:$0xff] }
 0x13c   : > { %v1343_v5 = vadd.f32 %v1339_v2, %v1168_v32  ;;  %v1344_v6 = vadd.f32 %v1340_v3, %v1220_v15  ;;  %v1345_v7 = vadd.f32 %v1341_v4, %v1272_v50  ;;  %v1342_v8 = vld [vmem:[%s2880_s4 + $0x18] sm:$0xff] }
 0x13d   : > { %v1346_v9 = vadd.f32 %v1342_v8, %v1324_v63 }
 0x13e   : > { %1347 = vst [vmem:[%s2880_s4] sm:$0xff] %v1343_v5 }
 0x13f   : > { %1348 = vst [vmem:[%s2880_s4 + $0x8] sm:$0xff] %v1344_v6 }
 0x140   : > { %1349 = vst [vmem:[%s2880_s4 + $0x10] sm:$0xff] %v1345_v7 }
 0x141   : > { %1350 = vst [vmem:[%s2880_s4 + $0x18] sm:$0xff] %v1346_v9 }
 0x142 PF: > { %p2041_p4 = scmp.ne.s32.totalorder %s2350_s18, 8 }
 0x144   : > { %1354 = sbr.rel (%p2041_p4) target bundleno = 343 (0x157), region = 56 }
 0x149   : > { %v1355_v10 = vld [vmem:[%s2880_s4] sm:$0xff]  ;;  %v1356_v14 = vld [vmem:[%s2880_s4 + $0x8] sm:$0xff]  ;;  %v1357_v18 = vld [vmem:[%s2880_s4 + $0x10] sm:$0xff] }
 0x14a   : > { %v1359_v11 = vld [vmem:[#allocation4] sm:$0xf]  ;;  %v1374_v20 = vld [vmem:[%s2879_s3 + $0x8] sm:$0xff]  ;;  %v1375_v21 = vld [vmem:[%s2879_s3 + $0x10] sm:$0xff] }
 0x14b   : > { %v1361_v12 = vperm.slane %v1359_v11, 0  ;;  %v1373_v13 = vld [vmem:[%s2879_s3] sm:$0xff]  ;;  %v1362_v17 = vperm.slane %v1359_v11, 1  ;;  %v1363_v19 = vperm.slane %v1359_v11, 2  ;;  %v1358_v22 = vld [vmem:[%s2880_s4 + $0x18] sm:$0xff]  ;;  %v1364_v23 = vperm.slane %v1359_v11, 3 }
 0x14c   : > { %v1376_v27 = vld [vmem:[%s2879_s3 + $0x18] sm:$0xff] }
 0x14d   : > { %v1369_v24 = vadd.f32 %v1361_v12, %v1355_v10  ;;  %v1370_v25 = vadd.f32 %v1362_v17, %v1356_v14  ;;  %v1371_v26 = vadd.f32 %v1363_v19, %v1357_v18  ;;  %v1372_v28 = vadd.f32 %v1364_v23, %v1358_v22 }
 0x14f   : > { %v1377_v29 = vadd.f32 %v1373_v13, %v1369_v24  ;;  %v1378_v32 = vadd.f32 %v1374_v20, %v1370_v25  ;;  %v1379_v33 = vadd.f32 %v1375_v21, %v1371_v26  ;;  %v1380_v34 = vadd.f32 %v1376_v27, %v1372_v28 }
 0x151   : > { %v1381_v35 = vmax.f32 %v1377_v29, 0.0  ;;  %v1382_v36 = vmax.f32 %v1378_v32, 0.0  ;;  %v1383_v37 = vmax.f32 %v1379_v33, 0.0  ;;  %v1384_v38 = vmax.f32 %v1380_v34, 0.0 }
 0x153   : > { %1385 = vst [vmem:[%s2880_s4] sm:$0xff] %v1381_v35 }
 0x154   : > { %1386 = vst [vmem:[%s2880_s4 + $0x8] sm:$0xff] %v1382_v36 }
 0x155   : > { %1387 = vst [vmem:[%s2880_s4 + $0x10] sm:$0xff] %v1383_v37 }
 0x156   : > { %1388 = vst [vmem:[%s2880_s4 + $0x18] sm:$0xff] %v1384_v38 }
 0x157 PF: > { %s18_s20 = sadd.s32 1, %s2358_s20   ;;  %s2887_s15 = smov %s2342_s16 }
 0x158   : > { %p15_p5 = scmp.ge.s32.totalorder %s18_s20, 11   ;;  %s2888_s16 = smov %s2346_s17 }
 0x159   : > { %s2889_s17 = smov %s2469_s26  ;;  %s2890_s18 = smov %s2354_s19 }
 0x15a   : > { %s2891_s19 = smov %s2893_s7  ;;  %17 = sbr.rel (!%p15_p5) target bundleno = 5 (0x5), region = 98 }
 0x15f   :  { %1413 = vsyncpa [#allocation3], 1 }
 0x160   :  { %1415 = vsyncpa [#allocation3 + $0x1], 1 }
 0x161   :  { %1416 = vsyncpa [#allocation5], 1 }

// kernel: forward_pallas.22
= control target key start
LH: loop header
LB: loop body
LE: loop exit
PB: predicated region body
PF: predicated region fallthrough
CT: control target
= control target key end

     0   :  { %8 = vsyncpa [#allocation3], 0  ;;  %s1747_s0 = inlined_call_operand.vmem [shape: bf16[32,4096], index: 0, kind: input, shape index: {}]   ;;  %s1748_s1 = inlined_call_operand.hbm [shape: bf16[4,4096,256], index: 1, kind: input, shape index: {}]   ;;  %s1749_s2 = inlined_call_operand.vmem [shape: f32[1,256], index: 2, kind: input, shape index: {}]   ;;  %s1750_s3 = inlined_call_operand.vmem [shape: f32[32,256], index: 3, kind: output, shape index: {}]  }
   0x1   :  { %10 = vsyncpa [#allocation3 + $0x1], 0  ;;  %s1445_s12 = smov 0   ;;  %s1447_s13 = smov 0  }
   0x2   :  { %s1449_s14 = smov 0   ;;  %s1451_s15 = smov 0  }
   0x3   :  { %s1453_s16 = smov 0   ;;  %s1455_s17 = smov 0  }
   0x4   :  { %s1457_s18 = smov 0   ;;  %s1459_s19 = smov 0  }
   0x5 LB: > { %s909_s20 = sadd.s32 4294967295, %s1421_s19   ;;  %s28_s21 = sadd.s32 1, %s1413_s17  ;;  %s1421_s19 = sphi %s1459_s19, %s16_s19   ;;  %s1417_s18 = sphi %s1457_s18, %s1760_s18   ;;  %s1413_s17 = sphi %s1455_s17, %s1759_s17   ;;  %s1409_s16 = sphi %s1453_s16, %s1758_s16   ;;  %s1405_s15 = sphi %s1451_s15, %s1757_s15   ;;  %s1401_s14 = sphi %s1449_s14, %s1756_s14   ;;  %s1397_s13 = sphi %s1447_s13, %s1755_s13   ;;  %s1393_s12 = sphi %s1445_s12, %s1754_s12  }
   0x6   : > { %p29_p0 = scmp.ge.s32.totalorder %s28_s21, 8  ;;  %s35_s22 = sadd.s32 1, %s1417_s18 }
   0x7   : > { %s74_s23 = sadd.s32 1, %s1401_s14  ;;  %p81_p1 = scmp.ne.s32.totalorder %s1401_s14, %s1397_s13 }
   0x8   : > { %s1762_s21 = smov (%p29_p0, %s28_s21), 0  ;;  %s1764_s22 = smov (!%p29_p0, %s35_s22), %s1417_s18 }
   0x9   : > { %s70_s24 = ssub.s32 %s1413_s17, %s1762_s21  ;;  %p82_p2 = scmp.eq.s32.totalorder %s1421_s19, 0 }
   0xa   : > { %p37_p3 = scmp.ge.s32.totalorder %s1764_s22, 4  ;;  %p87_p4 = scmp.ne.s32.totalorder %s1397_s13, %s1393_s12 }
   0xb   : > { %p1496_p5 = por %p82_p2, %p81_p1  ;;  %p88_p6 = scmp.eq.s32.totalorder %s909_s20, 0 }
   0xc   : > { %s1766_s22 = smov (%p37_p3, %s1764_s22), 0  ;;  %p1258_p8 = scmp.lt.s32.totalorder %s1421_s19, 32 }
   0xd   : > { %p1502_p7 = por %p88_p6, %p87_p4  ;;  %s69_s27 = ssub.s32 %s1417_s18, %s1766_s22 }
   0xe   : > { %s71_s28 = sor.u32 %s70_s24, %s69_s27  ;;  %s178_s29 = sand.u32 1, %s1401_s14  }
   0xf   : > { %p72_p9 = scmp.eq.s32.totalorder %s71_s28, 0  ;;  %s913_s30 = sshll.u32 %s178_s29, 9 }
  0x10   : > { %s1186_s4 = sshll.u32 %s1413_s17, 7  ;;  %s916_s6 = sshll.u32 %s1417_s18, 10 }
  0x11   : > { %s1512_s5 = scalar_select %p72_p9, %s1401_s14, %s74_s23  }
  0x12   : > { %s188_s7 = sadd.s32 %s1186_s4, %s916_s6  ;;  %s182_s8 = scalar_lea.vmem [#allocation2], %s913_s30 }
  0x13   : > { %s193_s9 = sshll.u32 %s182_s8, 4  ;;  %s917_s10 = sshll.u32 %s188_s7, 2  ;;  %s194_s9 = int_to_ptr.vmem [resolvable:$true] %s193_s9 }
  0x14   : > { %s190_s20 = scalar_lea.hbm %s1748_s1, %s917_s10  ;;  %p1255_p10 = pnand %p1258_p8, %p1496_p5 }
  0x15   : > { %s191_s24 = sshll.u32 %s190_s20, 4  ;;  %p918_p11 = scmp.ge.s32.totalorder %s1421_s19, 1  ;;  %s192_s24 = int_to_ptr.hbm [resolvable:$true] %s191_s24 }
  0x16   : > { %s179_s27 = scalar_lea.sflag [#allocation3], %s178_s29  ;;  %s1423_s23 = smov 128  }
  0x17   : > { %s1424_s28 = smov 8   ;;  %p201_p12 = scmp.lt.s32.totalorder %s1421_s19, 33 }
  0x18   : > { %1257 = dma.hbm_to_vmem [thread:$0]  (!%p1255_p10), %s192_s24, 8192, %s194_s9, %s179_s27, %s1423_s23, %s1423_s23, %s1424_s28  }
  0x19   : > { %p202_p13 = pnand %p918_p11, %p201_p12 }
  0x1a   : > { %s207_s30 = sand.u32 (!%p202_p13), 1, %s1397_s13  }
  0x1b   : > { %205 = sbr.rel (%p202_p13) target bundleno = 274 (0x112), region = 32  ;;  %s919_s4 = sshll.u32 (!%p202_p13), %s207_s30, 9 }
  0x1c   : > { %s208_s6 = scalar_lea.sflag (!%p202_p13), [#allocation3], %s207_s30  ;;  %s1525_s7 = scalar_lea.vmem (!%p202_p13), [#allocation2], %s919_s4 }
  0x20   : > { %1388 = dma.done.wait (%p1502_p7), %s208_s6, 8192  }
  0x21   : > { %1390 = vsyncadd (%p1502_p7), %s208_s6, 4294959104  ;;  %p248_p0 = scmp.lt.s32.totalorder %s1409_s16, 3  ;;  %s920_s25 = sshll.u32 %s1405_s15, 2  ;;  %v983_v0 = vld [vmem:[%s1525_s7 + $0x70] sm:$0xf] }
  0x22   : > { %p1544_p1 = scmp.lt.s32.totalorder %s920_s25, 31  ;;  %v1203_v1 = vld [vmem:[%s1525_s7 + $0x74] sm:$0xf0]  ;;  %v1047_v2 = vld [vmem:[%s1525_s7 + $0xf0] sm:$0xf]  ;;  %p1181_p2 = scmp.ne.s32.totalorder %s1405_s15, 0 }
  0x23   : > { %s1768_s16 = smov (!%p248_p0, %s1409_s16), 3  ;;  %v984_v3 = vor.u32 %v1203_v1, %v983_v0  ;;  %v1219_v4 = vld [vmem:[%s1525_s7 + $0xf4] sm:$0xf0]  ;;  %v1111_v5 = vld [vmem:[%s1525_s7 + $0x170] sm:$0xf] }
  0x24   : > { %s1187_s26 = sshll.u32 %s1768_s16, 4  ;;  %v1235_v6 = vld [vmem:[%s1525_s7 + $0x174] sm:$0xf0]  ;;  %v1048_v7 = vor.u32 %v1219_v4, %v1047_v2  ;;  %v1175_v9 = vld [vmem:[%s1525_s7 + $0x1f0] sm:$0xf]  ;;  %s1770_s25 = smov (!%p1544_p1, %s920_s25), 31 }
  0x25   : > { %s1540_s9 = scalar_lea.vmem %s1750_s3, %s1187_s26  ;;  %v1112_v8 = vor.u32 %v1235_v6, %v1111_v5  ;;  %v1251_v10 = vld [vmem:[%s1525_s7 + $0x1f4] sm:$0xf0]  ;;  %v975_v11 = vld [vmem:[%s1525_s7 + $0x60] sm:$0xf]  ;;  %666 = vmatpush.bf16.msra.mxu0 %v984_v3  ;;  %v1201_v13 = vld [vmem:[%s1525_s7 + $0x64] sm:$0xf0] }
  0x26   : > { %v1176_v12 = vor.u32 %v1251_v10, %v1175_v9  ;;  %v1039_v14 = vld [vmem:[%s1525_s7 + $0xe0] sm:$0xf]  ;;  %v1217_v15 = vld [vmem:[%s1525_s7 + $0xe4] sm:$0xf0]  ;;  %679 = vmatpush.bf16.msra.mxu1 %v1048_v7  ;;  %v976_v16 = vor.u32 %v1201_v13, %v975_v11  ;;  %v967_v23 = vld [vmem:[%s1525_s7 + $0x50] sm:$0xf] }
  0x27   : > { %692 = vmatpush.bf16.msra.mxu2 %v1112_v8  ;;  %v1040_v17 = vor.u32 %v1217_v15, %v1039_v14  ;;  %v1103_v18 = vld [vmem:[%s1525_s7 + $0x160] sm:$0xf]  ;;  %v1233_v19 = vld [vmem:[%s1525_s7 + $0x164] sm:$0xf0]  ;;  %v1199_v24 = vld [vmem:[%s1525_s7 + $0x54] sm:$0xf0] }
  0x28   : > { %v1167_v20 = vld [vmem:[%s1525_s7 + $0x1e0] sm:$0xf]  ;;  %705 = vmatpush.bf16.msra.mxu3 %v1176_v12  ;;  %v1104_v21 = vor.u32 %v1233_v19, %v1103_v18  ;;  %v1249_v22 = vld [vmem:[%s1525_s7 + $0x1e4] sm:$0xf0]  ;;  %v1031_v26 = vld [vmem:[%s1525_s7 + $0xd0] sm:$0xf]  ;;  %v968_v29 = vor.u32 %v1199_v24, %v967_v23 }
  0x29   : > { %v1168_v25 = vor.u32 %v1249_v22, %v1167_v20  ;;  %v1215_v27 = vld [vmem:[%s1525_s7 + $0xd4] sm:$0xf0]  ;;  %v1095_v28 = vld [vmem:[%s1525_s7 + $0x150] sm:$0xf]  ;;  %667 = vmatpush.bf16.msra.mxu0 %v976_v16  ;;  %v959_v35 = vld [vmem:[%s1525_s7 + $0x40] sm:$0xf] }
  0x2a   : > { %v1231_v30 = vld [vmem:[%s1525_s7 + $0x154] sm:$0xf0]  ;;  %v1159_v31 = vld [vmem:[%s1525_s7 + $0x1d0] sm:$0xf]  ;;  %680 = vmatpush.bf16.msra.mxu1 %v1040_v17  ;;  %v1032_v33 = vor.u32 %v1215_v27, %v1031_v26  ;;  %v1197_v36 = vld [vmem:[%s1525_s7 + $0x44] sm:$0xf0] }
  0x2b   : > { %v1247_v32 = vld [vmem:[%s1525_s7 + $0x1d4] sm:$0xf0]  ;;  %693 = vmatpush.bf16.msra.mxu2 %v1104_v21  ;;  %v1096_v34 = vor.u32 %v1231_v30, %v1095_v28  ;;  %v1023_v37 = vld [vmem:[%s1525_s7 + $0xc0] sm:$0xf]  ;;  %v1213_v39 = vld [vmem:[%s1525_s7 + $0xc4] sm:$0xf0]  ;;  %v960_v44 = vor.u32 %v1197_v36, %v959_v35 }
  0x2c   : > { %706 = vmatpush.bf16.msra.mxu3 %v1168_v25  ;;  %v1160_v38 = vor.u32 %v1247_v32, %v1159_v31  ;;  %v1087_v40 = vld [vmem:[%s1525_s7 + $0x140] sm:$0xf]  ;;  %v1229_v41 = vld [vmem:[%s1525_s7 + $0x144] sm:$0xf0]  ;;  %s921_s11 = sshll.u32 %s1768_s16, 5  ;;  %v1024_v45 = vor.u32 %v1213_v39, %v1023_v37 }
  0x2d   : > { %v1151_v42 = vld [vmem:[%s1525_s7 + $0x1c0] sm:$0xf]  ;;  %v1245_v43 = vld [vmem:[%s1525_s7 + $0x1c4] sm:$0xf0]  ;;  %668 = vmatpush.bf16.msra.mxu0 %v968_v29  ;;  %v1088_v46 = vor.u32 %v1229_v41, %v1087_v40  ;;  %v951_v47 = vld [vmem:[%s1525_s7 + $0x30] sm:$0xf]  ;;  %s1596_s16 = sadd.s32 %s921_s11, %s1770_s25 }
  0x2e   : > { %681 = vmatpush.bf16.msra.mxu1 %v1032_v33  ;;  %v1195_v48 = vld [vmem:[%s1525_s7 + $0x34] sm:$0xf0]  ;;  %v1015_v49 = vld [vmem:[%s1525_s7 + $0xb0] sm:$0xf]  ;;  %v1152_v50 = vor.u32 %v1245_v43, %v1151_v42  ;;  %v943_v59 = vld [vmem:[%s1525_s7 + $0x20] sm:$0xf] }
  0x2f   : > { %694 = vmatpush.bf16.msra.mxu2 %v1096_v34  ;;  %v1211_v51 = vld [vmem:[%s1525_s7 + $0xb4] sm:$0xf0]  ;;  %v1079_v52 = vld [vmem:[%s1525_s7 + $0x130] sm:$0xf]  ;;  %v952_v56 = vor.u32 %v1195_v48, %v951_v47  ;;  %v1193_v60 = vld [vmem:[%s1525_s7 + $0x24] sm:$0xf0] }
  0x30   : > { %707 = vmatpush.bf16.msra.mxu3 %v1160_v38  ;;  %v1227_v53 = vld [vmem:[%s1525_s7 + $0x134] sm:$0xf0]  ;;  %v1143_v54 = vld [vmem:[%s1525_s7 + $0x1b0] sm:$0xf]  ;;  %v1016_v57 = vor.u32 %v1211_v51, %v1015_v49  ;;  %v1007_v61 = vld [vmem:[%s1525_s7 + $0xa0] sm:$0xf]  ;;  %v944_v4 = vor.u32 %v1193_v60, %v943_v59 }
  0x31   : > { %v1243_v55 = vld [vmem:[%s1525_s7 + $0x1b4] sm:$0xf0]  ;;  %669 = vmatpush.bf16.msra.mxu0 %v960_v44  ;;  %v1080_v58 = vor.u32 %v1227_v53, %v1079_v52  ;;  %v1209_v63 = vld [vmem:[%s1525_s7 + $0xa4] sm:$0xf0]  ;;  %v1071_v0 = vld [vmem:[%s1525_s7 + $0x120] sm:$0xf] }
  0x32   : > { %682 = vmatpush.bf16.msra.mxu1 %v1024_v45  ;;  %v1144_v62 = vor.u32 %v1243_v55, %v1143_v54  ;;  %v1225_v1 = vld [vmem:[%s1525_s7 + $0x124] sm:$0xf0]  ;;  %v1135_v2 = vld [vmem:[%s1525_s7 + $0x1a0] sm:$0xf]  ;;  %s922_s12 = sshll.u32 %s1596_s16, 2  ;;  %v1008_v5 = vor.u32 %v1209_v63, %v1007_v61 }
  0x33   : > { %695 = vmatpush.bf16.msra.mxu2 %v1088_v46  ;;  %v1241_v3 = vld [vmem:[%s1525_s7 + $0x1a4] sm:$0xf0]  ;;  %v1072_v6 = vor.u32 %v1225_v1, %v1071_v0  ;;  %v935_v7 = vld [vmem:[%s1525_s7 + $0x10] sm:$0xf]  ;;  %v1191_v8 = vld [vmem:[%s1525_s7 + $0x14] sm:$0xf0]  ;;  %s1618_s27 = scalar_lea.vmem %s1747_s0, %s922_s12 }
  0x34   : > { %708 = vmatpush.bf16.msra.mxu3 %v1152_v50  ;;  %v999_v9 = vld [vmem:[%s1525_s7 + $0x90] sm:$0xf]  ;;  %v1136_v10 = vor.u32 %v1241_v3, %v1135_v2  ;;  %v1207_v11 = vld [vmem:[%s1525_s7 + $0x94] sm:$0xf0]  ;;  %v936_v16 = vor.u32 %v1191_v8, %v935_v7  ;;  %v927_v17 = vld [vmem:[%s1525_s7] sm:$0xf] }
  0x35   : > { %670 = vmatpush.bf16.msra.mxu0 %v952_v56  ;;  %v1063_v12 = vld [vmem:[%s1525_s7 + $0x110] sm:$0xf]  ;;  %v1223_v13 = vld [vmem:[%s1525_s7 + $0x114] sm:$0xf0]  ;;  %v1189_v18 = vld [vmem:[%s1525_s7 + $0x4] sm:$0xf0]  ;;  %v1000_v20 = vor.u32 %v1207_v11, %v999_v9 }
  0x36   : > { %683 = vmatpush.bf16.msra.mxu1 %v1016_v57  ;;  %v1127_v14 = vld [vmem:[%s1525_s7 + $0x190] sm:$0xf]  ;;  %v1239_v15 = vld [vmem:[%s1525_s7 + $0x194] sm:$0xf0]  ;;  %v991_v19 = vld [vmem:[%s1525_s7 + $0x80] sm:$0xf]  ;;  %v1064_v21 = vor.u32 %v1223_v13, %v1063_v12  ;;  %v928_v32 = vor.u32 %v1189_v18, %v927_v17 }
  0x37   : > { %696 = vmatpush.bf16.msra.mxu2 %v1080_v58  ;;  %v1205_v22 = vld [vmem:[%s1525_s7 + $0x84] sm:$0xf0]  ;;  %v1055_v23 = vld [vmem:[%s1525_s7 + $0x100] sm:$0xf]  ;;  %v1128_v25 = vor.u32 %v1239_v15, %v1127_v14  ;;  %v1202_v28 = vld [vmem:[%s1525_s7 + $0x74] sm:$0xf] }
  0x38   : > { %709 = vmatpush.bf16.msra.mxu3 %v1144_v62  ;;  %v1221_v24 = vld [vmem:[%s1525_s7 + $0x104] sm:$0xf0]  ;;  %v1119_v26 = vld [vmem:[%s1525_s7 + $0x180] sm:$0xf]  ;;  %v985_v29 = vld [vmem:[%s1525_s7 + $0x78] sm:$0xf0]  ;;  %v992_v37 = vor.u32 %v1205_v22, %v991_v19 }
  0x39   : > { %671 = vmatpush.bf16.msra.mxu0 %v944_v4  ;;  %v1237_v27 = vld [vmem:[%s1525_s7 + $0x184] sm:$0xf0]  ;;  %v1218_v30 = vld [vmem:[%s1525_s7 + $0xf4] sm:$0xf]  ;;  %v1049_v33 = vld [vmem:[%s1525_s7 + $0xf8] sm:$0xf0]  ;;  %v1056_v38 = vor.u32 %v1221_v24, %v1055_v23  ;;  %v988_v43 = vor.u32 %v1202_v28, %v985_v29 }
  0x3a   : > { %684 = vmatpush.bf16.msra.mxu1 %v1008_v5  ;;  %v267_v31 = vld [vmem:[%s1618_s27 + $0x8] sm:$0xff]  ;;  %v1234_v34 = vld [vmem:[%s1525_s7 + $0x174] sm:$0xf]  ;;  %v1113_v35 = vld [vmem:[%s1525_s7 + $0x178] sm:$0xf0]  ;;  %v1120_v42 = vor.u32 %v1237_v27, %v1119_v26  ;;  %v1052_v44 = vor.u32 %v1218_v30, %v1049_v33 }
  0x3b   : > { %697 = vmatpush.bf16.msra.mxu2 %v1072_v6  ;;  %v336_v36 = vunpack.c.l.b16 %v267_v31  ;;  %v1250_v39 = vld [vmem:[%s1525_s7 + $0x1f4] sm:$0xf]  ;;  %v1177_v40 = vld [vmem:[%s1525_s7 + $0x1f8] sm:$0xf0]  ;;  %v337_v41 = vunpack.c.h.b16 %v267_v31  ;;  %v1116_v45 = vor.u32 %v1234_v34, %v1113_v35  ;;  %v1200_v46 = vld [vmem:[%s1525_s7 + $0x64] sm:$0xf] }
  0x3c   : > { %710 = vmatpush.bf16.msra.mxu3 %v1136_v10  ;;  %v977_v47 = vld [vmem:[%s1525_s7 + $0x68] sm:$0xf0]  ;;  %v1216_v48 = vld [vmem:[%s1525_s7 + $0xe4] sm:$0xf]  ;;  %v1180_v49 = vor.u32 %v1250_v39, %v1177_v40  ;;  %v1198_v63 = vld [vmem:[%s1525_s7 + $0x54] sm:$0xf] }
  0x3d   : > { %672 = vmatpush.bf16.msra.mxu0 %v936_v16  ;;  %v1041_v50 = vld [vmem:[%s1525_s7 + $0xe8] sm:$0xf0]  ;;  %v1232_v51 = vld [vmem:[%s1525_s7 + $0x164] sm:$0xf]  ;;  %v1640_v53 = vpack.c.b16 %v336_v36, %v336_v36  ;;  %v1644_v56 = vpack.c.b16 %v337_v41, %v337_v41  ;;  %v980_v58 = vor.u32 %v1200_v46, %v977_v47  ;;  %v969_v0 = vld [vmem:[%s1525_s7 + $0x58] sm:$0xf0] }
  0x3e   : > { %685 = vmatpush.bf16.msra.mxu1 %v1000_v20  ;;  %v1105_v52 = vld [vmem:[%s1525_s7 + $0x168] sm:$0xf0]  ;;  %v1248_v54 = vld [vmem:[%s1525_s7 + $0x1e4] sm:$0xf]  ;;  %v1044_v61 = vor.u32 %v1216_v48, %v1041_v50  ;;  %v1214_v1 = vld [vmem:[%s1525_s7 + $0xd4] sm:$0xf]  ;;  %v972_v10 = vor.u32 %v1198_v63, %v969_v0 }
  0x3f   : > { %698 = vmatpush.bf16.msra.mxu2 %v1064_v21  ;;  %v1169_v55 = vld [vmem:[%s1525_s7 + $0x1e8] sm:$0xf0]  ;;  %v266_v57 = vld [vmem:[%s1618_s27] sm:$0xff]  ;;  %v1108_v62 = vor.u32 %v1232_v51, %v1105_v52  ;;  %v1033_v3 = vld [vmem:[%s1525_s7 + $0xd8] sm:$0xf0] }
  0x40   : > { %711 = vmatpush.bf16.msra.mxu3 %v1128_v25  ;;  %v334_v59 = vunpack.c.l.b16 %v266_v57  ;;  %v335_v60 = vunpack.c.h.b16 %v266_v57  ;;  %v1172_v2 = vor.u32 %v1248_v54, %v1169_v55  ;;  %v1230_v4 = vld [vmem:[%s1525_s7 + $0x154] sm:$0xf]  ;;  %v1097_v5 = vld [vmem:[%s1525_s7 + $0x158] sm:$0xf0]  ;;  %v1036_v11 = vor.u32 %v1214_v1, %v1033_v3  ;;  %v1196_v13 = vld [vmem:[%s1525_s7 + $0x44] sm:$0xf] }
  0x41   : > { %673 = vmatpush.bf16.msra.mxu0 %v928_v32  ;;  %v1246_v8 = vld [vmem:[%s1525_s7 + $0x1d4] sm:$0xf]  ;;  %v1161_v9 = vld [vmem:[%s1525_s7 + $0x1d8] sm:$0xf0]  ;;  %v1100_v12 = vor.u32 %v1230_v4, %v1097_v5  ;;  %v961_v14 = vld [vmem:[%s1525_s7 + $0x48] sm:$0xf0] }
  0x42   : > { %686 = vmatpush.bf16.msra.mxu1 %v992_v37  ;;  %v1654_v6 = vpack.c.b16 %v334_v59, %v334_v59  ;;  %v1656_v7 = vpack.c.b16 %v335_v60, %v335_v60  ;;  %v1212_v15 = vld [vmem:[%s1525_s7 + $0xc4] sm:$0xf]  ;;  %v1164_v16 = vor.u32 %v1246_v8, %v1161_v9  ;;  %v1025_v17 = vld [vmem:[%s1525_s7 + $0xc8] sm:$0xf0]  ;;  %v964_v22 = vor.u32 %v1196_v13, %v961_v14  ;;  %v1194_v25 = vld [vmem:[%s1525_s7 + $0x34] sm:$0xf] }
  0x43   : > { %699 = vmatpush.bf16.msra.mxu2 %v1056_v38  ;;  %v1228_v18 = vld [vmem:[%s1525_s7 + $0x144] sm:$0xf]  ;;  %v1089_v19 = vld [vmem:[%s1525_s7 + $0x148] sm:$0xf0]  ;;  %v1028_v23 = vor.u32 %v1212_v15, %v1025_v17  ;;  %v953_v26 = vld [vmem:[%s1525_s7 + $0x38] sm:$0xf0] }
  0x44   : > { %712 = vmatpush.bf16.msra.mxu3 %v1120_v42  ;;  %674 = vmatmul.bf16.vlgmr.msra.gmra.mxu0 %v1654_v6  ;;  %v1244_v20 = vld [vmem:[%s1525_s7 + $0x1c4] sm:$0xf]  ;;  %v1153_v21 = vld [vmem:[%s1525_s7 + $0x1c8] sm:$0xf0]  ;;  %v1092_v24 = vor.u32 %v1228_v18, %v1089_v19  ;;  %v1210_v27 = vld [vmem:[%s1525_s7 + $0xb4] sm:$0xf]  ;;  %v956_v34 = vor.u32 %v1194_v25, %v953_v26 }
  0x45   : > { %718 = vmatpush.bf16.msrb.mxu0 %v988_v43  ;;  %687 = vmatmul.bf16.vlgmr.msra.gmra.mxu1 %v1656_v7  ;;  %v1156_v28 = vor.u32 %v1244_v20, %v1153_v21  ;;  %v1017_v29 = vld [vmem:[%s1525_s7 + $0xb8] sm:$0xf0]  ;;  %v1226_v30 = vld [vmem:[%s1525_s7 + $0x134] sm:$0xf]  ;;  %v1192_v37 = vld [vmem:[%s1525_s7 + $0x24] sm:$0xf] }
  0x46   : > { %731 = vmatpush.bf16.msrb.mxu1 %v1052_v44  ;;  %700 = vmatmul.bf16.vlgmr.msra.gmra.mxu2 %v1640_v53  ;;  %v1081_v31 = vld [vmem:[%s1525_s7 + $0x138] sm:$0xf0]  ;;  %v1242_v32 = vld [vmem:[%s1525_s7 + $0x1b4] sm:$0xf]  ;;  %v1020_v35 = vor.u32 %v1210_v27, %v1017_v29  ;;  %v945_v38 = vld [vmem:[%s1525_s7 + $0x28] sm:$0xf0] }
  0x47   : > { %744 = vmatpush.bf16.msrb.mxu2 %v1116_v45  ;;  %713 = vmatmul.bf16.vlgmr.msra.gmra.mxu3 %v1644_v56  ;;  %v1145_v33 = vld [vmem:[%s1525_s7 + $0x1b8] sm:$0xf0]  ;;  %v1084_v36 = vor.u32 %v1226_v30, %v1081_v31  ;;  %v1208_v39 = vld [vmem:[%s1525_s7 + $0xa4] sm:$0xf]  ;;  %v1009_v41 = vld [vmem:[%s1525_s7 + $0xa8] sm:$0xf0]  ;;  %v948_v46 = vor.u32 %v1192_v37, %v945_v38 }
  0x48   : > { %757 = vmatpush.bf16.msrb.mxu3 %v1180_v49  ;;  %v1148_v40 = vor.u32 %v1242_v32, %v1145_v33  ;;  %v1224_v42 = vld [vmem:[%s1525_s7 + $0x124] sm:$0xf]  ;;  %v1073_v43 = vld [vmem:[%s1525_s7 + $0x128] sm:$0xf0]  ;;  %v1012_v47 = vor.u32 %v1208_v39, %v1009_v41  ;;  %v1190_v49 = vld [vmem:[%s1525_s7 + $0x14] sm:$0xf] }
  0x49   : > { %719 = vmatpush.bf16.msrb.mxu0 %v980_v58  ;;  %v1240_v44 = vld [vmem:[%s1525_s7 + $0x1a4] sm:$0xf]  ;;  %v1137_v45 = vld [vmem:[%s1525_s7 + $0x1a8] sm:$0xf0]  ;;  %v1076_v48 = vor.u32 %v1224_v42, %v1073_v43  ;;  %v937_v50 = vld [vmem:[%s1525_s7 + $0x18] sm:$0xf0] }
  0x4a   : > { %732 = vmatpush.bf16.msrb.mxu1 %v1044_v61  ;;  %v1206_v51 = vld [vmem:[%s1525_s7 + $0x94] sm:$0xf]  ;;  %v1140_v52 = vor.u32 %v1240_v44, %v1137_v45  ;;  %v1001_v54 = vld [vmem:[%s1525_s7 + $0x98] sm:$0xf0]  ;;  %v940_v60 = vor.u32 %v1190_v49, %v937_v50  ;;  %v1188_v63 = vld [vmem:[%s1525_s7 + $0x4] sm:$0xf] }
  0x4b   : > { %745 = vmatpush.bf16.msrb.mxu2 %v1108_v62  ;;  %v1222_v55 = vld [vmem:[%s1525_s7 + $0x114] sm:$0xf]  ;;  %v1065_v57 = vld [vmem:[%s1525_s7 + $0x118] sm:$0xf0]  ;;  %v1004_v61 = vor.u32 %v1206_v51, %v1001_v54  ;;  %v929_v0 = vld [vmem:[%s1525_s7 + $0x8] sm:$0xf0] }
  0x4c   : > { %758 = vmatpush.bf16.msrb.mxu3 %v1172_v2  ;;  %v1238_v58 = vld [vmem:[%s1525_s7 + $0x194] sm:$0xf]  ;;  %v1129_v59 = vld [vmem:[%s1525_s7 + $0x198] sm:$0xf0]  ;;  %v1068_v62 = vor.u32 %v1222_v55, %v1065_v57  ;;  %v1204_v1 = vld [vmem:[%s1525_s7 + $0x84] sm:$0xf] }
  0x4d   : > { %720 = vmatpush.bf16.msrb.mxu0 %v972_v10  ;;  %v1132_v2 = vor.u32 %v1238_v58, %v1129_v59  ;;  %v993_v3 = vld [vmem:[%s1525_s7 + $0x88] sm:$0xf0]  ;;  %v1220_v4 = vld [vmem:[%s1525_s7 + $0x104] sm:$0xf]  ;;  %v932_v10 = vor.u32 %v1188_v63, %v929_v0 }
  0x4e   : > { %733 = vmatpush.bf16.msrb.mxu1 %v1036_v11  ;;  %v1057_v5 = vld [vmem:[%s1525_s7 + $0x108] sm:$0xf0]  ;;  %v1236_v8 = vld [vmem:[%s1525_s7 + $0x184] sm:$0xf]  ;;  %v996_v11 = vor.u32 %v1204_v1, %v993_v3 }
  0x4f   : > { %746 = vmatpush.bf16.msrb.mxu2 %v1100_v12  ;;  %v1121_v9 = vld [vmem:[%s1525_s7 + $0x188] sm:$0xf0]  ;;  %v1060_v12 = vor.u32 %v1220_v4, %v1057_v5 }
  0x50   : > { %759 = vmatpush.bf16.msrb.mxu3 %v1164_v16  ;;  %v1124_v13 = vor.u32 %v1236_v8, %v1121_v9 }
  0x51   : > { %721 = vmatpush.bf16.msrb.mxu0 %v964_v22 }
  0x52   : > { %734 = vmatpush.bf16.msrb.mxu1 %v1028_v23 }
  0x53   : > { %747 = vmatpush.bf16.msrb.mxu2 %v1092_v24 }
  0x54   : > { %760 = vmatpush.bf16.msrb.mxu3 %v1156_v28 }
  0x55   : > { %722 = vmatpush.bf16.msrb.mxu0 %v956_v34 }
  0x56   : > { %735 = vmatpush.bf16.msrb.mxu1 %v1020_v35 }
  0x57   : > { %748 = vmatpush.bf16.msrb.mxu2 %v1084_v36 }
  0x58   : > { %761 = vmatpush.bf16.msrb.mxu3 %v1148_v40 }
  0x59   : > { %723 = vmatpush.bf16.msrb.mxu0 %v948_v46 }
  0x5a   : > { %736 = vmatpush.bf16.msrb.mxu1 %v1012_v47 }
  0x5b   : > { %749 = vmatpush.bf16.msrb.mxu2 %v1076_v48 }
  0x5c   : > { %762 = vmatpush.bf16.msrb.mxu3 %v1140_v52 }
  0x5d   : > { %724 = vmatpush.bf16.msrb.mxu0 %v940_v60 }
  0x5e   : > { %737 = vmatpush.bf16.msrb.mxu1 %v1004_v61 }
  0x5f   : > { %750 = vmatpush.bf16.msrb.mxu2 %v1068_v62 }
  0x60   : > { %763 = vmatpush.bf16.msrb.mxu3 %v1132_v2 }
  0x61   : > { %725 = vmatpush.bf16.msrb.mxu0 %v932_v10 }
  0x62   : > { %738 = vmatpush.bf16.msrb.mxu1 %v996_v11 }
  0x63   : > { %751 = vmatpush.bf16.msrb.mxu2 %v1060_v12 }
  0x64   : > { %764 = vmatpush.bf16.msrb.mxu3 %v1124_v13  ;;  %726 = vmatmul.bf16.vlgmr.msrb.gmra.mxu0 %v1654_v6 }
  0x65   : > { %739 = vmatmul.bf16.vlgmr.msrb.gmra.mxu1 %v1656_v7 }
  0x66   : > { %752 = vmatmul.bf16.vlgmr.msrb.gmra.mxu2 %v1640_v53 }
  0x67   : > { %765 = vmatmul.bf16.vlgmr.msrb.gmra.mxu3 %v1644_v56 }
  0xc1   : > { %v675_v15 = vpop.f32.mrf.mxu0 }
  0xc2   : > { %v688_v14 = vpop.f32.mrf.mxu1 }
  0xc3   : > { %v689_v16 = vadd.f32 %v688_v14, %v675_v15 }
  0xc9   : > { %v701_v17 = vpop.f32.mrf.mxu2  ;;  %v677_v22 = vpop.f32.mrf.mxu0 }
  0xca   : > { %v702_v18 = vadd.f32 %v701_v17, %v689_v16  ;;  %v714_v19 = vpop.f32.mrf.mxu3  ;;  %v690_v21 = vpop.f32.mrf.mxu1 }
  0xcc   : > { %v715_v20 = vadd.f32 %v714_v19, %v702_v18 }
  0xd1   : > { %v703_v23 = vpop.f32.mrf.mxu2 }
  0xd2   : > { %v716_v24 = vpop.f32.mrf.mxu3 }
  0xe1   : > { %v727_v25 = vpop.f32.mrf.mxu0 }
  0xe2   : > { %v740_v26 = vpop.f32.mrf.mxu1 }
  0xe3   : > { %v741_v6 = vadd.f32 %v740_v26, %v727_v25 }
  0xe9   : > { %v753_v27 = vpop.f32.mrf.mxu2  ;;  %v729_v53 = vpop.f32.mrf.mxu0 }
  0xea   : > { %v754_v7 = vadd.f32 %v753_v27, %v741_v6  ;;  %v766_v28 = vpop.f32.mrf.mxu3  ;;  %v742_v29 = vpop.f32.mrf.mxu1 }
  0xec   : > { %v767_v56 = vadd.f32 %v766_v28, %v754_v7 }
  0xee   : > { %773 = sbr.rel (%p1181_p2) target bundleno = 245 (0xf5), region = 40 }
  0xf1   : > { %v755_v30 = vpop.f32.mrf.mxu2 }
  0xf2   : > { %v768_v31 = vpop.f32.mrf.mxu3 }
  0xf3   : > { %774 = vst [vmem:[%s1540_s9] sm:$0xff] %v715_v20 }
  0xf4   : > { %775 = vst [vmem:[%s1540_s9 + $0x8] sm:$0xff] %v767_v56 }
  0xf5 PF: > { %p1182_p3 = scmp.le.s32.totalorder %s1405_s15, 0 }
  0xf7   : > { %779 = sbr.rel (%p1182_p3) target bundleno = 257 (0x101), region = 44 }
  0xfc   : > { %v780_v32 = vld [vmem:[%s1540_s9] sm:$0xff]  ;;  %v781_v33 = vld [vmem:[%s1540_s9 + $0x8] sm:$0xff] }
  0xfd   : > { %v782_v34 = vadd.f32 %v780_v32, %v715_v20  ;;  %v783_v35 = vadd.f32 %v781_v33, %v767_v56 }
  0xff   : > { %784 = vst [vmem:[%s1540_s9] sm:$0xff] %v782_v34 }
 0x100   : > { %785 = vst [vmem:[%s1540_s9 + $0x8] sm:$0xff] %v783_v35 }
 0x101 PF: > { %p1183_p4 = scmp.ne.s32.totalorder %s1405_s15, 7 }
 0x103   : > { %789 = sbr.rel (%p1183_p4) target bundleno = 274 (0x112), region = 48 }
 0x108   : > { %v790_v36 = vld [vmem:[%s1540_s9] sm:$0xff]  ;;  %v791_v38 = vld [vmem:[%s1540_s9 + $0x8] sm:$0xff] }
 0x109   : > { %v792_v37 = vld [vmem:[%s1749_s2] sm:$0x3] }
 0x10a   : > { %v794_v39 = vperm.slane %v792_v37, 0  ;;  %v795_v40 = vperm.slane %v792_v37, 1 }
 0x10c   : > { %v798_v41 = vadd.f32 %v794_v39, %v790_v36  ;;  %v799_v42 = vadd.f32 %v795_v40, %v791_v38 }
 0x10e   : > { %v800_v43 = vmax.f32 %v798_v41, 0.0  ;;  %v801_v44 = vmax.f32 %v799_v42, 0.0 }
 0x110   : > { %802 = vst [vmem:[%s1540_s9] sm:$0xff] %v800_v43 }
 0x111   : > { %803 = vst [vmem:[%s1540_s9 + $0x8] sm:$0xff] %v801_v44 }
 0x112 PF: > { %s16_s19 = sadd.s32 1, %s1421_s19   ;;  %s1754_s12 = smov %s1397_s13 }
 0x113   : > { %p13_p5 = scmp.ge.s32.totalorder %s16_s19, 34   ;;  %s1755_s13 = smov %s1401_s14 }
 0x114   : > { %s1756_s14 = smov %s1512_s5  ;;  %s1757_s15 = smov %s1413_s17 }
 0x115   : > { %s1758_s16 = smov %s1417_s18  ;;  %s1759_s17 = smov %s1762_s21 }
 0x116   : > { %s1760_s18 = smov %s1766_s22  ;;  %15 = sbr.rel (!%p13_p5) target bundleno = 5 (0x5), region = 87 }
 0x11b   :  { %828 = vsyncpa [#allocation3], 1 }
 0x11c   :  { %830 = vsyncpa [#allocation3 + $0x1], 1 }

// kernel: forward_pallas.23
= control target key start
LH: loop header
LB: loop body
LE: loop exit
PB: predicated region body
PF: predicated region fallthrough
CT: control target
= control target key end

     0   :  { %s1333_s12 = smov 0   ;;  %s1335_s13 = smov 0   ;;  %s1647_s0 = inlined_call_operand.vmem [shape: bf16[32,2304], index: 0, kind: input, shape index: {}]   ;;  %s1648_s1 = inlined_call_operand.vmem [shape: bf16[1,2304,256], index: 1, kind: input, shape index: {}]   ;;  %s1649_s2 = inlined_call_operand.vmem [shape: f32[1,256], index: 2, kind: input, shape index: {}]   ;;  %s1650_s3 = inlined_call_operand.vmem [shape: f32[32,256], index: 3, kind: output, shape index: {}]  }
   0x1   :  { %s1337_s14 = smov 0   ;;  %s1339_s15 = smov 0  }
   0x2   :  { %s1341_s16 = smov 0  }
   0x3 LB: > { %s25_s17 = sadd.s32 1, %s1307_s15  ;;  %p50_p1 = scmp.ne.s32.totalorder %s1299_s13, %s1295_s12  ;;  %s1311_s16 = sphi %s1341_s16, %s13_s16   ;;  %s1307_s15 = sphi %s1339_s15, %s1654_s15   ;;  %s1303_s14 = sphi %s1337_s14, %s1653_s14   ;;  %s1299_s13 = sphi %s1335_s13, %s1652_s13   ;;  %s1295_s12 = sphi %s1333_s12, %s1651_s12  }
   0x4   : > { %p26_p0 = scmp.ge.s32.totalorder %s25_s17, 6  ;;  %p51_p2 = scmp.eq.s32.totalorder %s1311_s16, 0 }
   0x5   : > { %s43_s19 = sadd.s32 1, %s1299_s13  ;;  %p923_p5 = scmp.ge.s32.totalorder %s1311_s16, 6 }
   0x6   : > { %s1656_s17 = smov (%p26_p0, %s25_s17), 0  ;;  %p52_p3 = por %p51_p2, %p50_p1 }
   0x7   : > { %s39_s18 = ssub.s32 %s1307_s15, %s1656_s17  ;;  %156 = sbr.rel (%p923_p5) target bundleno = 25 (0x19), region = 20 }
   0x8   : > { %p41_p4 = scmp.eq.s32.totalorder %s39_s18, 0 }
   0xa   : > { %s1368_s20 = scalar_select %p41_p4, %s1299_s13, %s43_s19  }
   0xc   : > { %159 = sbr.rel (!%p52_p3) target bundleno = 25 (0x19), region = 24  ;;  %s161_s21 = sand.u32 (%p52_p3), 1, %s1299_s13  }
   0xd   : > { %s1159_s22 = smul.u32 (%p52_p3), 12, %s1307_s15 }
   0xe   : > { %s1231_s23 = smul.u32 (%p52_p3), 48, %s161_s21 }
   0xf   : > { %s170_s26 = scalar_lea.vmem (%p52_p3), %s1647_s0, %s1159_s22 }
  0x10   : > { %v185_v0 = vld [vmem:[%s170_s26] sm:$0xff] (%p52_p3)  ;;  %v187_v1 = vld [vmem:[%s170_s26 + $0x48] sm:$0xff] (%p52_p3)  ;;  %v189_v2 = vld [vmem:[%s170_s26 + $0x90] sm:$0xff] (%p52_p3)  ;;  %s163_s27 = scalar_lea.vmem (%p52_p3), [#allocation2], %s1231_s23 }
  0x11   : > { %186 = vst [vmem:[%s163_s27] sm:$0xff] %v185_v0  ;;  %v191_v3 = vld [vmem:[%s170_s26 + $0xd8] sm:$0xff]  ;;  %v925_v4 = vld [vmem:[%s170_s26 + $0x8] sm:$0xf]  ;;  %v927_v5 = vld [vmem:[%s170_s26 + $0x50] sm:$0xf] }
  0x12   : > { %188 = vst [vmem:[%s163_s27 + $0xc] sm:$0xff] %v187_v1  ;;  %v929_v6 = vld [vmem:[%s170_s26 + $0x98] sm:$0xf]  ;;  %v931_v7 = vld [vmem:[%s170_s26 + $0xe0] sm:$0xf] }
  0x13   : > { %190 = vst [vmem:[%s163_s27 + $0x18] sm:$0xff] %v189_v2 }
  0x14   : > { %192 = vst [vmem:[%s163_s27 + $0x24] sm:$0xff] %v191_v3 }
  0x15   : > { %926 = vst [vmem:[%s163_s27 + $0x8] sm:$0xf] %v925_v4 }
  0x16   : > { %928 = vst [vmem:[%s163_s27 + $0x14] sm:$0xf] %v927_v5 }
  0x17   : > { %930 = vst [vmem:[%s163_s27 + $0x20] sm:$0xf] %v929_v6 }
  0x18   : > { %932 = vst [vmem:[%s163_s27 + $0x2c] sm:$0xf] %v931_v7 }
  0x19 PF: > { %p933_p6 = scmp.ge.s32.totalorder %s1311_s16, 1  ;;  %p227_p7 = scmp.lt.s32.totalorder %s1311_s16, 7 }
  0x1b   : > { %p228_p8 = pnand %p933_p6, %p227_p7 }
  0x1c   : > { %s272_s28 = smul.u32 (!%p228_p8), 48, %s1303_s14  ;;  %s234_s6 = sand.u32 (!%p228_p8), 1, %s1295_s12  }
  0x1d   : > { %231 = sbr.rel (%p228_p8) target bundleno = 297 (0x129), region = 54  ;;  %p1152_p10 = scmp.ne.s32.totalorder (!%p228_p8), %s1303_s14, 0 }
  0x1e   : > { %p275_p9 = scmp.lt.s32.totalorder (!%p228_p8), %s272_s28, 287  ;;  %s1433_s7 = smul.u32 (!%p228_p8), 48, %s234_s6 }
  0x20   : > { %s1452_s8 = scalar_lea.vmem (!%p228_p8), [#allocation2], %s1433_s7 }
  0x22   : > { %s1658_s28 = smov (!%p275_p9, %s272_s28), 287 }
  0x23   : > { %s1160_s29 = sshll.u32 %s1658_s28, 3 }
  0x24   : > { %s1382_s5 = scalar_lea.vmem %s1648_s1, %s1160_s29 }
  0x25   : > { %v1018_v8 = vld [vmem:[%s1382_s5 + $0x70] sm:$0xf]  ;;  %v1182_v9 = vld [vmem:[%s1382_s5 + $0x74] sm:$0xf0]  ;;  %v1181_v17 = vld [vmem:[%s1382_s5 + $0x74] sm:$0xf] }
  0x26   : > { %v1082_v10 = vld [vmem:[%s1382_s5 + $0xf0] sm:$0xf]  ;;  %v1019_v11 = vor.u32 %v1182_v9, %v1018_v8  ;;  %v1198_v12 = vld [vmem:[%s1382_s5 + $0xf4] sm:$0xf0]  ;;  %v1020_v18 = vld [vmem:[%s1382_s5 + $0x78] sm:$0xf0] }
  0x27   : > { %v1146_v13 = vld [vmem:[%s1382_s5 + $0x170] sm:$0xf]  ;;  %v1214_v14 = vld [vmem:[%s1382_s5 + $0x174] sm:$0xf0]  ;;  %v1083_v15 = vor.u32 %v1198_v12, %v1082_v10  ;;  %v1010_v19 = vld [vmem:[%s1382_s5 + $0x60] sm:$0xf]  ;;  %v1023_v20 = vor.u32 %v1181_v17, %v1020_v18 }
  0x28   : > { %v1147_v16 = vor.u32 %v1214_v14, %v1146_v13  ;;  %620 = vmatpush.bf16.msra.mxu0 %v1019_v11  ;;  %v1180_v21 = vld [vmem:[%s1382_s5 + $0x64] sm:$0xf0]  ;;  %v1074_v22 = vld [vmem:[%s1382_s5 + $0xe0] sm:$0xf]  ;;  %v1179_v28 = vld [vmem:[%s1382_s5 + $0x64] sm:$0xf] }
  0x29   : > { %v1196_v23 = vld [vmem:[%s1382_s5 + $0xe4] sm:$0xf0]  ;;  %639 = vmatpush.bf16.msra.mxu1 %v1083_v15  ;;  %v1011_v24 = vor.u32 %v1180_v21, %v1010_v19  ;;  %v1138_v26 = vld [vmem:[%s1382_s5 + $0x160] sm:$0xf]  ;;  %677 = vmatpush.bf16.msra.mxu3 %v1023_v20  ;;  %v1012_v30 = vld [vmem:[%s1382_s5 + $0x68] sm:$0xf0] }
  0x2a   : > { %658 = vmatpush.bf16.msra.mxu2 %v1147_v16  ;;  %v1075_v25 = vor.u32 %v1196_v23, %v1074_v22  ;;  %v1212_v27 = vld [vmem:[%s1382_s5 + $0x164] sm:$0xf0]  ;;  %v1002_v31 = vld [vmem:[%s1382_s5 + $0x50] sm:$0xf]  ;;  %v1178_v32 = vld [vmem:[%s1382_s5 + $0x54] sm:$0xf0]  ;;  %v1015_v33 = vor.u32 %v1179_v28, %v1012_v30 }
  0x2b   : > { %v1139_v29 = vor.u32 %v1212_v27, %v1138_v26  ;;  %v1066_v34 = vld [vmem:[%s1382_s5 + $0xd0] sm:$0xf]  ;;  %v1194_v35 = vld [vmem:[%s1382_s5 + $0xd4] sm:$0xf0]  ;;  %v1003_v37 = vor.u32 %v1178_v32, %v1002_v31  ;;  %v1177_v39 = vld [vmem:[%s1382_s5 + $0x54] sm:$0xf] }
  0x2c   : > { %v1130_v36 = vld [vmem:[%s1382_s5 + $0x150] sm:$0xf]  ;;  %621 = vmatpush.bf16.msra.mxu0 %v1011_v24  ;;  %v1210_v38 = vld [vmem:[%s1382_s5 + $0x154] sm:$0xf0]  ;;  %v1004_v40 = vld [vmem:[%s1382_s5 + $0x58] sm:$0xf0]  ;;  %v1067_v41 = vor.u32 %v1194_v35, %v1066_v34 }
  0x2d   : > { %640 = vmatpush.bf16.msra.mxu1 %v1075_v25  ;;  %v1131_v42 = vor.u32 %v1210_v38, %v1130_v36  ;;  %v994_v43 = vld [vmem:[%s1382_s5 + $0x40] sm:$0xf]  ;;  %v1176_v44 = vld [vmem:[%s1382_s5 + $0x44] sm:$0xf0]  ;;  %678 = vmatpush.bf16.msra.mxu3 %v1015_v33  ;;  %v1007_v46 = vor.u32 %v1177_v39, %v1004_v40  ;;  %v1175_v50 = vld [vmem:[%s1382_s5 + $0x44] sm:$0xf] }
  0x2e   : > { %659 = vmatpush.bf16.msra.mxu2 %v1139_v29  ;;  %v1058_v45 = vld [vmem:[%s1382_s5 + $0xc0] sm:$0xf]  ;;  %v1192_v47 = vld [vmem:[%s1382_s5 + $0xc4] sm:$0xf0]  ;;  %v996_v51 = vld [vmem:[%s1382_s5 + $0x48] sm:$0xf0]  ;;  %v995_v52 = vor.u32 %v1176_v44, %v994_v43 }
  0x2f   : > { %v1122_v48 = vld [vmem:[%s1382_s5 + $0x140] sm:$0xf]  ;;  %v1208_v49 = vld [vmem:[%s1382_s5 + $0x144] sm:$0xf0]  ;;  %v1059_v53 = vor.u32 %v1192_v47, %v1058_v45  ;;  %v986_v55 = vld [vmem:[%s1382_s5 + $0x30] sm:$0xf]  ;;  %v999_v58 = vor.u32 %v1175_v50, %v996_v51 }
  0x30   : > { %622 = vmatpush.bf16.msra.mxu0 %v1003_v37  ;;  %v1123_v54 = vor.u32 %v1208_v49, %v1122_v48  ;;  %v1174_v56 = vld [vmem:[%s1382_s5 + $0x34] sm:$0xf0]  ;;  %v1050_v57 = vld [vmem:[%s1382_s5 + $0xb0] sm:$0xf]  ;;  %v1173_v62 = vld [vmem:[%s1382_s5 + $0x34] sm:$0xf] }
  0x31   : > { %641 = vmatpush.bf16.msra.mxu1 %v1067_v41  ;;  %679 = vmatpush.bf16.msra.mxu3 %v1007_v46  ;;  %v1190_v59 = vld [vmem:[%s1382_s5 + $0xb4] sm:$0xf0]  ;;  %v1114_v60 = vld [vmem:[%s1382_s5 + $0x130] sm:$0xf]  ;;  %v988_v63 = vld [vmem:[%s1382_s5 + $0x38] sm:$0xf0]  ;;  %v987_v0 = vor.u32 %v1174_v56, %v986_v55 }
  0x32   : > { %660 = vmatpush.bf16.msra.mxu2 %v1131_v42  ;;  %v1206_v61 = vld [vmem:[%s1382_s5 + $0x134] sm:$0xf0]  ;;  %v1051_v1 = vor.u32 %v1190_v59, %v1050_v57  ;;  %v978_v3 = vld [vmem:[%s1382_s5 + $0x20] sm:$0xf]  ;;  %v1172_v4 = vld [vmem:[%s1382_s5 + $0x24] sm:$0xf0]  ;;  %v991_v6 = vor.u32 %v1173_v62, %v988_v63 }
  0x33   : > { %v1115_v2 = vor.u32 %v1206_v61, %v1114_v60  ;;  %v1042_v5 = vld [vmem:[%s1382_s5 + $0xa0] sm:$0xf]  ;;  %v1188_v7 = vld [vmem:[%s1382_s5 + $0xa4] sm:$0xf0]  ;;  %v1171_v10 = vld [vmem:[%s1382_s5 + $0x24] sm:$0xf]  ;;  %v979_v12 = vor.u32 %v1172_v4, %v978_v3 }
  0x34   : > { %623 = vmatpush.bf16.msra.mxu0 %v995_v52  ;;  %v1106_v8 = vld [vmem:[%s1382_s5 + $0x120] sm:$0xf]  ;;  %v1204_v9 = vld [vmem:[%s1382_s5 + $0x124] sm:$0xf0]  ;;  %v980_v11 = vld [vmem:[%s1382_s5 + $0x28] sm:$0xf0]  ;;  %v1043_v13 = vor.u32 %v1188_v7, %v1042_v5 }
  0x35   : > { %642 = vmatpush.bf16.msra.mxu1 %v1059_v53  ;;  %680 = vmatpush.bf16.msra.mxu3 %v999_v58  ;;  %v1107_v14 = vor.u32 %v1204_v9, %v1106_v8  ;;  %v970_v15 = vld [vmem:[%s1382_s5 + $0x10] sm:$0xf]  ;;  %v1170_v16 = vld [vmem:[%s1382_s5 + $0x14] sm:$0xf0]  ;;  %v983_v18 = vor.u32 %v1171_v10, %v980_v11  ;;  %v1169_v22 = vld [vmem:[%s1382_s5 + $0x14] sm:$0xf] }
  0x36   : > { %661 = vmatpush.bf16.msra.mxu2 %v1123_v54  ;;  %v1034_v17 = vld [vmem:[%s1382_s5 + $0x90] sm:$0xf]  ;;  %v1186_v19 = vld [vmem:[%s1382_s5 + $0x94] sm:$0xf0]  ;;  %v972_v23 = vld [vmem:[%s1382_s5 + $0x18] sm:$0xf0]  ;;  %v971_v24 = vor.u32 %v1170_v16, %v970_v15 }
  0x37   : > { %v1098_v20 = vld [vmem:[%s1382_s5 + $0x110] sm:$0xf]  ;;  %v1202_v21 = vld [vmem:[%s1382_s5 + $0x114] sm:$0xf0]  ;;  %v962_v25 = vld [vmem:[%s1382_s5] sm:$0xf]  ;;  %v1035_v28 = vor.u32 %v1186_v19, %v1034_v17  ;;  %v975_v33 = vor.u32 %v1169_v22, %v972_v23 }
  0x38   : > { %624 = vmatpush.bf16.msra.mxu0 %v987_v0  ;;  %v1168_v26 = vld [vmem:[%s1382_s5 + $0x4] sm:$0xf0]  ;;  %v1026_v27 = vld [vmem:[%s1382_s5 + $0x80] sm:$0xf]  ;;  %v1099_v29 = vor.u32 %v1202_v21, %v1098_v20  ;;  %v1167_v34 = vld [vmem:[%s1382_s5 + $0x4] sm:$0xf] }
  0x39   : > { %643 = vmatpush.bf16.msra.mxu1 %v1051_v1  ;;  %681 = vmatpush.bf16.msra.mxu3 %v991_v6  ;;  %v1184_v30 = vld [vmem:[%s1382_s5 + $0x84] sm:$0xf0]  ;;  %v1090_v31 = vld [vmem:[%s1382_s5 + $0x100] sm:$0xf]  ;;  %v964_v35 = vld [vmem:[%s1382_s5 + $0x8] sm:$0xf0]  ;;  %v963_v40 = vor.u32 %v1168_v26, %v962_v25 }
  0x3a   : > { %662 = vmatpush.bf16.msra.mxu2 %v1115_v2  ;;  %v1200_v32 = vld [vmem:[%s1382_s5 + $0x104] sm:$0xf0]  ;;  %v938_v36 = vld [vmem:[%s1452_s8] sm:$0xf]  ;;  %v1162_v37 = vld [vmem:[%s1452_s8 + $0x8] sm:$0xf0]  ;;  %v1027_v44 = vor.u32 %v1184_v30, %v1026_v27  ;;  %v967_v49 = vor.u32 %v1167_v34, %v964_v35 }
  0x3b   : > { %v1197_v38 = vld [vmem:[%s1382_s5 + $0xf4] sm:$0xf]  ;;  %v1084_v39 = vld [vmem:[%s1382_s5 + $0xf8] sm:$0xf0]  ;;  %v1091_v45 = vor.u32 %v1200_v32, %v1090_v31  ;;  %v940_v46 = vld [vmem:[%s1452_s8 + $0xc] sm:$0xf0]  ;;  %v939_v51 = vor.u32 %v1162_v37, %v938_v36 }
  0x3c   : > { %625 = vmatpush.bf16.msra.mxu0 %v979_v12  ;;  %v1161_v41 = vld [vmem:[%s1452_s8 + $0x4] sm:$0xf]  ;;  %v1148_v43 = vld [vmem:[%s1382_s5 + $0x178] sm:$0xf0]  ;;  %v946_v47 = vld [vmem:[%s1452_s8 + $0x8] sm:$0xf]  ;;  %v1087_v50 = vor.u32 %v1197_v38, %v1084_v39 }
  0x3d   : > { %644 = vmatpush.bf16.msra.mxu1 %v1043_v13  ;;  %682 = vmatpush.bf16.msra.mxu3 %v983_v18  ;;  %v1213_v42 = vld [vmem:[%s1382_s5 + $0x174] sm:$0xf]  ;;  %v1195_v53 = vld [vmem:[%s1382_s5 + $0xe4] sm:$0xf]  ;;  %v1076_v54 = vld [vmem:[%s1382_s5 + $0xe8] sm:$0xf0]  ;;  %v1466_v55 = vor.u32 %v1161_v41, %v940_v46 }
  0x3e   : > { %663 = vmatpush.bf16.msra.mxu2 %v1107_v14  ;;  %v1163_v48 = vld [vmem:[%s1452_s8 + $0x10] sm:$0xf0]  ;;  %v1151_v52 = vor.u32 %v1213_v42, %v1148_v43  ;;  %v1140_v58 = vld [vmem:[%s1382_s5 + $0x168] sm:$0xf0]  ;;  %v1079_v59 = vor.u32 %v1195_v53, %v1076_v54  ;;  %v1068_v62 = vld [vmem:[%s1382_s5 + $0xd8] sm:$0xf0] }
  0x3f   : > { %v1468_v56 = vor.u32 %v1163_v48, %v946_v47  ;;  %v1211_v57 = vld [vmem:[%s1382_s5 + $0x164] sm:$0xf]  ;;  %v1193_v61 = vld [vmem:[%s1382_s5 + $0xd4] sm:$0xf]  ;;  %v1132_v0 = vld [vmem:[%s1382_s5 + $0x158] sm:$0xf0] }
  0x40   : > { %626 = vmatpush.bf16.msra.mxu0 %v971_v24  ;;  %v1143_v60 = vor.u32 %v1211_v57, %v1140_v58  ;;  %v1209_v63 = vld [vmem:[%s1382_s5 + $0x154] sm:$0xf]  ;;  %v1071_v1 = vor.u32 %v1193_v61, %v1068_v62  ;;  %v1191_v3 = vld [vmem:[%s1382_s5 + $0xc4] sm:$0xf]  ;;  %v1060_v4 = vld [vmem:[%s1382_s5 + $0xc8] sm:$0xf0] }
  0x41   : > { %645 = vmatpush.bf16.msra.mxu1 %v1035_v28  ;;  %683 = vmatpush.bf16.msra.mxu3 %v975_v33  ;;  %v1135_v2 = vor.u32 %v1209_v63, %v1132_v0  ;;  %v1207_v5 = vld [vmem:[%s1382_s5 + $0x144] sm:$0xf]  ;;  %v1124_v6 = vld [vmem:[%s1382_s5 + $0x148] sm:$0xf0]  ;;  %v1063_v7 = vor.u32 %v1191_v3, %v1060_v4  ;;  %v950_v8 = vld [vmem:[%s1452_s8 + $0x18] sm:$0xf] }
  0x42   : > { %664 = vmatpush.bf16.msra.mxu2 %v1099_v29  ;;  %v1127_v9 = vor.u32 %v1207_v5, %v1124_v6  ;;  %v1165_v10 = vld [vmem:[%s1452_s8 + $0x20] sm:$0xf0]  ;;  %v1052_v12 = vld [vmem:[%s1382_s5 + $0xb8] sm:$0xf0]  ;;  %v952_v16 = vld [vmem:[%s1452_s8 + $0x24] sm:$0xf0] }
  0x43   : > { %v1189_v11 = vld [vmem:[%s1382_s5 + $0xb4] sm:$0xf]  ;;  %v1164_v13 = vld [vmem:[%s1452_s8 + $0x1c] sm:$0xf]  ;;  %v958_v17 = vld [vmem:[%s1452_s8 + $0x20] sm:$0xf]  ;;  %v951_v20 = vor.u32 %v1165_v10, %v950_v8 }
  0x44   : > { %627 = vmatpush.bf16.msra.mxu0 %v963_v40  ;;  %v1205_v14 = vld [vmem:[%s1382_s5 + $0x134] sm:$0xf]  ;;  %v1116_v15 = vld [vmem:[%s1382_s5 + $0x138] sm:$0xf0]  ;;  %v1055_v19 = vor.u32 %v1189_v11, %v1052_v12  ;;  %v1187_v22 = vld [vmem:[%s1382_s5 + $0xa4] sm:$0xf]  ;;  %v955_v24 = vor.u32 %v1164_v13, %v952_v16 }
  0x45   : > { %646 = vmatpush.bf16.msra.mxu1 %v1027_v44  ;;  %684 = vmatpush.bf16.msra.mxu3 %v967_v49  ;;  %v1166_v18 = vld [vmem:[%s1452_s8 + $0x28] sm:$0xf0]  ;;  %v1119_v21 = vor.u32 %v1205_v14, %v1116_v15  ;;  %v1203_v26 = vld [vmem:[%s1382_s5 + $0x124] sm:$0xf]  ;;  %v1185_v30 = vld [vmem:[%s1382_s5 + $0x94] sm:$0xf] }
  0x46   : > { %665 = vmatpush.bf16.msra.mxu2 %v1091_v45  ;;  %v1044_v23 = vld [vmem:[%s1382_s5 + $0xa8] sm:$0xf0]  ;;  %v959_v25 = vor.u32 %v1166_v18, %v958_v17  ;;  %v1036_v31 = vld [vmem:[%s1382_s5 + $0x98] sm:$0xf0]  ;;  %v1201_v32 = vld [vmem:[%s1382_s5 + $0x114] sm:$0xf] }
  0x47   : > { %628 = vmatmul.bf16.vlgmr.msra.gmra.mxu0 %v939_v51  ;;  %v1108_v27 = vld [vmem:[%s1382_s5 + $0x128] sm:$0xf0]  ;;  %v1047_v28 = vor.u32 %v1187_v22, %v1044_v23  ;;  %v1100_v33 = vld [vmem:[%s1382_s5 + $0x118] sm:$0xf0]  ;;  %v1039_v34 = vor.u32 %v1185_v30, %v1036_v31  ;;  %v1183_v36 = vld [vmem:[%s1382_s5 + $0x84] sm:$0xf] }
  0x48   : > { %647 = vmatmul.bf16.vlgmr.msra.gmra.mxu1 %v1466_v55  ;;  %685 = vmatmul.bf16.vlgmr.msra.gmra.mxu3 %v939_v51  ;;  %v1111_v29 = vor.u32 %v1203_v26, %v1108_v27  ;;  %v1103_v35 = vor.u32 %v1201_v32, %v1100_v33  ;;  %v1028_v37 = vld [vmem:[%s1382_s5 + $0x88] sm:$0xf0]  ;;  %v1199_v38 = vld [vmem:[%s1382_s5 + $0x104] sm:$0xf] }
  0x49   : > { %715 = vmatpush.bf16.msrb.mxu1 %v1151_v52  ;;  %666 = vmatmul.bf16.vlgmr.msra.gmra.mxu2 %v1468_v56  ;;  %v1092_v39 = vld [vmem:[%s1382_s5 + $0x108] sm:$0xf0]  ;;  %v1031_v40 = vor.u32 %v1183_v36, %v1028_v37 }
  0x4a   : > { %1215 = vmatpush.bf16.msrb.mxu2 %v1087_v50  ;;  %696 = vmatpush.bf16.msrb.mxu0 %v1087_v50  ;;  %v1095_v41 = vor.u32 %v1199_v38, %v1092_v39 }
  0x4b   : > { %1223 = vmatpush.bf16.msrb.mxu3 %v1151_v52 }
  0x4d   : > { %716 = vmatpush.bf16.msrb.mxu1 %v1143_v60 }
  0x4e   : > { %1216 = vmatpush.bf16.msrb.mxu2 %v1079_v59  ;;  %697 = vmatpush.bf16.msrb.mxu0 %v1079_v59 }
  0x4f   : > { %1224 = vmatpush.bf16.msrb.mxu3 %v1143_v60 }
  0x51   : > { %717 = vmatpush.bf16.msrb.mxu1 %v1135_v2 }
  0x52   : > { %1217 = vmatpush.bf16.msrb.mxu2 %v1071_v1  ;;  %698 = vmatpush.bf16.msrb.mxu0 %v1071_v1 }
  0x53   : > { %1225 = vmatpush.bf16.msrb.mxu3 %v1135_v2 }
  0x55   : > { %718 = vmatpush.bf16.msrb.mxu1 %v1127_v9 }
  0x56   : > { %1218 = vmatpush.bf16.msrb.mxu2 %v1063_v7  ;;  %699 = vmatpush.bf16.msrb.mxu0 %v1063_v7 }
  0x57   : > { %1226 = vmatpush.bf16.msrb.mxu3 %v1127_v9  ;;  %633 = vmatmul.bf16.gmra.mxu0 %v951_v20 }
  0x58   : > { %652 = vmatmul.bf16.gmra.mxu1 %v955_v24  ;;  %690 = vmatmul.bf16.gmra.mxu3 %v951_v20 }
  0x59   : > { %719 = vmatpush.bf16.msrb.mxu1 %v1119_v21  ;;  %671 = vmatmul.bf16.gmra.mxu2 %v959_v25 }
  0x5a   : > { %1219 = vmatpush.bf16.msrb.mxu2 %v1055_v19  ;;  %700 = vmatpush.bf16.msrb.mxu0 %v1055_v19 }
  0x5b   : > { %1227 = vmatpush.bf16.msrb.mxu3 %v1119_v21 }
  0x5d   : > { %720 = vmatpush.bf16.msrb.mxu1 %v1111_v29 }
  0x5e   : > { %1220 = vmatpush.bf16.msrb.mxu2 %v1047_v28  ;;  %701 = vmatpush.bf16.msrb.mxu0 %v1047_v28 }
  0x5f   : > { %1228 = vmatpush.bf16.msrb.mxu3 %v1111_v29 }
  0x61   : > { %721 = vmatpush.bf16.msrb.mxu1 %v1103_v35 }
  0x62   : > { %1221 = vmatpush.bf16.msrb.mxu2 %v1039_v34  ;;  %702 = vmatpush.bf16.msrb.mxu0 %v1039_v34 }
  0x63   : > { %1229 = vmatpush.bf16.msrb.mxu3 %v1103_v35 }
  0x65   : > { %722 = vmatpush.bf16.msrb.mxu1 %v1095_v41 }
  0x66   : > { %1222 = vmatpush.bf16.msrb.mxu2 %v1031_v40  ;;  %703 = vmatpush.bf16.msrb.mxu0 %v1031_v40 }
  0x67   : > { %1230 = vmatpush.bf16.msrb.mxu3 %v1095_v41 }
  0x68   : > { %723 = vmatmul.bf16.vlgmr.msrb.gmra.mxu1 %v1468_v56 }
  0x69   : > { %704 = vmatmul.bf16.vlgmr.msrb.gmra.mxu0 %v1466_v55  ;;  %709 = vmatmul.bf16.vlgmr.msrb.gmra.mxu2 %v955_v24 }
  0x6a   : > { %728 = vmatmul.bf16.vlgmr.msrb.gmra.mxu3 %v959_v25 }
  0xc4   : > { %v629_v42 = vpop.f32.mrf.mxu0 }
  0xc5   : > { %v648_v43 = vpop.f32.mrf.mxu1 }
  0xc6   : > { %v649_v44 = vadd.f32 %v648_v43, %v629_v42 }
  0xcb   : > { %v686_v47 = vpop.f32.mrf.mxu3 }
  0xcc   : > { %v667_v45 = vpop.f32.mrf.mxu2  ;;  %v631_v48 = vpop.f32.mrf.mxu0 }
  0xcd   : > { %v668_v46 = vadd.f32 %v667_v45, %v649_v44  ;;  %v650_v49 = vpop.f32.mrf.mxu1 }
  0xce   : > { %v651_v50 = vadd.f32 %v650_v49, %v631_v48 }
  0xd3   : > { %v688_v53 = vpop.f32.mrf.mxu3 }
  0xd4   : > { %v669_v51 = vpop.f32.mrf.mxu2  ;;  %v634_v54 = vpop.f32.mrf.mxu0 }
  0xd5   : > { %v670_v52 = vadd.f32 %v669_v51, %v651_v50  ;;  %v653_v57 = vpop.f32.mrf.mxu1 }
  0xd6   : > { %v654_v58 = vadd.f32 %v653_v57, %v634_v54 }
  0xdb   : > { %v691_v60 = vpop.f32.mrf.mxu3 }
  0xdc   : > { %v672_v55 = vpop.f32.mrf.mxu2  ;;  %v636_v56 = vpop.f32.mrf.mxu0 }
  0xdd   : > { %v673_v59 = vadd.f32 %v672_v55, %v654_v58  ;;  %v655_v61 = vpop.f32.mrf.mxu1 }
  0xde   : > { %v656_v62 = vadd.f32 %v655_v61, %v636_v56 }
  0xe3   : > { %v693_v1 = vpop.f32.mrf.mxu3 }
  0xe4   : > { %v674_v63 = vpop.f32.mrf.mxu2 }
  0xe5   : > { %v675_v0 = vadd.f32 %v674_v63, %v656_v62  ;;  %v724_v4 = vpop.f32.mrf.mxu1 }
  0xe6   : > { %v705_v2 = vpop.f32.mrf.mxu0 }
  0xe7   : > { %v706_v3 = vadd.f32 %v705_v2, %v686_v47 }
  0xe9   : > { %v725_v5 = vadd.f32 %v724_v4, %v706_v3 }
  0xec   : > { %v710_v6 = vpop.f32.mrf.mxu2 }
  0xed   : > { %v711_v7 = vadd.f32 %v710_v6, %v691_v60  ;;  %v729_v8 = vpop.f32.mrf.mxu3  ;;  %v726_v12 = vpop.f32.mrf.mxu1 }
  0xee   : > { %v707_v9 = vpop.f32.mrf.mxu0 }
  0xef   : > { %v730_v10 = vadd.f32 %v729_v8, %v711_v7  ;;  %v708_v11 = vadd.f32 %v707_v9, %v688_v53 }
  0xf1   : > { %v727_v13 = vadd.f32 %v726_v12, %v708_v11 }
  0xf3   : > { %737 = sbr.rel (%p1152_p10) target bundleno = 256 (0x100), region = 62 }
  0xf4   : > { %v712_v14 = vpop.f32.mrf.mxu2 }
  0xf5   : > { %v713_v15 = vadd.f32 %v712_v14, %v693_v1  ;;  %v731_v16 = vpop.f32.mrf.mxu3 }
  0xf7   : > { %v732_v17 = vadd.f32 %v731_v16, %v713_v15 }
  0xf8   : > { %738 = vst [vmem:[%s1650_s3] sm:$0xff] %v668_v46 }
  0xf9   : > { %739 = vst [vmem:[%s1650_s3 + $0x8] sm:$0xff] %v725_v5 }
  0xfa   : > { %740 = vst [vmem:[%s1650_s3 + $0x10] sm:$0xff] %v670_v52 }
  0xfb   : > { %741 = vst [vmem:[%s1650_s3 + $0x18] sm:$0xff] %v727_v13 }
  0xfc   : > { %742 = vst [vmem:[%s1650_s3 + $0x20] sm:$0xff] %v673_v59 }
  0xfd   : > { %743 = vst [vmem:[%s1650_s3 + $0x28] sm:$0xff] %v730_v10 }
  0xfe   : > { %744 = vst [vmem:[%s1650_s3 + $0x30] sm:$0xff] %v675_v0 }
  0xff   : > { %745 = vst [vmem:[%s1650_s3 + $0x38] sm:$0xff] %v732_v17 }
 0x100 PF: > { %p1153_p11 = scmp.le.s32.totalorder %s1303_s14, 0 }
 0x102   : > { %749 = sbr.rel (%p1153_p11) target bundleno = 274 (0x112), region = 66 }
 0x107   : > { %v750_v18 = vld [vmem:[%s1650_s3] sm:$0xff]  ;;  %v751_v19 = vld [vmem:[%s1650_s3 + $0x8] sm:$0xff]  ;;  %v752_v20 = vld [vmem:[%s1650_s3 + $0x10] sm:$0xff] }
 0x108   : > { %v758_v21 = vadd.f32 %v750_v18, %v668_v46  ;;  %v759_v22 = vadd.f32 %v751_v19, %v725_v5  ;;  %v760_v23 = vadd.f32 %v752_v20, %v670_v52  ;;  %v753_v24 = vld [vmem:[%s1650_s3 + $0x18] sm:$0xff]  ;;  %v754_v25 = vld [vmem:[%s1650_s3 + $0x20] sm:$0xff]  ;;  %v755_v26 = vld [vmem:[%s1650_s3 + $0x28] sm:$0xff] }
 0x109   : > { %v761_v27 = vadd.f32 %v753_v24, %v727_v13  ;;  %v756_v28 = vld [vmem:[%s1650_s3 + $0x30] sm:$0xff]  ;;  %v762_v29 = vadd.f32 %v754_v25, %v673_v59  ;;  %v757_v30 = vld [vmem:[%s1650_s3 + $0x38] sm:$0xff]  ;;  %v763_v31 = vadd.f32 %v755_v26, %v730_v10 }
 0x10a   : > { %766 = vst [vmem:[%s1650_s3] sm:$0xff] %v758_v21  ;;  %v764_v32 = vadd.f32 %v756_v28, %v675_v0  ;;  %v765_v33 = vadd.f32 %v757_v30, %v732_v17 }
 0x10b   : > { %767 = vst [vmem:[%s1650_s3 + $0x8] sm:$0xff] %v759_v22 }
 0x10c   : > { %768 = vst [vmem:[%s1650_s3 + $0x10] sm:$0xff] %v760_v23 }
 0x10d   : > { %769 = vst [vmem:[%s1650_s3 + $0x18] sm:$0xff] %v761_v27 }
 0x10e   : > { %770 = vst [vmem:[%s1650_s3 + $0x20] sm:$0xff] %v762_v29 }
 0x10f   : > { %771 = vst [vmem:[%s1650_s3 + $0x28] sm:$0xff] %v763_v31 }
 0x110   : > { %772 = vst [vmem:[%s1650_s3 + $0x30] sm:$0xff] %v764_v32 }
 0x111   : > { %773 = vst [vmem:[%s1650_s3 + $0x38] sm:$0xff] %v765_v33 }
 0x112 PF: > { %p1154_p12 = scmp.ne.s32.totalorder %s1303_s14, 5 }
 0x114   : > { %777 = sbr.rel (%p1154_p12) target bundleno = 297 (0x129), region = 70 }
 0x119   : > { %v778_v34 = vld [vmem:[%s1650_s3] sm:$0xff]  ;;  %v779_v36 = vld [vmem:[%s1650_s3 + $0x8] sm:$0xff]  ;;  %v780_v39 = vld [vmem:[%s1650_s3 + $0x10] sm:$0xff] }
 0x11a   : > { %v786_v35 = vld [vmem:[%s1649_s2] sm:$0x3]  ;;  %v781_v40 = vld [vmem:[%s1650_s3 + $0x18] sm:$0xff]  ;;  %v783_v42 = vld [vmem:[%s1650_s3 + $0x28] sm:$0xff] }
 0x11b   : > { %v788_v37 = vperm.slane %v786_v35, 0  ;;  %v789_v38 = vperm.slane %v786_v35, 1  ;;  %v782_v41 = vld [vmem:[%s1650_s3 + $0x20] sm:$0xff]  ;;  %v784_v43 = vld [vmem:[%s1650_s3 + $0x30] sm:$0xff]  ;;  %v785_v48 = vld [vmem:[%s1650_s3 + $0x38] sm:$0xff] }
 0x11d   : > { %v792_v44 = vadd.f32 %v788_v37, %v778_v34  ;;  %v793_v45 = vadd.f32 %v789_v38, %v779_v36  ;;  %v794_v46 = vadd.f32 %v788_v37, %v780_v39  ;;  %v795_v47 = vadd.f32 %v789_v38, %v781_v40 }
 0x11e   : > { %v796_v49 = vadd.f32 %v788_v37, %v782_v41  ;;  %v797_v50 = vadd.f32 %v789_v38, %v783_v42  ;;  %v798_v54 = vadd.f32 %v788_v37, %v784_v43  ;;  %v799_v58 = vadd.f32 %v789_v38, %v785_v48 }
 0x11f   : > { %v800_v51 = vmax.f32 %v792_v44, 0.0  ;;  %v801_v52 = vmax.f32 %v793_v45, 0.0  ;;  %v802_v53 = vmax.f32 %v794_v46, 0.0  ;;  %v803_v57 = vmax.f32 %v795_v47, 0.0 }
 0x120   : > { %v804_v55 = vmax.f32 %v796_v49, 0.0  ;;  %v805_v59 = vmax.f32 %v797_v50, 0.0  ;;  %v806_v60 = vmax.f32 %v798_v54, 0.0  ;;  %v807_v56 = vmax.f32 %v799_v58, 0.0 }
 0x121   : > { %808 = vst [vmem:[%s1650_s3] sm:$0xff] %v800_v51 }
 0x122   : > { %809 = vst [vmem:[%s1650_s3 + $0x8] sm:$0xff] %v801_v52 }
 0x123   : > { %810 = vst [vmem:[%s1650_s3 + $0x10] sm:$0xff] %v802_v53 }
 0x124   : > { %811 = vst [vmem:[%s1650_s3 + $0x18] sm:$0xff] %v803_v57 }
 0x125   : > { %812 = vst [vmem:[%s1650_s3 + $0x20] sm:$0xff] %v804_v55 }
 0x126   : > { %813 = vst [vmem:[%s1650_s3 + $0x28] sm:$0xff] %v805_v59 }
 0x127   : > { %814 = vst [vmem:[%s1650_s3 + $0x30] sm:$0xff] %v806_v60 }
 0x128   : > { %815 = vst [vmem:[%s1650_s3 + $0x38] sm:$0xff] %v807_v56 }
 0x129 PF: > { %s13_s16 = sadd.s32 1, %s1311_s16   ;;  %s1651_s12 = smov %s1299_s13 }
 0x12a   : > { %p10_p13 = scmp.ge.s32.totalorder %s13_s16, 8   ;;  %s1652_s13 = smov %s1368_s20 }
 0x12b   : > { %s1653_s14 = smov %s1307_s15  ;;  %s1654_s15 = smov %s1656_s17 }
 0x12c   :  { %12 = sbr.rel (!%p10_p13) target bundleno = 3 (0x3), region = 114 }

// kernel: forward_pallas.24
= control target key start
LH: loop header
LB: loop body
LE: loop exit
PB: predicated region body
PF: predicated region fallthrough
CT: control target
= control target key end

     0   :  { %s1429_s15 = smov 0   ;;  %s1431_s16 = smov 0   ;;  %s1767_s0 = inlined_call_operand.vmem [shape: bf16[32,2304], index: 0, kind: input, shape index: {}]   ;;  %s1768_s1 = inlined_call_operand.vmem [shape: bf16[1,2304,256], index: 1, kind: input, shape index: {}]   ;;  %s1769_s2 = inlined_call_operand.vmem [shape: f32[1,256], index: 2, kind: input, shape index: {}]   ;;  %s1770_s3 = inlined_call_operand.vmem [shape: f32[32,256], index: 3, kind: input, shape index: {}]   ;;  %s1771_s4 = inlined_call_operand.vmem [shape: f32[32,256], index: 4, kind: output, shape index: {}]  }
   0x1   :  { %s1433_s17 = smov 0   ;;  %s1435_s18 = smov 0  }
   0x2   :  { %s1437_s19 = smov 0  }
   0x3 LB: > { %s26_s20 = sadd.s32 1, %s1398_s18  ;;  %p51_p1 = scmp.ne.s32.totalorder %s1390_s16, %s1386_s15  ;;  %s1402_s19 = sphi %s1437_s19, %s14_s19   ;;  %s1398_s18 = sphi %s1435_s18, %s1775_s18   ;;  %s1394_s17 = sphi %s1433_s17, %s1774_s17   ;;  %s1390_s16 = sphi %s1431_s16, %s1773_s16   ;;  %s1386_s15 = sphi %s1429_s15, %s1772_s15  }
   0x4   : > { %p27_p0 = scmp.ge.s32.totalorder %s26_s20, 6  ;;  %p52_p2 = scmp.eq.s32.totalorder %s1402_s19, 0 }
   0x5   : > { %s44_s22 = sadd.s32 1, %s1390_s16  ;;  %p1014_p5 = scmp.ge.s32.totalorder %s1402_s19, 6 }
   0x6   : > { %s1777_s20 = smov (%p27_p0, %s26_s20), 0  ;;  %p53_p3 = por %p52_p2, %p51_p1 }
   0x7   : > { %s40_s21 = ssub.s32 %s1398_s18, %s1777_s20  ;;  %197 = sbr.rel (%p1014_p5) target bundleno = 25 (0x19), region = 24 }
   0x8   : > { %p42_p4 = scmp.eq.s32.totalorder %s40_s21, 0 }
   0xa   : > { %s1464_s23 = scalar_select %p42_p4, %s1390_s16, %s44_s22  }
   0xc   : > { %200 = sbr.rel (!%p53_p3) target bundleno = 25 (0x19), region = 28  ;;  %s202_s24 = sand.u32 (%p53_p3), 1, %s1390_s16  }
   0xd   : > { %s1250_s25 = smul.u32 (%p53_p3), 12, %s1398_s18 }
   0xe   : > { %s1322_s26 = smul.u32 (%p53_p3), 48, %s202_s24 }
   0xf   : > { %s211_s29 = scalar_lea.vmem (%p53_p3), %s1767_s0, %s1250_s25 }
  0x10   : > { %v226_v0 = vld [vmem:[%s211_s29] sm:$0xff] (%p53_p3)  ;;  %v228_v1 = vld [vmem:[%s211_s29 + $0x48] sm:$0xff] (%p53_p3)  ;;  %v230_v2 = vld [vmem:[%s211_s29 + $0x90] sm:$0xff] (%p53_p3)  ;;  %s204_s30 = scalar_lea.vmem (%p53_p3), [#allocation2], %s1322_s26 }
  0x11   : > { %227 = vst [vmem:[%s204_s30] sm:$0xff] %v226_v0  ;;  %v232_v3 = vld [vmem:[%s211_s29 + $0xd8] sm:$0xff]  ;;  %v1016_v4 = vld [vmem:[%s211_s29 + $0x8] sm:$0xf]  ;;  %v1018_v5 = vld [vmem:[%s211_s29 + $0x50] sm:$0xf] }
  0x12   : > { %229 = vst [vmem:[%s204_s30 + $0xc] sm:$0xff] %v228_v1  ;;  %v1020_v6 = vld [vmem:[%s211_s29 + $0x98] sm:$0xf]  ;;  %v1022_v7 = vld [vmem:[%s211_s29 + $0xe0] sm:$0xf] }
  0x13   : > { %231 = vst [vmem:[%s204_s30 + $0x18] sm:$0xff] %v230_v2 }
  0x14   : > { %233 = vst [vmem:[%s204_s30 + $0x24] sm:$0xff] %v232_v3 }
  0x15   : > { %1017 = vst [vmem:[%s204_s30 + $0x8] sm:$0xf] %v1016_v4 }
  0x16   : > { %1019 = vst [vmem:[%s204_s30 + $0x14] sm:$0xf] %v1018_v5 }
  0x17   : > { %1021 = vst [vmem:[%s204_s30 + $0x20] sm:$0xf] %v1020_v6 }
  0x18   : > { %1023 = vst [vmem:[%s204_s30 + $0x2c] sm:$0xf] %v1022_v7 }
  0x19 PF: > { %p1024_p6 = scmp.ge.s32.totalorder %s1402_s19, 1  ;;  %p268_p7 = scmp.lt.s32.totalorder %s1402_s19, 7 }
  0x1b   : > { %p269_p8 = pnand %p1024_p6, %p268_p7 }
  0x1c   : > { %s322_s5 = smul.u32 (!%p269_p8), 48, %s1394_s17  ;;  %s275_s10 = sand.u32 (!%p269_p8), 1, %s1386_s15  }
  0x1d   : > { %272 = sbr.rel (%p269_p8) target bundleno = 299 (0x12b), region = 58  ;;  %p1243_p10 = scmp.ne.s32.totalorder (!%p269_p8), %s1394_s17, 0 }
  0x1e   : > { %p325_p9 = scmp.lt.s32.totalorder (!%p269_p8), %s322_s5, 287  ;;  %s1529_s11 = smul.u32 (!%p269_p8), 48, %s275_s10 }
  0x20   : > { %s1548_s12 = scalar_lea.vmem (!%p269_p8), [#allocation2], %s1529_s11 }
  0x22   : > { %s1779_s5 = smov (!%p325_p9, %s322_s5), 287 }
  0x23   : > { %s1251_s6 = sshll.u32 %s1779_s5, 3 }
  0x24   : > { %s1478_s9 = scalar_lea.vmem %s1768_s1, %s1251_s6 }
  0x25   : > { %v1109_v8 = vld [vmem:[%s1478_s9 + $0x70] sm:$0xf]  ;;  %v1273_v9 = vld [vmem:[%s1478_s9 + $0x74] sm:$0xf0]  ;;  %v1272_v17 = vld [vmem:[%s1478_s9 + $0x74] sm:$0xf] }
  0x26   : > { %v1173_v10 = vld [vmem:[%s1478_s9 + $0xf0] sm:$0xf]  ;;  %v1110_v11 = vor.u32 %v1273_v9, %v1109_v8  ;;  %v1289_v12 = vld [vmem:[%s1478_s9 + $0xf4] sm:$0xf0]  ;;  %v1111_v18 = vld [vmem:[%s1478_s9 + $0x78] sm:$0xf0] }
  0x27   : > { %v1237_v13 = vld [vmem:[%s1478_s9 + $0x170] sm:$0xf]  ;;  %v1305_v14 = vld [vmem:[%s1478_s9 + $0x174] sm:$0xf0]  ;;  %v1174_v15 = vor.u32 %v1289_v12, %v1173_v10  ;;  %v1101_v19 = vld [vmem:[%s1478_s9 + $0x60] sm:$0xf]  ;;  %v1114_v20 = vor.u32 %v1272_v17, %v1111_v18 }
  0x28   : > { %v1238_v16 = vor.u32 %v1305_v14, %v1237_v13  ;;  %679 = vmatpush.bf16.msra.mxu0 %v1110_v11  ;;  %v1271_v21 = vld [vmem:[%s1478_s9 + $0x64] sm:$0xf0]  ;;  %v1165_v22 = vld [vmem:[%s1478_s9 + $0xe0] sm:$0xf]  ;;  %v1270_v28 = vld [vmem:[%s1478_s9 + $0x64] sm:$0xf] }
  0x29   : > { %v1287_v23 = vld [vmem:[%s1478_s9 + $0xe4] sm:$0xf0]  ;;  %698 = vmatpush.bf16.msra.mxu1 %v1174_v15  ;;  %v1102_v24 = vor.u32 %v1271_v21, %v1101_v19  ;;  %v1229_v26 = vld [vmem:[%s1478_s9 + $0x160] sm:$0xf]  ;;  %736 = vmatpush.bf16.msra.mxu3 %v1114_v20  ;;  %v1103_v30 = vld [vmem:[%s1478_s9 + $0x68] sm:$0xf0] }
  0x2a   : > { %717 = vmatpush.bf16.msra.mxu2 %v1238_v16  ;;  %v1166_v25 = vor.u32 %v1287_v23, %v1165_v22  ;;  %v1303_v27 = vld [vmem:[%s1478_s9 + $0x164] sm:$0xf0]  ;;  %v1093_v31 = vld [vmem:[%s1478_s9 + $0x50] sm:$0xf]  ;;  %v1269_v32 = vld [vmem:[%s1478_s9 + $0x54] sm:$0xf0]  ;;  %v1106_v33 = vor.u32 %v1270_v28, %v1103_v30 }
  0x2b   : > { %v1230_v29 = vor.u32 %v1303_v27, %v1229_v26  ;;  %v1157_v34 = vld [vmem:[%s1478_s9 + $0xd0] sm:$0xf]  ;;  %v1285_v35 = vld [vmem:[%s1478_s9 + $0xd4] sm:$0xf0]  ;;  %v1094_v37 = vor.u32 %v1269_v32, %v1093_v31  ;;  %v1268_v39 = vld [vmem:[%s1478_s9 + $0x54] sm:$0xf] }
  0x2c   : > { %v1221_v36 = vld [vmem:[%s1478_s9 + $0x150] sm:$0xf]  ;;  %680 = vmatpush.bf16.msra.mxu0 %v1102_v24  ;;  %v1301_v38 = vld [vmem:[%s1478_s9 + $0x154] sm:$0xf0]  ;;  %v1095_v40 = vld [vmem:[%s1478_s9 + $0x58] sm:$0xf0]  ;;  %v1158_v41 = vor.u32 %v1285_v35, %v1157_v34 }
  0x2d   : > { %699 = vmatpush.bf16.msra.mxu1 %v1166_v25  ;;  %v1222_v42 = vor.u32 %v1301_v38, %v1221_v36  ;;  %v1085_v43 = vld [vmem:[%s1478_s9 + $0x40] sm:$0xf]  ;;  %v1267_v44 = vld [vmem:[%s1478_s9 + $0x44] sm:$0xf0]  ;;  %737 = vmatpush.bf16.msra.mxu3 %v1106_v33  ;;  %v1098_v46 = vor.u32 %v1268_v39, %v1095_v40  ;;  %v1266_v50 = vld [vmem:[%s1478_s9 + $0x44] sm:$0xf] }
  0x2e   : > { %718 = vmatpush.bf16.msra.mxu2 %v1230_v29  ;;  %v1149_v45 = vld [vmem:[%s1478_s9 + $0xc0] sm:$0xf]  ;;  %v1283_v47 = vld [vmem:[%s1478_s9 + $0xc4] sm:$0xf0]  ;;  %v1087_v51 = vld [vmem:[%s1478_s9 + $0x48] sm:$0xf0]  ;;  %v1086_v52 = vor.u32 %v1267_v44, %v1085_v43 }
  0x2f   : > { %v1213_v48 = vld [vmem:[%s1478_s9 + $0x140] sm:$0xf]  ;;  %v1299_v49 = vld [vmem:[%s1478_s9 + $0x144] sm:$0xf0]  ;;  %v1150_v53 = vor.u32 %v1283_v47, %v1149_v45  ;;  %v1077_v55 = vld [vmem:[%s1478_s9 + $0x30] sm:$0xf]  ;;  %v1090_v58 = vor.u32 %v1266_v50, %v1087_v51 }
  0x30   : > { %681 = vmatpush.bf16.msra.mxu0 %v1094_v37  ;;  %v1214_v54 = vor.u32 %v1299_v49, %v1213_v48  ;;  %v1265_v56 = vld [vmem:[%s1478_s9 + $0x34] sm:$0xf0]  ;;  %v1141_v57 = vld [vmem:[%s1478_s9 + $0xb0] sm:$0xf]  ;;  %v1264_v62 = vld [vmem:[%s1478_s9 + $0x34] sm:$0xf] }
  0x31   : > { %700 = vmatpush.bf16.msra.mxu1 %v1158_v41  ;;  %738 = vmatpush.bf16.msra.mxu3 %v1098_v46  ;;  %v1281_v59 = vld [vmem:[%s1478_s9 + $0xb4] sm:$0xf0]  ;;  %v1205_v60 = vld [vmem:[%s1478_s9 + $0x130] sm:$0xf]  ;;  %v1079_v63 = vld [vmem:[%s1478_s9 + $0x38] sm:$0xf0]  ;;  %v1078_v0 = vor.u32 %v1265_v56, %v1077_v55 }
  0x32   : > { %719 = vmatpush.bf16.msra.mxu2 %v1222_v42  ;;  %v1297_v61 = vld [vmem:[%s1478_s9 + $0x134] sm:$0xf0]  ;;  %v1142_v1 = vor.u32 %v1281_v59, %v1141_v57  ;;  %v1069_v3 = vld [vmem:[%s1478_s9 + $0x20] sm:$0xf]  ;;  %v1263_v4 = vld [vmem:[%s1478_s9 + $0x24] sm:$0xf0]  ;;  %v1082_v6 = vor.u32 %v1264_v62, %v1079_v63 }
  0x33   : > { %v1206_v2 = vor.u32 %v1297_v61, %v1205_v60  ;;  %v1133_v5 = vld [vmem:[%s1478_s9 + $0xa0] sm:$0xf]  ;;  %v1279_v7 = vld [vmem:[%s1478_s9 + $0xa4] sm:$0xf0]  ;;  %v1262_v10 = vld [vmem:[%s1478_s9 + $0x24] sm:$0xf]  ;;  %v1070_v12 = vor.u32 %v1263_v4, %v1069_v3 }
  0x34   : > { %682 = vmatpush.bf16.msra.mxu0 %v1086_v52  ;;  %v1197_v8 = vld [vmem:[%s1478_s9 + $0x120] sm:$0xf]  ;;  %v1295_v9 = vld [vmem:[%s1478_s9 + $0x124] sm:$0xf0]  ;;  %v1071_v11 = vld [vmem:[%s1478_s9 + $0x28] sm:$0xf0]  ;;  %v1134_v13 = vor.u32 %v1279_v7, %v1133_v5 }
  0x35   : > { %701 = vmatpush.bf16.msra.mxu1 %v1150_v53  ;;  %739 = vmatpush.bf16.msra.mxu3 %v1090_v58  ;;  %v1198_v14 = vor.u32 %v1295_v9, %v1197_v8  ;;  %v1061_v15 = vld [vmem:[%s1478_s9 + $0x10] sm:$0xf]  ;;  %v1261_v16 = vld [vmem:[%s1478_s9 + $0x14] sm:$0xf0]  ;;  %v1074_v18 = vor.u32 %v1262_v10, %v1071_v11  ;;  %v1260_v22 = vld [vmem:[%s1478_s9 + $0x14] sm:$0xf] }
  0x36   : > { %720 = vmatpush.bf16.msra.mxu2 %v1214_v54  ;;  %v1125_v17 = vld [vmem:[%s1478_s9 + $0x90] sm:$0xf]  ;;  %v1277_v19 = vld [vmem:[%s1478_s9 + $0x94] sm:$0xf0]  ;;  %v1063_v23 = vld [vmem:[%s1478_s9 + $0x18] sm:$0xf0]  ;;  %v1062_v24 = vor.u32 %v1261_v16, %v1061_v15 }
  0x37   : > { %v1189_v20 = vld [vmem:[%s1478_s9 + $0x110] sm:$0xf]  ;;  %v1293_v21 = vld [vmem:[%s1478_s9 + $0x114] sm:$0xf0]  ;;  %v1053_v25 = vld [vmem:[%s1478_s9] sm:$0xf]  ;;  %v1126_v28 = vor.u32 %v1277_v19, %v1125_v17  ;;  %v1066_v33 = vor.u32 %v1260_v22, %v1063_v23 }
  0x38   : > { %683 = vmatpush.bf16.msra.mxu0 %v1078_v0  ;;  %v1259_v26 = vld [vmem:[%s1478_s9 + $0x4] sm:$0xf0]  ;;  %v1117_v27 = vld [vmem:[%s1478_s9 + $0x80] sm:$0xf]  ;;  %v1190_v29 = vor.u32 %v1293_v21, %v1189_v20  ;;  %v1258_v34 = vld [vmem:[%s1478_s9 + $0x4] sm:$0xf] }
  0x39   : > { %702 = vmatpush.bf16.msra.mxu1 %v1142_v1  ;;  %740 = vmatpush.bf16.msra.mxu3 %v1082_v6  ;;  %v1275_v30 = vld [vmem:[%s1478_s9 + $0x84] sm:$0xf0]  ;;  %v1181_v31 = vld [vmem:[%s1478_s9 + $0x100] sm:$0xf]  ;;  %v1055_v35 = vld [vmem:[%s1478_s9 + $0x8] sm:$0xf0]  ;;  %v1054_v40 = vor.u32 %v1259_v26, %v1053_v25 }
  0x3a   : > { %721 = vmatpush.bf16.msra.mxu2 %v1206_v2  ;;  %v1291_v32 = vld [vmem:[%s1478_s9 + $0x104] sm:$0xf0]  ;;  %v1029_v36 = vld [vmem:[%s1548_s12] sm:$0xf]  ;;  %v1253_v37 = vld [vmem:[%s1548_s12 + $0x8] sm:$0xf0]  ;;  %v1118_v44 = vor.u32 %v1275_v30, %v1117_v27  ;;  %v1058_v49 = vor.u32 %v1258_v34, %v1055_v35 }
  0x3b   : > { %v1288_v38 = vld [vmem:[%s1478_s9 + $0xf4] sm:$0xf]  ;;  %v1175_v39 = vld [vmem:[%s1478_s9 + $0xf8] sm:$0xf0]  ;;  %v1182_v45 = vor.u32 %v1291_v32, %v1181_v31  ;;  %v1031_v46 = vld [vmem:[%s1548_s12 + $0xc] sm:$0xf0]  ;;  %v1030_v51 = vor.u32 %v1253_v37, %v1029_v36 }
  0x3c   : > { %684 = vmatpush.bf16.msra.mxu0 %v1070_v12  ;;  %v1252_v41 = vld [vmem:[%s1548_s12 + $0x4] sm:$0xf]  ;;  %v1239_v43 = vld [vmem:[%s1478_s9 + $0x178] sm:$0xf0]  ;;  %v1037_v47 = vld [vmem:[%s1548_s12 + $0x8] sm:$0xf]  ;;  %v1178_v50 = vor.u32 %v1288_v38, %v1175_v39 }
  0x3d   : > { %703 = vmatpush.bf16.msra.mxu1 %v1134_v13  ;;  %741 = vmatpush.bf16.msra.mxu3 %v1074_v18  ;;  %v1304_v42 = vld [vmem:[%s1478_s9 + $0x174] sm:$0xf]  ;;  %v1286_v53 = vld [vmem:[%s1478_s9 + $0xe4] sm:$0xf]  ;;  %v1167_v54 = vld [vmem:[%s1478_s9 + $0xe8] sm:$0xf0]  ;;  %v1562_v55 = vor.u32 %v1252_v41, %v1031_v46 }
  0x3e   : > { %722 = vmatpush.bf16.msra.mxu2 %v1198_v14  ;;  %v1254_v48 = vld [vmem:[%s1548_s12 + $0x10] sm:$0xf0]  ;;  %v1242_v52 = vor.u32 %v1304_v42, %v1239_v43  ;;  %v1231_v58 = vld [vmem:[%s1478_s9 + $0x168] sm:$0xf0]  ;;  %v1170_v59 = vor.u32 %v1286_v53, %v1167_v54  ;;  %v1159_v62 = vld [vmem:[%s1478_s9 + $0xd8] sm:$0xf0] }
  0x3f   : > { %v1564_v56 = vor.u32 %v1254_v48, %v1037_v47  ;;  %v1302_v57 = vld [vmem:[%s1478_s9 + $0x164] sm:$0xf]  ;;  %v1284_v61 = vld [vmem:[%s1478_s9 + $0xd4] sm:$0xf]  ;;  %v1223_v0 = vld [vmem:[%s1478_s9 + $0x158] sm:$0xf0] }
  0x40   : > { %685 = vmatpush.bf16.msra.mxu0 %v1062_v24  ;;  %v1234_v60 = vor.u32 %v1302_v57, %v1231_v58  ;;  %v1300_v63 = vld [vmem:[%s1478_s9 + $0x154] sm:$0xf]  ;;  %v1162_v1 = vor.u32 %v1284_v61, %v1159_v62  ;;  %v1282_v3 = vld [vmem:[%s1478_s9 + $0xc4] sm:$0xf]  ;;  %v1151_v4 = vld [vmem:[%s1478_s9 + $0xc8] sm:$0xf0] }
  0x41   : > { %704 = vmatpush.bf16.msra.mxu1 %v1126_v28  ;;  %742 = vmatpush.bf16.msra.mxu3 %v1066_v33  ;;  %v1226_v2 = vor.u32 %v1300_v63, %v1223_v0  ;;  %v1298_v5 = vld [vmem:[%s1478_s9 + $0x144] sm:$0xf]  ;;  %v1215_v6 = vld [vmem:[%s1478_s9 + $0x148] sm:$0xf0]  ;;  %v1154_v7 = vor.u32 %v1282_v3, %v1151_v4  ;;  %v1041_v8 = vld [vmem:[%s1548_s12 + $0x18] sm:$0xf] }
  0x42   : > { %723 = vmatpush.bf16.msra.mxu2 %v1190_v29  ;;  %v1218_v9 = vor.u32 %v1298_v5, %v1215_v6  ;;  %v1256_v10 = vld [vmem:[%s1548_s12 + $0x20] sm:$0xf0]  ;;  %v1143_v12 = vld [vmem:[%s1478_s9 + $0xb8] sm:$0xf0]  ;;  %v1043_v16 = vld [vmem:[%s1548_s12 + $0x24] sm:$0xf0] }
  0x43   : > { %v1280_v11 = vld [vmem:[%s1478_s9 + $0xb4] sm:$0xf]  ;;  %v1255_v13 = vld [vmem:[%s1548_s12 + $0x1c] sm:$0xf]  ;;  %v1049_v17 = vld [vmem:[%s1548_s12 + $0x20] sm:$0xf]  ;;  %v1042_v20 = vor.u32 %v1256_v10, %v1041_v8 }
  0x44   : > { %686 = vmatpush.bf16.msra.mxu0 %v1054_v40  ;;  %v1296_v14 = vld [vmem:[%s1478_s9 + $0x134] sm:$0xf]  ;;  %v1207_v15 = vld [vmem:[%s1478_s9 + $0x138] sm:$0xf0]  ;;  %v1146_v19 = vor.u32 %v1280_v11, %v1143_v12  ;;  %v1278_v22 = vld [vmem:[%s1478_s9 + $0xa4] sm:$0xf]  ;;  %v1046_v24 = vor.u32 %v1255_v13, %v1043_v16 }
  0x45   : > { %705 = vmatpush.bf16.msra.mxu1 %v1118_v44  ;;  %743 = vmatpush.bf16.msra.mxu3 %v1058_v49  ;;  %v1257_v18 = vld [vmem:[%s1548_s12 + $0x28] sm:$0xf0]  ;;  %v1210_v21 = vor.u32 %v1296_v14, %v1207_v15  ;;  %v1294_v26 = vld [vmem:[%s1478_s9 + $0x124] sm:$0xf]  ;;  %v1276_v30 = vld [vmem:[%s1478_s9 + $0x94] sm:$0xf] }
  0x46   : > { %724 = vmatpush.bf16.msra.mxu2 %v1182_v45  ;;  %v1135_v23 = vld [vmem:[%s1478_s9 + $0xa8] sm:$0xf0]  ;;  %v1050_v25 = vor.u32 %v1257_v18, %v1049_v17  ;;  %v1127_v31 = vld [vmem:[%s1478_s9 + $0x98] sm:$0xf0]  ;;  %v1292_v32 = vld [vmem:[%s1478_s9 + $0x114] sm:$0xf] }
  0x47   : > { %687 = vmatmul.bf16.vlgmr.msra.gmra.mxu0 %v1030_v51  ;;  %v1199_v27 = vld [vmem:[%s1478_s9 + $0x128] sm:$0xf0]  ;;  %v1138_v28 = vor.u32 %v1278_v22, %v1135_v23  ;;  %v1191_v33 = vld [vmem:[%s1478_s9 + $0x118] sm:$0xf0]  ;;  %v1130_v34 = vor.u32 %v1276_v30, %v1127_v31  ;;  %v1274_v36 = vld [vmem:[%s1478_s9 + $0x84] sm:$0xf] }
  0x48   : > { %706 = vmatmul.bf16.vlgmr.msra.gmra.mxu1 %v1562_v55  ;;  %744 = vmatmul.bf16.vlgmr.msra.gmra.mxu3 %v1030_v51  ;;  %v1202_v29 = vor.u32 %v1294_v26, %v1199_v27  ;;  %v1194_v35 = vor.u32 %v1292_v32, %v1191_v33  ;;  %v1119_v37 = vld [vmem:[%s1478_s9 + $0x88] sm:$0xf0]  ;;  %v1290_v38 = vld [vmem:[%s1478_s9 + $0x104] sm:$0xf] }
  0x49   : > { %774 = vmatpush.bf16.msrb.mxu1 %v1242_v52  ;;  %725 = vmatmul.bf16.vlgmr.msra.gmra.mxu2 %v1564_v56  ;;  %v1183_v39 = vld [vmem:[%s1478_s9 + $0x108] sm:$0xf0]  ;;  %v1122_v40 = vor.u32 %v1274_v36, %v1119_v37 }
  0x4a   : > { %1306 = vmatpush.bf16.msrb.mxu2 %v1178_v50  ;;  %755 = vmatpush.bf16.msrb.mxu0 %v1178_v50  ;;  %v1186_v41 = vor.u32 %v1290_v38, %v1183_v39 }
  0x4b   : > { %1314 = vmatpush.bf16.msrb.mxu3 %v1242_v52 }
  0x4d   : > { %775 = vmatpush.bf16.msrb.mxu1 %v1234_v60 }
  0x4e   : > { %1307 = vmatpush.bf16.msrb.mxu2 %v1170_v59  ;;  %756 = vmatpush.bf16.msrb.mxu0 %v1170_v59 }
  0x4f   : > { %1315 = vmatpush.bf16.msrb.mxu3 %v1234_v60 }
  0x51   : > { %776 = vmatpush.bf16.msrb.mxu1 %v1226_v2 }
  0x52   : > { %1308 = vmatpush.bf16.msrb.mxu2 %v1162_v1  ;;  %757 = vmatpush.bf16.msrb.mxu0 %v1162_v1 }
  0x53   : > { %1316 = vmatpush.bf16.msrb.mxu3 %v1226_v2 }
  0x55   : > { %777 = vmatpush.bf16.msrb.mxu1 %v1218_v9 }
  0x56   : > { %1309 = vmatpush.bf16.msrb.mxu2 %v1154_v7  ;;  %758 = vmatpush.bf16.msrb.mxu0 %v1154_v7 }
  0x57   : > { %1317 = vmatpush.bf16.msrb.mxu3 %v1218_v9  ;;  %692 = vmatmul.bf16.gmra.mxu0 %v1042_v20 }
  0x58   : > { %711 = vmatmul.bf16.gmra.mxu1 %v1046_v24  ;;  %749 = vmatmul.bf16.gmra.mxu3 %v1042_v20 }
  0x59   : > { %778 = vmatpush.bf16.msrb.mxu1 %v1210_v21  ;;  %730 = vmatmul.bf16.gmra.mxu2 %v1050_v25 }
  0x5a   : > { %1310 = vmatpush.bf16.msrb.mxu2 %v1146_v19  ;;  %759 = vmatpush.bf16.msrb.mxu0 %v1146_v19 }
  0x5b   : > { %1318 = vmatpush.bf16.msrb.mxu3 %v1210_v21 }
  0x5d   : > { %779 = vmatpush.bf16.msrb.mxu1 %v1202_v29 }
  0x5e   : > { %1311 = vmatpush.bf16.msrb.mxu2 %v1138_v28  ;;  %760 = vmatpush.bf16.msrb.mxu0 %v1138_v28 }
  0x5f   : > { %1319 = vmatpush.bf16.msrb.mxu3 %v1202_v29 }
  0x61   : > { %780 = vmatpush.bf16.msrb.mxu1 %v1194_v35 }
  0x62   : > { %1312 = vmatpush.bf16.msrb.mxu2 %v1130_v34  ;;  %761 = vmatpush.bf16.msrb.mxu0 %v1130_v34 }
  0x63   : > { %1320 = vmatpush.bf16.msrb.mxu3 %v1194_v35 }
  0x65   : > { %781 = vmatpush.bf16.msrb.mxu1 %v1186_v41 }
  0x66   : > { %1313 = vmatpush.bf16.msrb.mxu2 %v1122_v40  ;;  %762 = vmatpush.bf16.msrb.mxu0 %v1122_v40 }
  0x67   : > { %1321 = vmatpush.bf16.msrb.mxu3 %v1186_v41 }
  0x68   : > { %782 = vmatmul.bf16.vlgmr.msrb.gmra.mxu1 %v1564_v56 }
  0x69   : > { %763 = vmatmul.bf16.vlgmr.msrb.gmra.mxu0 %v1562_v55  ;;  %768 = vmatmul.bf16.vlgmr.msrb.gmra.mxu2 %v1046_v24 }
  0x6a   : > { %787 = vmatmul.bf16.vlgmr.msrb.gmra.mxu3 %v1050_v25 }
  0xc4   : > { %v688_v42 = vpop.f32.mrf.mxu0 }
  0xc5   : > { %v707_v43 = vpop.f32.mrf.mxu1 }
  0xc6   : > { %v708_v44 = vadd.f32 %v707_v43, %v688_v42 }
  0xcb   : > { %v745_v47 = vpop.f32.mrf.mxu3 }
  0xcc   : > { %v726_v45 = vpop.f32.mrf.mxu2  ;;  %v690_v48 = vpop.f32.mrf.mxu0 }
  0xcd   : > { %v727_v46 = vadd.f32 %v726_v45, %v708_v44  ;;  %v709_v49 = vpop.f32.mrf.mxu1 }
  0xce   : > { %v710_v50 = vadd.f32 %v709_v49, %v690_v48 }
  0xd3   : > { %v747_v53 = vpop.f32.mrf.mxu3 }
  0xd4   : > { %v728_v51 = vpop.f32.mrf.mxu2  ;;  %v693_v54 = vpop.f32.mrf.mxu0 }
  0xd5   : > { %v729_v52 = vadd.f32 %v728_v51, %v710_v50  ;;  %v712_v57 = vpop.f32.mrf.mxu1 }
  0xd6   : > { %v713_v58 = vadd.f32 %v712_v57, %v693_v54 }
  0xdb   : > { %v750_v60 = vpop.f32.mrf.mxu3 }
  0xdc   : > { %v731_v55 = vpop.f32.mrf.mxu2  ;;  %v695_v56 = vpop.f32.mrf.mxu0 }
  0xdd   : > { %v732_v59 = vadd.f32 %v731_v55, %v713_v58  ;;  %v714_v61 = vpop.f32.mrf.mxu1 }
  0xde   : > { %v715_v62 = vadd.f32 %v714_v61, %v695_v56 }
  0xe3   : > { %v752_v1 = vpop.f32.mrf.mxu3 }
  0xe4   : > { %v733_v63 = vpop.f32.mrf.mxu2 }
  0xe5   : > { %v734_v0 = vadd.f32 %v733_v63, %v715_v62  ;;  %v783_v4 = vpop.f32.mrf.mxu1 }
  0xe6   : > { %v764_v2 = vpop.f32.mrf.mxu0 }
  0xe7   : > { %v765_v3 = vadd.f32 %v764_v2, %v745_v47 }
  0xe9   : > { %v784_v5 = vadd.f32 %v783_v4, %v765_v3 }
  0xec   : > { %v769_v6 = vpop.f32.mrf.mxu2 }
  0xed   : > { %v770_v7 = vadd.f32 %v769_v6, %v750_v60  ;;  %v788_v8 = vpop.f32.mrf.mxu3  ;;  %v785_v12 = vpop.f32.mrf.mxu1 }
  0xee   : > { %v766_v9 = vpop.f32.mrf.mxu0 }
  0xef   : > { %v789_v10 = vadd.f32 %v788_v8, %v770_v7  ;;  %v767_v11 = vadd.f32 %v766_v9, %v747_v53 }
  0xf1   : > { %v786_v13 = vadd.f32 %v785_v12, %v767_v11 }
  0xf3   : > { %796 = sbr.rel (%p1243_p10) target bundleno = 256 (0x100), region = 66 }
  0xf4   : > { %v771_v14 = vpop.f32.mrf.mxu2 }
  0xf5   : > { %v772_v15 = vadd.f32 %v771_v14, %v752_v1  ;;  %v790_v16 = vpop.f32.mrf.mxu3 }
  0xf7   : > { %v791_v17 = vadd.f32 %v790_v16, %v772_v15 }
  0xf8   : > { %797 = vst [vmem:[%s1771_s4] sm:$0xff] %v727_v46 }
  0xf9   : > { %798 = vst [vmem:[%s1771_s4 + $0x8] sm:$0xff] %v784_v5 }
  0xfa   : > { %799 = vst [vmem:[%s1771_s4 + $0x10] sm:$0xff] %v729_v52 }
  0xfb   : > { %800 = vst [vmem:[%s1771_s4 + $0x18] sm:$0xff] %v786_v13 }
  0xfc   : > { %801 = vst [vmem:[%s1771_s4 + $0x20] sm:$0xff] %v732_v59 }
  0xfd   : > { %802 = vst [vmem:[%s1771_s4 + $0x28] sm:$0xff] %v789_v10 }
  0xfe   : > { %803 = vst [vmem:[%s1771_s4 + $0x30] sm:$0xff] %v734_v0 }
  0xff   : > { %804 = vst [vmem:[%s1771_s4 + $0x38] sm:$0xff] %v791_v17 }
 0x100 PF: > { %p1244_p11 = scmp.le.s32.totalorder %s1394_s17, 0 }
 0x102   : > { %808 = sbr.rel (%p1244_p11) target bundleno = 274 (0x112), region = 70 }
 0x107   : > { %v809_v18 = vld [vmem:[%s1771_s4] sm:$0xff]  ;;  %v810_v19 = vld [vmem:[%s1771_s4 + $0x8] sm:$0xff]  ;;  %v811_v20 = vld [vmem:[%s1771_s4 + $0x10] sm:$0xff] }
 0x108   : > { %v817_v21 = vadd.f32 %v809_v18, %v727_v46  ;;  %v818_v22 = vadd.f32 %v810_v19, %v784_v5  ;;  %v819_v23 = vadd.f32 %v811_v20, %v729_v52  ;;  %v812_v24 = vld [vmem:[%s1771_s4 + $0x18] sm:$0xff]  ;;  %v813_v25 = vld [vmem:[%s1771_s4 + $0x20] sm:$0xff]  ;;  %v814_v26 = vld [vmem:[%s1771_s4 + $0x28] sm:$0xff] }
 0x109   : > { %v820_v27 = vadd.f32 %v812_v24, %v786_v13  ;;  %v815_v28 = vld [vmem:[%s1771_s4 + $0x30] sm:$0xff]  ;;  %v821_v29 = vadd.f32 %v813_v25, %v732_v59  ;;  %v816_v30 = vld [vmem:[%s1771_s4 + $0x38] sm:$0xff]  ;;  %v822_v31 = vadd.f32 %v814_v26, %v789_v10 }
 0x10a   : > { %825 = vst [vmem:[%s1771_s4] sm:$0xff] %v817_v21  ;;  %v823_v32 = vadd.f32 %v815_v28, %v734_v0  ;;  %v824_v33 = vadd.f32 %v816_v30, %v791_v17 }
 0x10b   : > { %826 = vst [vmem:[%s1771_s4 + $0x8] sm:$0xff] %v818_v22 }
 0x10c   : > { %827 = vst [vmem:[%s1771_s4 + $0x10] sm:$0xff] %v819_v23 }
 0x10d   : > { %828 = vst [vmem:[%s1771_s4 + $0x18] sm:$0xff] %v820_v27 }
 0x10e   : > { %829 = vst [vmem:[%s1771_s4 + $0x20] sm:$0xff] %v821_v29 }
 0x10f   : > { %830 = vst [vmem:[%s1771_s4 + $0x28] sm:$0xff] %v822_v31 }
 0x110   : > { %831 = vst [vmem:[%s1771_s4 + $0x30] sm:$0xff] %v823_v32 }
 0x111   : > { %832 = vst [vmem:[%s1771_s4 + $0x38] sm:$0xff] %v824_v33 }
 0x112 PF: > { %p1245_p12 = scmp.ne.s32.totalorder %s1394_s17, 5 }
 0x114   : > { %836 = sbr.rel (%p1245_p12) target bundleno = 299 (0x12b), region = 74 }
 0x119   : > { %v837_v34 = vld [vmem:[%s1771_s4] sm:$0xff]  ;;  %v838_v38 = vld [vmem:[%s1771_s4 + $0x8] sm:$0xff]  ;;  %v839_v41 = vld [vmem:[%s1771_s4 + $0x10] sm:$0xff] }
 0x11a   : > { %v845_v35 = vld [vmem:[%s1769_s2] sm:$0x3]  ;;  %v860_v40 = vld [vmem:[%s1770_s3 + $0x8] sm:$0xff]  ;;  %v861_v42 = vld [vmem:[%s1770_s3 + $0x10] sm:$0xff] }
 0x11b   : > { %v859_v36 = vld [vmem:[%s1770_s3] sm:$0xff]  ;;  %v847_v37 = vperm.slane %v845_v35, 0  ;;  %v848_v39 = vperm.slane %v845_v35, 1  ;;  %v840_v43 = vld [vmem:[%s1771_s4 + $0x18] sm:$0xff]  ;;  %v842_v51 = vld [vmem:[%s1771_s4 + $0x28] sm:$0xff] }
 0x11c   : > { %v862_v44 = vld [vmem:[%s1770_s3 + $0x18] sm:$0xff]  ;;  %v841_v49 = vld [vmem:[%s1771_s4 + $0x20] sm:$0xff]  ;;  %v864_v54 = vld [vmem:[%s1770_s3 + $0x28] sm:$0xff] }
 0x11d   : > { %v851_v45 = vadd.f32 %v847_v37, %v837_v34  ;;  %v852_v46 = vadd.f32 %v848_v39, %v838_v38  ;;  %v853_v47 = vadd.f32 %v847_v37, %v839_v41  ;;  %v854_v48 = vadd.f32 %v848_v39, %v840_v43  ;;  %v863_v50 = vld [vmem:[%s1770_s3 + $0x20] sm:$0xff]  ;;  %v843_v57 = vld [vmem:[%s1771_s4 + $0x30] sm:$0xff]  ;;  %v844_v61 = vld [vmem:[%s1771_s4 + $0x38] sm:$0xff] }
 0x11e   : > { %v855_v52 = vadd.f32 %v847_v37, %v841_v49  ;;  %v856_v53 = vadd.f32 %v848_v39, %v842_v51  ;;  %v865_v56 = vld [vmem:[%s1770_s3 + $0x30] sm:$0xff]  ;;  %v866_v62 = vld [vmem:[%s1770_s3 + $0x38] sm:$0xff]  ;;  %v857_v1 = vadd.f32 %v847_v37, %v843_v57  ;;  %v858_v2 = vadd.f32 %v848_v39, %v844_v61 }
 0x11f   : > { %v867_v58 = vadd.f32 %v859_v36, %v851_v45  ;;  %v868_v55 = vadd.f32 %v860_v40, %v852_v46  ;;  %v869_v59 = vadd.f32 %v861_v42, %v853_v47  ;;  %v870_v60 = vadd.f32 %v862_v44, %v854_v48 }
 0x120   : > { %v871_v63 = vadd.f32 %v863_v50, %v855_v52  ;;  %v872_v0 = vadd.f32 %v864_v54, %v856_v53  ;;  %v873_v7 = vadd.f32 %v865_v56, %v857_v1  ;;  %v874_v8 = vadd.f32 %v866_v62, %v858_v2 }
 0x121   : > { %v875_v3 = vmax.f32 %v867_v58, 0.0  ;;  %v876_v4 = vmax.f32 %v868_v55, 0.0  ;;  %v877_v5 = vmax.f32 %v869_v59, 0.0  ;;  %v878_v6 = vmax.f32 %v870_v60, 0.0 }
 0x122   : > { %v879_v9 = vmax.f32 %v871_v63, 0.0  ;;  %v880_v10 = vmax.f32 %v872_v0, 0.0  ;;  %v881_v11 = vmax.f32 %v873_v7, 0.0  ;;  %v882_v12 = vmax.f32 %v874_v8, 0.0 }
 0x123   : > { %883 = vst [vmem:[%s1771_s4] sm:$0xff] %v875_v3 }
 0x124   : > { %884 = vst [vmem:[%s1771_s4 + $0x8] sm:$0xff] %v876_v4 }
 0x125   : > { %885 = vst [vmem:[%s1771_s4 + $0x10] sm:$0xff] %v877_v5 }
 0x126   : > { %886 = vst [vmem:[%s1771_s4 + $0x18] sm:$0xff] %v878_v6 }
 0x127   : > { %887 = vst [vmem:[%s1771_s4 + $0x20] sm:$0xff] %v879_v9 }
 0x128   : > { %888 = vst [vmem:[%s1771_s4 + $0x28] sm:$0xff] %v880_v10 }
 0x129   : > { %889 = vst [vmem:[%s1771_s4 + $0x30] sm:$0xff] %v881_v11 }
 0x12a   : > { %890 = vst [vmem:[%s1771_s4 + $0x38] sm:$0xff] %v882_v12 }
 0x12b PF: > { %s14_s19 = sadd.s32 1, %s1402_s19   ;;  %s1772_s15 = smov %s1390_s16 }
 0x12c   : > { %p11_p13 = scmp.ge.s32.totalorder %s14_s19, 8   ;;  %s1773_s16 = smov %s1464_s23 }
 0x12d   : > { %s1774_s17 = smov %s1398_s18  ;;  %s1775_s18 = smov %s1777_s20 }
 0x12e   :  { %13 = sbr.rel (!%p11_p13) target bundleno = 3 (0x3), region = 121 }

// kernel: forward_pallas.26
= control target key start
LH: loop header
LB: loop body
LE: loop exit
PB: predicated region body
PF: predicated region fallthrough
CT: control target
= control target key end

     0   :  { %s1162_s12 = smov 0   ;;  %s1164_s13 = smov 0   ;;  %s1336_s0 = inlined_call_operand.vmem [shape: bf16[128,2048], index: 0, kind: input, shape index: {}]   ;;  %s1337_s1 = inlined_call_operand.vmem [shape: bf16[4,2048,128], index: 1, kind: input, shape index: {}]   ;;  %s1338_s2 = inlined_call_operand.vmem [shape: f32[1,128], index: 2, kind: input, shape index: {}]   ;;  %s1339_s3 = inlined_call_operand.vmem [shape: f32[128,128], index: 3, kind: output, shape index: {}]  }
   0x1   :  { %s1166_s14 = smov 0   ;;  %s1168_s15 = smov 0  }
   0x2   :  { %s1170_s16 = smov 0   ;;  %s1172_s17 = smov 0  }
   0x3   :  { %s1174_s18 = smov 0  }
   0x4 LB: > { %s25_s19 = sadd.s32 1, %s1132_s16  ;;  %s32_s20 = sadd.s32 1, %s1136_s17  ;;  %s1140_s18 = sphi %s1174_s18, %s13_s18   ;;  %s1136_s17 = sphi %s1172_s17, %s1345_s17   ;;  %s1132_s16 = sphi %s1170_s16, %s1344_s16   ;;  %s1128_s15 = sphi %s1168_s15, %s1343_s15   ;;  %s1124_s14 = sphi %s1166_s14, %s1342_s14   ;;  %s1120_s13 = sphi %s1164_s13, %s1341_s13   ;;  %s1116_s12 = sphi %s1162_s12, %s1340_s12  }
   0x5   : > { %p26_p0 = scmp.ge.s32.totalorder %s25_s19, 4  ;;  %p50_p1 = scmp.ne.s32.totalorder %s1120_s13, %s1116_s12 }
   0x6   : > { %p51_p2 = scmp.eq.s32.totalorder %s1140_s18, 0  ;;  %s43_s24 = sadd.s32 1, %s1120_s13 }
   0x7   : > { %s1347_s19 = smov (%p26_p0, %s25_s19), 0  ;;  %s1349_s20 = smov (!%p26_p0, %s32_s20), %s1136_s17 }
   0x8   : > { %p52_p3 = por %p51_p2, %p50_p1  ;;  %p34_p4 = scmp.ge.s32.totalorder %s1349_s20, 4 }
   0x9   : > { %s39_s21 = ssub.s32 %s1132_s16, %s1347_s19  ;;  %p810_p6 = scmp.ge.s32.totalorder %s1140_s18, 16 }
   0xa   : > { %s1351_s20 = smov (%p34_p4, %s1349_s20), 0 }
   0xb   : > { %s38_s22 = ssub.s32 %s1136_s17, %s1351_s20  ;;  %156 = sbr.rel (%p810_p6) target bundleno = 31 (0x1f), region = 20 }
   0xc   : > { %s40_s23 = sor.u32 %s39_s21, %s38_s22 }
   0xd   : > { %p41_p5 = scmp.eq.s32.totalorder %s40_s23, 0 }
   0xf   : > { %s1213_s25 = scalar_select %p41_p5, %s1120_s13, %s43_s24  }
  0x10   : > { %159 = sbr.rel (!%p52_p3) target bundleno = 31 (0x1f), region = 24  ;;  %s161_s26 = sand.u32 (%p52_p3), 1, %s1120_s13  }
  0x11   : > { %s813_s27 = sshll.u32 (%p52_p3), %s1132_s16, 2  ;;  %s811_s28 = sshll.u32 (%p52_p3), %s161_s26, 6 }
  0x12   : > { %s988_s29 = sshll.u32 (%p52_p3), %s1136_s17, 6  ;;  %s163_s8 = scalar_lea.vmem (%p52_p3), [#allocation2], %s811_s28 }
  0x13   : > { %s168_s30 = sadd.s32 (%p52_p3), %s988_s29, %s813_s27 }
  0x14   : > { %s815_s4 = sshll.u32 (%p52_p3), %s168_s30, 2 }
  0x15   : > { %s170_s7 = scalar_lea.vmem %s1336_s0, %s815_s4 }
  0x16   : > { %v183_v0 = vld [vmem:[%s170_s7] sm:$0xff]  ;;  %v185_v1 = vld [vmem:[%s170_s7 + $0x8] sm:$0xff] }
  0x17   : > { %v187_v2 = vld [vmem:[%s170_s7 + $0x40] sm:$0xff]  ;;  %184 = vst [vmem:[%s163_s8] sm:$0xff] %v183_v0  ;;  %v189_v3 = vld [vmem:[%s170_s7 + $0x48] sm:$0xff] }
  0x18   : > { %186 = vst [vmem:[%s163_s8 + $0x8] sm:$0xff] %v185_v1  ;;  %v191_v4 = vld [vmem:[%s170_s7 + $0x80] sm:$0xff]  ;;  %v193_v5 = vld [vmem:[%s170_s7 + $0x88] sm:$0xff] }
  0x19   : > { %188 = vst [vmem:[%s163_s8 + $0x10] sm:$0xff] %v187_v2  ;;  %v195_v6 = vld [vmem:[%s170_s7 + $0xc0] sm:$0xff]  ;;  %v197_v7 = vld [vmem:[%s170_s7 + $0xc8] sm:$0xff] }
  0x1a   : > { %190 = vst [vmem:[%s163_s8 + $0x18] sm:$0xff] %v189_v3 }
  0x1b   : > { %192 = vst [vmem:[%s163_s8 + $0x20] sm:$0xff] %v191_v4 }
  0x1c   : > { %194 = vst [vmem:[%s163_s8 + $0x28] sm:$0xff] %v193_v5 }
  0x1d   : > { %196 = vst [vmem:[%s163_s8 + $0x30] sm:$0xff] %v195_v6 }
  0x1e   : > { %198 = vst [vmem:[%s163_s8 + $0x38] sm:$0xff] %v197_v7 }
  0x1f PF: > { %p816_p7 = scmp.ge.s32.totalorder %s1140_s18, 1  ;;  %p216_p8 = scmp.lt.s32.totalorder %s1140_s18, 17 }
  0x21   : > { %p217_p9 = pnand %p816_p7, %p216_p8 }
  0x22   : > { %s818_s9 = sshll.u32 (!%p217_p9), %s1124_s14, 6  ;;  %p260_p10 = scmp.lt.s32.totalorder (!%p217_p9), %s1128_s15, 3 }
  0x23   : > { %220 = sbr.rel (%p217_p9) target bundleno = 273 (0x111), region = 51  ;;  %p262_p11 = scmp.lt.s32.totalorder (!%p217_p9), %s818_s9, 255 }
  0x24   : > { %s821_s10 = sshll.u32 (!%p217_p9), %s1128_s15, 2  ;;  %s223_s30 = sand.u32 (!%p217_p9), 1, %s1116_s12  }
  0x25   : > { %p271_p12 = scmp.lt.s32.totalorder (!%p217_p9), %s821_s10, 15  ;;  %s817_s4 = sshll.u32 (!%p217_p9), %s223_s30, 6 }
  0x26   : > { %s1271_s12 = scalar_lea.vmem (!%p217_p9), [#allocation2], %s817_s4  ;;  %p983_p13 = scmp.ne.s32.totalorder (!%p217_p9), %s1124_s14, 0 }
  0x28   : > { %s1353_s15 = smov (!%p260_p10, %s1128_s15), 3  ;;  %s1355_s9 = smov (!%p262_p11, %s818_s9), 255  ;;  %v825_v40 = vld [vmem:[%s1271_s12] sm:$0xf]  ;;  %v991_v41 = vld [vmem:[%s1271_s12 + $0xc] sm:$0xf0] }
  0x29   : > { %s819_s11 = sshll.u32 %s1353_s15, 8  ;;  %s1357_s10 = smov (!%p271_p12, %s821_s10), 15  ;;  %v989_v42 = vld [vmem:[%s1271_s12 + $0x4] sm:$0xf]  ;;  %v827_v43 = vld [vmem:[%s1271_s12 + $0x10] sm:$0xf0]  ;;  %v826_v48 = vor.u32 %v991_v41, %v825_v40 }
  0x2a   : > { %s265_s21 = sadd.s32 %s819_s11, %s1355_s9  ;;  %s822_s15 = sshll.u32 %s1357_s10, 3  ;;  %v833_v44 = vld [vmem:[%s1271_s12 + $0x8] sm:$0xf]  ;;  %v992_v45 = vld [vmem:[%s1271_s12 + $0x14] sm:$0xf0]  ;;  %v830_v49 = vor.u32 %v989_v42, %v827_v43 }
  0x2b   : > { %s820_s22 = sshll.u32 %s265_s21, 2  ;;  %s1242_s29 = scalar_lea.vmem %s1339_s3, %s822_s15  ;;  %v990_v46 = vld [vmem:[%s1271_s12 + $0xc] sm:$0xf]  ;;  %v835_v47 = vld [vmem:[%s1271_s12 + $0x18] sm:$0xf0]  ;;  %v834_v50 = vor.u32 %v992_v45, %v833_v44 }
  0x2c   : > { %s1231_s26 = scalar_lea.vmem %s1337_s1, %s820_s22  ;;  %v838_v51 = vor.u32 %v990_v46, %v835_v47  ;;  %v841_v52 = vld [vmem:[%s1271_s12 + $0x20] sm:$0xf]  ;;  %v995_v53 = vld [vmem:[%s1271_s12 + $0x2c] sm:$0xf0]  ;;  %v993_v54 = vld [vmem:[%s1271_s12 + $0x24] sm:$0xf] }
  0x2d   : > { %v1004_v8 = vld [vmem:[%s1231_s26 + $0x38] sm:$0xff]  ;;  %v1003_v12 = vld [vmem:[%s1231_s26 + $0x30] sm:$0xff]  ;;  %v1002_v16 = vld [vmem:[%s1231_s26 + $0x28] sm:$0xff]  ;;  %v842_v60 = vor.u32 %v995_v53, %v841_v52 }
  0x2e   : > { %v1012_v9 = vld [vmem:[%s1231_s26 + $0x78] sm:$0xff]  ;;  %581 = vmatpush.bf16.msra.mxu0 %v1004_v8  ;;  %v1011_v13 = vld [vmem:[%s1231_s26 + $0x70] sm:$0xff]  ;;  %v1010_v17 = vld [vmem:[%s1231_s26 + $0x68] sm:$0xff] }
  0x2f   : > { %v1020_v10 = vld [vmem:[%s1231_s26 + $0xb8] sm:$0xff]  ;;  %600 = vmatpush.bf16.msra.mxu1 %v1012_v9  ;;  %v1019_v14 = vld [vmem:[%s1231_s26 + $0xb0] sm:$0xff]  ;;  %v1018_v18 = vld [vmem:[%s1231_s26 + $0xa8] sm:$0xff] }
  0x30   : > { %v1028_v11 = vld [vmem:[%s1231_s26 + $0xf8] sm:$0xff]  ;;  %619 = vmatpush.bf16.msra.mxu2 %v1020_v10  ;;  %v1027_v15 = vld [vmem:[%s1231_s26 + $0xf0] sm:$0xff]  ;;  %v1026_v19 = vld [vmem:[%s1231_s26 + $0xe8] sm:$0xff] }
  0x31   : > { %638 = vmatpush.bf16.msra.mxu3 %v1028_v11  ;;  %v1001_v20 = vld [vmem:[%s1231_s26 + $0x20] sm:$0xff]  ;;  %v1000_v24 = vld [vmem:[%s1231_s26 + $0x18] sm:$0xff]  ;;  %v999_v28 = vld [vmem:[%s1231_s26 + $0x10] sm:$0xff] }
  0x32   : > { %582 = vmatpush.bf16.msra.mxu0 %v1003_v12  ;;  %v1009_v21 = vld [vmem:[%s1231_s26 + $0x60] sm:$0xff]  ;;  %v1008_v25 = vld [vmem:[%s1231_s26 + $0x58] sm:$0xff]  ;;  %v1007_v29 = vld [vmem:[%s1231_s26 + $0x50] sm:$0xff] }
  0x33   : > { %601 = vmatpush.bf16.msra.mxu1 %v1011_v13  ;;  %v1017_v22 = vld [vmem:[%s1231_s26 + $0xa0] sm:$0xff]  ;;  %v1016_v26 = vld [vmem:[%s1231_s26 + $0x98] sm:$0xff]  ;;  %v1015_v30 = vld [vmem:[%s1231_s26 + $0x90] sm:$0xff] }
  0x34   : > { %620 = vmatpush.bf16.msra.mxu2 %v1019_v14  ;;  %v1025_v23 = vld [vmem:[%s1231_s26 + $0xe0] sm:$0xff]  ;;  %v1024_v27 = vld [vmem:[%s1231_s26 + $0xd8] sm:$0xff]  ;;  %v1023_v31 = vld [vmem:[%s1231_s26 + $0xd0] sm:$0xff] }
  0x35   : > { %639 = vmatpush.bf16.msra.mxu3 %v1027_v15  ;;  %v998_v32 = vld [vmem:[%s1231_s26 + $0x8] sm:$0xff]  ;;  %v997_v36 = vld [vmem:[%s1231_s26] sm:$0xff]  ;;  %v843_v55 = vld [vmem:[%s1271_s12 + $0x30] sm:$0xf0] }
  0x36   : > { %583 = vmatpush.bf16.msra.mxu0 %v1002_v16  ;;  %v1006_v33 = vld [vmem:[%s1231_s26 + $0x48] sm:$0xff]  ;;  %v1005_v37 = vld [vmem:[%s1231_s26 + $0x40] sm:$0xff]  ;;  %v996_v57 = vld [vmem:[%s1271_s12 + $0x34] sm:$0xf0]  ;;  %v846_v61 = vor.u32 %v993_v54, %v843_v55 }
  0x37   : > { %602 = vmatpush.bf16.msra.mxu1 %v1010_v17  ;;  %v1014_v34 = vld [vmem:[%s1231_s26 + $0x88] sm:$0xff]  ;;  %v1013_v38 = vld [vmem:[%s1231_s26 + $0x80] sm:$0xff]  ;;  %v851_v59 = vld [vmem:[%s1271_s12 + $0x38] sm:$0xf0] }
  0x38   : > { %621 = vmatpush.bf16.msra.mxu2 %v1018_v18  ;;  %v1022_v35 = vld [vmem:[%s1231_s26 + $0xc8] sm:$0xff]  ;;  %v1021_v39 = vld [vmem:[%s1231_s26 + $0xc0] sm:$0xff] }
  0x39   : > { %640 = vmatpush.bf16.msra.mxu3 %v1026_v19  ;;  %v849_v56 = vld [vmem:[%s1271_s12 + $0x28] sm:$0xf]  ;;  %v994_v58 = vld [vmem:[%s1271_s12 + $0x2c] sm:$0xf] }
  0x3a   : > { %584 = vmatpush.bf16.msra.mxu0 %v1001_v20  ;;  %v850_v62 = vor.u32 %v996_v57, %v849_v56  ;;  %v854_v63 = vor.u32 %v994_v58, %v851_v59 }
  0x3b   : > { %603 = vmatpush.bf16.msra.mxu1 %v1009_v21 }
  0x3c   : > { %622 = vmatpush.bf16.msra.mxu2 %v1017_v22 }
  0x3d   : > { %641 = vmatpush.bf16.msra.mxu3 %v1025_v23 }
  0x3e   : > { %585 = vmatpush.bf16.msra.mxu0 %v1000_v24 }
  0x3f   : > { %604 = vmatpush.bf16.msra.mxu1 %v1008_v25 }
  0x40   : > { %623 = vmatpush.bf16.msra.mxu2 %v1016_v26 }
  0x41   : > { %642 = vmatpush.bf16.msra.mxu3 %v1024_v27 }
  0x42   : > { %586 = vmatpush.bf16.msra.mxu0 %v999_v28 }
  0x43   : > { %605 = vmatpush.bf16.msra.mxu1 %v1007_v29 }
  0x44   : > { %624 = vmatpush.bf16.msra.mxu2 %v1015_v30 }
  0x45   : > { %643 = vmatpush.bf16.msra.mxu3 %v1023_v31 }
  0x46   : > { %587 = vmatpush.bf16.msra.mxu0 %v998_v32 }
  0x47   : > { %606 = vmatpush.bf16.msra.mxu1 %v1006_v33 }
  0x48   : > { %625 = vmatpush.bf16.msra.mxu2 %v1014_v34 }
  0x49   : > { %644 = vmatpush.bf16.msra.mxu3 %v1022_v35 }
  0x4a   : > { %588 = vmatpush.bf16.msra.mxu0 %v997_v36 }
  0x4b   : > { %607 = vmatpush.bf16.msra.mxu1 %v1005_v37 }
  0x4c   : > { %626 = vmatpush.bf16.msra.mxu2 %v1013_v38 }
  0x4d   : > { %645 = vmatpush.bf16.msra.mxu3 %v1021_v39  ;;  %589 = vmatmul.bf16.vlgmr.msra.gmra.mxu0 %v826_v48 }
  0x4e   : > { %608 = vmatmul.bf16.vlgmr.msra.gmra.mxu1 %v830_v49 }
  0x4f   : > { %627 = vmatmul.bf16.vlgmr.msra.gmra.mxu2 %v834_v50 }
  0x50   : > { %646 = vmatmul.bf16.vlgmr.msra.gmra.mxu3 %v838_v51 }
  0x5d   : > { %594 = vmatmul.bf16.gmra.mxu0 %v842_v60 }
  0x5e   : > { %613 = vmatmul.bf16.gmra.mxu1 %v846_v61 }
  0x5f   : > { %632 = vmatmul.bf16.gmra.mxu2 %v850_v62 }
  0x60   : > { %651 = vmatmul.bf16.gmra.mxu3 %v854_v63 }
  0xca   : > { %v590_v0 = vpop.f32.mrf.mxu0 }
  0xcb   : > { %v609_v1 = vpop.f32.mrf.mxu1 }
  0xcc   : > { %v610_v2 = vadd.f32 %v609_v1, %v590_v0 }
  0xd2   : > { %v628_v3 = vpop.f32.mrf.mxu2  ;;  %v592_v6 = vpop.f32.mrf.mxu0 }
  0xd3   : > { %v647_v4 = vpop.f32.mrf.mxu3  ;;  %v629_v5 = vadd.f32 %v628_v3, %v610_v2  ;;  %v611_v7 = vpop.f32.mrf.mxu1 }
  0xd4   : > { %v612_v9 = vadd.f32 %v611_v7, %v592_v6 }
  0xd5   : > { %v648_v8 = vadd.f32 %v647_v4, %v629_v5 }
  0xda   : > { %v630_v10 = vpop.f32.mrf.mxu2  ;;  %v595_v13 = vpop.f32.mrf.mxu0 }
  0xdb   : > { %v649_v11 = vpop.f32.mrf.mxu3  ;;  %v631_v12 = vadd.f32 %v630_v10, %v612_v9  ;;  %v614_v14 = vpop.f32.mrf.mxu1 }
  0xdc   : > { %v615_v16 = vadd.f32 %v614_v14, %v595_v13 }
  0xdd   : > { %v650_v15 = vadd.f32 %v649_v11, %v631_v12 }
  0xe2   : > { %v633_v17 = vpop.f32.mrf.mxu2  ;;  %v597_v21 = vpop.f32.mrf.mxu0 }
  0xe3   : > { %v652_v18 = vpop.f32.mrf.mxu3  ;;  %v634_v19 = vadd.f32 %v633_v17, %v615_v16  ;;  %v616_v22 = vpop.f32.mrf.mxu1 }
  0xe4   : > { %v617_v23 = vadd.f32 %v616_v22, %v597_v21 }
  0xe5   : > { %v653_v20 = vadd.f32 %v652_v18, %v634_v19 }
  0xe9   : > { %660 = sbr.rel (%p983_p13) target bundleno = 242 (0xf2), region = 59 }
  0xea   : > { %v635_v24 = vpop.f32.mrf.mxu2 }
  0xeb   : > { %v636_v25 = vadd.f32 %v635_v24, %v617_v23  ;;  %v654_v26 = vpop.f32.mrf.mxu3 }
  0xed   : > { %v655_v27 = vadd.f32 %v654_v26, %v636_v25 }
  0xee   : > { %661 = vst [vmem:[%s1242_s29] sm:$0xff] %v648_v8 }
  0xef   : > { %662 = vst [vmem:[%s1242_s29 + $0x8] sm:$0xff] %v650_v15 }
  0xf0   : > { %663 = vst [vmem:[%s1242_s29 + $0x10] sm:$0xff] %v653_v20 }
  0xf1   : > { %664 = vst [vmem:[%s1242_s29 + $0x18] sm:$0xff] %v655_v27 }
  0xf2 PF: > { %p984_p0 = scmp.le.s32.totalorder %s1124_s14, 0 }
  0xf4   : > { %668 = sbr.rel (%p984_p0) target bundleno = 256 (0x100), region = 63 }
  0xf9   : > { %v669_v28 = vld [vmem:[%s1242_s29] sm:$0xff]  ;;  %v670_v29 = vld [vmem:[%s1242_s29 + $0x8] sm:$0xff]  ;;  %v671_v30 = vld [vmem:[%s1242_s29 + $0x10] sm:$0xff] }
  0xfa   : > { %v673_v31 = vadd.f32 %v669_v28, %v648_v8  ;;  %v674_v32 = vadd.f32 %v670_v29, %v650_v15  ;;  %v675_v33 = vadd.f32 %v671_v30, %v653_v20  ;;  %v672_v34 = vld [vmem:[%s1242_s29 + $0x18] sm:$0xff] }
  0xfb   : > { %v676_v35 = vadd.f32 %v672_v34, %v655_v27 }
  0xfc   : > { %677 = vst [vmem:[%s1242_s29] sm:$0xff] %v673_v31 }
  0xfd   : > { %678 = vst [vmem:[%s1242_s29 + $0x8] sm:$0xff] %v674_v32 }
  0xfe   : > { %679 = vst [vmem:[%s1242_s29 + $0x10] sm:$0xff] %v675_v33 }
  0xff   : > { %680 = vst [vmem:[%s1242_s29 + $0x18] sm:$0xff] %v676_v35 }
 0x100 PF: > { %p985_p1 = scmp.ne.s32.totalorder %s1124_s14, 3 }
 0x102   : > { %684 = sbr.rel (%p985_p1) target bundleno = 273 (0x111), region = 67 }
 0x107   : > { %v685_v36 = vld [vmem:[%s1242_s29] sm:$0xff]  ;;  %v686_v38 = vld [vmem:[%s1242_s29 + $0x8] sm:$0xff]  ;;  %v687_v39 = vld [vmem:[%s1242_s29 + $0x10] sm:$0xff] }
 0x108   : > { %v1085_v37 = vld [vmem:[%s1338_s2] ss:$0 sm:$0xff]  ;;  %v688_v40 = vld [vmem:[%s1242_s29 + $0x18] sm:$0xff] }
 0x109   : > { %v693_v41 = vadd.f32 %v1085_v37, %v685_v36  ;;  %v694_v42 = vadd.f32 %v1085_v37, %v686_v38  ;;  %v695_v43 = vadd.f32 %v1085_v37, %v687_v39  ;;  %v696_v44 = vadd.f32 %v1085_v37, %v688_v40 }
 0x10b   : > { %v697_v45 = vmax.f32 %v693_v41, 0.0  ;;  %v698_v46 = vmax.f32 %v694_v42, 0.0  ;;  %v699_v47 = vmax.f32 %v695_v43, 0.0  ;;  %v700_v48 = vmax.f32 %v696_v44, 0.0 }
 0x10d   : > { %701 = vst [vmem:[%s1242_s29] sm:$0xff] %v697_v45 }
 0x10e   : > { %702 = vst [vmem:[%s1242_s29 + $0x8] sm:$0xff] %v698_v46 }
 0x10f   : > { %703 = vst [vmem:[%s1242_s29 + $0x10] sm:$0xff] %v699_v47 }
 0x110   : > { %704 = vst [vmem:[%s1242_s29 + $0x18] sm:$0xff] %v700_v48 }
 0x111 PF: > { %s13_s18 = sadd.s32 1, %s1140_s18   ;;  %s1340_s12 = smov %s1120_s13 }
 0x112   : > { %p10_p2 = scmp.ge.s32.totalorder %s13_s18, 18   ;;  %s1341_s13 = smov %s1213_s25 }
 0x113   : > { %s1342_s14 = smov %s1132_s16  ;;  %s1343_s15 = smov %s1136_s17 }
 0x114   : > { %s1344_s16 = smov %s1347_s19  ;;  %s1345_s17 = smov %s1351_s20 }
 0x115   :  { %12 = sbr.rel (!%p10_p2) target bundleno = 4 (0x4), region = 105 }

// kernel: forward_pallas.27
= control target key start
LH: loop header
LB: loop body
LE: loop exit
PB: predicated region body
PF: predicated region fallthrough
CT: control target
= control target key end

     0   :  { %s1491_s12 = smov 0   ;;  %s1493_s13 = smov 0   ;;  %s2046_s0 = inlined_call_operand.vmem [shape: bf16[128,1152], index: 0, kind: input, shape index: {}]   ;;  %s2047_s1 = inlined_call_operand.vmem [shape: bf16[1,1152,128], index: 1, kind: input, shape index: {}]   ;;  %s2048_s2 = inlined_call_operand.vmem [shape: f32[1,128], index: 2, kind: input, shape index: {}]   ;;  %s2049_s3 = inlined_call_operand.vmem [shape: f32[128,128], index: 3, kind: output, shape index: {}]  }
   0x1   :  { %s1495_s14 = smov 0   ;;  %s1497_s15 = smov 0  }
   0x2   :  { %s1499_s16 = smov 0  }
   0x3 LB: > { %s25_s17 = sadd.s32 1, %s1465_s15  ;;  %p50_p1 = scmp.ne.s32.totalorder %s1457_s13, %s1453_s12  ;;  %s1469_s16 = sphi %s1499_s16, %s13_s16   ;;  %s1465_s15 = sphi %s1497_s15, %s2053_s15   ;;  %s1461_s14 = sphi %s1495_s14, %s2052_s14   ;;  %s1457_s13 = sphi %s1493_s13, %s2051_s13   ;;  %s1453_s12 = sphi %s1491_s12, %s2050_s12  }
   0x4   : > { %p26_p0 = scmp.ge.s32.totalorder %s25_s17, 3  ;;  %p51_p2 = scmp.eq.s32.totalorder %s1469_s16, 0 }
   0x5   : > { %s43_s19 = sadd.s32 1, %s1457_s13  ;;  %p1080_p5 = scmp.ge.s32.totalorder %s1469_s16, 3 }
   0x6   : > { %s2055_s17 = smov (%p26_p0, %s25_s17), 0  ;;  %p52_p3 = por %p51_p2, %p50_p1 }
   0x7   : > { %s39_s18 = ssub.s32 %s1465_s15, %s2055_s17  ;;  %156 = sbr.rel (%p1080_p5) target bundleno = 49 (0x31), region = 20 }
   0x8   : > { %p41_p4 = scmp.eq.s32.totalorder %s39_s18, 0 }
   0xa   : > { %s1526_s20 = scalar_select %p41_p4, %s1457_s13, %s43_s19  }
   0xc   : > { %159 = sbr.rel (!%p52_p3) target bundleno = 49 (0x31), region = 24  ;;  %s161_s21 = sand.u32 (%p52_p3), 1, %s1457_s13  }
   0xd   : > { %s1315_s22 = smul.u32 (%p52_p3), 12, %s1465_s15 }
   0xe   : > { %s1388_s23 = smul.u32 (%p52_p3), 192, %s161_s21 }
   0xf   : > { %s1534_s26 = scalar_lea.vmem (%p52_p3), %s2046_s0, %s1315_s22 }
  0x10   : > { %v185_v0 = vld [vmem:[%s1534_s26] sm:$0xff] (%p52_p3)  ;;  %v189_v2 = vld [vmem:[%s1534_s26 + $0x48] sm:$0xff] (%p52_p3)  ;;  %s1539_s27 = scalar_lea.vmem (%p52_p3), [#allocation2], %s1388_s23  ;;  %v193_v4 = vld [vmem:[%s1534_s26 + $0x90] sm:$0xff] (%p52_p3) }
  0x11   : > { %v187_v1 = vld [vmem:[%s1534_s26 + $0x24] sm:$0xff]  ;;  %186 = vst [vmem:[%s1539_s27] sm:$0xff] %v185_v0  ;;  %v191_v3 = vld [vmem:[%s1534_s26 + $0x6c] sm:$0xff]  ;;  %v195_v5 = vld [vmem:[%s1534_s26 + $0xb4] sm:$0xff] }
  0x12   : > { %188 = vst [vmem:[%s1539_s27 + $0xc] sm:$0xff] %v187_v1  ;;  %v197_v6 = vld [vmem:[%s1534_s26 + $0xd8] sm:$0xff]  ;;  %v201_v8 = vld [vmem:[%s1534_s26 + $0x120] sm:$0xff]  ;;  %v205_v10 = vld [vmem:[%s1534_s26 + $0x168] sm:$0xff] }
  0x13   : > { %190 = vst [vmem:[%s1539_s27 + $0x18] sm:$0xff] %v189_v2  ;;  %v199_v7 = vld [vmem:[%s1534_s26 + $0xfc] sm:$0xff]  ;;  %v203_v9 = vld [vmem:[%s1534_s26 + $0x144] sm:$0xff]  ;;  %v207_v11 = vld [vmem:[%s1534_s26 + $0x18c] sm:$0xff] }
  0x14   : > { %192 = vst [vmem:[%s1539_s27 + $0x24] sm:$0xff] %v191_v3  ;;  %v209_v12 = vld [vmem:[%s1534_s26 + $0x1b0] sm:$0xff]  ;;  %v213_v14 = vld [vmem:[%s1534_s26 + $0x1f8] sm:$0xff]  ;;  %v1082_v16 = vld [vmem:[%s1534_s26 + $0x8] sm:$0xf] }
  0x15   : > { %194 = vst [vmem:[%s1539_s27 + $0x30] sm:$0xff] %v193_v4  ;;  %v211_v13 = vld [vmem:[%s1534_s26 + $0x1d4] sm:$0xff]  ;;  %v215_v15 = vld [vmem:[%s1534_s26 + $0x21c] sm:$0xff]  ;;  %v1084_v17 = vld [vmem:[%s1534_s26 + $0x2c] sm:$0xf] }
  0x16   : > { %196 = vst [vmem:[%s1539_s27 + $0x3c] sm:$0xff] %v195_v5  ;;  %v1086_v18 = vld [vmem:[%s1534_s26 + $0x50] sm:$0xf]  ;;  %v1088_v19 = vld [vmem:[%s1534_s26 + $0x74] sm:$0xf] }
  0x17   : > { %198 = vst [vmem:[%s1539_s27 + $0x48] sm:$0xff] %v197_v6  ;;  %v1090_v20 = vld [vmem:[%s1534_s26 + $0x98] sm:$0xf]  ;;  %v1092_v21 = vld [vmem:[%s1534_s26 + $0xbc] sm:$0xf] }
  0x18   : > { %200 = vst [vmem:[%s1539_s27 + $0x54] sm:$0xff] %v199_v7  ;;  %v1094_v22 = vld [vmem:[%s1534_s26 + $0xe0] sm:$0xf]  ;;  %v1096_v23 = vld [vmem:[%s1534_s26 + $0x104] sm:$0xf] }
  0x19   : > { %202 = vst [vmem:[%s1539_s27 + $0x60] sm:$0xff] %v201_v8  ;;  %v1098_v24 = vld [vmem:[%s1534_s26 + $0x128] sm:$0xf]  ;;  %v1100_v25 = vld [vmem:[%s1534_s26 + $0x14c] sm:$0xf] }
  0x1a   : > { %204 = vst [vmem:[%s1539_s27 + $0x6c] sm:$0xff] %v203_v9  ;;  %v1102_v26 = vld [vmem:[%s1534_s26 + $0x170] sm:$0xf]  ;;  %v1104_v27 = vld [vmem:[%s1534_s26 + $0x194] sm:$0xf] }
  0x1b   : > { %206 = vst [vmem:[%s1539_s27 + $0x78] sm:$0xff] %v205_v10  ;;  %v1106_v28 = vld [vmem:[%s1534_s26 + $0x1b8] sm:$0xf]  ;;  %v1108_v29 = vld [vmem:[%s1534_s26 + $0x1dc] sm:$0xf] }
  0x1c   : > { %208 = vst [vmem:[%s1539_s27 + $0x84] sm:$0xff] %v207_v11  ;;  %v1110_v30 = vld [vmem:[%s1534_s26 + $0x200] sm:$0xf]  ;;  %v1112_v31 = vld [vmem:[%s1534_s26 + $0x224] sm:$0xf] }
  0x1d   : > { %210 = vst [vmem:[%s1539_s27 + $0x90] sm:$0xff] %v209_v12 }
  0x1e   : > { %212 = vst [vmem:[%s1539_s27 + $0x9c] sm:$0xff] %v211_v13 }
  0x1f   : > { %214 = vst [vmem:[%s1539_s27 + $0xa8] sm:$0xff] %v213_v14 }
  0x20   : > { %216 = vst [vmem:[%s1539_s27 + $0xb4] sm:$0xff] %v215_v15 }
  0x21   : > { %1083 = vst [vmem:[%s1539_s27 + $0x8] sm:$0xf] %v1082_v16 }
  0x22   : > { %1085 = vst [vmem:[%s1539_s27 + $0x14] sm:$0xf] %v1084_v17 }
  0x23   : > { %1087 = vst [vmem:[%s1539_s27 + $0x20] sm:$0xf] %v1086_v18 }
  0x24   : > { %1089 = vst [vmem:[%s1539_s27 + $0x2c] sm:$0xf] %v1088_v19 }
  0x25   : > { %1091 = vst [vmem:[%s1539_s27 + $0x38] sm:$0xf] %v1090_v20 }
  0x26   : > { %1093 = vst [vmem:[%s1539_s27 + $0x44] sm:$0xf] %v1092_v21 }
  0x27   : > { %1095 = vst [vmem:[%s1539_s27 + $0x50] sm:$0xf] %v1094_v22 }
  0x28   : > { %1097 = vst [vmem:[%s1539_s27 + $0x5c] sm:$0xf] %v1096_v23 }
  0x29   : > { %1099 = vst [vmem:[%s1539_s27 + $0x68] sm:$0xf] %v1098_v24 }
  0x2a   : > { %1101 = vst [vmem:[%s1539_s27 + $0x74] sm:$0xf] %v1100_v25 }
  0x2b   : > { %1103 = vst [vmem:[%s1539_s27 + $0x80] sm:$0xf] %v1102_v26 }
  0x2c   : > { %1105 = vst [vmem:[%s1539_s27 + $0x8c] sm:$0xf] %v1104_v27 }
  0x2d   : > { %1107 = vst [vmem:[%s1539_s27 + $0x98] sm:$0xf] %v1106_v28 }
  0x2e   : > { %1109 = vst [vmem:[%s1539_s27 + $0xa4] sm:$0xf] %v1108_v29 }
  0x2f   : > { %1111 = vst [vmem:[%s1539_s27 + $0xb0] sm:$0xf] %v1110_v30 }
  0x30   : > { %1113 = vst [vmem:[%s1539_s27 + $0xbc] sm:$0xf] %v1112_v31 }
  0x31 PF: > { %p1114_p6 = scmp.ge.s32.totalorder %s1469_s16, 1  ;;  %p274_p7 = scmp.lt.s32.totalorder %s1469_s16, 4 }
  0x33   : > { %p275_p8 = pnand %p1114_p6, %p274_p7 }
  0x34   : > { %s317_s28 = smul.u32 (!%p275_p8), 48, %s1461_s14  ;;  %s281_s6 = sand.u32 (!%p275_p8), 1, %s1453_s12  }
  0x35   : > { %278 = sbr.rel (%p275_p8) target bundleno = 387 (0x183), region = 54  ;;  %p1308_p10 = scmp.ne.s32.totalorder (!%p275_p8), %s1461_s14, 0 }
  0x36   : > { %p320_p9 = scmp.lt.s32.totalorder (!%p275_p8), %s317_s28, 143  ;;  %s1389_s7 = smul.u32 (!%p275_p8), 192, %s281_s6 }
  0x38   : > { %s1661_s8 = scalar_lea.vmem (!%p275_p8), [#allocation2], %s1389_s7 }
  0x3a   : > { %s2057_s28 = smov (!%p320_p9, %s317_s28), 143  ;;  %v1118_v53 = vld [vmem:[%s1661_s8] sm:$0xf]  ;;  %v1317_v54 = vld [vmem:[%s1661_s8 + $0x8] sm:$0xf0] }
  0x3b   : > { %s1115_s29 = sshll.u32 %s2057_s28, 2  ;;  %v1190_v57 = vld [vmem:[%s1661_s8 + $0x90] sm:$0xf]  ;;  %v1335_v59 = vld [vmem:[%s1661_s8 + $0x98] sm:$0xf0]  ;;  %v1119_v0 = vor.u32 %v1317_v54, %v1118_v53 }
  0x3c   : > { %s1608_s5 = scalar_lea.vmem %s2047_s1, %s1115_s29  ;;  %v1316_v60 = vld [vmem:[%s1661_s8 + $0x4] sm:$0xf]  ;;  %v1120_v61 = vld [vmem:[%s1661_s8 + $0xc] sm:$0xf0]  ;;  %v1126_v62 = vld [vmem:[%s1661_s8 + $0x8] sm:$0xf]  ;;  %v1191_v1 = vor.u32 %v1335_v59, %v1190_v57 }
  0x3d   : > { %v1347_v32 = vld [vmem:[%s1608_s5 + $0x38] sm:$0xff]  ;;  %v1346_v35 = vld [vmem:[%s1608_s5 + $0x30] sm:$0xff]  ;;  %v1345_v38 = vld [vmem:[%s1608_s5 + $0x28] sm:$0xff]  ;;  %v1123_v2 = vor.u32 %v1316_v60, %v1120_v61 }
  0x3e   : > { %v1612_v33 = vld [vmem:[%s1608_s5 + $0x78] sm:$0xff]  ;;  %687 = vmatpush.bf16.msra.mxu0 %v1347_v32  ;;  %1364 = vmatpush.bf16.msra.mxu3 %v1347_v32  ;;  %v1621_v36 = vld [vmem:[%s1608_s5 + $0x70] sm:$0xff]  ;;  %v1353_v39 = vld [vmem:[%s1608_s5 + $0x68] sm:$0xff] }
  0x3f   : > { %v1615_v34 = vld [vmem:[%s1608_s5 + $0xb8] sm:$0xff]  ;;  %736 = vmatpush.bf16.msra.mxu1 %v1612_v33  ;;  %v1624_v37 = vld [vmem:[%s1608_s5 + $0xb0] sm:$0xff]  ;;  %v1631_v40 = vld [vmem:[%s1608_s5 + $0xa8] sm:$0xff] }
  0x40   : > { %785 = vmatpush.bf16.msra.mxu2 %v1615_v34  ;;  %v1344_v41 = vld [vmem:[%s1608_s5 + $0x20] sm:$0xff]  ;;  %v1343_v44 = vld [vmem:[%s1608_s5 + $0x18] sm:$0xff]  ;;  %v1342_v47 = vld [vmem:[%s1608_s5 + $0x10] sm:$0xff] }
  0x41   : > { %v1636_v42 = vld [vmem:[%s1608_s5 + $0x60] sm:$0xff]  ;;  %v1351_v45 = vld [vmem:[%s1608_s5 + $0x58] sm:$0xff]  ;;  %v1350_v48 = vld [vmem:[%s1608_s5 + $0x50] sm:$0xff] }
  0x42   : > { %688 = vmatpush.bf16.msra.mxu0 %v1346_v35  ;;  %1365 = vmatpush.bf16.msra.mxu3 %v1346_v35  ;;  %v1639_v43 = vld [vmem:[%s1608_s5 + $0xa0] sm:$0xff]  ;;  %v1647_v46 = vld [vmem:[%s1608_s5 + $0x98] sm:$0xff]  ;;  %v1653_v49 = vld [vmem:[%s1608_s5 + $0x90] sm:$0xff] }
  0x43   : > { %737 = vmatpush.bf16.msra.mxu1 %v1621_v36  ;;  %v1341_v50 = vld [vmem:[%s1608_s5 + $0x8] sm:$0xff]  ;;  %v1340_v55 = vld [vmem:[%s1608_s5] sm:$0xff]  ;;  %v1318_v63 = vld [vmem:[%s1661_s8 + $0x10] sm:$0xf0] }
  0x44   : > { %786 = vmatpush.bf16.msra.mxu2 %v1624_v37  ;;  %v1349_v51 = vld [vmem:[%s1608_s5 + $0x48] sm:$0xff]  ;;  %v1348_v56 = vld [vmem:[%s1608_s5 + $0x40] sm:$0xff]  ;;  %v1127_v3 = vor.u32 %v1318_v63, %v1126_v62  ;;  %v1130_v4 = vld [vmem:[%s1661_s8 + $0x18] sm:$0xf] }
  0x45   : > { %v1659_v52 = vld [vmem:[%s1608_s5 + $0x88] sm:$0xff]  ;;  %v1669_v58 = vld [vmem:[%s1608_s5 + $0x80] sm:$0xff]  ;;  %v1338_v7 = vld [vmem:[%s1661_s8 + $0xb0] sm:$0xf0] }
  0x46   : > { %689 = vmatpush.bf16.msra.mxu0 %v1345_v38  ;;  %1366 = vmatpush.bf16.msra.mxu3 %v1345_v38  ;;  %v1320_v5 = vld [vmem:[%s1661_s8 + $0x20] sm:$0xf0]  ;;  %v1202_v6 = vld [vmem:[%s1661_s8 + $0xa8] sm:$0xf]  ;;  %v1319_v8 = vld [vmem:[%s1661_s8 + $0x1c] sm:$0xf] }
  0x47   : > { %738 = vmatpush.bf16.msra.mxu1 %v1353_v39  ;;  %v1132_v9 = vld [vmem:[%s1661_s8 + $0x24] sm:$0xf0]  ;;  %v1138_v10 = vld [vmem:[%s1661_s8 + $0x20] sm:$0xf]  ;;  %v1321_v11 = vld [vmem:[%s1661_s8 + $0x28] sm:$0xf0]  ;;  %v1131_v12 = vor.u32 %v1320_v5, %v1130_v4  ;;  %v1203_v13 = vor.u32 %v1338_v7, %v1202_v6 }
  0x48   : > { %787 = vmatpush.bf16.msra.mxu2 %v1631_v40  ;;  %v1135_v14 = vor.u32 %v1319_v8, %v1132_v9  ;;  %v1139_v15 = vor.u32 %v1321_v11, %v1138_v10  ;;  %v1142_v16 = vld [vmem:[%s1661_s8 + $0x30] sm:$0xf]  ;;  %v1323_v17 = vld [vmem:[%s1661_s8 + $0x38] sm:$0xf0]  ;;  %v1322_v18 = vld [vmem:[%s1661_s8 + $0x34] sm:$0xf] }
  0x49   : > { %v1334_v19 = vld [vmem:[%s1661_s8 + $0x94] sm:$0xf]  ;;  %v1192_v20 = vld [vmem:[%s1661_s8 + $0x9c] sm:$0xf0]  ;;  %v1150_v22 = vld [vmem:[%s1661_s8 + $0x38] sm:$0xf]  ;;  %v1143_v24 = vor.u32 %v1323_v17, %v1142_v16 }
  0x4a   : > { %690 = vmatpush.bf16.msra.mxu0 %v1344_v41  ;;  %1367 = vmatpush.bf16.msra.mxu3 %v1344_v41  ;;  %v1144_v21 = vld [vmem:[%s1661_s8 + $0x3c] sm:$0xf0]  ;;  %v1324_v23 = vld [vmem:[%s1661_s8 + $0x40] sm:$0xf0]  ;;  %v1195_v25 = vor.u32 %v1334_v19, %v1192_v20  ;;  %v1154_v28 = vld [vmem:[%s1661_s8 + $0x48] sm:$0xf] }
  0x4b   : > { %739 = vmatpush.bf16.msra.mxu1 %v1636_v42  ;;  %v1147_v26 = vor.u32 %v1322_v18, %v1144_v21  ;;  %v1151_v27 = vor.u32 %v1324_v23, %v1150_v22  ;;  %v1326_v29 = vld [vmem:[%s1661_s8 + $0x50] sm:$0xf0]  ;;  %v1325_v30 = vld [vmem:[%s1661_s8 + $0x4c] sm:$0xf]  ;;  %v1204_v32 = vld [vmem:[%s1661_s8 + $0xb4] sm:$0xf0] }
  0x4c   : > { %788 = vmatpush.bf16.msra.mxu2 %v1639_v43  ;;  %v1337_v31 = vld [vmem:[%s1661_s8 + $0xac] sm:$0xf]  ;;  %v1327_v35 = vld [vmem:[%s1661_s8 + $0x58] sm:$0xf0]  ;;  %v1332_v53 = vld [vmem:[%s1661_s8 + $0x80] sm:$0xf0] }
  0x4d   : > { %v1207_v38 = vor.u32 %v1337_v31, %v1204_v32  ;;  %v1329_v41 = vld [vmem:[%s1661_s8 + $0x68] sm:$0xf0]  ;;  %v1331_v54 = vld [vmem:[%s1661_s8 + $0x7c] sm:$0xf]  ;;  %v1180_v57 = vld [vmem:[%s1661_s8 + $0x84] sm:$0xf0] }
  0x4e   : > { %691 = vmatpush.bf16.msra.mxu0 %v1343_v44  ;;  %1368 = vmatpush.bf16.msra.mxu3 %v1343_v44  ;;  %v1336_v44 = vld [vmem:[%s1661_s8 + $0xa0] sm:$0xf0]  ;;  %v1333_v59 = vld [vmem:[%s1661_s8 + $0x88] sm:$0xf0]  ;;  %v1183_v62 = vor.u32 %v1331_v54, %v1180_v57 }
  0x4f   : > { %740 = vmatpush.bf16.msra.mxu1 %v1351_v45 }
  0x50   : > { %789 = vmatpush.bf16.msra.mxu2 %v1647_v46 }
  0x52   : > { %692 = vmatpush.bf16.msra.mxu0 %v1342_v47  ;;  %1369 = vmatpush.bf16.msra.mxu3 %v1342_v47  ;;  %v1330_v47 = vld [vmem:[%s1661_s8 + $0x70] sm:$0xf0] }
  0x53   : > { %741 = vmatpush.bf16.msra.mxu1 %v1350_v48 }
  0x54   : > { %790 = vmatpush.bf16.msra.mxu2 %v1653_v49 }
  0x56   : > { %693 = vmatpush.bf16.msra.mxu0 %v1341_v50  ;;  %1370 = vmatpush.bf16.msra.mxu3 %v1341_v50 }
  0x57   : > { %742 = vmatpush.bf16.msra.mxu1 %v1349_v51 }
  0x58   : > { %791 = vmatpush.bf16.msra.mxu2 %v1659_v52 }
  0x5a   : > { %694 = vmatpush.bf16.msra.mxu0 %v1340_v55  ;;  %1371 = vmatpush.bf16.msra.mxu3 %v1340_v55  ;;  %v1210_v55 = vld [vmem:[%s1661_s8 + $0xb0] sm:$0xf] }
  0x5b   : > { %743 = vmatpush.bf16.msra.mxu1 %v1348_v56 }
  0x5c   : > { %792 = vmatpush.bf16.msra.mxu2 %v1669_v58 }
  0x5d   : > { %695 = vmatmul.bf16.vlgmr.msra.gmra.mxu0 %v1119_v0  ;;  %725 = vmatmul.bf16.vlgmr.msra.gmra.mxu3 %v1191_v1 }
  0x5e   : > { %1372 = vmatpush.bf16.msrb.mxu3 %v1612_v33  ;;  %744 = vmatmul.bf16.vlgmr.msra.gmra.mxu1 %v1123_v2  ;;  %v1156_v33 = vld [vmem:[%s1661_s8 + $0x54] sm:$0xf0] }
  0x5f   : > { %793 = vmatmul.bf16.vlgmr.msra.gmra.mxu2 %v1127_v3 }
  0x62   : > { %1373 = vmatpush.bf16.msrb.mxu3 %v1621_v36  ;;  %v1155_v36 = vor.u32 %v1326_v29, %v1154_v28 }
  0x66   : > { %1374 = vmatpush.bf16.msrb.mxu3 %v1353_v39 }
  0x6a   : > { %1375 = vmatpush.bf16.msrb.mxu3 %v1636_v42  ;;  %v1328_v42 = vld [vmem:[%s1661_s8 + $0x64] sm:$0xf] }
  0x6d   : > { %700 = vmatmul.bf16.gmra.mxu0 %v1131_v12  ;;  %730 = vmatmul.bf16.gmra.mxu3 %v1203_v13 }
  0x6e   : > { %1376 = vmatpush.bf16.msrb.mxu3 %v1351_v45  ;;  %749 = vmatmul.bf16.gmra.mxu1 %v1135_v14  ;;  %v1168_v45 = vld [vmem:[%s1661_s8 + $0x6c] sm:$0xf0] }
  0x6f   : > { %798 = vmatmul.bf16.gmra.mxu2 %v1139_v15  ;;  %v1171_v50 = vor.u32 %v1328_v42, %v1168_v45 }
  0x72   : > { %1377 = vmatpush.bf16.msrb.mxu3 %v1350_v48 }
  0x76   : > { %1378 = vmatpush.bf16.msrb.mxu3 %v1349_v51 }
  0x7a   : > { %1379 = vmatpush.bf16.msrb.mxu3 %v1348_v56  ;;  %v1339_v56 = vld [vmem:[%s1661_s8 + $0xb8] sm:$0xf0] }
  0x7b   : > { %v1211_v61 = vor.u32 %v1339_v56, %v1210_v55 }
  0x7d   : > { %705 = vmatmul.bf16.gmra.mxu0 %v1143_v24  ;;  %774 = vmatmul.bf16.vlgmr.msrb.gmra.mxu3 %v1195_v25 }
  0x7e   : > { %1380 = vmatpush.bf16.msra.mxu3 %v1615_v34  ;;  %754 = vmatmul.bf16.gmra.mxu1 %v1147_v26  ;;  %v1162_v34 = vld [vmem:[%s1661_s8 + $0x50] sm:$0xf] }
  0x7f   : > { %803 = vmatmul.bf16.gmra.mxu2 %v1151_v27  ;;  %v1163_v39 = vor.u32 %v1327_v35, %v1162_v34 }
  0x82   : > { %1381 = vmatpush.bf16.msra.mxu3 %v1624_v37  ;;  %v1159_v37 = vor.u32 %v1325_v30, %v1156_v33 }
  0x86   : > { %1382 = vmatpush.bf16.msra.mxu3 %v1631_v40  ;;  %v1166_v40 = vld [vmem:[%s1661_s8 + $0x60] sm:$0xf] }
  0x87   : > { %v1167_v48 = vor.u32 %v1329_v41, %v1166_v40 }
  0x8a   : > { %1383 = vmatpush.bf16.msra.mxu3 %v1639_v43  ;;  %v1198_v43 = vld [vmem:[%s1661_s8 + $0x98] sm:$0xf] }
  0x8d   : > { %710 = vmatmul.bf16.gmra.mxu0 %v1155_v36  ;;  %779 = vmatmul.bf16.gmra.mxu3 %v1207_v38 }
  0x8e   : > { %1384 = vmatpush.bf16.msra.mxu3 %v1647_v46  ;;  %759 = vmatmul.bf16.gmra.mxu1 %v1159_v37  ;;  %v1174_v46 = vld [vmem:[%s1661_s8 + $0x68] sm:$0xf] }
  0x8f   : > { %808 = vmatmul.bf16.gmra.mxu2 %v1163_v39  ;;  %v1175_v51 = vor.u32 %v1330_v47, %v1174_v46 }
  0x92   : > { %1385 = vmatpush.bf16.msra.mxu3 %v1653_v49  ;;  %v1199_v49 = vor.u32 %v1336_v44, %v1198_v43 }
  0x96   : > { %1386 = vmatpush.bf16.msra.mxu3 %v1659_v52  ;;  %v1178_v52 = vld [vmem:[%s1661_s8 + $0x78] sm:$0xf] }
  0x97   : > { %v1179_v60 = vor.u32 %v1332_v53, %v1178_v52 }
  0x9a   : > { %1387 = vmatpush.bf16.msra.mxu3 %v1669_v58  ;;  %v1186_v58 = vld [vmem:[%s1661_s8 + $0x80] sm:$0xf] }
  0x9b   : > { %v1187_v63 = vor.u32 %v1333_v59, %v1186_v58 }
  0x9d   : > { %715 = vmatmul.bf16.gmra.mxu0 %v1167_v48  ;;  %823 = vmatmul.bf16.vlgmr.msra.gmra.mxu3 %v1199_v49 }
  0x9e   : > { %764 = vmatmul.bf16.gmra.mxu1 %v1171_v50 }
  0x9f   : > { %813 = vmatmul.bf16.gmra.mxu2 %v1175_v51 }
  0xad   : > { %720 = vmatmul.bf16.gmra.mxu0 %v1179_v60  ;;  %828 = vmatmul.bf16.gmra.mxu3 %v1211_v61 }
  0xae   : > { %769 = vmatmul.bf16.gmra.mxu1 %v1183_v62 }
  0xaf   : > { %818 = vmatmul.bf16.gmra.mxu2 %v1187_v63 }
  0xda   : > { %v696_v0 = vpop.f32.mrf.mxu0 }
  0xdb   : > { %v745_v1 = vpop.f32.mrf.mxu1 }
  0xdc   : > { %v746_v2 = vadd.f32 %v745_v1, %v696_v0 }
  0xe0   : > { %v726_v3 = vpop.f32.mrf.mxu3 }
  0xe2   : > { %v794_v4 = vpop.f32.mrf.mxu2  ;;  %v698_v6 = vpop.f32.mrf.mxu0 }
  0xe3   : > { %v1729_v5 = vadd.f32 %v794_v4, %v746_v2  ;;  %v747_v7 = vpop.f32.mrf.mxu1 }
  0xe4   : > { %v748_v8 = vadd.f32 %v747_v7, %v698_v6 }
  0xe8   : > { %v728_v9 = vpop.f32.mrf.mxu3 }
  0xea   : > { %v796_v10 = vpop.f32.mrf.mxu2  ;;  %v701_v12 = vpop.f32.mrf.mxu0 }
  0xeb   : > { %v1731_v11 = vadd.f32 %v796_v10, %v748_v8  ;;  %v750_v13 = vpop.f32.mrf.mxu1 }
  0xec   : > { %v751_v14 = vadd.f32 %v750_v13, %v701_v12 }
  0xf0   : > { %v731_v15 = vpop.f32.mrf.mxu3 }
  0xf2   : > { %v799_v16 = vpop.f32.mrf.mxu2  ;;  %v703_v18 = vpop.f32.mrf.mxu0 }
  0xf3   : > { %v1733_v17 = vadd.f32 %v799_v16, %v751_v14  ;;  %v752_v19 = vpop.f32.mrf.mxu1 }
  0xf4   : > { %v753_v20 = vadd.f32 %v752_v19, %v703_v18 }
  0xf8   : > { %v733_v21 = vpop.f32.mrf.mxu3 }
  0xfa   : > { %v801_v22 = vpop.f32.mrf.mxu2  ;;  %v706_v24 = vpop.f32.mrf.mxu0 }
  0xfb   : > { %v1735_v23 = vadd.f32 %v801_v22, %v753_v20  ;;  %v755_v25 = vpop.f32.mrf.mxu1 }
  0xfc   : > { %v756_v26 = vadd.f32 %v755_v25, %v706_v24 }
 0x100   : > { %v775_v27 = vpop.f32.mrf.mxu3 }
 0x101   : > { %v776_v51 = vadd.f32 %v775_v27, %v726_v3 }
 0x102   : > { %v804_v28 = vpop.f32.mrf.mxu2  ;;  %v708_v30 = vpop.f32.mrf.mxu0 }
 0x103   : > { %v1737_v29 = vadd.f32 %v804_v28, %v756_v26  ;;  %v757_v31 = vpop.f32.mrf.mxu1 }
 0x104   : > { %v758_v32 = vadd.f32 %v757_v31, %v708_v30 }
 0x108   : > { %v777_v33 = vpop.f32.mrf.mxu3 }
 0x109   : > { %v778_v58 = vadd.f32 %v777_v33, %v728_v9 }
 0x10a   : > { %v806_v34 = vpop.f32.mrf.mxu2  ;;  %v711_v36 = vpop.f32.mrf.mxu0 }
 0x10b   : > { %v1739_v35 = vadd.f32 %v806_v34, %v758_v32  ;;  %v760_v38 = vpop.f32.mrf.mxu1 }
 0x10c   : > { %v761_v37 = vadd.f32 %v760_v38, %v711_v36 }
 0x110   : > { %v780_v39 = vpop.f32.mrf.mxu3 }
 0x111   : > { %v781_v3 = vadd.f32 %v780_v39, %v731_v15 }
 0x112   : > { %v809_v40 = vpop.f32.mrf.mxu2  ;;  %v713_v42 = vpop.f32.mrf.mxu0 }
 0x113   : > { %v1741_v41 = vadd.f32 %v809_v40, %v761_v37  ;;  %v762_v43 = vpop.f32.mrf.mxu1 }
 0x114   : > { %v763_v44 = vadd.f32 %v762_v43, %v713_v42 }
 0x118   : > { %v782_v45 = vpop.f32.mrf.mxu3 }
 0x119   : > { %v783_v13 = vadd.f32 %v782_v45, %v733_v21 }
 0x11a   : > { %v811_v46 = vpop.f32.mrf.mxu2  ;;  %v716_v48 = vpop.f32.mrf.mxu0 }
 0x11b   : > { %v1743_v47 = vadd.f32 %v811_v46, %v763_v44  ;;  %v765_v49 = vpop.f32.mrf.mxu1 }
 0x11c   : > { %v766_v50 = vadd.f32 %v765_v49, %v716_v48 }
 0x120   : > { %v824_v52 = vpop.f32.mrf.mxu3 }
 0x121   : > { %v1745_v54 = vadd.f32 %v824_v52, %v776_v51 }
 0x122   : > { %v814_v53 = vpop.f32.mrf.mxu2  ;;  %v718_v56 = vpop.f32.mrf.mxu0 }
 0x123   : > { %v1747_v55 = vadd.f32 %v814_v53, %v766_v50  ;;  %v767_v57 = vpop.f32.mrf.mxu1 }
 0x124   : > { %v768_v59 = vadd.f32 %v767_v57, %v718_v56 }
 0x128   : > { %v826_v60 = vpop.f32.mrf.mxu3 }
 0x129   : > { %v1749_v62 = vadd.f32 %v826_v60, %v778_v58 }
 0x12a   : > { %v816_v61 = vpop.f32.mrf.mxu2  ;;  %v721_v0 = vpop.f32.mrf.mxu0 }
 0x12b   : > { %v1751_v63 = vadd.f32 %v816_v61, %v768_v59  ;;  %v770_v1 = vpop.f32.mrf.mxu1 }
 0x12c   : > { %v771_v2 = vadd.f32 %v770_v1, %v721_v0 }
 0x130   : > { %v829_v4 = vpop.f32.mrf.mxu3 }
 0x131   : > { %v1753_v7 = vadd.f32 %v829_v4, %v781_v3 }
 0x132   : > { %v819_v6 = vpop.f32.mrf.mxu2  ;;  %v723_v10 = vpop.f32.mrf.mxu0 }
 0x133   : > { %v820_v8 = vadd.f32 %v819_v6, %v771_v2  ;;  %v772_v12 = vpop.f32.mrf.mxu1 }
 0x134   : > { %v773_v9 = vadd.f32 %v772_v12, %v723_v10 }
 0x137   : > { %837 = sbr.rel (%p1308_p10) target bundleno = 332 (0x14c), region = 62 }
 0x138   : > { %v831_v14 = vpop.f32.mrf.mxu3 }
 0x139   : > { %v1755_v18 = vadd.f32 %v831_v14, %v783_v13 }
 0x13a   : > { %v821_v16 = vpop.f32.mrf.mxu2 }
 0x13b   : > { %v822_v19 = vadd.f32 %v821_v16, %v773_v9 }
 0x13c   : > { %838 = vst [vmem:[%s2049_s3] sm:$0xff] %v1729_v5 }
 0x13d   : > { %839 = vst [vmem:[%s2049_s3 + $0x8] sm:$0xff] %v1731_v11 }
 0x13e   : > { %840 = vst [vmem:[%s2049_s3 + $0x10] sm:$0xff] %v1733_v17 }
 0x13f   : > { %841 = vst [vmem:[%s2049_s3 + $0x18] sm:$0xff] %v1735_v23 }
 0x140   : > { %842 = vst [vmem:[%s2049_s3 + $0x20] sm:$0xff] %v1737_v29 }
 0x141   : > { %843 = vst [vmem:[%s2049_s3 + $0x28] sm:$0xff] %v1739_v35 }
 0x142   : > { %844 = vst [vmem:[%s2049_s3 + $0x30] sm:$0xff] %v1741_v41 }
 0x143   : > { %845 = vst [vmem:[%s2049_s3 + $0x38] sm:$0xff] %v1743_v47 }
 0x144   : > { %846 = vst [vmem:[%s2049_s3 + $0x40] sm:$0xff] %v1747_v55 }
 0x145   : > { %847 = vst [vmem:[%s2049_s3 + $0x48] sm:$0xff] %v1751_v63 }
 0x146   : > { %848 = vst [vmem:[%s2049_s3 + $0x50] sm:$0xff] %v820_v8 }
 0x147   : > { %849 = vst [vmem:[%s2049_s3 + $0x58] sm:$0xff] %v822_v19 }
 0x148   : > { %850 = vst [vmem:[%s2049_s3 + $0x60] sm:$0xff] %v1745_v54 }
 0x149   : > { %851 = vst [vmem:[%s2049_s3 + $0x68] sm:$0xff] %v1749_v62 }
 0x14a   : > { %852 = vst [vmem:[%s2049_s3 + $0x70] sm:$0xff] %v1753_v7 }
 0x14b   : > { %853 = vst [vmem:[%s2049_s3 + $0x78] sm:$0xff] %v1755_v18 }
 0x14c PF: > { %p1309_p11 = scmp.le.s32.totalorder %s1461_s14, 0 }
 0x14e   : > { %857 = sbr.rel (%p1309_p11) target bundleno = 358 (0x166), region = 66 }
 0x153   : > { %v858_v15 = vld [vmem:[%s2049_s3] sm:$0xff]  ;;  %v859_v20 = vld [vmem:[%s2049_s3 + $0x8] sm:$0xff]  ;;  %v860_v21 = vld [vmem:[%s2049_s3 + $0x10] sm:$0xff] }
 0x154   : > { %v874_v22 = vadd.f32 %v858_v15, %v1729_v5  ;;  %v875_v24 = vadd.f32 %v859_v20, %v1731_v11  ;;  %v876_v25 = vadd.f32 %v860_v21, %v1733_v17  ;;  %v861_v26 = vld [vmem:[%s2049_s3 + $0x18] sm:$0xff]  ;;  %v862_v27 = vld [vmem:[%s2049_s3 + $0x20] sm:$0xff]  ;;  %v863_v28 = vld [vmem:[%s2049_s3 + $0x28] sm:$0xff] }
 0x155   : > { %v877_v30 = vadd.f32 %v861_v26, %v1735_v23  ;;  %v864_v5 = vld [vmem:[%s2049_s3 + $0x30] sm:$0xff]  ;;  %v878_v11 = vadd.f32 %v862_v27, %v1737_v29  ;;  %v865_v17 = vld [vmem:[%s2049_s3 + $0x38] sm:$0xff]  ;;  %v879_v23 = vadd.f32 %v863_v28, %v1739_v35  ;;  %v866_v31 = vld [vmem:[%s2049_s3 + $0x40] sm:$0xff] }
 0x156   : > { %890 = vst [vmem:[%s2049_s3] sm:$0xff] %v874_v22  ;;  %v880_v29 = vadd.f32 %v864_v5, %v1741_v41  ;;  %v867_v32 = vld [vmem:[%s2049_s3 + $0x48] sm:$0xff]  ;;  %v881_v33 = vadd.f32 %v865_v17, %v1743_v47  ;;  %v868_v34 = vld [vmem:[%s2049_s3 + $0x50] sm:$0xff]  ;;  %v882_v35 = vadd.f32 %v866_v31, %v1747_v55  ;;  %v869_v36 = vld [vmem:[%s2049_s3 + $0x58] sm:$0xff] }
 0x157   : > { %891 = vst [vmem:[%s2049_s3 + $0x8] sm:$0xff] %v875_v24  ;;  %v883_v38 = vadd.f32 %v867_v32, %v1751_v63  ;;  %v870_v37 = vld [vmem:[%s2049_s3 + $0x60] sm:$0xff]  ;;  %v884_v39 = vadd.f32 %v868_v34, %v820_v8  ;;  %v871_v40 = vld [vmem:[%s2049_s3 + $0x68] sm:$0xff]  ;;  %v885_v41 = vadd.f32 %v869_v36, %v822_v19  ;;  %v872_v42 = vld [vmem:[%s2049_s3 + $0x70] sm:$0xff] }
 0x158   : > { %892 = vst [vmem:[%s2049_s3 + $0x10] sm:$0xff] %v876_v25  ;;  %v886_v43 = vadd.f32 %v870_v37, %v1745_v54  ;;  %v873_v44 = vld [vmem:[%s2049_s3 + $0x78] sm:$0xff]  ;;  %v887_v45 = vadd.f32 %v871_v40, %v1749_v62  ;;  %v888_v46 = vadd.f32 %v872_v42, %v1753_v7 }
 0x159   : > { %893 = vst [vmem:[%s2049_s3 + $0x18] sm:$0xff] %v877_v30  ;;  %v889_v47 = vadd.f32 %v873_v44, %v1755_v18 }
 0x15a   : > { %894 = vst [vmem:[%s2049_s3 + $0x20] sm:$0xff] %v878_v11 }
 0x15b   : > { %895 = vst [vmem:[%s2049_s3 + $0x28] sm:$0xff] %v879_v23 }
 0x15c   : > { %896 = vst [vmem:[%s2049_s3 + $0x30] sm:$0xff] %v880_v29 }
 0x15d   : > { %897 = vst [vmem:[%s2049_s3 + $0x38] sm:$0xff] %v881_v33 }
 0x15e   : > { %898 = vst [vmem:[%s2049_s3 + $0x40] sm:$0xff] %v882_v35 }
 0x15f   : > { %899 = vst [vmem:[%s2049_s3 + $0x48] sm:$0xff] %v883_v38 }
 0x160   : > { %900 = vst [vmem:[%s2049_s3 + $0x50] sm:$0xff] %v884_v39 }
 0x161   : > { %901 = vst [vmem:[%s2049_s3 + $0x58] sm:$0xff] %v885_v41 }
 0x162   : > { %902 = vst [vmem:[%s2049_s3 + $0x60] sm:$0xff] %v886_v43 }
 0x163   : > { %903 = vst [vmem:[%s2049_s3 + $0x68] sm:$0xff] %v887_v45 }
 0x164   : > { %904 = vst [vmem:[%s2049_s3 + $0x70] sm:$0xff] %v888_v46 }
 0x165   : > { %905 = vst [vmem:[%s2049_s3 + $0x78] sm:$0xff] %v889_v47 }
 0x166 PF: > { %p1310_p12 = scmp.ne.s32.totalorder %s1461_s14, 2 }
 0x168   : > { %909 = sbr.rel (%p1310_p12) target bundleno = 387 (0x183), region = 70 }
 0x16d   : > { %v910_v48 = vld [vmem:[%s2049_s3] sm:$0xff]  ;;  %v911_v50 = vld [vmem:[%s2049_s3 + $0x8] sm:$0xff]  ;;  %v912_v51 = vld [vmem:[%s2049_s3 + $0x10] sm:$0xff] }
 0x16e   : > { %v1430_v49 = vld [vmem:[%s2048_s2] ss:$0 sm:$0xff]  ;;  %v913_v52 = vld [vmem:[%s2049_s3 + $0x18] sm:$0xff]  ;;  %v915_v58 = vld [vmem:[%s2049_s3 + $0x28] sm:$0xff] }
 0x16f   : > { %v930_v53 = vadd.f32 %v1430_v49, %v910_v48  ;;  %v931_v54 = vadd.f32 %v1430_v49, %v911_v50  ;;  %v932_v55 = vadd.f32 %v1430_v49, %v912_v51  ;;  %v933_v56 = vadd.f32 %v1430_v49, %v913_v52  ;;  %v914_v57 = vld [vmem:[%s2049_s3 + $0x20] sm:$0xff]  ;;  %v916_v59 = vld [vmem:[%s2049_s3 + $0x30] sm:$0xff]  ;;  %v917_v62 = vld [vmem:[%s2049_s3 + $0x38] sm:$0xff] }
 0x170   : > { %v934_v60 = vadd.f32 %v1430_v49, %v914_v57  ;;  %v935_v61 = vadd.f32 %v1430_v49, %v915_v58  ;;  %v918_v63 = vld [vmem:[%s2049_s3 + $0x40] sm:$0xff]  ;;  %v936_v3 = vadd.f32 %v1430_v49, %v916_v59  ;;  %v919_v4 = vld [vmem:[%s2049_s3 + $0x48] sm:$0xff]  ;;  %v937_v7 = vadd.f32 %v1430_v49, %v917_v62  ;;  %v920_v8 = vld [vmem:[%s2049_s3 + $0x50] sm:$0xff] }
 0x171   : > { %v946_v0 = vmax.f32 %v930_v53, 0.0  ;;  %v947_v1 = vmax.f32 %v931_v54, 0.0  ;;  %v948_v2 = vmax.f32 %v932_v55, 0.0  ;;  %v949_v6 = vmax.f32 %v933_v56, 0.0  ;;  %v921_v13 = vld [vmem:[%s2049_s3 + $0x58] sm:$0xff]  ;;  %v922_v16 = vld [vmem:[%s2049_s3 + $0x60] sm:$0xff] }
 0x172   : > { %v950_v10 = vmax.f32 %v934_v60, 0.0  ;;  %v938_v12 = vadd.f32 %v1430_v49, %v918_v63  ;;  %v951_v9 = vmax.f32 %v935_v61, 0.0  ;;  %v939_v14 = vadd.f32 %v1430_v49, %v919_v4  ;;  %v923_v15 = vld [vmem:[%s2049_s3 + $0x68] sm:$0xff]  ;;  %v924_v22 = vld [vmem:[%s2049_s3 + $0x70] sm:$0xff]  ;;  %v925_v26 = vld [vmem:[%s2049_s3 + $0x78] sm:$0xff] }
 0x173   : > { %962 = vst [vmem:[%s2049_s3] sm:$0xff] %v946_v0  ;;  %v952_v18 = vmax.f32 %v936_v3, 0.0  ;;  %v940_v19 = vadd.f32 %v1430_v49, %v920_v8  ;;  %v953_v20 = vmax.f32 %v937_v7, 0.0  ;;  %v941_v21 = vadd.f32 %v1430_v49, %v921_v13 }
 0x174   : > { %963 = vst [vmem:[%s2049_s3 + $0x8] sm:$0xff] %v947_v1  ;;  %v954_v24 = vmax.f32 %v938_v12, 0.0  ;;  %v942_v25 = vadd.f32 %v1430_v49, %v922_v16  ;;  %v955_v27 = vmax.f32 %v939_v14, 0.0  ;;  %v943_v28 = vadd.f32 %v1430_v49, %v923_v15 }
 0x175   : > { %964 = vst [vmem:[%s2049_s3 + $0x10] sm:$0xff] %v948_v2  ;;  %v956_v30 = vmax.f32 %v940_v19, 0.0  ;;  %v944_v5 = vadd.f32 %v1430_v49, %v924_v22  ;;  %v957_v11 = vmax.f32 %v941_v21, 0.0  ;;  %v945_v17 = vadd.f32 %v1430_v49, %v925_v26 }
 0x176   : > { %965 = vst [vmem:[%s2049_s3 + $0x18] sm:$0xff] %v949_v6  ;;  %v958_v23 = vmax.f32 %v942_v25, 0.0  ;;  %v959_v31 = vmax.f32 %v943_v28, 0.0 }
 0x177   : > { %966 = vst [vmem:[%s2049_s3 + $0x20] sm:$0xff] %v950_v10  ;;  %v960_v29 = vmax.f32 %v944_v5, 0.0  ;;  %v961_v32 = vmax.f32 %v945_v17, 0.0 }
 0x178   : > { %967 = vst [vmem:[%s2049_s3 + $0x28] sm:$0xff] %v951_v9 }
 0x179   : > { %968 = vst [vmem:[%s2049_s3 + $0x30] sm:$0xff] %v952_v18 }
 0x17a   : > { %969 = vst [vmem:[%s2049_s3 + $0x38] sm:$0xff] %v953_v20 }
 0x17b   : > { %970 = vst [vmem:[%s2049_s3 + $0x40] sm:$0xff] %v954_v24 }
 0x17c   : > { %971 = vst [vmem:[%s2049_s3 + $0x48] sm:$0xff] %v955_v27 }
 0x17d   : > { %972 = vst [vmem:[%s2049_s3 + $0x50] sm:$0xff] %v956_v30 }
 0x17e   : > { %973 = vst [vmem:[%s2049_s3 + $0x58] sm:$0xff] %v957_v11 }
 0x17f   : > { %974 = vst [vmem:[%s2049_s3 + $0x60] sm:$0xff] %v958_v23 }
 0x180   : > { %975 = vst [vmem:[%s2049_s3 + $0x68] sm:$0xff] %v959_v31 }
 0x181   : > { %976 = vst [vmem:[%s2049_s3 + $0x70] sm:$0xff] %v960_v29 }
 0x182   : > { %977 = vst [vmem:[%s2049_s3 + $0x78] sm:$0xff] %v961_v32 }
 0x183 PF: > { %s13_s16 = sadd.s32 1, %s1469_s16   ;;  %s2050_s12 = smov %s1457_s13 }
 0x184   : > { %p10_p13 = scmp.ge.s32.totalorder %s13_s16, 5   ;;  %s2051_s13 = smov %s1526_s20 }
 0x185   : > { %s2052_s14 = smov %s1465_s15  ;;  %s2053_s15 = smov %s2055_s17 }
 0x186   :  { %12 = sbr.rel (!%p10_p13) target bundleno = 3 (0x3), region = 114 }

// kernel: forward_pallas.28
= control target key start
LH: loop header
LB: loop body
LE: loop exit
PB: predicated region body
PF: predicated region fallthrough
CT: control target
= control target key end

     0   :  { %s1600_s15 = smov 0   ;;  %s1602_s16 = smov 0   ;;  %s2221_s0 = inlined_call_operand.vmem [shape: bf16[128,1152], index: 0, kind: input, shape index: {}]   ;;  %s2222_s1 = inlined_call_operand.vmem [shape: bf16[1,1152,128], index: 1, kind: input, shape index: {}]   ;;  %s2223_s2 = inlined_call_operand.vmem [shape: f32[1,128], index: 2, kind: input, shape index: {}]   ;;  %s2224_s3 = inlined_call_operand.vmem [shape: f32[128,128], index: 3, kind: input, shape index: {}]   ;;  %s2225_s4 = inlined_call_operand.vmem [shape: f32[128,128], index: 4, kind: output, shape index: {}]  }
   0x1   :  { %s1604_s17 = smov 0   ;;  %s1606_s18 = smov 0  }
   0x2   :  { %s1608_s19 = smov 0  }
   0x3 LB: > { %s26_s20 = sadd.s32 1, %s1569_s18  ;;  %p51_p1 = scmp.ne.s32.totalorder %s1561_s16, %s1557_s15  ;;  %s1573_s19 = sphi %s1608_s19, %s14_s19   ;;  %s1569_s18 = sphi %s1606_s18, %s2229_s18   ;;  %s1565_s17 = sphi %s1604_s17, %s2228_s17   ;;  %s1561_s16 = sphi %s1602_s16, %s2227_s16   ;;  %s1557_s15 = sphi %s1600_s15, %s2226_s15  }
   0x4   : > { %p27_p0 = scmp.ge.s32.totalorder %s26_s20, 3  ;;  %p52_p2 = scmp.eq.s32.totalorder %s1573_s19, 0 }
   0x5   : > { %s44_s22 = sadd.s32 1, %s1561_s16  ;;  %p1184_p5 = scmp.ge.s32.totalorder %s1573_s19, 3 }
   0x6   : > { %s2231_s20 = smov (%p27_p0, %s26_s20), 0  ;;  %p53_p3 = por %p52_p2, %p51_p1 }
   0x7   : > { %s40_s21 = ssub.s32 %s1569_s18, %s2231_s20  ;;  %196 = sbr.rel (%p1184_p5) target bundleno = 49 (0x31), region = 24 }
   0x8   : > { %p42_p4 = scmp.eq.s32.totalorder %s40_s21, 0 }
   0xa   : > { %s1635_s23 = scalar_select %p42_p4, %s1561_s16, %s44_s22  }
   0xc   : > { %199 = sbr.rel (!%p53_p3) target bundleno = 49 (0x31), region = 28  ;;  %s201_s24 = sand.u32 (%p53_p3), 1, %s1561_s16  }
   0xd   : > { %s1419_s25 = smul.u32 (%p53_p3), 12, %s1569_s18 }
   0xe   : > { %s1492_s26 = smul.u32 (%p53_p3), 192, %s201_s24 }
   0xf   : > { %s1643_s29 = scalar_lea.vmem (%p53_p3), %s2221_s0, %s1419_s25 }
  0x10   : > { %v225_v0 = vld [vmem:[%s1643_s29] sm:$0xff] (%p53_p3)  ;;  %v229_v2 = vld [vmem:[%s1643_s29 + $0x48] sm:$0xff] (%p53_p3)  ;;  %s1648_s30 = scalar_lea.vmem (%p53_p3), [#allocation2], %s1492_s26  ;;  %v233_v4 = vld [vmem:[%s1643_s29 + $0x90] sm:$0xff] (%p53_p3) }
  0x11   : > { %v227_v1 = vld [vmem:[%s1643_s29 + $0x24] sm:$0xff]  ;;  %226 = vst [vmem:[%s1648_s30] sm:$0xff] %v225_v0  ;;  %v231_v3 = vld [vmem:[%s1643_s29 + $0x6c] sm:$0xff]  ;;  %v235_v5 = vld [vmem:[%s1643_s29 + $0xb4] sm:$0xff] }
  0x12   : > { %228 = vst [vmem:[%s1648_s30 + $0xc] sm:$0xff] %v227_v1  ;;  %v237_v6 = vld [vmem:[%s1643_s29 + $0xd8] sm:$0xff]  ;;  %v241_v8 = vld [vmem:[%s1643_s29 + $0x120] sm:$0xff]  ;;  %v245_v10 = vld [vmem:[%s1643_s29 + $0x168] sm:$0xff] }
  0x13   : > { %230 = vst [vmem:[%s1648_s30 + $0x18] sm:$0xff] %v229_v2  ;;  %v239_v7 = vld [vmem:[%s1643_s29 + $0xfc] sm:$0xff]  ;;  %v243_v9 = vld [vmem:[%s1643_s29 + $0x144] sm:$0xff]  ;;  %v247_v11 = vld [vmem:[%s1643_s29 + $0x18c] sm:$0xff] }
  0x14   : > { %232 = vst [vmem:[%s1648_s30 + $0x24] sm:$0xff] %v231_v3  ;;  %v249_v12 = vld [vmem:[%s1643_s29 + $0x1b0] sm:$0xff]  ;;  %v253_v14 = vld [vmem:[%s1643_s29 + $0x1f8] sm:$0xff]  ;;  %v1186_v16 = vld [vmem:[%s1643_s29 + $0x8] sm:$0xf] }
  0x15   : > { %234 = vst [vmem:[%s1648_s30 + $0x30] sm:$0xff] %v233_v4  ;;  %v251_v13 = vld [vmem:[%s1643_s29 + $0x1d4] sm:$0xff]  ;;  %v255_v15 = vld [vmem:[%s1643_s29 + $0x21c] sm:$0xff]  ;;  %v1188_v17 = vld [vmem:[%s1643_s29 + $0x2c] sm:$0xf] }
  0x16   : > { %236 = vst [vmem:[%s1648_s30 + $0x3c] sm:$0xff] %v235_v5  ;;  %v1190_v18 = vld [vmem:[%s1643_s29 + $0x50] sm:$0xf]  ;;  %v1192_v19 = vld [vmem:[%s1643_s29 + $0x74] sm:$0xf] }
  0x17   : > { %238 = vst [vmem:[%s1648_s30 + $0x48] sm:$0xff] %v237_v6  ;;  %v1194_v20 = vld [vmem:[%s1643_s29 + $0x98] sm:$0xf]  ;;  %v1196_v21 = vld [vmem:[%s1643_s29 + $0xbc] sm:$0xf] }
  0x18   : > { %240 = vst [vmem:[%s1648_s30 + $0x54] sm:$0xff] %v239_v7  ;;  %v1198_v22 = vld [vmem:[%s1643_s29 + $0xe0] sm:$0xf]  ;;  %v1200_v23 = vld [vmem:[%s1643_s29 + $0x104] sm:$0xf] }
  0x19   : > { %242 = vst [vmem:[%s1648_s30 + $0x60] sm:$0xff] %v241_v8  ;;  %v1202_v24 = vld [vmem:[%s1643_s29 + $0x128] sm:$0xf]  ;;  %v1204_v25 = vld [vmem:[%s1643_s29 + $0x14c] sm:$0xf] }
  0x1a   : > { %244 = vst [vmem:[%s1648_s30 + $0x6c] sm:$0xff] %v243_v9  ;;  %v1206_v26 = vld [vmem:[%s1643_s29 + $0x170] sm:$0xf]  ;;  %v1208_v27 = vld [vmem:[%s1643_s29 + $0x194] sm:$0xf] }
  0x1b   : > { %246 = vst [vmem:[%s1648_s30 + $0x78] sm:$0xff] %v245_v10  ;;  %v1210_v28 = vld [vmem:[%s1643_s29 + $0x1b8] sm:$0xf]  ;;  %v1212_v29 = vld [vmem:[%s1643_s29 + $0x1dc] sm:$0xf] }
  0x1c   : > { %248 = vst [vmem:[%s1648_s30 + $0x84] sm:$0xff] %v247_v11  ;;  %v1214_v30 = vld [vmem:[%s1643_s29 + $0x200] sm:$0xf]  ;;  %v1216_v31 = vld [vmem:[%s1643_s29 + $0x224] sm:$0xf] }
  0x1d   : > { %250 = vst [vmem:[%s1648_s30 + $0x90] sm:$0xff] %v249_v12 }
  0x1e   : > { %252 = vst [vmem:[%s1648_s30 + $0x9c] sm:$0xff] %v251_v13 }
  0x1f   : > { %254 = vst [vmem:[%s1648_s30 + $0xa8] sm:$0xff] %v253_v14 }
  0x20   : > { %256 = vst [vmem:[%s1648_s30 + $0xb4] sm:$0xff] %v255_v15 }
  0x21   : > { %1187 = vst [vmem:[%s1648_s30 + $0x8] sm:$0xf] %v1186_v16 }
  0x22   : > { %1189 = vst [vmem:[%s1648_s30 + $0x14] sm:$0xf] %v1188_v17 }
  0x23   : > { %1191 = vst [vmem:[%s1648_s30 + $0x20] sm:$0xf] %v1190_v18 }
  0x24   : > { %1193 = vst [vmem:[%s1648_s30 + $0x2c] sm:$0xf] %v1192_v19 }
  0x25   : > { %1195 = vst [vmem:[%s1648_s30 + $0x38] sm:$0xf] %v1194_v20 }
  0x26   : > { %1197 = vst [vmem:[%s1648_s30 + $0x44] sm:$0xf] %v1196_v21 }
  0x27   : > { %1199 = vst [vmem:[%s1648_s30 + $0x50] sm:$0xf] %v1198_v22 }
  0x28   : > { %1201 = vst [vmem:[%s1648_s30 + $0x5c] sm:$0xf] %v1200_v23 }
  0x29   : > { %1203 = vst [vmem:[%s1648_s30 + $0x68] sm:$0xf] %v1202_v24 }
  0x2a   : > { %1205 = vst [vmem:[%s1648_s30 + $0x74] sm:$0xf] %v1204_v25 }
  0x2b   : > { %1207 = vst [vmem:[%s1648_s30 + $0x80] sm:$0xf] %v1206_v26 }
  0x2c   : > { %1209 = vst [vmem:[%s1648_s30 + $0x8c] sm:$0xf] %v1208_v27 }
  0x2d   : > { %1211 = vst [vmem:[%s1648_s30 + $0x98] sm:$0xf] %v1210_v28 }
  0x2e   : > { %1213 = vst [vmem:[%s1648_s30 + $0xa4] sm:$0xf] %v1212_v29 }
  0x2f   : > { %1215 = vst [vmem:[%s1648_s30 + $0xb0] sm:$0xf] %v1214_v30 }
  0x30   : > { %1217 = vst [vmem:[%s1648_s30 + $0xbc] sm:$0xf] %v1216_v31 }
  0x31 PF: > { %p1218_p6 = scmp.ge.s32.totalorder %s1573_s19, 1  ;;  %p314_p7 = scmp.lt.s32.totalorder %s1573_s19, 4 }
  0x33   : > { %p315_p8 = pnand %p1218_p6, %p314_p7 }
  0x34   : > { %s365_s5 = smul.u32 (!%p315_p8), 48, %s1565_s17  ;;  %s321_s10 = sand.u32 (!%p315_p8), 1, %s1557_s15  }
  0x35   : > { %318 = sbr.rel (%p315_p8) target bundleno = 389 (0x185), region = 58  ;;  %p1412_p10 = scmp.ne.s32.totalorder (!%p315_p8), %s1565_s17, 0 }
  0x36   : > { %p368_p9 = scmp.lt.s32.totalorder (!%p315_p8), %s365_s5, 143  ;;  %s1493_s11 = smul.u32 (!%p315_p8), 192, %s321_s10 }
  0x38   : > { %s1770_s12 = scalar_lea.vmem (!%p315_p8), [#allocation2], %s1493_s11 }
  0x3a   : > { %s2233_s5 = smov (!%p368_p9, %s365_s5), 143  ;;  %v1222_v53 = vld [vmem:[%s1770_s12] sm:$0xf]  ;;  %v1421_v54 = vld [vmem:[%s1770_s12 + $0x8] sm:$0xf0] }
  0x3b   : > { %s1219_s6 = sshll.u32 %s2233_s5, 2  ;;  %v1294_v57 = vld [vmem:[%s1770_s12 + $0x90] sm:$0xf]  ;;  %v1439_v59 = vld [vmem:[%s1770_s12 + $0x98] sm:$0xf0]  ;;  %v1223_v0 = vor.u32 %v1421_v54, %v1222_v53 }
  0x3c   : > { %s1717_s9 = scalar_lea.vmem %s2222_s1, %s1219_s6  ;;  %v1420_v60 = vld [vmem:[%s1770_s12 + $0x4] sm:$0xf]  ;;  %v1224_v61 = vld [vmem:[%s1770_s12 + $0xc] sm:$0xf0]  ;;  %v1230_v62 = vld [vmem:[%s1770_s12 + $0x8] sm:$0xf]  ;;  %v1295_v1 = vor.u32 %v1439_v59, %v1294_v57 }
  0x3d   : > { %v1451_v32 = vld [vmem:[%s1717_s9 + $0x38] sm:$0xff]  ;;  %v1450_v35 = vld [vmem:[%s1717_s9 + $0x30] sm:$0xff]  ;;  %v1449_v38 = vld [vmem:[%s1717_s9 + $0x28] sm:$0xff]  ;;  %v1227_v2 = vor.u32 %v1420_v60, %v1224_v61 }
  0x3e   : > { %v1721_v33 = vld [vmem:[%s1717_s9 + $0x78] sm:$0xff]  ;;  %743 = vmatpush.bf16.msra.mxu0 %v1451_v32  ;;  %1468 = vmatpush.bf16.msra.mxu3 %v1451_v32  ;;  %v1730_v36 = vld [vmem:[%s1717_s9 + $0x70] sm:$0xff]  ;;  %v1457_v39 = vld [vmem:[%s1717_s9 + $0x68] sm:$0xff] }
  0x3f   : > { %v1724_v34 = vld [vmem:[%s1717_s9 + $0xb8] sm:$0xff]  ;;  %792 = vmatpush.bf16.msra.mxu1 %v1721_v33  ;;  %v1733_v37 = vld [vmem:[%s1717_s9 + $0xb0] sm:$0xff]  ;;  %v1740_v40 = vld [vmem:[%s1717_s9 + $0xa8] sm:$0xff] }
  0x40   : > { %841 = vmatpush.bf16.msra.mxu2 %v1724_v34  ;;  %v1448_v41 = vld [vmem:[%s1717_s9 + $0x20] sm:$0xff]  ;;  %v1447_v44 = vld [vmem:[%s1717_s9 + $0x18] sm:$0xff]  ;;  %v1446_v47 = vld [vmem:[%s1717_s9 + $0x10] sm:$0xff] }
  0x41   : > { %v1745_v42 = vld [vmem:[%s1717_s9 + $0x60] sm:$0xff]  ;;  %v1455_v45 = vld [vmem:[%s1717_s9 + $0x58] sm:$0xff]  ;;  %v1454_v48 = vld [vmem:[%s1717_s9 + $0x50] sm:$0xff] }
  0x42   : > { %744 = vmatpush.bf16.msra.mxu0 %v1450_v35  ;;  %1469 = vmatpush.bf16.msra.mxu3 %v1450_v35  ;;  %v1748_v43 = vld [vmem:[%s1717_s9 + $0xa0] sm:$0xff]  ;;  %v1756_v46 = vld [vmem:[%s1717_s9 + $0x98] sm:$0xff]  ;;  %v1762_v49 = vld [vmem:[%s1717_s9 + $0x90] sm:$0xff] }
  0x43   : > { %793 = vmatpush.bf16.msra.mxu1 %v1730_v36  ;;  %v1445_v50 = vld [vmem:[%s1717_s9 + $0x8] sm:$0xff]  ;;  %v1444_v55 = vld [vmem:[%s1717_s9] sm:$0xff]  ;;  %v1422_v63 = vld [vmem:[%s1770_s12 + $0x10] sm:$0xf0] }
  0x44   : > { %842 = vmatpush.bf16.msra.mxu2 %v1733_v37  ;;  %v1453_v51 = vld [vmem:[%s1717_s9 + $0x48] sm:$0xff]  ;;  %v1452_v56 = vld [vmem:[%s1717_s9 + $0x40] sm:$0xff]  ;;  %v1231_v3 = vor.u32 %v1422_v63, %v1230_v62  ;;  %v1234_v4 = vld [vmem:[%s1770_s12 + $0x18] sm:$0xf] }
  0x45   : > { %v1768_v52 = vld [vmem:[%s1717_s9 + $0x88] sm:$0xff]  ;;  %v1778_v58 = vld [vmem:[%s1717_s9 + $0x80] sm:$0xff]  ;;  %v1442_v7 = vld [vmem:[%s1770_s12 + $0xb0] sm:$0xf0] }
  0x46   : > { %745 = vmatpush.bf16.msra.mxu0 %v1449_v38  ;;  %1470 = vmatpush.bf16.msra.mxu3 %v1449_v38  ;;  %v1424_v5 = vld [vmem:[%s1770_s12 + $0x20] sm:$0xf0]  ;;  %v1306_v6 = vld [vmem:[%s1770_s12 + $0xa8] sm:$0xf]  ;;  %v1423_v8 = vld [vmem:[%s1770_s12 + $0x1c] sm:$0xf] }
  0x47   : > { %794 = vmatpush.bf16.msra.mxu1 %v1457_v39  ;;  %v1236_v9 = vld [vmem:[%s1770_s12 + $0x24] sm:$0xf0]  ;;  %v1242_v10 = vld [vmem:[%s1770_s12 + $0x20] sm:$0xf]  ;;  %v1425_v11 = vld [vmem:[%s1770_s12 + $0x28] sm:$0xf0]  ;;  %v1235_v12 = vor.u32 %v1424_v5, %v1234_v4  ;;  %v1307_v13 = vor.u32 %v1442_v7, %v1306_v6 }
  0x48   : > { %843 = vmatpush.bf16.msra.mxu2 %v1740_v40  ;;  %v1239_v14 = vor.u32 %v1423_v8, %v1236_v9  ;;  %v1243_v15 = vor.u32 %v1425_v11, %v1242_v10  ;;  %v1246_v16 = vld [vmem:[%s1770_s12 + $0x30] sm:$0xf]  ;;  %v1427_v17 = vld [vmem:[%s1770_s12 + $0x38] sm:$0xf0]  ;;  %v1426_v18 = vld [vmem:[%s1770_s12 + $0x34] sm:$0xf] }
  0x49   : > { %v1438_v19 = vld [vmem:[%s1770_s12 + $0x94] sm:$0xf]  ;;  %v1296_v20 = vld [vmem:[%s1770_s12 + $0x9c] sm:$0xf0]  ;;  %v1254_v22 = vld [vmem:[%s1770_s12 + $0x38] sm:$0xf]  ;;  %v1247_v24 = vor.u32 %v1427_v17, %v1246_v16 }
  0x4a   : > { %746 = vmatpush.bf16.msra.mxu0 %v1448_v41  ;;  %1471 = vmatpush.bf16.msra.mxu3 %v1448_v41  ;;  %v1248_v21 = vld [vmem:[%s1770_s12 + $0x3c] sm:$0xf0]  ;;  %v1428_v23 = vld [vmem:[%s1770_s12 + $0x40] sm:$0xf0]  ;;  %v1299_v25 = vor.u32 %v1438_v19, %v1296_v20  ;;  %v1258_v28 = vld [vmem:[%s1770_s12 + $0x48] sm:$0xf] }
  0x4b   : > { %795 = vmatpush.bf16.msra.mxu1 %v1745_v42  ;;  %v1251_v26 = vor.u32 %v1426_v18, %v1248_v21  ;;  %v1255_v27 = vor.u32 %v1428_v23, %v1254_v22  ;;  %v1430_v29 = vld [vmem:[%s1770_s12 + $0x50] sm:$0xf0]  ;;  %v1429_v30 = vld [vmem:[%s1770_s12 + $0x4c] sm:$0xf]  ;;  %v1308_v32 = vld [vmem:[%s1770_s12 + $0xb4] sm:$0xf0] }
  0x4c   : > { %844 = vmatpush.bf16.msra.mxu2 %v1748_v43  ;;  %v1441_v31 = vld [vmem:[%s1770_s12 + $0xac] sm:$0xf]  ;;  %v1431_v35 = vld [vmem:[%s1770_s12 + $0x58] sm:$0xf0]  ;;  %v1436_v53 = vld [vmem:[%s1770_s12 + $0x80] sm:$0xf0] }
  0x4d   : > { %v1311_v38 = vor.u32 %v1441_v31, %v1308_v32  ;;  %v1433_v41 = vld [vmem:[%s1770_s12 + $0x68] sm:$0xf0]  ;;  %v1435_v54 = vld [vmem:[%s1770_s12 + $0x7c] sm:$0xf]  ;;  %v1284_v57 = vld [vmem:[%s1770_s12 + $0x84] sm:$0xf0] }
  0x4e   : > { %747 = vmatpush.bf16.msra.mxu0 %v1447_v44  ;;  %1472 = vmatpush.bf16.msra.mxu3 %v1447_v44  ;;  %v1440_v44 = vld [vmem:[%s1770_s12 + $0xa0] sm:$0xf0]  ;;  %v1437_v59 = vld [vmem:[%s1770_s12 + $0x88] sm:$0xf0]  ;;  %v1287_v62 = vor.u32 %v1435_v54, %v1284_v57 }
  0x4f   : > { %796 = vmatpush.bf16.msra.mxu1 %v1455_v45 }
  0x50   : > { %845 = vmatpush.bf16.msra.mxu2 %v1756_v46 }
  0x52   : > { %748 = vmatpush.bf16.msra.mxu0 %v1446_v47  ;;  %1473 = vmatpush.bf16.msra.mxu3 %v1446_v47  ;;  %v1434_v47 = vld [vmem:[%s1770_s12 + $0x70] sm:$0xf0] }
  0x53   : > { %797 = vmatpush.bf16.msra.mxu1 %v1454_v48 }
  0x54   : > { %846 = vmatpush.bf16.msra.mxu2 %v1762_v49 }
  0x56   : > { %749 = vmatpush.bf16.msra.mxu0 %v1445_v50  ;;  %1474 = vmatpush.bf16.msra.mxu3 %v1445_v50 }
  0x57   : > { %798 = vmatpush.bf16.msra.mxu1 %v1453_v51 }
  0x58   : > { %847 = vmatpush.bf16.msra.mxu2 %v1768_v52 }
  0x5a   : > { %750 = vmatpush.bf16.msra.mxu0 %v1444_v55  ;;  %1475 = vmatpush.bf16.msra.mxu3 %v1444_v55  ;;  %v1314_v55 = vld [vmem:[%s1770_s12 + $0xb0] sm:$0xf] }
  0x5b   : > { %799 = vmatpush.bf16.msra.mxu1 %v1452_v56 }
  0x5c   : > { %848 = vmatpush.bf16.msra.mxu2 %v1778_v58 }
  0x5d   : > { %751 = vmatmul.bf16.vlgmr.msra.gmra.mxu0 %v1223_v0  ;;  %781 = vmatmul.bf16.vlgmr.msra.gmra.mxu3 %v1295_v1 }
  0x5e   : > { %1476 = vmatpush.bf16.msrb.mxu3 %v1721_v33  ;;  %800 = vmatmul.bf16.vlgmr.msra.gmra.mxu1 %v1227_v2  ;;  %v1260_v33 = vld [vmem:[%s1770_s12 + $0x54] sm:$0xf0] }
  0x5f   : > { %849 = vmatmul.bf16.vlgmr.msra.gmra.mxu2 %v1231_v3 }
  0x62   : > { %1477 = vmatpush.bf16.msrb.mxu3 %v1730_v36  ;;  %v1259_v36 = vor.u32 %v1430_v29, %v1258_v28 }
  0x66   : > { %1478 = vmatpush.bf16.msrb.mxu3 %v1457_v39 }
  0x6a   : > { %1479 = vmatpush.bf16.msrb.mxu3 %v1745_v42  ;;  %v1432_v42 = vld [vmem:[%s1770_s12 + $0x64] sm:$0xf] }
  0x6d   : > { %756 = vmatmul.bf16.gmra.mxu0 %v1235_v12  ;;  %786 = vmatmul.bf16.gmra.mxu3 %v1307_v13 }
  0x6e   : > { %1480 = vmatpush.bf16.msrb.mxu3 %v1455_v45  ;;  %805 = vmatmul.bf16.gmra.mxu1 %v1239_v14  ;;  %v1272_v45 = vld [vmem:[%s1770_s12 + $0x6c] sm:$0xf0] }
  0x6f   : > { %854 = vmatmul.bf16.gmra.mxu2 %v1243_v15  ;;  %v1275_v50 = vor.u32 %v1432_v42, %v1272_v45 }
  0x72   : > { %1481 = vmatpush.bf16.msrb.mxu3 %v1454_v48 }
  0x76   : > { %1482 = vmatpush.bf16.msrb.mxu3 %v1453_v51 }
  0x7a   : > { %1483 = vmatpush.bf16.msrb.mxu3 %v1452_v56  ;;  %v1443_v56 = vld [vmem:[%s1770_s12 + $0xb8] sm:$0xf0] }
  0x7b   : > { %v1315_v61 = vor.u32 %v1443_v56, %v1314_v55 }
  0x7d   : > { %761 = vmatmul.bf16.gmra.mxu0 %v1247_v24  ;;  %830 = vmatmul.bf16.vlgmr.msrb.gmra.mxu3 %v1299_v25 }
  0x7e   : > { %1484 = vmatpush.bf16.msra.mxu3 %v1724_v34  ;;  %810 = vmatmul.bf16.gmra.mxu1 %v1251_v26  ;;  %v1266_v34 = vld [vmem:[%s1770_s12 + $0x50] sm:$0xf] }
  0x7f   : > { %859 = vmatmul.bf16.gmra.mxu2 %v1255_v27  ;;  %v1267_v39 = vor.u32 %v1431_v35, %v1266_v34 }
  0x82   : > { %1485 = vmatpush.bf16.msra.mxu3 %v1733_v37  ;;  %v1263_v37 = vor.u32 %v1429_v30, %v1260_v33 }
  0x86   : > { %1486 = vmatpush.bf16.msra.mxu3 %v1740_v40  ;;  %v1270_v40 = vld [vmem:[%s1770_s12 + $0x60] sm:$0xf] }
  0x87   : > { %v1271_v48 = vor.u32 %v1433_v41, %v1270_v40 }
  0x8a   : > { %1487 = vmatpush.bf16.msra.mxu3 %v1748_v43  ;;  %v1302_v43 = vld [vmem:[%s1770_s12 + $0x98] sm:$0xf] }
  0x8d   : > { %766 = vmatmul.bf16.gmra.mxu0 %v1259_v36  ;;  %835 = vmatmul.bf16.gmra.mxu3 %v1311_v38 }
  0x8e   : > { %1488 = vmatpush.bf16.msra.mxu3 %v1756_v46  ;;  %815 = vmatmul.bf16.gmra.mxu1 %v1263_v37  ;;  %v1278_v46 = vld [vmem:[%s1770_s12 + $0x68] sm:$0xf] }
  0x8f   : > { %864 = vmatmul.bf16.gmra.mxu2 %v1267_v39  ;;  %v1279_v51 = vor.u32 %v1434_v47, %v1278_v46 }
  0x92   : > { %1489 = vmatpush.bf16.msra.mxu3 %v1762_v49  ;;  %v1303_v49 = vor.u32 %v1440_v44, %v1302_v43 }
  0x96   : > { %1490 = vmatpush.bf16.msra.mxu3 %v1768_v52  ;;  %v1282_v52 = vld [vmem:[%s1770_s12 + $0x78] sm:$0xf] }
  0x97   : > { %v1283_v60 = vor.u32 %v1436_v53, %v1282_v52 }
  0x9a   : > { %1491 = vmatpush.bf16.msra.mxu3 %v1778_v58  ;;  %v1290_v58 = vld [vmem:[%s1770_s12 + $0x80] sm:$0xf] }
  0x9b   : > { %v1291_v63 = vor.u32 %v1437_v59, %v1290_v58 }
  0x9d   : > { %771 = vmatmul.bf16.gmra.mxu0 %v1271_v48  ;;  %879 = vmatmul.bf16.vlgmr.msra.gmra.mxu3 %v1303_v49 }
  0x9e   : > { %820 = vmatmul.bf16.gmra.mxu1 %v1275_v50 }
  0x9f   : > { %869 = vmatmul.bf16.gmra.mxu2 %v1279_v51 }
  0xad   : > { %776 = vmatmul.bf16.gmra.mxu0 %v1283_v60  ;;  %884 = vmatmul.bf16.gmra.mxu3 %v1315_v61 }
  0xae   : > { %825 = vmatmul.bf16.gmra.mxu1 %v1287_v62 }
  0xaf   : > { %874 = vmatmul.bf16.gmra.mxu2 %v1291_v63 }
  0xda   : > { %v752_v0 = vpop.f32.mrf.mxu0 }
  0xdb   : > { %v801_v1 = vpop.f32.mrf.mxu1 }
  0xdc   : > { %v802_v2 = vadd.f32 %v801_v1, %v752_v0 }
  0xe0   : > { %v782_v3 = vpop.f32.mrf.mxu3 }
  0xe2   : > { %v850_v4 = vpop.f32.mrf.mxu2  ;;  %v754_v6 = vpop.f32.mrf.mxu0 }
  0xe3   : > { %v1838_v5 = vadd.f32 %v850_v4, %v802_v2  ;;  %v803_v7 = vpop.f32.mrf.mxu1 }
  0xe4   : > { %v804_v8 = vadd.f32 %v803_v7, %v754_v6 }
  0xe8   : > { %v784_v9 = vpop.f32.mrf.mxu3 }
  0xea   : > { %v852_v10 = vpop.f32.mrf.mxu2  ;;  %v757_v12 = vpop.f32.mrf.mxu0 }
  0xeb   : > { %v1840_v11 = vadd.f32 %v852_v10, %v804_v8  ;;  %v806_v13 = vpop.f32.mrf.mxu1 }
  0xec   : > { %v807_v14 = vadd.f32 %v806_v13, %v757_v12 }
  0xf0   : > { %v787_v15 = vpop.f32.mrf.mxu3 }
  0xf2   : > { %v855_v16 = vpop.f32.mrf.mxu2  ;;  %v759_v18 = vpop.f32.mrf.mxu0 }
  0xf3   : > { %v1842_v17 = vadd.f32 %v855_v16, %v807_v14  ;;  %v808_v19 = vpop.f32.mrf.mxu1 }
  0xf4   : > { %v809_v20 = vadd.f32 %v808_v19, %v759_v18 }
  0xf8   : > { %v789_v21 = vpop.f32.mrf.mxu3 }
  0xfa   : > { %v857_v22 = vpop.f32.mrf.mxu2  ;;  %v762_v24 = vpop.f32.mrf.mxu0 }
  0xfb   : > { %v1844_v23 = vadd.f32 %v857_v22, %v809_v20  ;;  %v811_v25 = vpop.f32.mrf.mxu1 }
  0xfc   : > { %v812_v26 = vadd.f32 %v811_v25, %v762_v24 }
 0x100   : > { %v831_v27 = vpop.f32.mrf.mxu3 }
 0x101   : > { %v832_v51 = vadd.f32 %v831_v27, %v782_v3 }
 0x102   : > { %v860_v28 = vpop.f32.mrf.mxu2  ;;  %v764_v30 = vpop.f32.mrf.mxu0 }
 0x103   : > { %v1846_v29 = vadd.f32 %v860_v28, %v812_v26  ;;  %v813_v31 = vpop.f32.mrf.mxu1 }
 0x104   : > { %v814_v32 = vadd.f32 %v813_v31, %v764_v30 }
 0x108   : > { %v833_v33 = vpop.f32.mrf.mxu3 }
 0x109   : > { %v834_v58 = vadd.f32 %v833_v33, %v784_v9 }
 0x10a   : > { %v862_v34 = vpop.f32.mrf.mxu2  ;;  %v767_v36 = vpop.f32.mrf.mxu0 }
 0x10b   : > { %v1848_v35 = vadd.f32 %v862_v34, %v814_v32  ;;  %v816_v38 = vpop.f32.mrf.mxu1 }
 0x10c   : > { %v817_v37 = vadd.f32 %v816_v38, %v767_v36 }
 0x110   : > { %v836_v39 = vpop.f32.mrf.mxu3 }
 0x111   : > { %v837_v3 = vadd.f32 %v836_v39, %v787_v15 }
 0x112   : > { %v865_v40 = vpop.f32.mrf.mxu2  ;;  %v769_v42 = vpop.f32.mrf.mxu0 }
 0x113   : > { %v1850_v41 = vadd.f32 %v865_v40, %v817_v37  ;;  %v818_v43 = vpop.f32.mrf.mxu1 }
 0x114   : > { %v819_v44 = vadd.f32 %v818_v43, %v769_v42 }
 0x118   : > { %v838_v45 = vpop.f32.mrf.mxu3 }
 0x119   : > { %v839_v13 = vadd.f32 %v838_v45, %v789_v21 }
 0x11a   : > { %v867_v46 = vpop.f32.mrf.mxu2  ;;  %v772_v48 = vpop.f32.mrf.mxu0 }
 0x11b   : > { %v1852_v47 = vadd.f32 %v867_v46, %v819_v44  ;;  %v821_v49 = vpop.f32.mrf.mxu1 }
 0x11c   : > { %v822_v50 = vadd.f32 %v821_v49, %v772_v48 }
 0x120   : > { %v880_v52 = vpop.f32.mrf.mxu3 }
 0x121   : > { %v1854_v54 = vadd.f32 %v880_v52, %v832_v51 }
 0x122   : > { %v870_v53 = vpop.f32.mrf.mxu2  ;;  %v774_v56 = vpop.f32.mrf.mxu0 }
 0x123   : > { %v1856_v55 = vadd.f32 %v870_v53, %v822_v50  ;;  %v823_v57 = vpop.f32.mrf.mxu1 }
 0x124   : > { %v824_v59 = vadd.f32 %v823_v57, %v774_v56 }
 0x128   : > { %v882_v60 = vpop.f32.mrf.mxu3 }
 0x129   : > { %v1858_v62 = vadd.f32 %v882_v60, %v834_v58 }
 0x12a   : > { %v872_v61 = vpop.f32.mrf.mxu2  ;;  %v777_v0 = vpop.f32.mrf.mxu0 }
 0x12b   : > { %v1860_v63 = vadd.f32 %v872_v61, %v824_v59  ;;  %v826_v1 = vpop.f32.mrf.mxu1 }
 0x12c   : > { %v827_v2 = vadd.f32 %v826_v1, %v777_v0 }
 0x130   : > { %v885_v4 = vpop.f32.mrf.mxu3 }
 0x131   : > { %v1862_v7 = vadd.f32 %v885_v4, %v837_v3 }
 0x132   : > { %v875_v6 = vpop.f32.mrf.mxu2  ;;  %v779_v10 = vpop.f32.mrf.mxu0 }
 0x133   : > { %v876_v8 = vadd.f32 %v875_v6, %v827_v2  ;;  %v828_v12 = vpop.f32.mrf.mxu1 }
 0x134   : > { %v829_v9 = vadd.f32 %v828_v12, %v779_v10 }
 0x137   : > { %893 = sbr.rel (%p1412_p10) target bundleno = 332 (0x14c), region = 66 }
 0x138   : > { %v887_v14 = vpop.f32.mrf.mxu3 }
 0x139   : > { %v1864_v18 = vadd.f32 %v887_v14, %v839_v13 }
 0x13a   : > { %v877_v16 = vpop.f32.mrf.mxu2 }
 0x13b   : > { %v878_v19 = vadd.f32 %v877_v16, %v829_v9 }
 0x13c   : > { %894 = vst [vmem:[%s2225_s4] sm:$0xff] %v1838_v5 }
 0x13d   : > { %895 = vst [vmem:[%s2225_s4 + $0x8] sm:$0xff] %v1840_v11 }
 0x13e   : > { %896 = vst [vmem:[%s2225_s4 + $0x10] sm:$0xff] %v1842_v17 }
 0x13f   : > { %897 = vst [vmem:[%s2225_s4 + $0x18] sm:$0xff] %v1844_v23 }
 0x140   : > { %898 = vst [vmem:[%s2225_s4 + $0x20] sm:$0xff] %v1846_v29 }
 0x141   : > { %899 = vst [vmem:[%s2225_s4 + $0x28] sm:$0xff] %v1848_v35 }
 0x142   : > { %900 = vst [vmem:[%s2225_s4 + $0x30] sm:$0xff] %v1850_v41 }
 0x143   : > { %901 = vst [vmem:[%s2225_s4 + $0x38] sm:$0xff] %v1852_v47 }
 0x144   : > { %902 = vst [vmem:[%s2225_s4 + $0x40] sm:$0xff] %v1856_v55 }
 0x145   : > { %903 = vst [vmem:[%s2225_s4 + $0x48] sm:$0xff] %v1860_v63 }
 0x146   : > { %904 = vst [vmem:[%s2225_s4 + $0x50] sm:$0xff] %v876_v8 }
 0x147   : > { %905 = vst [vmem:[%s2225_s4 + $0x58] sm:$0xff] %v878_v19 }
 0x148   : > { %906 = vst [vmem:[%s2225_s4 + $0x60] sm:$0xff] %v1854_v54 }
 0x149   : > { %907 = vst [vmem:[%s2225_s4 + $0x68] sm:$0xff] %v1858_v62 }
 0x14a   : > { %908 = vst [vmem:[%s2225_s4 + $0x70] sm:$0xff] %v1862_v7 }
 0x14b   : > { %909 = vst [vmem:[%s2225_s4 + $0x78] sm:$0xff] %v1864_v18 }
 0x14c PF: > { %p1413_p11 = scmp.le.s32.totalorder %s1565_s17, 0 }
 0x14e   : > { %913 = sbr.rel (%p1413_p11) target bundleno = 358 (0x166), region = 70 }
 0x153   : > { %v914_v15 = vld [vmem:[%s2225_s4] sm:$0xff]  ;;  %v915_v20 = vld [vmem:[%s2225_s4 + $0x8] sm:$0xff]  ;;  %v916_v21 = vld [vmem:[%s2225_s4 + $0x10] sm:$0xff] }
 0x154   : > { %v930_v22 = vadd.f32 %v914_v15, %v1838_v5  ;;  %v931_v24 = vadd.f32 %v915_v20, %v1840_v11  ;;  %v932_v25 = vadd.f32 %v916_v21, %v1842_v17  ;;  %v917_v26 = vld [vmem:[%s2225_s4 + $0x18] sm:$0xff]  ;;  %v918_v27 = vld [vmem:[%s2225_s4 + $0x20] sm:$0xff]  ;;  %v919_v28 = vld [vmem:[%s2225_s4 + $0x28] sm:$0xff] }
 0x155   : > { %v933_v30 = vadd.f32 %v917_v26, %v1844_v23  ;;  %v920_v5 = vld [vmem:[%s2225_s4 + $0x30] sm:$0xff]  ;;  %v934_v11 = vadd.f32 %v918_v27, %v1846_v29  ;;  %v921_v17 = vld [vmem:[%s2225_s4 + $0x38] sm:$0xff]  ;;  %v935_v23 = vadd.f32 %v919_v28, %v1848_v35  ;;  %v922_v31 = vld [vmem:[%s2225_s4 + $0x40] sm:$0xff] }
 0x156   : > { %946 = vst [vmem:[%s2225_s4] sm:$0xff] %v930_v22  ;;  %v936_v29 = vadd.f32 %v920_v5, %v1850_v41  ;;  %v923_v32 = vld [vmem:[%s2225_s4 + $0x48] sm:$0xff]  ;;  %v937_v33 = vadd.f32 %v921_v17, %v1852_v47  ;;  %v924_v34 = vld [vmem:[%s2225_s4 + $0x50] sm:$0xff]  ;;  %v938_v35 = vadd.f32 %v922_v31, %v1856_v55  ;;  %v925_v36 = vld [vmem:[%s2225_s4 + $0x58] sm:$0xff] }
 0x157   : > { %947 = vst [vmem:[%s2225_s4 + $0x8] sm:$0xff] %v931_v24  ;;  %v939_v38 = vadd.f32 %v923_v32, %v1860_v63  ;;  %v926_v37 = vld [vmem:[%s2225_s4 + $0x60] sm:$0xff]  ;;  %v940_v39 = vadd.f32 %v924_v34, %v876_v8  ;;  %v927_v40 = vld [vmem:[%s2225_s4 + $0x68] sm:$0xff]  ;;  %v941_v41 = vadd.f32 %v925_v36, %v878_v19  ;;  %v928_v42 = vld [vmem:[%s2225_s4 + $0x70] sm:$0xff] }
 0x158   : > { %948 = vst [vmem:[%s2225_s4 + $0x10] sm:$0xff] %v932_v25  ;;  %v942_v43 = vadd.f32 %v926_v37, %v1854_v54  ;;  %v929_v44 = vld [vmem:[%s2225_s4 + $0x78] sm:$0xff]  ;;  %v943_v45 = vadd.f32 %v927_v40, %v1858_v62  ;;  %v944_v46 = vadd.f32 %v928_v42, %v1862_v7 }
 0x159   : > { %949 = vst [vmem:[%s2225_s4 + $0x18] sm:$0xff] %v933_v30  ;;  %v945_v47 = vadd.f32 %v929_v44, %v1864_v18 }
 0x15a   : > { %950 = vst [vmem:[%s2225_s4 + $0x20] sm:$0xff] %v934_v11 }
 0x15b   : > { %951 = vst [vmem:[%s2225_s4 + $0x28] sm:$0xff] %v935_v23 }
 0x15c   : > { %952 = vst [vmem:[%s2225_s4 + $0x30] sm:$0xff] %v936_v29 }
 0x15d   : > { %953 = vst [vmem:[%s2225_s4 + $0x38] sm:$0xff] %v937_v33 }
 0x15e   : > { %954 = vst [vmem:[%s2225_s4 + $0x40] sm:$0xff] %v938_v35 }
 0x15f   : > { %955 = vst [vmem:[%s2225_s4 + $0x48] sm:$0xff] %v939_v38 }
 0x160   : > { %956 = vst [vmem:[%s2225_s4 + $0x50] sm:$0xff] %v940_v39 }
 0x161   : > { %957 = vst [vmem:[%s2225_s4 + $0x58] sm:$0xff] %v941_v41 }
 0x162   : > { %958 = vst [vmem:[%s2225_s4 + $0x60] sm:$0xff] %v942_v43 }
 0x163   : > { %959 = vst [vmem:[%s2225_s4 + $0x68] sm:$0xff] %v943_v45 }
 0x164   : > { %960 = vst [vmem:[%s2225_s4 + $0x70] sm:$0xff] %v944_v46 }
 0x165   : > { %961 = vst [vmem:[%s2225_s4 + $0x78] sm:$0xff] %v945_v47 }
 0x166 PF: > { %p1414_p12 = scmp.ne.s32.totalorder %s1565_s17, 2 }
 0x168   : > { %965 = sbr.rel (%p1414_p12) target bundleno = 389 (0x185), region = 74 }
 0x16d   : > { %v966_v48 = vld [vmem:[%s2225_s4] sm:$0xff]  ;;  %v967_v51 = vld [vmem:[%s2225_s4 + $0x8] sm:$0xff]  ;;  %v968_v55 = vld [vmem:[%s2225_s4 + $0x10] sm:$0xff] }
 0x16e   : > { %v2047_v49 = vld [vmem:[%s2223_s2] ss:$0 sm:$0xff]  ;;  %v1003_v52 = vld [vmem:[%s2224_s3 + $0x8] sm:$0xff]  ;;  %v1004_v56 = vld [vmem:[%s2224_s3 + $0x10] sm:$0xff] }
 0x16f   : > { %v1002_v50 = vld [vmem:[%s2224_s3] sm:$0xff]  ;;  %v986_v53 = vadd.f32 %v2047_v49, %v966_v48  ;;  %v987_v54 = vadd.f32 %v2047_v49, %v967_v51  ;;  %v969_v57 = vld [vmem:[%s2225_s4 + $0x18] sm:$0xff]  ;;  %v988_v58 = vadd.f32 %v2047_v49, %v968_v55  ;;  %v971_v2 = vld [vmem:[%s2225_s4 + $0x28] sm:$0xff] }
 0x170   : > { %v989_v59 = vadd.f32 %v2047_v49, %v969_v57  ;;  %v1005_v60 = vld [vmem:[%s2224_s3 + $0x18] sm:$0xff]  ;;  %v970_v61 = vld [vmem:[%s2225_s4 + $0x20] sm:$0xff]  ;;  %v1007_v3 = vld [vmem:[%s2224_s3 + $0x28] sm:$0xff]  ;;  %v991_v8 = vadd.f32 %v2047_v49, %v971_v2 }
 0x171   : > { %v1006_v62 = vld [vmem:[%s2224_s3 + $0x20] sm:$0xff]  ;;  %v1018_v63 = vadd.f32 %v1002_v50, %v986_v53  ;;  %v1019_v0 = vadd.f32 %v1003_v52, %v987_v54  ;;  %v990_v1 = vadd.f32 %v2047_v49, %v970_v61  ;;  %v972_v4 = vld [vmem:[%s2225_s4 + $0x30] sm:$0xff]  ;;  %v1020_v6 = vadd.f32 %v1004_v56, %v988_v58  ;;  %v973_v13 = vld [vmem:[%s2225_s4 + $0x38] sm:$0xff] }
 0x172   : > { %v1021_v7 = vadd.f32 %v1005_v60, %v989_v59  ;;  %v992_v10 = vadd.f32 %v2047_v49, %v972_v4  ;;  %v1008_v12 = vld [vmem:[%s2224_s3 + $0x30] sm:$0xff]  ;;  %v1009_v9 = vld [vmem:[%s2224_s3 + $0x38] sm:$0xff]  ;;  %v993_v19 = vadd.f32 %v2047_v49, %v973_v13  ;;  %v974_v15 = vld [vmem:[%s2225_s4 + $0x40] sm:$0xff]  ;;  %v1023_v25 = vadd.f32 %v1007_v3, %v991_v8 }
 0x173   : > { %v1034_v14 = vmax.f32 %v1018_v63, 0.0  ;;  %v1035_v16 = vmax.f32 %v1019_v0, 0.0  ;;  %v1022_v18 = vadd.f32 %v1006_v62, %v990_v1  ;;  %v1010_v20 = vld [vmem:[%s2224_s3 + $0x40] sm:$0xff]  ;;  %v975_v21 = vld [vmem:[%s2225_s4 + $0x48] sm:$0xff]  ;;  %v1036_v22 = vmax.f32 %v1020_v6, 0.0  ;;  %v976_v28 = vld [vmem:[%s2225_s4 + $0x50] sm:$0xff] }
 0x174   : > { %v1037_v24 = vmax.f32 %v1021_v7, 0.0  ;;  %v1024_v26 = vadd.f32 %v1008_v12, %v992_v10  ;;  %v1011_v27 = vld [vmem:[%s2224_s3 + $0x48] sm:$0xff]  ;;  %v1012_v30 = vld [vmem:[%s2224_s3 + $0x50] sm:$0xff]  ;;  %v1025_v11 = vadd.f32 %v1009_v9, %v993_v19  ;;  %v994_v17 = vadd.f32 %v2047_v49, %v974_v15  ;;  %v977_v31 = vld [vmem:[%s2225_s4 + $0x58] sm:$0xff] }
 0x175   : > { %1050 = vst [vmem:[%s2225_s4] sm:$0xff] %v1034_v14  ;;  %v1038_v5 = vmax.f32 %v1022_v18, 0.0  ;;  %v995_v23 = vadd.f32 %v2047_v49, %v975_v21  ;;  %v1013_v29 = vld [vmem:[%s2224_s3 + $0x58] sm:$0xff]  ;;  %v978_v32 = vld [vmem:[%s2225_s4 + $0x60] sm:$0xff]  ;;  %v1039_v33 = vmax.f32 %v1023_v25, 0.0  ;;  %v996_v35 = vadd.f32 %v2047_v49, %v976_v28  ;;  %v979_v37 = vld [vmem:[%s2225_s4 + $0x68] sm:$0xff] }
 0x176   : > { %1051 = vst [vmem:[%s2225_s4 + $0x8] sm:$0xff] %v1035_v16  ;;  %v1040_v34 = vmax.f32 %v1024_v26, 0.0  ;;  %v997_v36 = vadd.f32 %v2047_v49, %v977_v31  ;;  %v1014_v38 = vld [vmem:[%s2224_s3 + $0x60] sm:$0xff]  ;;  %v1041_v39 = vmax.f32 %v1025_v11, 0.0  ;;  %v1026_v40 = vadd.f32 %v1010_v20, %v994_v17  ;;  %v1015_v43 = vld [vmem:[%s2224_s3 + $0x68] sm:$0xff]  ;;  %v980_v44 = vld [vmem:[%s2225_s4 + $0x70] sm:$0xff] }
 0x177   : > { %1052 = vst [vmem:[%s2225_s4 + $0x10] sm:$0xff] %v1036_v22  ;;  %v1027_v41 = vadd.f32 %v1011_v27, %v995_v23  ;;  %v998_v42 = vadd.f32 %v2047_v49, %v978_v32  ;;  %v981_v45 = vld [vmem:[%s2225_s4 + $0x78] sm:$0xff]  ;;  %v1028_v46 = vadd.f32 %v1012_v30, %v996_v35  ;;  %v999_v48 = vadd.f32 %v2047_v49, %v979_v37  ;;  %v1016_v51 = vld [vmem:[%s2224_s3 + $0x70] sm:$0xff] }
 0x178   : > { %1053 = vst [vmem:[%s2225_s4 + $0x18] sm:$0xff] %v1037_v24  ;;  %v1029_v47 = vadd.f32 %v1013_v29, %v997_v36  ;;  %v1000_v50 = vadd.f32 %v2047_v49, %v980_v44  ;;  %v1042_v52 = vmax.f32 %v1026_v40, 0.0  ;;  %v1001_v54 = vadd.f32 %v2047_v49, %v981_v45  ;;  %v1017_v55 = vld [vmem:[%s2224_s3 + $0x78] sm:$0xff] }
 0x179   : > { %1054 = vst [vmem:[%s2225_s4 + $0x20] sm:$0xff] %v1038_v5  ;;  %v1030_v53 = vadd.f32 %v1014_v38, %v998_v42  ;;  %v1043_v56 = vmax.f32 %v1027_v41, 0.0  ;;  %v1031_v57 = vadd.f32 %v1015_v43, %v999_v48  ;;  %v1044_v58 = vmax.f32 %v1028_v46, 0.0 }
 0x17a   : > { %1055 = vst [vmem:[%s2225_s4 + $0x28] sm:$0xff] %v1039_v33  ;;  %v1032_v59 = vadd.f32 %v1016_v51, %v1000_v50  ;;  %v1045_v49 = vmax.f32 %v1029_v47, 0.0  ;;  %v1033_v60 = vadd.f32 %v1017_v55, %v1001_v54 }
 0x17b   : > { %1056 = vst [vmem:[%s2225_s4 + $0x30] sm:$0xff] %v1040_v34  ;;  %v1046_v61 = vmax.f32 %v1030_v53, 0.0  ;;  %v1047_v62 = vmax.f32 %v1031_v57, 0.0 }
 0x17c   : > { %1057 = vst [vmem:[%s2225_s4 + $0x38] sm:$0xff] %v1041_v39  ;;  %v1048_v63 = vmax.f32 %v1032_v59, 0.0  ;;  %v1049_v0 = vmax.f32 %v1033_v60, 0.0 }
 0x17d   : > { %1058 = vst [vmem:[%s2225_s4 + $0x40] sm:$0xff] %v1042_v52 }
 0x17e   : > { %1059 = vst [vmem:[%s2225_s4 + $0x48] sm:$0xff] %v1043_v56 }
 0x17f   : > { %1060 = vst [vmem:[%s2225_s4 + $0x50] sm:$0xff] %v1044_v58 }
 0x180   : > { %1061 = vst [vmem:[%s2225_s4 + $0x58] sm:$0xff] %v1045_v49 }
 0x181   : > { %1062 = vst [vmem:[%s2225_s4 + $0x60] sm:$0xff] %v1046_v61 }
 0x182   : > { %1063 = vst [vmem:[%s2225_s4 + $0x68] sm:$0xff] %v1047_v62 }
 0x183   : > { %1064 = vst [vmem:[%s2225_s4 + $0x70] sm:$0xff] %v1048_v63 }
 0x184   : > { %1065 = vst [vmem:[%s2225_s4 + $0x78] sm:$0xff] %v1049_v0 }
 0x185 PF: > { %s14_s19 = sadd.s32 1, %s1573_s19   ;;  %s2226_s15 = smov %s1561_s16 }
 0x186   : > { %p11_p13 = scmp.ge.s32.totalorder %s14_s19, 5   ;;  %s2227_s16 = smov %s1635_s23 }
 0x187   : > { %s2228_s17 = smov %s1569_s18  ;;  %s2229_s18 = smov %s2231_s20 }
 0x188   :  { %13 = sbr.rel (!%p11_p13) target bundleno = 3 (0x3), region = 121 }

// kernel: forward_pallas.30
= control target key start
LH: loop header
LB: loop body
LE: loop exit
PB: predicated region body
PF: predicated region fallthrough
CT: control target
= control target key end

     0   :  { %s1690_s12 = smov 0   ;;  %s1692_s13 = smov 0   ;;  %s2104_s0 = inlined_call_operand.vmem [shape: bf16[512,1024], index: 0, kind: input, shape index: {}]   ;;  %s2105_s1 = inlined_call_operand.vmem [shape: bf16[4,1024,128], index: 1, kind: input, shape index: {}]   ;;  %s2106_s2 = inlined_call_operand.vmem [shape: f32[1,128], index: 2, kind: input, shape index: {}]   ;;  %s2107_s3 = inlined_call_operand.vmem [shape: f32[512,128], index: 3, kind: output, shape index: {}]  }
   0x1   :  { %s1694_s14 = smov 0   ;;  %s1696_s15 = smov 0  }
   0x2   :  { %s1698_s16 = smov 0   ;;  %s1700_s17 = smov 0  }
   0x3   :  { %s1702_s18 = smov 0  }
   0x4 LB: > { %s25_s19 = sadd.s32 1, %s1660_s16  ;;  %s32_s20 = sadd.s32 1, %s1664_s17  ;;  %s1668_s18 = sphi %s1702_s18, %s13_s18   ;;  %s1664_s17 = sphi %s1700_s17, %s2113_s17   ;;  %s1660_s16 = sphi %s1698_s16, %s2112_s16   ;;  %s1656_s15 = sphi %s1696_s15, %s2111_s15   ;;  %s1652_s14 = sphi %s1694_s14, %s2110_s14   ;;  %s1648_s13 = sphi %s1692_s13, %s2109_s13   ;;  %s1644_s12 = sphi %s1690_s12, %s2108_s12  }
   0x5   : > { %p26_p0 = scmp.ge.s32.totalorder %s25_s19, 2  ;;  %p50_p1 = scmp.ne.s32.totalorder %s1648_s13, %s1644_s12 }
   0x6   : > { %p51_p2 = scmp.eq.s32.totalorder %s1668_s18, 0  ;;  %s43_s24 = sadd.s32 1, %s1648_s13 }
   0x7   : > { %s2115_s19 = smov (%p26_p0, %s25_s19), 0  ;;  %s2117_s20 = smov (!%p26_p0, %s32_s20), %s1664_s17 }
   0x8   : > { %p52_p3 = por %p51_p2, %p50_p1  ;;  %p34_p4 = scmp.ge.s32.totalorder %s2117_s20, 4 }
   0x9   : > { %s39_s21 = ssub.s32 %s1660_s16, %s2115_s19  ;;  %p1218_p6 = scmp.ge.s32.totalorder %s1668_s18, 8 }
   0xa   : > { %s2119_s20 = smov (%p34_p4, %s2117_s20), 0 }
   0xb   : > { %s38_s22 = ssub.s32 %s1664_s17, %s2119_s20  ;;  %156 = sbr.rel (%p1218_p6) target bundleno = 55 (0x37), region = 20 }
   0xc   : > { %s40_s23 = sor.u32 %s39_s21, %s38_s22 }
   0xd   : > { %p41_p5 = scmp.eq.s32.totalorder %s40_s23, 0 }
   0xf   : > { %s1741_s25 = scalar_select %p41_p5, %s1648_s13, %s43_s24  }
  0x10   : > { %159 = sbr.rel (!%p52_p3) target bundleno = 55 (0x37), region = 24  ;;  %s161_s26 = sand.u32 (%p52_p3), 1, %s1648_s13  }
  0x11   : > { %s1221_s27 = sshll.u32 (%p52_p3), %s1660_s16, 2  ;;  %s1219_s28 = sshll.u32 (%p52_p3), %s161_s26, 8 }
  0x12   : > { %s1492_s29 = sshll.u32 (%p52_p3), %s1664_s17, 7  ;;  %s1755_s8 = scalar_lea.vmem (%p52_p3), [#allocation2], %s1219_s28 }
  0x13   : > { %s168_s30 = sadd.s32 (%p52_p3), %s1492_s29, %s1221_s27 }
  0x14   : > { %s1223_s4 = sshll.u32 (%p52_p3), %s168_s30, 2 }
  0x15   : > { %s1750_s7 = scalar_lea.vmem %s2104_s0, %s1223_s4 }
  0x16   : > { %v183_v0 = vld [vmem:[%s1750_s7] sm:$0xff]  ;;  %v185_v1 = vld [vmem:[%s1750_s7 + $0x8] sm:$0xff] }
  0x17   : > { %v187_v2 = vld [vmem:[%s1750_s7 + $0x20] sm:$0xff]  ;;  %184 = vst [vmem:[%s1755_s8] sm:$0xff] %v183_v0  ;;  %v189_v3 = vld [vmem:[%s1750_s7 + $0x28] sm:$0xff] }
  0x18   : > { %186 = vst [vmem:[%s1755_s8 + $0x8] sm:$0xff] %v185_v1  ;;  %v191_v4 = vld [vmem:[%s1750_s7 + $0x40] sm:$0xff]  ;;  %v193_v5 = vld [vmem:[%s1750_s7 + $0x48] sm:$0xff] }
  0x19   : > { %188 = vst [vmem:[%s1755_s8 + $0x10] sm:$0xff] %v187_v2  ;;  %v195_v6 = vld [vmem:[%s1750_s7 + $0x60] sm:$0xff]  ;;  %v197_v7 = vld [vmem:[%s1750_s7 + $0x68] sm:$0xff] }
  0x1a   : > { %190 = vst [vmem:[%s1755_s8 + $0x18] sm:$0xff] %v189_v3  ;;  %v199_v8 = vld [vmem:[%s1750_s7 + $0x80] sm:$0xff]  ;;  %v201_v9 = vld [vmem:[%s1750_s7 + $0x88] sm:$0xff] }
  0x1b   : > { %192 = vst [vmem:[%s1755_s8 + $0x20] sm:$0xff] %v191_v4  ;;  %v203_v10 = vld [vmem:[%s1750_s7 + $0xa0] sm:$0xff]  ;;  %v205_v11 = vld [vmem:[%s1750_s7 + $0xa8] sm:$0xff] }
  0x1c   : > { %194 = vst [vmem:[%s1755_s8 + $0x28] sm:$0xff] %v193_v5  ;;  %v207_v12 = vld [vmem:[%s1750_s7 + $0xc0] sm:$0xff]  ;;  %v209_v13 = vld [vmem:[%s1750_s7 + $0xc8] sm:$0xff] }
  0x1d   : > { %196 = vst [vmem:[%s1755_s8 + $0x30] sm:$0xff] %v195_v6  ;;  %v211_v14 = vld [vmem:[%s1750_s7 + $0xe0] sm:$0xff]  ;;  %v213_v15 = vld [vmem:[%s1750_s7 + $0xe8] sm:$0xff] }
  0x1e   : > { %198 = vst [vmem:[%s1755_s8 + $0x38] sm:$0xff] %v197_v7  ;;  %v215_v16 = vld [vmem:[%s1750_s7 + $0x100] sm:$0xff]  ;;  %v217_v17 = vld [vmem:[%s1750_s7 + $0x108] sm:$0xff] }
  0x1f   : > { %200 = vst [vmem:[%s1755_s8 + $0x40] sm:$0xff] %v199_v8  ;;  %v219_v18 = vld [vmem:[%s1750_s7 + $0x120] sm:$0xff]  ;;  %v221_v19 = vld [vmem:[%s1750_s7 + $0x128] sm:$0xff] }
  0x20   : > { %202 = vst [vmem:[%s1755_s8 + $0x48] sm:$0xff] %v201_v9  ;;  %v223_v20 = vld [vmem:[%s1750_s7 + $0x140] sm:$0xff]  ;;  %v225_v21 = vld [vmem:[%s1750_s7 + $0x148] sm:$0xff] }
  0x21   : > { %204 = vst [vmem:[%s1755_s8 + $0x50] sm:$0xff] %v203_v10  ;;  %v227_v22 = vld [vmem:[%s1750_s7 + $0x160] sm:$0xff]  ;;  %v229_v23 = vld [vmem:[%s1750_s7 + $0x168] sm:$0xff] }
  0x22   : > { %206 = vst [vmem:[%s1755_s8 + $0x58] sm:$0xff] %v205_v11  ;;  %v231_v24 = vld [vmem:[%s1750_s7 + $0x180] sm:$0xff]  ;;  %v233_v25 = vld [vmem:[%s1750_s7 + $0x188] sm:$0xff] }
  0x23   : > { %208 = vst [vmem:[%s1755_s8 + $0x60] sm:$0xff] %v207_v12  ;;  %v235_v26 = vld [vmem:[%s1750_s7 + $0x1a0] sm:$0xff]  ;;  %v237_v27 = vld [vmem:[%s1750_s7 + $0x1a8] sm:$0xff] }
  0x24   : > { %210 = vst [vmem:[%s1755_s8 + $0x68] sm:$0xff] %v209_v13  ;;  %v239_v28 = vld [vmem:[%s1750_s7 + $0x1c0] sm:$0xff]  ;;  %v241_v29 = vld [vmem:[%s1750_s7 + $0x1c8] sm:$0xff] }
  0x25   : > { %212 = vst [vmem:[%s1755_s8 + $0x70] sm:$0xff] %v211_v14  ;;  %v243_v30 = vld [vmem:[%s1750_s7 + $0x1e0] sm:$0xff]  ;;  %v245_v31 = vld [vmem:[%s1750_s7 + $0x1e8] sm:$0xff] }
  0x26   : > { %214 = vst [vmem:[%s1755_s8 + $0x78] sm:$0xff] %v213_v15 }
  0x27   : > { %216 = vst [vmem:[%s1755_s8 + $0x80] sm:$0xff] %v215_v16 }
  0x28   : > { %218 = vst [vmem:[%s1755_s8 + $0x88] sm:$0xff] %v217_v17 }
  0x29   : > { %220 = vst [vmem:[%s1755_s8 + $0x90] sm:$0xff] %v219_v18 }
  0x2a   : > { %222 = vst [vmem:[%s1755_s8 + $0x98] sm:$0xff] %v221_v19 }
  0x2b   : > { %224 = vst [vmem:[%s1755_s8 + $0xa0] sm:$0xff] %v223_v20 }
  0x2c   : > { %226 = vst [vmem:[%s1755_s8 + $0xa8] sm:$0xff] %v225_v21 }
  0x2d   : > { %228 = vst [vmem:[%s1755_s8 + $0xb0] sm:$0xff] %v227_v22 }
  0x2e   : > { %230 = vst [vmem:[%s1755_s8 + $0xb8] sm:$0xff] %v229_v23 }
  0x2f   : > { %232 = vst [vmem:[%s1755_s8 + $0xc0] sm:$0xff] %v231_v24 }
  0x30   : > { %234 = vst [vmem:[%s1755_s8 + $0xc8] sm:$0xff] %v233_v25 }
  0x31   : > { %236 = vst [vmem:[%s1755_s8 + $0xd0] sm:$0xff] %v235_v26 }
  0x32   : > { %238 = vst [vmem:[%s1755_s8 + $0xd8] sm:$0xff] %v237_v27 }
  0x33   : > { %240 = vst [vmem:[%s1755_s8 + $0xe0] sm:$0xff] %v239_v28 }
  0x34   : > { %242 = vst [vmem:[%s1755_s8 + $0xe8] sm:$0xff] %v241_v29 }
  0x35   : > { %244 = vst [vmem:[%s1755_s8 + $0xf0] sm:$0xff] %v243_v30 }
  0x36   : > { %246 = vst [vmem:[%s1755_s8 + $0xf8] sm:$0xff] %v245_v31 }
  0x37 PF: > { %p1224_p7 = scmp.ge.s32.totalorder %s1668_s18, 1  ;;  %p264_p8 = scmp.lt.s32.totalorder %s1668_s18, 9 }
  0x39   : > { %p265_p9 = pnand %p1224_p7, %p264_p8 }
  0x3a   : > { %s1226_s9 = sshll.u32 (!%p265_p9), %s1652_s14, 6  ;;  %p308_p10 = scmp.lt.s32.totalorder (!%p265_p9), %s1656_s15, 3 }
  0x3b   : > { %268 = sbr.rel (%p265_p9) target bundleno = 429 (0x1ad), region = 51  ;;  %p310_p11 = scmp.lt.s32.totalorder (!%p265_p9), %s1226_s9, 127 }
  0x3c   : > { %s1229_s10 = sshll.u32 (!%p265_p9), %s1656_s15, 4  ;;  %s271_s30 = sand.u32 (!%p265_p9), 1, %s1644_s12  }
  0x3d   : > { %p319_p12 = scmp.lt.s32.totalorder (!%p265_p9), %s1229_s10, 63  ;;  %s1225_s4 = sshll.u32 (!%p265_p9), %s271_s30, 8 }
  0x3e   : > { %s1867_s12 = scalar_lea.vmem (!%p265_p9), [#allocation2], %s1225_s4  ;;  %p1487_p13 = scmp.ne.s32.totalorder (!%p265_p9), %s1652_s14, 0 }
  0x40   : > { %s2121_s15 = smov (!%p308_p10, %s1656_s15), 3  ;;  %s2123_s9 = smov (!%p310_p11, %s1226_s9), 127  ;;  %v1233_v0 = vld [vmem:[%s1867_s12] sm:$0xf]  ;;  %v1495_v1 = vld [vmem:[%s1867_s12 + $0xc] sm:$0xf0] }
  0x41   : > { %s1227_s11 = sshll.u32 %s2121_s15, 7  ;;  %s2125_s10 = smov (!%p319_p12, %s1229_s10), 63  ;;  %v1493_v2 = vld [vmem:[%s1867_s12 + $0x4] sm:$0xf]  ;;  %v1235_v3 = vld [vmem:[%s1867_s12 + $0x10] sm:$0xf0]  ;;  %v1234_v8 = vor.u32 %v1495_v1, %v1233_v0 }
  0x42   : > { %s313_s21 = sadd.s32 %s1227_s11, %s2123_s9  ;;  %s1230_s15 = sshll.u32 %s2125_s10, 3  ;;  %v1241_v4 = vld [vmem:[%s1867_s12 + $0x8] sm:$0xf]  ;;  %v1496_v5 = vld [vmem:[%s1867_s12 + $0x14] sm:$0xf0]  ;;  %v1238_v9 = vor.u32 %v1493_v2, %v1235_v3 }
  0x43   : > { %s1228_s22 = sshll.u32 %s313_s21, 2  ;;  %s1838_s29 = scalar_lea.vmem %s2107_s3, %s1230_s15  ;;  %v1494_v6 = vld [vmem:[%s1867_s12 + $0xc] sm:$0xf]  ;;  %v1243_v7 = vld [vmem:[%s1867_s12 + $0x18] sm:$0xf0]  ;;  %v1242_v10 = vor.u32 %v1496_v5, %v1241_v4 }
  0x44   : > { %s1827_s26 = scalar_lea.vmem %s2105_s1, %s1228_s22  ;;  %v1246_v11 = vor.u32 %v1494_v6, %v1243_v7  ;;  %v1249_v12 = vld [vmem:[%s1867_s12 + $0x20] sm:$0xf]  ;;  %v1499_v13 = vld [vmem:[%s1867_s12 + $0x2c] sm:$0xf0]  ;;  %v1497_v14 = vld [vmem:[%s1867_s12 + $0x24] sm:$0xf] }
  0x45   : > { %v1532_v32 = vld [vmem:[%s1827_s26 + $0x38] sm:$0xff]  ;;  %v1531_v36 = vld [vmem:[%s1827_s26 + $0x30] sm:$0xff]  ;;  %v1530_v40 = vld [vmem:[%s1827_s26 + $0x28] sm:$0xff]  ;;  %v1250_v20 = vor.u32 %v1499_v13, %v1249_v12 }
  0x46   : > { %v1540_v33 = vld [vmem:[%s1827_s26 + $0x78] sm:$0xff]  ;;  %773 = vmatpush.bf16.msra.mxu0 %v1532_v32  ;;  %v1539_v37 = vld [vmem:[%s1827_s26 + $0x70] sm:$0xff]  ;;  %v1538_v41 = vld [vmem:[%s1827_s26 + $0x68] sm:$0xff] }
  0x47   : > { %v1548_v34 = vld [vmem:[%s1827_s26 + $0xb8] sm:$0xff]  ;;  %822 = vmatpush.bf16.msra.mxu1 %v1540_v33  ;;  %v1547_v38 = vld [vmem:[%s1827_s26 + $0xb0] sm:$0xff]  ;;  %v1546_v42 = vld [vmem:[%s1827_s26 + $0xa8] sm:$0xff] }
  0x48   : > { %v1556_v35 = vld [vmem:[%s1827_s26 + $0xf8] sm:$0xff]  ;;  %871 = vmatpush.bf16.msra.mxu2 %v1548_v34  ;;  %v1555_v39 = vld [vmem:[%s1827_s26 + $0xf0] sm:$0xff]  ;;  %v1554_v43 = vld [vmem:[%s1827_s26 + $0xe8] sm:$0xff] }
  0x49   : > { %920 = vmatpush.bf16.msra.mxu3 %v1556_v35  ;;  %v1529_v44 = vld [vmem:[%s1827_s26 + $0x20] sm:$0xff]  ;;  %v1528_v48 = vld [vmem:[%s1827_s26 + $0x18] sm:$0xff]  ;;  %v1527_v52 = vld [vmem:[%s1827_s26 + $0x10] sm:$0xff] }
  0x4a   : > { %774 = vmatpush.bf16.msra.mxu0 %v1531_v36  ;;  %v1537_v45 = vld [vmem:[%s1827_s26 + $0x60] sm:$0xff]  ;;  %v1536_v49 = vld [vmem:[%s1827_s26 + $0x58] sm:$0xff]  ;;  %v1535_v53 = vld [vmem:[%s1827_s26 + $0x50] sm:$0xff] }
  0x4b   : > { %823 = vmatpush.bf16.msra.mxu1 %v1539_v37  ;;  %v1545_v46 = vld [vmem:[%s1827_s26 + $0xa0] sm:$0xff]  ;;  %v1544_v50 = vld [vmem:[%s1827_s26 + $0x98] sm:$0xff]  ;;  %v1543_v54 = vld [vmem:[%s1827_s26 + $0x90] sm:$0xff] }
  0x4c   : > { %872 = vmatpush.bf16.msra.mxu2 %v1547_v38  ;;  %v1553_v47 = vld [vmem:[%s1827_s26 + $0xe0] sm:$0xff]  ;;  %v1552_v51 = vld [vmem:[%s1827_s26 + $0xd8] sm:$0xff]  ;;  %v1551_v55 = vld [vmem:[%s1827_s26 + $0xd0] sm:$0xff] }
  0x4d   : > { %921 = vmatpush.bf16.msra.mxu3 %v1555_v39  ;;  %v1526_v56 = vld [vmem:[%s1827_s26 + $0x8] sm:$0xff]  ;;  %v1525_v60 = vld [vmem:[%s1827_s26] sm:$0xff]  ;;  %v1251_v15 = vld [vmem:[%s1867_s12 + $0x30] sm:$0xf0] }
  0x4e   : > { %775 = vmatpush.bf16.msra.mxu0 %v1530_v40  ;;  %v1534_v57 = vld [vmem:[%s1827_s26 + $0x48] sm:$0xff]  ;;  %v1533_v61 = vld [vmem:[%s1827_s26 + $0x40] sm:$0xff]  ;;  %v1500_v17 = vld [vmem:[%s1867_s12 + $0x34] sm:$0xf0]  ;;  %v1254_v21 = vor.u32 %v1497_v14, %v1251_v15 }
  0x4f   : > { %824 = vmatpush.bf16.msra.mxu1 %v1538_v41  ;;  %v1542_v58 = vld [vmem:[%s1827_s26 + $0x88] sm:$0xff]  ;;  %v1541_v62 = vld [vmem:[%s1827_s26 + $0x80] sm:$0xff]  ;;  %v1259_v19 = vld [vmem:[%s1867_s12 + $0x38] sm:$0xf0] }
  0x50   : > { %873 = vmatpush.bf16.msra.mxu2 %v1546_v42  ;;  %v1550_v59 = vld [vmem:[%s1827_s26 + $0xc8] sm:$0xff]  ;;  %v1549_v63 = vld [vmem:[%s1827_s26 + $0xc0] sm:$0xff]  ;;  %v1503_v25 = vld [vmem:[%s1867_s12 + $0x4c] sm:$0xf0] }
  0x51   : > { %922 = vmatpush.bf16.msra.mxu3 %v1554_v43  ;;  %v1257_v16 = vld [vmem:[%s1867_s12 + $0x28] sm:$0xf]  ;;  %v1498_v18 = vld [vmem:[%s1867_s12 + $0x2c] sm:$0xf]  ;;  %v1265_v24 = vld [vmem:[%s1867_s12 + $0x40] sm:$0xf] }
  0x52   : > { %776 = vmatpush.bf16.msra.mxu0 %v1529_v44  ;;  %v1258_v22 = vor.u32 %v1500_v17, %v1257_v16  ;;  %v1262_v23 = vor.u32 %v1498_v18, %v1259_v19  ;;  %v1501_v26 = vld [vmem:[%s1867_s12 + $0x44] sm:$0xf]  ;;  %v1267_v27 = vld [vmem:[%s1867_s12 + $0x50] sm:$0xf0]  ;;  %v1273_v28 = vld [vmem:[%s1867_s12 + $0x48] sm:$0xf]  ;;  %v1266_v32 = vor.u32 %v1503_v25, %v1265_v24 }
  0x53   : > { %825 = vmatpush.bf16.msra.mxu1 %v1537_v45  ;;  %v1504_v29 = vld [vmem:[%s1867_s12 + $0x54] sm:$0xf0]  ;;  %v1502_v30 = vld [vmem:[%s1867_s12 + $0x4c] sm:$0xf]  ;;  %v1275_v31 = vld [vmem:[%s1867_s12 + $0x58] sm:$0xf0]  ;;  %v1270_v33 = vor.u32 %v1501_v26, %v1267_v27 }
  0x54   : > { %874 = vmatpush.bf16.msra.mxu2 %v1545_v46  ;;  %v1274_v34 = vor.u32 %v1504_v29, %v1273_v28  ;;  %v1278_v35 = vor.u32 %v1502_v30, %v1275_v31  ;;  %v1281_v36 = vld [vmem:[%s1867_s12 + $0x60] sm:$0xf]  ;;  %v1507_v37 = vld [vmem:[%s1867_s12 + $0x6c] sm:$0xf0]  ;;  %v1505_v38 = vld [vmem:[%s1867_s12 + $0x64] sm:$0xf] }
  0x55   : > { %923 = vmatpush.bf16.msra.mxu3 %v1553_v47  ;;  %v1283_v39 = vld [vmem:[%s1867_s12 + $0x70] sm:$0xf0]  ;;  %v1289_v40 = vld [vmem:[%s1867_s12 + $0x68] sm:$0xf]  ;;  %v1508_v41 = vld [vmem:[%s1867_s12 + $0x74] sm:$0xf0]  ;;  %v1282_v44 = vor.u32 %v1507_v37, %v1281_v36 }
  0x56   : > { %777 = vmatpush.bf16.msra.mxu0 %v1528_v48  ;;  %v1506_v42 = vld [vmem:[%s1867_s12 + $0x6c] sm:$0xf]  ;;  %v1291_v43 = vld [vmem:[%s1867_s12 + $0x78] sm:$0xf0]  ;;  %v1286_v45 = vor.u32 %v1505_v38, %v1283_v39  ;;  %v1290_v46 = vor.u32 %v1508_v41, %v1289_v40  ;;  %v1297_v48 = vld [vmem:[%s1867_s12 + $0x80] sm:$0xf] }
  0x57   : > { %826 = vmatpush.bf16.msra.mxu1 %v1536_v49  ;;  %v1294_v47 = vor.u32 %v1506_v42, %v1291_v43  ;;  %v1511_v49 = vld [vmem:[%s1867_s12 + $0x8c] sm:$0xf0]  ;;  %v1321_v0 = vld [vmem:[%s1867_s12 + $0xa8] sm:$0xf]  ;;  %v1516_v1 = vld [vmem:[%s1867_s12 + $0xb4] sm:$0xf0] }
  0x58   : > { %875 = vmatpush.bf16.msra.mxu2 %v1544_v50  ;;  %v1509_v50 = vld [vmem:[%s1867_s12 + $0x84] sm:$0xf]  ;;  %v1514_v2 = vld [vmem:[%s1867_s12 + $0xac] sm:$0xf]  ;;  %v1323_v3 = vld [vmem:[%s1867_s12 + $0xb8] sm:$0xf0]  ;;  %v1322_v6 = vor.u32 %v1516_v1, %v1321_v0 }
  0x59   : > { %924 = vmatpush.bf16.msra.mxu3 %v1552_v51  ;;  %v1299_v51 = vld [vmem:[%s1867_s12 + $0x90] sm:$0xf0]  ;;  %v1326_v7 = vor.u32 %v1514_v2, %v1323_v3  ;;  %v1337_v12 = vld [vmem:[%s1867_s12 + $0xc8] sm:$0xf]  ;;  %v1520_v13 = vld [vmem:[%s1867_s12 + $0xd4] sm:$0xf0] }
  0x5a   : > { %778 = vmatpush.bf16.msra.mxu0 %v1527_v52  ;;  %v1305_v52 = vld [vmem:[%s1867_s12 + $0x88] sm:$0xf]  ;;  %v1518_v14 = vld [vmem:[%s1867_s12 + $0xcc] sm:$0xf]  ;;  %v1339_v15 = vld [vmem:[%s1867_s12 + $0xd8] sm:$0xf0]  ;;  %v1338_v18 = vor.u32 %v1520_v13, %v1337_v12 }
  0x5b   : > { %827 = vmatpush.bf16.msra.mxu1 %v1535_v53  ;;  %v1512_v53 = vld [vmem:[%s1867_s12 + $0x94] sm:$0xf0]  ;;  %v1342_v19 = vor.u32 %v1518_v14, %v1339_v15  ;;  %v1353_v24 = vld [vmem:[%s1867_s12 + $0xe8] sm:$0xf]  ;;  %v1522_v26 = vld [vmem:[%s1867_s12 + $0xec] sm:$0xf] }
  0x5c   : > { %876 = vmatpush.bf16.msra.mxu2 %v1543_v54  ;;  %v1510_v54 = vld [vmem:[%s1867_s12 + $0x8c] sm:$0xf]  ;;  %v1524_v25 = vld [vmem:[%s1867_s12 + $0xf4] sm:$0xf0]  ;;  %v1355_v27 = vld [vmem:[%s1867_s12 + $0xf8] sm:$0xf0] }
  0x5d   : > { %925 = vmatpush.bf16.msra.mxu3 %v1551_v55  ;;  %v1307_v55 = vld [vmem:[%s1867_s12 + $0x98] sm:$0xf0]  ;;  %v1354_v30 = vor.u32 %v1524_v25, %v1353_v24  ;;  %v1358_v31 = vor.u32 %v1522_v26, %v1355_v27 }
  0x5e   : > { %779 = vmatpush.bf16.msra.mxu0 %v1526_v56  ;;  %v1298_v56 = vor.u32 %v1511_v49, %v1297_v48 }
  0x5f   : > { %828 = vmatpush.bf16.msra.mxu1 %v1534_v57  ;;  %v1302_v57 = vor.u32 %v1509_v50, %v1299_v51 }
  0x60   : > { %877 = vmatpush.bf16.msra.mxu2 %v1542_v58  ;;  %v1306_v58 = vor.u32 %v1512_v53, %v1305_v52 }
  0x61   : > { %926 = vmatpush.bf16.msra.mxu3 %v1550_v59  ;;  %v1310_v59 = vor.u32 %v1510_v54, %v1307_v55 }
  0x62   : > { %780 = vmatpush.bf16.msra.mxu0 %v1525_v60  ;;  %v1313_v60 = vld [vmem:[%s1867_s12 + $0xa0] sm:$0xf] }
  0x63   : > { %829 = vmatpush.bf16.msra.mxu1 %v1533_v61  ;;  %v1515_v61 = vld [vmem:[%s1867_s12 + $0xac] sm:$0xf0] }
  0x64   : > { %878 = vmatpush.bf16.msra.mxu2 %v1541_v62  ;;  %v1513_v62 = vld [vmem:[%s1867_s12 + $0xa4] sm:$0xf]  ;;  %v1314_v4 = vor.u32 %v1515_v61, %v1313_v60 }
  0x65   : > { %927 = vmatpush.bf16.msra.mxu3 %v1549_v63  ;;  %781 = vmatmul.bf16.vlgmr.msra.gmra.mxu0 %v1234_v8  ;;  %v1315_v63 = vld [vmem:[%s1867_s12 + $0xb0] sm:$0xf0]  ;;  %v1329_v8 = vld [vmem:[%s1867_s12 + $0xc0] sm:$0xf] }
  0x66   : > { %830 = vmatmul.bf16.vlgmr.msra.gmra.mxu1 %v1238_v9  ;;  %v1318_v5 = vor.u32 %v1513_v62, %v1315_v63  ;;  %v1519_v9 = vld [vmem:[%s1867_s12 + $0xcc] sm:$0xf0] }
  0x67   : > { %879 = vmatmul.bf16.vlgmr.msra.gmra.mxu2 %v1242_v10  ;;  %v1517_v10 = vld [vmem:[%s1867_s12 + $0xc4] sm:$0xf]  ;;  %v1330_v16 = vor.u32 %v1519_v9, %v1329_v8 }
  0x68   : > { %928 = vmatmul.bf16.vlgmr.msra.gmra.mxu3 %v1246_v11  ;;  %v1331_v11 = vld [vmem:[%s1867_s12 + $0xd0] sm:$0xf0] }
  0x69   : > { %v1334_v17 = vor.u32 %v1517_v10, %v1331_v11 }
  0x75   : > { %786 = vmatmul.bf16.gmra.mxu0 %v1250_v20  ;;  %v1345_v20 = vld [vmem:[%s1867_s12 + $0xe0] sm:$0xf] }
  0x76   : > { %835 = vmatmul.bf16.gmra.mxu1 %v1254_v21  ;;  %v1523_v21 = vld [vmem:[%s1867_s12 + $0xec] sm:$0xf0] }
  0x77   : > { %884 = vmatmul.bf16.gmra.mxu2 %v1258_v22  ;;  %v1521_v22 = vld [vmem:[%s1867_s12 + $0xe4] sm:$0xf]  ;;  %v1346_v28 = vor.u32 %v1523_v21, %v1345_v20 }
  0x78   : > { %933 = vmatmul.bf16.gmra.mxu3 %v1262_v23  ;;  %v1347_v23 = vld [vmem:[%s1867_s12 + $0xf0] sm:$0xf0] }
  0x79   : > { %v1350_v29 = vor.u32 %v1521_v22, %v1347_v23 }
  0x85   : > { %791 = vmatmul.bf16.gmra.mxu0 %v1266_v32 }
  0x86   : > { %840 = vmatmul.bf16.gmra.mxu1 %v1270_v33 }
  0x87   : > { %889 = vmatmul.bf16.gmra.mxu2 %v1274_v34 }
  0x88   : > { %938 = vmatmul.bf16.gmra.mxu3 %v1278_v35 }
  0x95   : > { %796 = vmatmul.bf16.gmra.mxu0 %v1282_v44 }
  0x96   : > { %845 = vmatmul.bf16.gmra.mxu1 %v1286_v45 }
  0x97   : > { %894 = vmatmul.bf16.gmra.mxu2 %v1290_v46 }
  0x98   : > { %943 = vmatmul.bf16.gmra.mxu3 %v1294_v47 }
  0xa5   : > { %801 = vmatmul.bf16.gmra.mxu0 %v1298_v56 }
  0xa6   : > { %850 = vmatmul.bf16.gmra.mxu1 %v1302_v57 }
  0xa7   : > { %899 = vmatmul.bf16.gmra.mxu2 %v1306_v58 }
  0xa8   : > { %948 = vmatmul.bf16.gmra.mxu3 %v1310_v59 }
  0xb5   : > { %806 = vmatmul.bf16.gmra.mxu0 %v1314_v4 }
  0xb6   : > { %855 = vmatmul.bf16.gmra.mxu1 %v1318_v5 }
  0xb7   : > { %904 = vmatmul.bf16.gmra.mxu2 %v1322_v6 }
  0xb8   : > { %953 = vmatmul.bf16.gmra.mxu3 %v1326_v7 }
  0xc5   : > { %811 = vmatmul.bf16.gmra.mxu0 %v1330_v16 }
  0xc6   : > { %860 = vmatmul.bf16.gmra.mxu1 %v1334_v17 }
  0xc7   : > { %909 = vmatmul.bf16.gmra.mxu2 %v1338_v18 }
  0xc8   : > { %958 = vmatmul.bf16.gmra.mxu3 %v1342_v19 }
  0xd5   : > { %816 = vmatmul.bf16.gmra.mxu0 %v1346_v28 }
  0xd6   : > { %865 = vmatmul.bf16.gmra.mxu1 %v1350_v29 }
  0xd7   : > { %914 = vmatmul.bf16.gmra.mxu2 %v1354_v30 }
  0xd8   : > { %963 = vmatmul.bf16.gmra.mxu3 %v1358_v31 }
  0xe2   : > { %v782_v32 = vpop.f32.mrf.mxu0 }
  0xe3   : > { %v831_v33 = vpop.f32.mrf.mxu1 }
  0xe4   : > { %v832_v34 = vadd.f32 %v831_v33, %v782_v32 }
  0xea   : > { %v880_v35 = vpop.f32.mrf.mxu2  ;;  %v784_v38 = vpop.f32.mrf.mxu0 }
  0xeb   : > { %v929_v36 = vpop.f32.mrf.mxu3  ;;  %v881_v37 = vadd.f32 %v880_v35, %v832_v34  ;;  %v833_v39 = vpop.f32.mrf.mxu1 }
  0xec   : > { %v834_v40 = vadd.f32 %v833_v39, %v784_v38 }
  0xed   : > { %v1933_v41 = vadd.f32 %v929_v36, %v881_v37 }
  0xf2   : > { %v882_v42 = vpop.f32.mrf.mxu2  ;;  %v787_v45 = vpop.f32.mrf.mxu0 }
  0xf3   : > { %v931_v43 = vpop.f32.mrf.mxu3  ;;  %v883_v44 = vadd.f32 %v882_v42, %v834_v40  ;;  %v836_v46 = vpop.f32.mrf.mxu1 }
  0xf4   : > { %v837_v47 = vadd.f32 %v836_v46, %v787_v45 }
  0xf5   : > { %v1935_v48 = vadd.f32 %v931_v43, %v883_v44 }
  0xfa   : > { %v885_v49 = vpop.f32.mrf.mxu2  ;;  %v789_v52 = vpop.f32.mrf.mxu0 }
  0xfb   : > { %v934_v50 = vpop.f32.mrf.mxu3  ;;  %v886_v51 = vadd.f32 %v885_v49, %v837_v47  ;;  %v838_v53 = vpop.f32.mrf.mxu1 }
  0xfc   : > { %v839_v54 = vadd.f32 %v838_v53, %v789_v52 }
  0xfd   : > { %v1937_v55 = vadd.f32 %v934_v50, %v886_v51 }
 0x102   : > { %v887_v56 = vpop.f32.mrf.mxu2  ;;  %v792_v59 = vpop.f32.mrf.mxu0 }
 0x103   : > { %v936_v57 = vpop.f32.mrf.mxu3  ;;  %v888_v58 = vadd.f32 %v887_v56, %v839_v54  ;;  %v841_v60 = vpop.f32.mrf.mxu1 }
 0x104   : > { %v842_v61 = vadd.f32 %v841_v60, %v792_v59 }
 0x105   : > { %v1939_v62 = vadd.f32 %v936_v57, %v888_v58 }
 0x10a   : > { %v890_v63 = vpop.f32.mrf.mxu2  ;;  %v794_v2 = vpop.f32.mrf.mxu0 }
 0x10b   : > { %v939_v0 = vpop.f32.mrf.mxu3  ;;  %v891_v1 = vadd.f32 %v890_v63, %v842_v61  ;;  %v843_v3 = vpop.f32.mrf.mxu1 }
 0x10c   : > { %v844_v4 = vadd.f32 %v843_v3, %v794_v2 }
 0x10d   : > { %v1941_v5 = vadd.f32 %v939_v0, %v891_v1 }
 0x112   : > { %v892_v6 = vpop.f32.mrf.mxu2  ;;  %v797_v9 = vpop.f32.mrf.mxu0 }
 0x113   : > { %v941_v7 = vpop.f32.mrf.mxu3  ;;  %v893_v8 = vadd.f32 %v892_v6, %v844_v4  ;;  %v846_v10 = vpop.f32.mrf.mxu1 }
 0x114   : > { %v847_v11 = vadd.f32 %v846_v10, %v797_v9 }
 0x115   : > { %v1943_v12 = vadd.f32 %v941_v7, %v893_v8 }
 0x11a   : > { %v895_v13 = vpop.f32.mrf.mxu2  ;;  %v799_v16 = vpop.f32.mrf.mxu0 }
 0x11b   : > { %v944_v14 = vpop.f32.mrf.mxu3  ;;  %v896_v15 = vadd.f32 %v895_v13, %v847_v11  ;;  %v848_v17 = vpop.f32.mrf.mxu1 }
 0x11c   : > { %v849_v18 = vadd.f32 %v848_v17, %v799_v16 }
 0x11d   : > { %v1945_v19 = vadd.f32 %v944_v14, %v896_v15 }
 0x122   : > { %v897_v20 = vpop.f32.mrf.mxu2  ;;  %v802_v23 = vpop.f32.mrf.mxu0 }
 0x123   : > { %v946_v21 = vpop.f32.mrf.mxu3  ;;  %v898_v22 = vadd.f32 %v897_v20, %v849_v18  ;;  %v851_v24 = vpop.f32.mrf.mxu1 }
 0x124   : > { %v852_v26 = vadd.f32 %v851_v24, %v802_v23 }
 0x125   : > { %v1947_v25 = vadd.f32 %v946_v21, %v898_v22 }
 0x12a   : > { %v900_v27 = vpop.f32.mrf.mxu2  ;;  %v804_v30 = vpop.f32.mrf.mxu0 }
 0x12b   : > { %v949_v28 = vpop.f32.mrf.mxu3  ;;  %v901_v29 = vadd.f32 %v900_v27, %v852_v26  ;;  %v853_v31 = vpop.f32.mrf.mxu1 }
 0x12c   : > { %v854_v33 = vadd.f32 %v853_v31, %v804_v30 }
 0x12d   : > { %v1949_v32 = vadd.f32 %v949_v28, %v901_v29 }
 0x132   : > { %v902_v34 = vpop.f32.mrf.mxu2  ;;  %v807_v37 = vpop.f32.mrf.mxu0 }
 0x133   : > { %v951_v35 = vpop.f32.mrf.mxu3  ;;  %v903_v36 = vadd.f32 %v902_v34, %v854_v33  ;;  %v856_v38 = vpop.f32.mrf.mxu1 }
 0x134   : > { %v857_v40 = vadd.f32 %v856_v38, %v807_v37 }
 0x135   : > { %v1951_v39 = vadd.f32 %v951_v35, %v903_v36 }
 0x13a   : > { %v905_v42 = vpop.f32.mrf.mxu2  ;;  %v809_v45 = vpop.f32.mrf.mxu0 }
 0x13b   : > { %v954_v43 = vpop.f32.mrf.mxu3  ;;  %v906_v44 = vadd.f32 %v905_v42, %v857_v40  ;;  %v858_v46 = vpop.f32.mrf.mxu1 }
 0x13c   : > { %v859_v49 = vadd.f32 %v858_v46, %v809_v45 }
 0x13d   : > { %v1953_v47 = vadd.f32 %v954_v43, %v906_v44 }
 0x142   : > { %v907_v50 = vpop.f32.mrf.mxu2  ;;  %v812_v53 = vpop.f32.mrf.mxu0 }
 0x143   : > { %v956_v51 = vpop.f32.mrf.mxu3  ;;  %v908_v52 = vadd.f32 %v907_v50, %v859_v49  ;;  %v861_v54 = vpop.f32.mrf.mxu1 }
 0x144   : > { %v862_v57 = vadd.f32 %v861_v54, %v812_v53 }
 0x145   : > { %v1955_v56 = vadd.f32 %v956_v51, %v908_v52 }
 0x14a   : > { %v910_v58 = vpop.f32.mrf.mxu2  ;;  %v814_v61 = vpop.f32.mrf.mxu0 }
 0x14b   : > { %v959_v59 = vpop.f32.mrf.mxu3  ;;  %v911_v60 = vadd.f32 %v910_v58, %v862_v57  ;;  %v863_v63 = vpop.f32.mrf.mxu1 }
 0x14c   : > { %v864_v1 = vadd.f32 %v863_v63, %v814_v61 }
 0x14d   : > { %v1957_v0 = vadd.f32 %v959_v59, %v911_v60 }
 0x152   : > { %v912_v2 = vpop.f32.mrf.mxu2  ;;  %v817_v6 = vpop.f32.mrf.mxu0 }
 0x153   : > { %v961_v3 = vpop.f32.mrf.mxu3  ;;  %v913_v4 = vadd.f32 %v912_v2, %v864_v1  ;;  %v866_v7 = vpop.f32.mrf.mxu1 }
 0x154   : > { %v867_v9 = vadd.f32 %v866_v7, %v817_v6 }
 0x155   : > { %v1959_v8 = vadd.f32 %v961_v3, %v913_v4 }
 0x15a   : > { %v915_v10 = vpop.f32.mrf.mxu2  ;;  %v819_v15 = vpop.f32.mrf.mxu0 }
 0x15b   : > { %v964_v11 = vpop.f32.mrf.mxu3  ;;  %v916_v13 = vadd.f32 %v915_v10, %v867_v9  ;;  %v868_v16 = vpop.f32.mrf.mxu1 }
 0x15c   : > { %v869_v17 = vadd.f32 %v868_v16, %v819_v15 }
 0x15d   : > { %v1961_v14 = vadd.f32 %v964_v11, %v916_v13 }
 0x161   : > { %972 = sbr.rel (%p1487_p13) target bundleno = 374 (0x176), region = 59 }
 0x162   : > { %v917_v18 = vpop.f32.mrf.mxu2 }
 0x163   : > { %v918_v20 = vadd.f32 %v917_v18, %v869_v17  ;;  %v966_v21 = vpop.f32.mrf.mxu3 }
 0x165   : > { %v1963_v22 = vadd.f32 %v966_v21, %v918_v20 }
 0x166   : > { %973 = vst [vmem:[%s1838_s29] sm:$0xff] %v1933_v41 }
 0x167   : > { %974 = vst [vmem:[%s1838_s29 + $0x8] sm:$0xff] %v1935_v48 }
 0x168   : > { %975 = vst [vmem:[%s1838_s29 + $0x10] sm:$0xff] %v1937_v55 }
 0x169   : > { %976 = vst [vmem:[%s1838_s29 + $0x18] sm:$0xff] %v1939_v62 }
 0x16a   : > { %977 = vst [vmem:[%s1838_s29 + $0x20] sm:$0xff] %v1941_v5 }
 0x16b   : > { %978 = vst [vmem:[%s1838_s29 + $0x28] sm:$0xff] %v1943_v12 }
 0x16c   : > { %979 = vst [vmem:[%s1838_s29 + $0x30] sm:$0xff] %v1945_v19 }
 0x16d   : > { %980 = vst [vmem:[%s1838_s29 + $0x38] sm:$0xff] %v1947_v25 }
 0x16e   : > { %981 = vst [vmem:[%s1838_s29 + $0x40] sm:$0xff] %v1949_v32 }
 0x16f   : > { %982 = vst [vmem:[%s1838_s29 + $0x48] sm:$0xff] %v1951_v39 }
 0x170   : > { %983 = vst [vmem:[%s1838_s29 + $0x50] sm:$0xff] %v1953_v47 }
 0x171   : > { %984 = vst [vmem:[%s1838_s29 + $0x58] sm:$0xff] %v1955_v56 }
 0x172   : > { %985 = vst [vmem:[%s1838_s29 + $0x60] sm:$0xff] %v1957_v0 }
 0x173   : > { %986 = vst [vmem:[%s1838_s29 + $0x68] sm:$0xff] %v1959_v8 }
 0x174   : > { %987 = vst [vmem:[%s1838_s29 + $0x70] sm:$0xff] %v1961_v14 }
 0x175   : > { %988 = vst [vmem:[%s1838_s29 + $0x78] sm:$0xff] %v1963_v22 }
 0x176 PF: > { %p1488_p0 = scmp.le.s32.totalorder %s1652_s14, 0 }
 0x178   : > { %992 = sbr.rel (%p1488_p0) target bundleno = 400 (0x190), region = 63 }
 0x17d   : > { %v993_v23 = vld [vmem:[%s1838_s29] sm:$0xff]  ;;  %v994_v24 = vld [vmem:[%s1838_s29 + $0x8] sm:$0xff]  ;;  %v995_v26 = vld [vmem:[%s1838_s29 + $0x10] sm:$0xff] }
 0x17e   : > { %v1009_v27 = vadd.f32 %v993_v23, %v1933_v41  ;;  %v1010_v28 = vadd.f32 %v994_v24, %v1935_v48  ;;  %v1011_v29 = vadd.f32 %v995_v26, %v1937_v55  ;;  %v996_v30 = vld [vmem:[%s1838_s29 + $0x18] sm:$0xff]  ;;  %v997_v31 = vld [vmem:[%s1838_s29 + $0x20] sm:$0xff]  ;;  %v998_v33 = vld [vmem:[%s1838_s29 + $0x28] sm:$0xff] }
 0x17f   : > { %v1012_v34 = vadd.f32 %v996_v30, %v1939_v62  ;;  %v999_v35 = vld [vmem:[%s1838_s29 + $0x30] sm:$0xff]  ;;  %v1013_v36 = vadd.f32 %v997_v31, %v1941_v5  ;;  %v1000_v41 = vld [vmem:[%s1838_s29 + $0x38] sm:$0xff]  ;;  %v1014_v48 = vadd.f32 %v998_v33, %v1943_v12  ;;  %v1001_v55 = vld [vmem:[%s1838_s29 + $0x40] sm:$0xff] }
 0x180   : > { %1025 = vst [vmem:[%s1838_s29] sm:$0xff] %v1009_v27  ;;  %v1015_v37 = vadd.f32 %v999_v35, %v1945_v19  ;;  %v1002_v62 = vld [vmem:[%s1838_s29 + $0x48] sm:$0xff]  ;;  %v1016_v38 = vadd.f32 %v1000_v41, %v1947_v25  ;;  %v1003_v5 = vld [vmem:[%s1838_s29 + $0x50] sm:$0xff]  ;;  %v1017_v40 = vadd.f32 %v1001_v55, %v1949_v32  ;;  %v1004_v12 = vld [vmem:[%s1838_s29 + $0x58] sm:$0xff] }
 0x181   : > { %1026 = vst [vmem:[%s1838_s29 + $0x8] sm:$0xff] %v1010_v28  ;;  %v1018_v42 = vadd.f32 %v1002_v62, %v1951_v39  ;;  %v1005_v43 = vld [vmem:[%s1838_s29 + $0x60] sm:$0xff]  ;;  %v1019_v19 = vadd.f32 %v1003_v5, %v1953_v47  ;;  %v1006_v25 = vld [vmem:[%s1838_s29 + $0x68] sm:$0xff]  ;;  %v1020_v44 = vadd.f32 %v1004_v12, %v1955_v56  ;;  %v1007_v45 = vld [vmem:[%s1838_s29 + $0x70] sm:$0xff] }
 0x182   : > { %1027 = vst [vmem:[%s1838_s29 + $0x10] sm:$0xff] %v1011_v29  ;;  %v1021_v32 = vadd.f32 %v1005_v43, %v1957_v0  ;;  %v1008_v46 = vld [vmem:[%s1838_s29 + $0x78] sm:$0xff]  ;;  %v1022_v39 = vadd.f32 %v1006_v25, %v1959_v8  ;;  %v1023_v49 = vadd.f32 %v1007_v45, %v1961_v14 }
 0x183   : > { %1028 = vst [vmem:[%s1838_s29 + $0x18] sm:$0xff] %v1012_v34  ;;  %v1024_v47 = vadd.f32 %v1008_v46, %v1963_v22 }
 0x184   : > { %1029 = vst [vmem:[%s1838_s29 + $0x20] sm:$0xff] %v1013_v36 }
 0x185   : > { %1030 = vst [vmem:[%s1838_s29 + $0x28] sm:$0xff] %v1014_v48 }
 0x186   : > { %1031 = vst [vmem:[%s1838_s29 + $0x30] sm:$0xff] %v1015_v37 }
 0x187   : > { %1032 = vst [vmem:[%s1838_s29 + $0x38] sm:$0xff] %v1016_v38 }
 0x188   : > { %1033 = vst [vmem:[%s1838_s29 + $0x40] sm:$0xff] %v1017_v40 }
 0x189   : > { %1034 = vst [vmem:[%s1838_s29 + $0x48] sm:$0xff] %v1018_v42 }
 0x18a   : > { %1035 = vst [vmem:[%s1838_s29 + $0x50] sm:$0xff] %v1019_v19 }
 0x18b   : > { %1036 = vst [vmem:[%s1838_s29 + $0x58] sm:$0xff] %v1020_v44 }
 0x18c   : > { %1037 = vst [vmem:[%s1838_s29 + $0x60] sm:$0xff] %v1021_v32 }
 0x18d   : > { %1038 = vst [vmem:[%s1838_s29 + $0x68] sm:$0xff] %v1022_v39 }
 0x18e   : > { %1039 = vst [vmem:[%s1838_s29 + $0x70] sm:$0xff] %v1023_v49 }
 0x18f   : > { %1040 = vst [vmem:[%s1838_s29 + $0x78] sm:$0xff] %v1024_v47 }
 0x190 PF: > { %p1489_p1 = scmp.ne.s32.totalorder %s1652_s14, 1 }
 0x192   : > { %1044 = sbr.rel (%p1489_p1) target bundleno = 429 (0x1ad), region = 67 }
 0x197   : > { %v1045_v50 = vld [vmem:[%s1838_s29] sm:$0xff]  ;;  %v1046_v52 = vld [vmem:[%s1838_s29 + $0x8] sm:$0xff]  ;;  %v1047_v53 = vld [vmem:[%s1838_s29 + $0x10] sm:$0xff] }
 0x198   : > { %v1613_v51 = vld [vmem:[%s2106_s2] ss:$0 sm:$0xff]  ;;  %v1048_v54 = vld [vmem:[%s1838_s29 + $0x18] sm:$0xff]  ;;  %v1050_v61 = vld [vmem:[%s1838_s29 + $0x28] sm:$0xff] }
 0x199   : > { %v1065_v56 = vadd.f32 %v1613_v51, %v1045_v50  ;;  %v1066_v57 = vadd.f32 %v1613_v51, %v1046_v52  ;;  %v1067_v58 = vadd.f32 %v1613_v51, %v1047_v53  ;;  %v1068_v59 = vadd.f32 %v1613_v51, %v1048_v54  ;;  %v1049_v60 = vld [vmem:[%s1838_s29 + $0x20] sm:$0xff]  ;;  %v1051_v63 = vld [vmem:[%s1838_s29 + $0x30] sm:$0xff]  ;;  %v1052_v2 = vld [vmem:[%s1838_s29 + $0x38] sm:$0xff] }
 0x19a   : > { %v1069_v0 = vadd.f32 %v1613_v51, %v1049_v60  ;;  %v1070_v1 = vadd.f32 %v1613_v51, %v1050_v61  ;;  %v1053_v3 = vld [vmem:[%s1838_s29 + $0x40] sm:$0xff]  ;;  %v1071_v8 = vadd.f32 %v1613_v51, %v1051_v63  ;;  %v1054_v9 = vld [vmem:[%s1838_s29 + $0x48] sm:$0xff]  ;;  %v1072_v11 = vadd.f32 %v1613_v51, %v1052_v2  ;;  %v1055_v13 = vld [vmem:[%s1838_s29 + $0x50] sm:$0xff] }
 0x19b   : > { %v1081_v4 = vmax.f32 %v1065_v56, 0.0  ;;  %v1082_v6 = vmax.f32 %v1066_v57, 0.0  ;;  %v1083_v7 = vmax.f32 %v1067_v58, 0.0  ;;  %v1084_v10 = vmax.f32 %v1068_v59, 0.0  ;;  %v1056_v16 = vld [vmem:[%s1838_s29 + $0x58] sm:$0xff]  ;;  %v1057_v20 = vld [vmem:[%s1838_s29 + $0x60] sm:$0xff] }
 0x19c   : > { %v1085_v14 = vmax.f32 %v1069_v0, 0.0  ;;  %v1073_v15 = vadd.f32 %v1613_v51, %v1053_v3  ;;  %v1086_v17 = vmax.f32 %v1070_v1, 0.0  ;;  %v1074_v18 = vadd.f32 %v1613_v51, %v1054_v9  ;;  %v1058_v23 = vld [vmem:[%s1838_s29 + $0x68] sm:$0xff]  ;;  %v1059_v27 = vld [vmem:[%s1838_s29 + $0x70] sm:$0xff]  ;;  %v1060_v30 = vld [vmem:[%s1838_s29 + $0x78] sm:$0xff] }
 0x19d   : > { %1097 = vst [vmem:[%s1838_s29] sm:$0xff] %v1081_v4  ;;  %v1087_v21 = vmax.f32 %v1071_v8, 0.0  ;;  %v1075_v22 = vadd.f32 %v1613_v51, %v1055_v13  ;;  %v1088_v24 = vmax.f32 %v1072_v11, 0.0  ;;  %v1076_v26 = vadd.f32 %v1613_v51, %v1056_v16 }
 0x19e   : > { %1098 = vst [vmem:[%s1838_s29 + $0x8] sm:$0xff] %v1082_v6  ;;  %v1089_v28 = vmax.f32 %v1073_v15, 0.0  ;;  %v1077_v29 = vadd.f32 %v1613_v51, %v1057_v20  ;;  %v1090_v31 = vmax.f32 %v1074_v18, 0.0  ;;  %v1078_v33 = vadd.f32 %v1613_v51, %v1058_v23 }
 0x19f   : > { %1099 = vst [vmem:[%s1838_s29 + $0x10] sm:$0xff] %v1083_v7  ;;  %v1091_v34 = vmax.f32 %v1075_v22, 0.0  ;;  %v1079_v35 = vadd.f32 %v1613_v51, %v1059_v27  ;;  %v1092_v36 = vmax.f32 %v1076_v26, 0.0  ;;  %v1080_v41 = vadd.f32 %v1613_v51, %v1060_v30 }
 0x1a0   : > { %1100 = vst [vmem:[%s1838_s29 + $0x18] sm:$0xff] %v1084_v10  ;;  %v1093_v48 = vmax.f32 %v1077_v29, 0.0  ;;  %v1094_v55 = vmax.f32 %v1078_v33, 0.0 }
 0x1a1   : > { %1101 = vst [vmem:[%s1838_s29 + $0x20] sm:$0xff] %v1085_v14  ;;  %v1095_v37 = vmax.f32 %v1079_v35, 0.0  ;;  %v1096_v62 = vmax.f32 %v1080_v41, 0.0 }
 0x1a2   : > { %1102 = vst [vmem:[%s1838_s29 + $0x28] sm:$0xff] %v1086_v17 }
 0x1a3   : > { %1103 = vst [vmem:[%s1838_s29 + $0x30] sm:$0xff] %v1087_v21 }
 0x1a4   : > { %1104 = vst [vmem:[%s1838_s29 + $0x38] sm:$0xff] %v1088_v24 }
 0x1a5   : > { %1105 = vst [vmem:[%s1838_s29 + $0x40] sm:$0xff] %v1089_v28 }
 0x1a6   : > { %1106 = vst [vmem:[%s1838_s29 + $0x48] sm:$0xff] %v1090_v31 }
 0x1a7   : > { %1107 = vst [vmem:[%s1838_s29 + $0x50] sm:$0xff] %v1091_v34 }
 0x1a8   : > { %1108 = vst [vmem:[%s1838_s29 + $0x58] sm:$0xff] %v1092_v36 }
 0x1a9   : > { %1109 = vst [vmem:[%s1838_s29 + $0x60] sm:$0xff] %v1093_v48 }
 0x1aa   : > { %1110 = vst [vmem:[%s1838_s29 + $0x68] sm:$0xff] %v1094_v55 }
 0x1ab   : > { %1111 = vst [vmem:[%s1838_s29 + $0x70] sm:$0xff] %v1095_v37 }
 0x1ac   : > { %1112 = vst [vmem:[%s1838_s29 + $0x78] sm:$0xff] %v1096_v62 }
 0x1ad PF: > { %s13_s18 = sadd.s32 1, %s1668_s18   ;;  %s2108_s12 = smov %s1648_s13 }
 0x1ae   : > { %p10_p2 = scmp.ge.s32.totalorder %s13_s18, 10   ;;  %s2109_s13 = smov %s1741_s25 }
 0x1af   : > { %s2110_s14 = smov %s1660_s16  ;;  %s2111_s15 = smov %s1664_s17 }
 0x1b0   : > { %s2112_s16 = smov %s2115_s19  ;;  %s2113_s17 = smov %s2119_s20 }
 0x1b1   :  { %12 = sbr.rel (!%p10_p2) target bundleno = 4 (0x4), region = 105 }

// kernel: forward_pallas.31
= control target key start
LH: loop header
LB: loop body
LE: loop exit
PB: predicated region body
PF: predicated region fallthrough
CT: control target
= control target key end

     0   :  { %s1817_s12 = smov 0   ;;  %s1819_s13 = smov 0   ;;  %s2130_s0 = inlined_call_operand.vmem [shape: bf16[512,576], index: 0, kind: input, shape index: {}]   ;;  %s2131_s1 = inlined_call_operand.vmem [shape: bf16[1,576,128], index: 1, kind: input, shape index: {}]   ;;  %s2132_s2 = inlined_call_operand.vmem [shape: f32[1,128], index: 2, kind: input, shape index: {}]   ;;  %s2133_s3 = inlined_call_operand.vmem [shape: f32[512,128], index: 3, kind: output, shape index: {}]  }
   0x1   :  { %s1821_s14 = smov 0  }
   0x2 LB: > { %s28_s15 = sadd.s32 1, %s1791_s13  ;;  %p1328_p0 = scmp.ge.s32.totalorder %s1795_s14, 1  ;;  %s1795_s14 = sphi %s1821_s14, %s13_s14   ;;  %s1791_s13 = sphi %s1819_s13, %s2135_s13   ;;  %s1787_s12 = sphi %s1817_s12, %s2134_s12  }
   0x3   : > { %p30_p1 = scmp.ge.s32.totalorder %s28_s15, 4  ;;  %p194_p2 = scmp.lt.s32.totalorder %s1795_s14, 5 }
   0x5   : > { %s2137_s15 = smov (%p30_p1, %s28_s15), 0  ;;  %p195_p3 = pnand %p1328_p0, %p194_p2 }
   0x6   : > { %s1329_s22 = sshll.u32 (!%p195_p3), %s1787_s12, 4 }
   0x7   : > { %198 = sbr.rel (%p195_p3) target bundleno = 339 (0x153), region = 32  ;;  %p240_p4 = scmp.lt.s32.totalorder (!%p195_p3), %s1329_s22, 63 }
   0xc   : > { %v1694_v0 = vld [vmem:[%s2131_s1 + $0x38] sm:$0xff]  ;;  %v1693_v1 = vld [vmem:[%s2131_s1 + $0x30] sm:$0xff]  ;;  %v1692_v2 = vld [vmem:[%s2131_s1 + $0x28] sm:$0xff]  ;;  %s2139_s22 = smov (!%p240_p4, %s1329_s22), 63  ;;  %vm809_vm0 = vcmask 523264  }
   0xd   : > { %1723 = vmatpush.bf16.msra.mxu1 %v1694_v0  ;;  %1724 = vmatpush.bf16.msra.mxu2 %v1694_v0  ;;  %v1691_v3 = vld [vmem:[%s2131_s1 + $0x20] sm:$0xff]  ;;  %v1690_v4 = vld [vmem:[%s2131_s1 + $0x18] sm:$0xff]  ;;  %v1689_v5 = vld [vmem:[%s2131_s1 + $0x10] sm:$0xff]  ;;  %s1747_s29 = smul.u32 20, %s2139_s22  ;;  %s1332_s27 = sshll.u32 %s2139_s22, 3 }
   0xe   : > { %1725 = vmatpush.bf16.msra.mxu3 %v1694_v0  ;;  %834 = vmatpush.bf16.msra.mxu0 %v1694_v0  ;;  %v1688_v6 = vld [vmem:[%s2131_s1 + $0x8] sm:$0xff]  ;;  %v1687_v7 = vld [vmem:[%s2131_s1] sm:$0xff]  ;;  %v1710_v16 = vld [vmem:[%s2131_s1 + $0xb8] sm:$0xff]  ;;  %s2076_s30 = scalar_lea.vmem %s2133_s3, %s1332_s27 }
   0xf   : > { %s1865_s7 = scalar_lea.vmem %s2130_s0, %s1747_s29  ;;  %v1702_v17 = vld [vmem:[%s2131_s1 + $0x78] sm:$0xff]  ;;  %v1709_v24 = vld [vmem:[%s2131_s1 + $0xb0] sm:$0xff]  ;;  %v1708_v28 = vld [vmem:[%s2131_s1 + $0xa8] sm:$0xff] }
  0x10   : > { %v1375_v8 = vld [vmem:[%s1865_s7 + $0x50] sm:$0xf]  ;;  %v1659_v9 = vld [vmem:[%s1865_s7 + $0x60] sm:$0xf0]  ;;  %v1415_v10 = vld [vmem:[%s1865_s7 + $0xa0] sm:$0xf] }
  0x11   : > { %1726 = vmatpush.bf16.msra.mxu1 %v1693_v1  ;;  %1727 = vmatpush.bf16.msra.mxu2 %v1693_v1  ;;  %v1669_v11 = vld [vmem:[%s1865_s7 + $0xb0] sm:$0xf0]  ;;  %v1455_v12 = vld [vmem:[%s1865_s7 + $0xf0] sm:$0xf]  ;;  %v1679_v13 = vld [vmem:[%s1865_s7 + $0x100] sm:$0xf0]  ;;  %v1376_v18 = vor.u32 %v1659_v9, %v1375_v8 }
  0x12   : > { %1728 = vmatpush.bf16.msra.mxu3 %v1693_v1  ;;  %835 = vmatpush.bf16.msra.mxu0 %v1693_v1  ;;  %v1335_v14 = vld [vmem:[%s1865_s7] sm:$0xf]  ;;  %v1649_v15 = vld [vmem:[%s1865_s7 + $0x10] sm:$0xf0]  ;;  %v1416_v19 = vor.u32 %v1669_v11, %v1415_v10  ;;  %v1456_v20 = vor.u32 %v1679_v13, %v1455_v12  ;;  %v1718_v22 = vld [vmem:[%s2131_s1 + $0xf8] sm:$0xff] }
  0x13   : > { %v1336_v21 = vor.u32 %v1649_v15, %v1335_v14  ;;  %v1722_v23 = vld [vmem:[%s2131_s1 + $0x118] sm:$0xff]  ;;  %v1701_v25 = vld [vmem:[%s2131_s1 + $0x70] sm:$0xff]  ;;  %v1700_v29 = vld [vmem:[%s2131_s1 + $0x68] sm:$0xff] }
  0x14   : > { %v1717_v26 = vld [vmem:[%s2131_s1 + $0xf0] sm:$0xff]  ;;  %v1716_v30 = vld [vmem:[%s2131_s1 + $0xe8] sm:$0xff]  ;;  %v1707_v32 = vld [vmem:[%s2131_s1 + $0xa0] sm:$0xff] }
  0x15   : > { %1729 = vmatpush.bf16.msra.mxu1 %v1692_v2  ;;  %1730 = vmatpush.bf16.msra.mxu2 %v1692_v2  ;;  %v1721_v27 = vld [vmem:[%s2131_s1 + $0x110] sm:$0xff]  ;;  %v1720_v31 = vld [vmem:[%s2131_s1 + $0x108] sm:$0xff]  ;;  %v1699_v33 = vld [vmem:[%s2131_s1 + $0x60] sm:$0xff] }
  0x16   : > { %1731 = vmatpush.bf16.msra.mxu3 %v1692_v2  ;;  %836 = vmatpush.bf16.msra.mxu0 %v1692_v2  ;;  %v1715_v34 = vld [vmem:[%s2131_s1 + $0xe0] sm:$0xff]  ;;  %v1395_v35 = vld [vmem:[%s1865_s7 + $0x78] sm:$0xf]  ;;  %v1664_v36 = vld [vmem:[%s1865_s7 + $0x88] sm:$0xf0] }
  0x17   : > { %v1435_v37 = vld [vmem:[%s1865_s7 + $0xc8] sm:$0xf]  ;;  %v1674_v38 = vld [vmem:[%s1865_s7 + $0xd8] sm:$0xf0]  ;;  %v1475_v39 = vld [vmem:[%s1865_s7 + $0x118] sm:$0xf]  ;;  %v1396_v46 = vor.u32 %v1664_v36, %v1395_v35 }
  0x18   : > { %v1684_v40 = vld [vmem:[%s1865_s7 + $0x128] sm:$0xf0]  ;;  %v1355_v41 = vld [vmem:[%s1865_s7 + $0x28] sm:$0xf]  ;;  %v1654_v42 = vld [vmem:[%s1865_s7 + $0x38] sm:$0xf0]  ;;  %v1436_v47 = vor.u32 %v1674_v38, %v1435_v37 }
  0x19   : > { %1732 = vmatpush.bf16.msra.mxu1 %v1691_v3  ;;  %1733 = vmatpush.bf16.msra.mxu2 %v1691_v3  ;;  %v1719_v43 = vld [vmem:[%s2131_s1 + $0x100] sm:$0xff]  ;;  %v1706_v44 = vld [vmem:[%s2131_s1 + $0x98] sm:$0xff]  ;;  %v1476_v48 = vor.u32 %v1684_v40, %v1475_v39  ;;  %v1356_v49 = vor.u32 %v1654_v42, %v1355_v41  ;;  %v1705_v51 = vld [vmem:[%s2131_s1 + $0x90] sm:$0xff] }
  0x1a   : > { %1734 = vmatpush.bf16.msra.mxu3 %v1691_v3  ;;  %837 = vmatpush.bf16.msra.mxu0 %v1691_v3  ;;  %v1698_v45 = vld [vmem:[%s2131_s1 + $0x58] sm:$0xff]  ;;  %v1697_v52 = vld [vmem:[%s2131_s1 + $0x50] sm:$0xff]  ;;  %v1704_v54 = vld [vmem:[%s2131_s1 + $0x88] sm:$0xff] }
  0x1b   : > { %v1714_v50 = vld [vmem:[%s2131_s1 + $0xd8] sm:$0xff]  ;;  %v1713_v53 = vld [vmem:[%s2131_s1 + $0xd0] sm:$0xff]  ;;  %v1696_v55 = vld [vmem:[%s2131_s1 + $0x48] sm:$0xff] }
  0x1c   : > { %v1712_v56 = vld [vmem:[%s2131_s1 + $0xc8] sm:$0xff]  ;;  %v1703_v57 = vld [vmem:[%s2131_s1 + $0x80] sm:$0xff]  ;;  %v1337_v61 = vld [vmem:[%s1865_s7 + $0x14] sm:$0xf0] }
  0x1d   : > { %1735 = vmatpush.bf16.msra.mxu1 %v1690_v4  ;;  %1736 = vmatpush.bf16.msra.mxu2 %v1690_v4  ;;  %v1695_v58 = vld [vmem:[%s2131_s1 + $0x40] sm:$0xff]  ;;  %v1343_v62 = vld [vmem:[%s1865_s7 + $0x8] sm:$0xf]  ;;  %v1650_v63 = vld [vmem:[%s1865_s7 + $0x18] sm:$0xf0] }
  0x1e   : > { %1737 = vmatpush.bf16.msra.mxu3 %v1690_v4  ;;  %838 = vmatpush.bf16.msra.mxu0 %v1690_v4  ;;  %v1711_v59 = vld [vmem:[%s2131_s1 + $0xc0] sm:$0xff]  ;;  %v1648_v0 = vld [vmem:[%s1865_s7 + $0xc] sm:$0xf]  ;;  %v1351_v2 = vld [vmem:[%s1865_s7 + $0x10] sm:$0xf] }
  0x1f   : > { %v1647_v60 = vld [vmem:[%s1865_s7 + $0x4] sm:$0xf]  ;;  %v1345_v1 = vld [vmem:[%s1865_s7 + $0x1c] sm:$0xf0]  ;;  %v1652_v8 = vld [vmem:[%s1865_s7 + $0x2c] sm:$0xf] }
  0x20   : > { %v1651_v3 = vld [vmem:[%s1865_s7 + $0x20] sm:$0xf0]  ;;  %v1340_v4 = vor.u32 %v1647_v60, %v1337_v61  ;;  %v1357_v9 = vld [vmem:[%s1865_s7 + $0x3c] sm:$0xf0]  ;;  %v1363_v10 = vld [vmem:[%s1865_s7 + $0x30] sm:$0xf] }
  0x21   : > { %1738 = vmatpush.bf16.msra.mxu1 %v1689_v5  ;;  %1739 = vmatpush.bf16.msra.mxu2 %v1689_v5  ;;  %v1655_v11 = vld [vmem:[%s1865_s7 + $0x40] sm:$0xf0]  ;;  %v1653_v12 = vld [vmem:[%s1865_s7 + $0x34] sm:$0xf]  ;;  %v1365_v13 = vld [vmem:[%s1865_s7 + $0x44] sm:$0xf0] }
  0x22   : > { %1740 = vmatpush.bf16.msra.mxu3 %v1689_v5  ;;  %839 = vmatpush.bf16.msra.mxu0 %v1689_v5  ;;  %v1344_v5 = vor.u32 %v1650_v63, %v1343_v62  ;;  %v1371_v14 = vld [vmem:[%s1865_s7 + $0x38] sm:$0xf]  ;;  %v1656_v15 = vld [vmem:[%s1865_s7 + $0x48] sm:$0xf0]  ;;  %v1665_v35 = vld [vmem:[%s1865_s7 + $0x90] sm:$0xf0] }
  0x23   : > { %v1663_v36 = vld [vmem:[%s1865_s7 + $0x84] sm:$0xf]  ;;  %v1405_v37 = vld [vmem:[%s1865_s7 + $0x94] sm:$0xf0]  ;;  %v1411_v38 = vld [vmem:[%s1865_s7 + $0x88] sm:$0xf] }
  0x24   : > { %v1666_v39 = vld [vmem:[%s1865_s7 + $0x98] sm:$0xf0]  ;;  %v1408_v42 = vor.u32 %v1663_v36, %v1405_v37  ;;  %v1673_v60 = vld [vmem:[%s1865_s7 + $0xd4] sm:$0xf]  ;;  %v1445_v61 = vld [vmem:[%s1865_s7 + $0xe4] sm:$0xf0] }
  0x25   : > { %1741 = vmatpush.bf16.msra.mxu1 %v1688_v6  ;;  %1742 = vmatpush.bf16.msra.mxu2 %v1688_v6  ;;  %v1451_v62 = vld [vmem:[%s1865_s7 + $0xd8] sm:$0xf]  ;;  %v1676_v63 = vld [vmem:[%s1865_s7 + $0xe8] sm:$0xf0] }
  0x26   : > { %1743 = vmatpush.bf16.msra.mxu3 %v1688_v6  ;;  %840 = vmatpush.bf16.msra.mxu0 %v1688_v6  ;;  %v1348_v6 = vor.u32 %v1648_v0, %v1345_v1 }
  0x29   : > { %1744 = vmatpush.bf16.msra.mxu1 %v1687_v7  ;;  %1745 = vmatpush.bf16.msra.mxu2 %v1687_v7 }
  0x2a   : > { %1746 = vmatpush.bf16.msra.mxu3 %v1687_v7  ;;  %841 = vmatpush.bf16.msra.mxu0 %v1687_v7  ;;  %v1352_v7 = vor.u32 %v1651_v3, %v1351_v2  ;;  %v1448_v2 = vor.u32 %v1673_v60, %v1445_v61  ;;  %v1452_v3 = vor.u32 %v1676_v63, %v1451_v62 }
  0x2c   : > { %852 = vmatmul.bf16.vlgmr.msra.gmra.mxu1 %v1376_v18  ;;  %862 = vmatmul.bf16.vlgmr.msra.gmra.mxu2 %v1416_v19  ;;  %v1368_v18 = vor.u32 %v1653_v12, %v1365_v13  ;;  %v1372_v19 = vor.u32 %v1656_v15, %v1371_v14 }
  0x2d   : > { %932 = vmatpush.bf16.msrb.mxu2 %v1710_v16  ;;  %883 = vmatpush.bf16.msrb.mxu1 %v1702_v17  ;;  %v1360_v16 = vor.u32 %v1652_v8, %v1357_v9  ;;  %v1364_v17 = vor.u32 %v1655_v11, %v1363_v10  ;;  %v1678_v8 = vld [vmem:[%s1865_s7 + $0xfc] sm:$0xf]  ;;  %v1465_v9 = vld [vmem:[%s1865_s7 + $0x10c] sm:$0xf0]  ;;  %v1471_v10 = vld [vmem:[%s1865_s7 + $0x100] sm:$0xf] }
  0x2e   : > { %872 = vmatmul.bf16.vlgmr.msra.gmra.mxu3 %v1456_v20  ;;  %842 = vmatmul.bf16.vlgmr.msra.gmra.mxu0 %v1336_v21  ;;  %v1657_v20 = vld [vmem:[%s1865_s7 + $0x54] sm:$0xf]  ;;  %v1377_v21 = vld [vmem:[%s1865_s7 + $0x64] sm:$0xf0]  ;;  %v1468_v15 = vor.u32 %v1678_v8, %v1465_v9 }
  0x2f   : > { %981 = vmatpush.bf16.msrb.mxu3 %v1718_v22  ;;  %1034 = vmatpush.bf16.msrb.mxu0 %v1722_v23  ;;  %v1383_v22 = vld [vmem:[%s1865_s7 + $0x58] sm:$0xf]  ;;  %v1660_v23 = vld [vmem:[%s1865_s7 + $0x68] sm:$0xf0]  ;;  %v1681_v11 = vld [vmem:[%s1865_s7 + $0x110] sm:$0xf0] }
  0x31   : > { %933 = vmatpush.bf16.msrb.mxu2 %v1709_v24  ;;  %884 = vmatpush.bf16.msrb.mxu1 %v1701_v25  ;;  %v1658_v24 = vld [vmem:[%s1865_s7 + $0x5c] sm:$0xf]  ;;  %v1385_v25 = vld [vmem:[%s1865_s7 + $0x6c] sm:$0xf0] }
  0x33   : > { %982 = vmatpush.bf16.msrb.mxu3 %v1717_v26  ;;  %1035 = vmatpush.bf16.msrb.mxu0 %v1721_v27  ;;  %v1391_v26 = vld [vmem:[%s1865_s7 + $0x60] sm:$0xf]  ;;  %v1661_v27 = vld [vmem:[%s1865_s7 + $0x70] sm:$0xf0] }
  0x35   : > { %934 = vmatpush.bf16.msrb.mxu2 %v1708_v28  ;;  %885 = vmatpush.bf16.msrb.mxu1 %v1700_v29  ;;  %v1380_v28 = vor.u32 %v1657_v20, %v1377_v21  ;;  %v1384_v29 = vor.u32 %v1660_v23, %v1383_v22  ;;  %v1682_v22 = vld [vmem:[%s1865_s7 + $0x11c] sm:$0xf]  ;;  %v1477_v23 = vld [vmem:[%s1865_s7 + $0x12c] sm:$0xf0] }
  0x37   : > { %983 = vmatpush.bf16.msrb.mxu3 %v1716_v30  ;;  %1036 = vmatpush.bf16.msrb.mxu0 %v1720_v31  ;;  %v1388_v30 = vor.u32 %v1658_v24, %v1385_v25  ;;  %v1392_v31 = vor.u32 %v1661_v27, %v1391_v26  ;;  %v1483_v24 = vld [vmem:[%s1865_s7 + $0x120] sm:$0xf]  ;;  %v1685_v25 = vld [vmem:[%s1865_s7 + $0x130] sm:$0xf0]  ;;  %v1683_v26 = vld [vmem:[%s1865_s7 + $0x124] sm:$0xf] }
  0x38   : > { %v1485_v27 = vld [vmem:[%s1865_s7 + $0x134] sm:$0xf0] }
  0x39   : > { %935 = vmatpush.bf16.msrb.mxu2 %v1707_v32  ;;  %886 = vmatpush.bf16.msrb.mxu1 %v1699_v33  ;;  %v1662_v32 = vld [vmem:[%s1865_s7 + $0x7c] sm:$0xf]  ;;  %v1397_v33 = vld [vmem:[%s1865_s7 + $0x8c] sm:$0xf0] }
  0x3a   : > { %v1400_v40 = vor.u32 %v1662_v32, %v1397_v33  ;;  %v1480_v32 = vor.u32 %v1682_v22, %v1477_v23  ;;  %v1484_v33 = vor.u32 %v1685_v25, %v1483_v24 }
  0x3b   : > { %984 = vmatpush.bf16.msrb.mxu3 %v1715_v34  ;;  %1037 = vmatpush.bf16.msrb.mxu0 %v1719_v43  ;;  %v1403_v34 = vld [vmem:[%s1865_s7 + $0x80] sm:$0xf]  ;;  %v1412_v43 = vor.u32 %v1666_v39, %v1411_v38 }
  0x3c   : > { %857 = vmatmul.bf16.gmra.mxu1 %v1396_v46  ;;  %867 = vmatmul.bf16.gmra.mxu2 %v1436_v47  ;;  %v1404_v41 = vor.u32 %v1665_v35, %v1403_v34  ;;  %v1423_v46 = vld [vmem:[%s1865_s7 + $0xa8] sm:$0xf]  ;;  %v1670_v47 = vld [vmem:[%s1865_s7 + $0xb8] sm:$0xf0]  ;;  %v1488_v35 = vor.u32 %v1683_v26, %v1485_v27 }
  0x3d   : > { %936 = vmatpush.bf16.msrb.mxu2 %v1706_v44  ;;  %887 = vmatpush.bf16.msrb.mxu1 %v1698_v45  ;;  %v1667_v44 = vld [vmem:[%s1865_s7 + $0xa4] sm:$0xf]  ;;  %v1417_v45 = vld [vmem:[%s1865_s7 + $0xb4] sm:$0xf0] }
  0x3e   : > { %877 = vmatmul.bf16.gmra.mxu3 %v1476_v48  ;;  %847 = vmatmul.bf16.gmra.mxu0 %v1356_v49  ;;  %v1668_v48 = vld [vmem:[%s1865_s7 + $0xac] sm:$0xf]  ;;  %v1425_v49 = vld [vmem:[%s1865_s7 + $0xbc] sm:$0xf0] }
  0x3f   : > { %985 = vmatpush.bf16.msrb.mxu3 %v1714_v50  ;;  %v1431_v50 = vld [vmem:[%s1865_s7 + $0xb0] sm:$0xf] }
  0x41   : > { %937 = vmatpush.bf16.msrb.mxu2 %v1705_v51  ;;  %888 = vmatpush.bf16.msrb.mxu1 %v1697_v52  ;;  %v1671_v51 = vld [vmem:[%s1865_s7 + $0xc0] sm:$0xf0]  ;;  %v1420_v52 = vor.u32 %v1667_v44, %v1417_v45 }
  0x43   : > { %986 = vmatpush.bf16.msrb.mxu3 %v1713_v53  ;;  %v1424_v53 = vor.u32 %v1670_v47, %v1423_v46 }
  0x45   : > { %938 = vmatpush.bf16.msrb.mxu2 %v1704_v54  ;;  %889 = vmatpush.bf16.msrb.mxu1 %v1696_v55  ;;  %v1428_v54 = vor.u32 %v1668_v48, %v1425_v49  ;;  %v1432_v55 = vor.u32 %v1671_v51, %v1431_v50 }
  0x47   : > { %987 = vmatpush.bf16.msrb.mxu3 %v1712_v56  ;;  %v1672_v56 = vld [vmem:[%s1865_s7 + $0xcc] sm:$0xf] }
  0x49   : > { %939 = vmatpush.bf16.msrb.mxu2 %v1703_v57  ;;  %890 = vmatpush.bf16.msrb.mxu1 %v1695_v58  ;;  %v1437_v57 = vld [vmem:[%s1865_s7 + $0xdc] sm:$0xf0]  ;;  %v1443_v58 = vld [vmem:[%s1865_s7 + $0xd0] sm:$0xf] }
  0x4a   : > { %v1440_v0 = vor.u32 %v1672_v56, %v1437_v57 }
  0x4b   : > { %988 = vmatpush.bf16.msrb.mxu3 %v1711_v59  ;;  %v1675_v59 = vld [vmem:[%s1865_s7 + $0xe0] sm:$0xf0] }
  0x4c   : > { %891 = vmatmul.bf16.vlgmr.msrb.gmra.mxu1 %v1340_v4  ;;  %940 = vmatmul.bf16.vlgmr.msrb.gmra.mxu2 %v1344_v5  ;;  %v1444_v1 = vor.u32 %v1675_v59, %v1443_v58  ;;  %v1677_v4 = vld [vmem:[%s1865_s7 + $0xf4] sm:$0xf]  ;;  %v1457_v5 = vld [vmem:[%s1865_s7 + $0x104] sm:$0xf0] }
  0x4d   : > { %v1460_v12 = vor.u32 %v1677_v4, %v1457_v5 }
  0x4e   : > { %989 = vmatmul.bf16.vlgmr.msrb.gmra.mxu3 %v1348_v6  ;;  %1637 = vmatmul.msk.bf16.vlgmr.msrb.gmra.mxu0 %vm809_vm0, %v1352_v7  ;;  %v1463_v6 = vld [vmem:[%s1865_s7 + $0xf8] sm:$0xf]  ;;  %v1680_v7 = vld [vmem:[%s1865_s7 + $0x108] sm:$0xf0] }
  0x4f   : > { %v1464_v13 = vor.u32 %v1680_v7, %v1463_v6 }
  0x5c   : > { %896 = vmatmul.bf16.gmra.mxu1 %v1360_v16  ;;  %945 = vmatmul.bf16.gmra.mxu2 %v1364_v17  ;;  %v1472_v16 = vor.u32 %v1681_v11, %v1471_v10 }
  0x5e   : > { %994 = vmatmul.bf16.gmra.mxu3 %v1368_v18  ;;  %1638 = vmatmul.msk.bf16.gmra.mxu0 %vm809_vm0, %v1372_v19 }
  0x6c   : > { %901 = vmatmul.bf16.gmra.mxu1 %v1380_v28  ;;  %950 = vmatmul.bf16.gmra.mxu2 %v1384_v29  ;;  %v1491_v28 = vld [vmem:[%s1865_s7 + $0x128] sm:$0xf]  ;;  %v1686_v29 = vld [vmem:[%s1865_s7 + $0x138] sm:$0xf0] }
  0x6d   : > { %v1492_v36 = vor.u32 %v1686_v29, %v1491_v28 }
  0x6e   : > { %999 = vmatmul.bf16.gmra.mxu3 %v1388_v30  ;;  %1639 = vmatmul.msk.bf16.gmra.mxu0 %vm809_vm0, %v1392_v31 }
  0x7c   : > { %906 = vmatmul.bf16.gmra.mxu1 %v1400_v40  ;;  %955 = vmatmul.bf16.gmra.mxu2 %v1404_v41 }
  0x7e   : > { %1004 = vmatmul.bf16.gmra.mxu3 %v1408_v42  ;;  %1640 = vmatmul.msk.bf16.gmra.mxu0 %vm809_vm0, %v1412_v43 }
  0x8c   : > { %911 = vmatmul.bf16.gmra.mxu1 %v1420_v52  ;;  %960 = vmatmul.bf16.gmra.mxu2 %v1424_v53  ;;  %v2069_v52 = vld [vmem:[%s2132_s2] ss:$0 sm:$0xff] }
  0x8e   : > { %1009 = vmatmul.bf16.gmra.mxu3 %v1428_v54  ;;  %1641 = vmatmul.msk.bf16.gmra.mxu0 %vm809_vm0, %v1432_v55 }
  0x9c   : > { %916 = vmatmul.bf16.gmra.mxu1 %v1440_v0  ;;  %965 = vmatmul.bf16.gmra.mxu2 %v1444_v1 }
  0x9e   : > { %1014 = vmatmul.bf16.gmra.mxu3 %v1448_v2  ;;  %1642 = vmatmul.msk.bf16.gmra.mxu0 %vm809_vm0, %v1452_v3 }
  0xa9   : > { %v2032_v14 = vpop.f32.mrf.mxu1 }
  0xab   : > { %v843_v17 = vpop.f32.mrf.mxu0 }
  0xac   : > { %921 = vmatmul.bf16.gmra.mxu1 %v1460_v12  ;;  %970 = vmatmul.bf16.gmra.mxu2 %v1464_v13 }
  0xae   : > { %1019 = vmatmul.bf16.gmra.mxu3 %v1468_v15  ;;  %1643 = vmatmul.msk.bf16.gmra.mxu0 %vm809_vm0, %v1472_v16 }
  0xaf   : > { %v2035_v18 = vpop.f32.mrf.mxu2 }
  0xb1   : > { %v2037_v19 = vpop.f32.mrf.mxu3  ;;  %v2039_v20 = vpop.f32.mrf.mxu1 }
  0xb3   : > { %v845_v21 = vpop.f32.mrf.mxu0 }
  0xb7   : > { %v2049_v30 = vpop.f32.mrf.mxu2 }
  0xb9   : > { %v2051_v31 = vpop.f32.mrf.mxu3  ;;  %v2053_v34 = vpop.f32.mrf.mxu1 }
  0xbb   : > { %v848_v37 = vpop.f32.mrf.mxu0 }
  0xbc   : > { %926 = vmatmul.bf16.gmra.mxu1 %v1480_v32  ;;  %975 = vmatmul.bf16.gmra.mxu2 %v1484_v33 }
  0xbe   : > { %1024 = vmatmul.bf16.gmra.mxu3 %v1488_v35  ;;  %1644 = vmatmul.msk.bf16.gmra.mxu0 %vm809_vm0, %v1492_v36 }
  0xbf   : > { %v2056_v38 = vpop.f32.mrf.mxu2 }
  0xc1   : > { %v2058_v39 = vpop.f32.mrf.mxu3  ;;  %v2060_v40 = vpop.f32.mrf.mxu1 }
  0xc3   : > { %v850_v41 = vpop.f32.mrf.mxu0 }
  0xc7   : > { %v2062_v42 = vpop.f32.mrf.mxu2 }
  0xc9   : > { %v2064_v43 = vpop.f32.mrf.mxu3  ;;  %v892_v44 = vpop.f32.mrf.mxu1 }
  0xca   : > { %v893_v46 = vadd.f32 %v892_v44, %v843_v17 }
  0xcb   : > { %v1039_v45 = vpop.f32.mrf.mxu0 }
  0xcf   : > { %v941_v47 = vpop.f32.mrf.mxu2 }
  0xd0   : > { %v942_v48 = vadd.f32 %v941_v47, %v893_v46 }
  0xd1   : > { %v990_v49 = vpop.f32.mrf.mxu3  ;;  %v894_v50 = vpop.f32.mrf.mxu1 }
  0xd2   : > { %v991_v51 = vadd.f32 %v990_v49, %v942_v48  ;;  %v895_v56 = vadd.f32 %v894_v50, %v845_v21 }
  0xd3   : > { %v1041_v53 = vpop.f32.mrf.mxu0 }
  0xd4   : > { %v1040_v54 = vadd.f32 %v1039_v45, %v991_v51 }
  0xd6   : > { %v1174_v55 = vadd.f32 %v2069_v52, %v1040_v54 }
  0xd7   : > { %v943_v57 = vpop.f32.mrf.mxu2 }
  0xd8   : > { %v1190_v58 = vmax.f32 %v1174_v55, 0.0  ;;  %v944_v59 = vadd.f32 %v943_v57, %v895_v56 }
  0xd9   : > { %v992_v60 = vpop.f32.mrf.mxu3  ;;  %v897_v61 = vpop.f32.mrf.mxu1 }
  0xda   : > { %1206 = vst [vmem:[%s2076_s30] sm:$0xff] %v1190_v58  ;;  %v993_v62 = vadd.f32 %v992_v60, %v944_v59  ;;  %v898_v2 = vadd.f32 %v897_v61, %v848_v37 }
  0xdb   : > { %v1044_v63 = vpop.f32.mrf.mxu0 }
  0xdc   : > { %v1042_v0 = vadd.f32 %v1041_v53, %v993_v62 }
  0xde   : > { %v1175_v1 = vadd.f32 %v2069_v52, %v1042_v0 }
  0xdf   : > { %v946_v3 = vpop.f32.mrf.mxu2 }
  0xe0   : > { %v1191_v4 = vmax.f32 %v1175_v1, 0.0  ;;  %v947_v5 = vadd.f32 %v946_v3, %v898_v2 }
  0xe1   : > { %v995_v6 = vpop.f32.mrf.mxu3  ;;  %v899_v7 = vpop.f32.mrf.mxu1 }
  0xe2   : > { %1207 = vst [vmem:[%s2076_s30 + $0x8] sm:$0xff] %v1191_v4  ;;  %v996_v8 = vadd.f32 %v995_v6, %v947_v5  ;;  %v900_v12 = vadd.f32 %v899_v7, %v850_v41 }
  0xe3   : > { %v1046_v9 = vpop.f32.mrf.mxu0 }
  0xe4   : > { %v1045_v10 = vadd.f32 %v1044_v63, %v996_v8 }
  0xe6   : > { %v1176_v11 = vadd.f32 %v2069_v52, %v1045_v10 }
  0xe7   : > { %v948_v13 = vpop.f32.mrf.mxu2 }
  0xe8   : > { %v1192_v15 = vmax.f32 %v1176_v11, 0.0  ;;  %v949_v16 = vadd.f32 %v948_v13, %v900_v12 }
  0xe9   : > { %v997_v17 = vpop.f32.mrf.mxu3  ;;  %v902_v21 = vpop.f32.mrf.mxu1 }
  0xea   : > { %1208 = vst [vmem:[%s2076_s30 + $0x10] sm:$0xff] %v1192_v15  ;;  %v998_v22 = vadd.f32 %v997_v17, %v949_v16  ;;  %v903_v26 = vadd.f32 %v902_v21, %v2032_v14 }
  0xeb   : > { %v1049_v23 = vpop.f32.mrf.mxu0 }
  0xec   : > { %v1047_v24 = vadd.f32 %v1046_v9, %v998_v22 }
  0xee   : > { %v1177_v25 = vadd.f32 %v2069_v52, %v1047_v24 }
  0xef   : > { %v951_v27 = vpop.f32.mrf.mxu2 }
  0xf0   : > { %v1193_v28 = vmax.f32 %v1177_v25, 0.0  ;;  %v952_v29 = vadd.f32 %v951_v27, %v903_v26 }
  0xf1   : > { %v1000_v32 = vpop.f32.mrf.mxu3  ;;  %v904_v33 = vpop.f32.mrf.mxu1 }
  0xf2   : > { %1209 = vst [vmem:[%s2076_s30 + $0x18] sm:$0xff] %v1193_v28  ;;  %v1001_v35 = vadd.f32 %v1000_v32, %v952_v29  ;;  %v905_v44 = vadd.f32 %v904_v33, %v2039_v20 }
  0xf3   : > { %v1051_v36 = vpop.f32.mrf.mxu0 }
  0xf4   : > { %v1050_v37 = vadd.f32 %v1049_v23, %v1001_v35 }
  0xf6   : > { %v1178_v41 = vadd.f32 %v2069_v52, %v1050_v37 }
  0xf7   : > { %v953_v45 = vpop.f32.mrf.mxu2 }
  0xf8   : > { %v1194_v46 = vmax.f32 %v1178_v41, 0.0  ;;  %v954_v47 = vadd.f32 %v953_v45, %v905_v44 }
  0xf9   : > { %v1002_v48 = vpop.f32.mrf.mxu3  ;;  %v907_v14 = vpop.f32.mrf.mxu1 }
  0xfa   : > { %1210 = vst [vmem:[%s2076_s30 + $0x20] sm:$0xff] %v1194_v46  ;;  %v1003_v49 = vadd.f32 %v1002_v48, %v954_v47  ;;  %v908_v54 = vadd.f32 %v907_v14, %v2053_v34 }
  0xfb   : > { %v1054_v50 = vpop.f32.mrf.mxu0 }
  0xfc   : > { %v1052_v51 = vadd.f32 %v1051_v36, %v1003_v49 }
  0xfe   : > { %v1179_v53 = vadd.f32 %v2069_v52, %v1052_v51 }
  0xff   : > { %v956_v55 = vpop.f32.mrf.mxu2 }
 0x100   : > { %v1195_v56 = vmax.f32 %v1179_v53, 0.0  ;;  %v957_v57 = vadd.f32 %v956_v55, %v908_v54 }
 0x101   : > { %v1005_v58 = vpop.f32.mrf.mxu3  ;;  %v909_v20 = vpop.f32.mrf.mxu1 }
 0x102   : > { %1211 = vst [vmem:[%s2076_s30 + $0x28] sm:$0xff] %v1195_v56  ;;  %v1006_v59 = vadd.f32 %v1005_v58, %v957_v57  ;;  %v910_v63 = vadd.f32 %v909_v20, %v2060_v40 }
 0x103   : > { %v1056_v60 = vpop.f32.mrf.mxu0 }
 0x104   : > { %v1055_v61 = vadd.f32 %v1054_v50, %v1006_v59 }
 0x106   : > { %v1180_v62 = vadd.f32 %v2069_v52, %v1055_v61 }
 0x107   : > { %v958_v0 = vpop.f32.mrf.mxu2 }
 0x108   : > { %v1196_v1 = vmax.f32 %v1180_v62, 0.0  ;;  %v959_v2 = vadd.f32 %v958_v0, %v910_v63 }
 0x109   : > { %v1007_v3 = vpop.f32.mrf.mxu3  ;;  %v912_v34 = vpop.f32.mrf.mxu1 }
 0x10a   : > { %1212 = vst [vmem:[%s2076_s30 + $0x30] sm:$0xff] %v1196_v1  ;;  %v1008_v4 = vadd.f32 %v1007_v3, %v959_v2  ;;  %v913_v8 = vadd.f32 %v912_v34, %v2035_v18 }
 0x10b   : > { %v1059_v5 = vpop.f32.mrf.mxu0 }
 0x10c   : > { %v1057_v6 = vadd.f32 %v1056_v60, %v1008_v4 }
 0x10e   : > { %v1181_v7 = vadd.f32 %v2069_v52, %v1057_v6 }
 0x10f   : > { %v961_v9 = vpop.f32.mrf.mxu2 }
 0x110   : > { %v1197_v10 = vmax.f32 %v1181_v7, 0.0  ;;  %v962_v11 = vadd.f32 %v961_v9, %v913_v8 }
 0x111   : > { %v1010_v12 = vpop.f32.mrf.mxu3  ;;  %v914_v40 = vpop.f32.mrf.mxu1 }
 0x112   : > { %1213 = vst [vmem:[%s2076_s30 + $0x38] sm:$0xff] %v1197_v10  ;;  %v1011_v13 = vadd.f32 %v1010_v12, %v962_v11  ;;  %v915_v21 = vadd.f32 %v914_v40, %v2049_v30 }
 0x113   : > { %v1061_v15 = vpop.f32.mrf.mxu0 }
 0x114   : > { %v1060_v16 = vadd.f32 %v1059_v5, %v1011_v13 }
 0x116   : > { %v1182_v17 = vadd.f32 %v2069_v52, %v1060_v16 }
 0x117   : > { %v963_v22 = vpop.f32.mrf.mxu2 }
 0x118   : > { %v1198_v23 = vmax.f32 %v1182_v17, 0.0  ;;  %v964_v24 = vadd.f32 %v963_v22, %v915_v21 }
 0x119   : > { %v1012_v25 = vpop.f32.mrf.mxu3  ;;  %v917_v18 = vpop.f32.mrf.mxu1 }
 0x11a   : > { %1214 = vst [vmem:[%s2076_s30 + $0x40] sm:$0xff] %v1198_v23  ;;  %v1013_v26 = vadd.f32 %v1012_v25, %v964_v24  ;;  %v918_v32 = vadd.f32 %v917_v18, %v2056_v38 }
 0x11b   : > { %v1064_v27 = vpop.f32.mrf.mxu0 }
 0x11c   : > { %v1062_v28 = vadd.f32 %v1061_v15, %v1013_v26 }
 0x11e   : > { %v1183_v29 = vadd.f32 %v2069_v52, %v1062_v28 }
 0x11f   : > { %v966_v33 = vpop.f32.mrf.mxu2 }
 0x120   : > { %v1199_v35 = vmax.f32 %v1183_v29, 0.0  ;;  %v967_v36 = vadd.f32 %v966_v33, %v918_v32 }
 0x121   : > { %v1015_v37 = vpop.f32.mrf.mxu3  ;;  %v919_v30 = vpop.f32.mrf.mxu1 }
 0x122   : > { %1215 = vst [vmem:[%s2076_s30 + $0x48] sm:$0xff] %v1199_v35  ;;  %v1016_v41 = vadd.f32 %v1015_v37, %v967_v36  ;;  %v920_v47 = vadd.f32 %v919_v30, %v2062_v42 }
 0x123   : > { %v1066_v44 = vpop.f32.mrf.mxu0 }
 0x124   : > { %v1065_v45 = vadd.f32 %v1064_v27, %v1016_v41 }
 0x126   : > { %v1184_v46 = vadd.f32 %v2069_v52, %v1065_v45 }
 0x127   : > { %v968_v48 = vpop.f32.mrf.mxu2 }
 0x128   : > { %v1200_v14 = vmax.f32 %v1184_v46, 0.0  ;;  %v969_v49 = vadd.f32 %v968_v48, %v920_v47 }
 0x129   : > { %v1017_v50 = vpop.f32.mrf.mxu3  ;;  %v922_v38 = vpop.f32.mrf.mxu1 }
 0x12a   : > { %1216 = vst [vmem:[%s2076_s30 + $0x50] sm:$0xff] %v1200_v14  ;;  %v1018_v51 = vadd.f32 %v1017_v50, %v969_v49  ;;  %v923_v56 = vadd.f32 %v922_v38, %v2037_v19 }
 0x12b   : > { %v1069_v54 = vpop.f32.mrf.mxu0 }
 0x12c   : > { %v1067_v53 = vadd.f32 %v1066_v44, %v1018_v51 }
 0x12e   : > { %v1185_v55 = vadd.f32 %v2069_v52, %v1067_v53 }
 0x12f   : > { %v971_v57 = vpop.f32.mrf.mxu2 }
 0x130   : > { %v1201_v58 = vmax.f32 %v1185_v55, 0.0  ;;  %v972_v20 = vadd.f32 %v971_v57, %v923_v56 }
 0x131   : > { %v1020_v59 = vpop.f32.mrf.mxu3  ;;  %v924_v42 = vpop.f32.mrf.mxu1 }
 0x132   : > { %1217 = vst [vmem:[%s2076_s30 + $0x58] sm:$0xff] %v1201_v58  ;;  %v1021_v60 = vadd.f32 %v1020_v59, %v972_v20  ;;  %v925_v63 = vadd.f32 %v924_v42, %v2051_v31 }
 0x133   : > { %v1071_v0 = vpop.f32.mrf.mxu0 }
 0x134   : > { %v1070_v61 = vadd.f32 %v1069_v54, %v1021_v60 }
 0x136   : > { %v1186_v62 = vadd.f32 %v2069_v52, %v1070_v61 }
 0x137   : > { %v973_v1 = vpop.f32.mrf.mxu2 }
 0x138   : > { %v1202_v2 = vmax.f32 %v1186_v62, 0.0  ;;  %v974_v3 = vadd.f32 %v973_v1, %v925_v63 }
 0x139   : > { %v1022_v34 = vpop.f32.mrf.mxu3  ;;  %v927_v19 = vpop.f32.mrf.mxu1 }
 0x13a   : > { %1218 = vst [vmem:[%s2076_s30 + $0x60] sm:$0xff] %v1202_v2  ;;  %v1023_v4 = vadd.f32 %v1022_v34, %v974_v3  ;;  %v928_v7 = vadd.f32 %v927_v19, %v2058_v39 }
 0x13b   : > { %v1074_v31 = vpop.f32.mrf.mxu0 }
 0x13c   : > { %v1072_v5 = vadd.f32 %v1071_v0, %v1023_v4 }
 0x13e   : > { %v1187_v6 = vadd.f32 %v2069_v52, %v1072_v5 }
 0x13f   : > { %v976_v8 = vpop.f32.mrf.mxu2 }
 0x140   : > { %v1203_v9 = vmax.f32 %v1187_v6, 0.0  ;;  %v977_v10 = vadd.f32 %v976_v8, %v928_v7 }
 0x141   : > { %v1025_v11 = vpop.f32.mrf.mxu3  ;;  %v929_v40 = vpop.f32.mrf.mxu1 }
 0x142   : > { %1219 = vst [vmem:[%s2076_s30 + $0x68] sm:$0xff] %v1203_v9  ;;  %v1026_v12 = vadd.f32 %v1025_v11, %v977_v10  ;;  %v930_v16 = vadd.f32 %v929_v40, %v2064_v43 }
 0x143   : > { %v1076_v24 = vpop.f32.mrf.mxu0 }
 0x144   : > { %v1075_v13 = vadd.f32 %v1074_v31, %v1026_v12 }
 0x146   : > { %v1188_v15 = vadd.f32 %v2069_v52, %v1075_v13 }
 0x147   : > { %v978_v17 = vpop.f32.mrf.mxu2 }
 0x148   : > { %v1204_v21 = vmax.f32 %v1188_v15, 0.0  ;;  %v979_v22 = vadd.f32 %v978_v17, %v930_v16 }
 0x149   : > { %v1027_v23 = vpop.f32.mrf.mxu3 }
 0x14a   : > { %1220 = vst [vmem:[%s2076_s30 + $0x70] sm:$0xff] %v1204_v21  ;;  %v1028_v39 = vadd.f32 %v1027_v23, %v979_v22 }
 0x14c   : > { %v1077_v25 = vadd.f32 %v1076_v24, %v1028_v39 }
 0x14e   : > { %v1189_v18 = vadd.f32 %v2069_v52, %v1077_v25 }
 0x150   : > { %v1205_v26 = vmax.f32 %v1189_v18, 0.0 }
 0x152   : > { %1221 = vst [vmem:[%s2076_s30 + $0x78] sm:$0xff] %v1205_v26 }
 0x153 PF: > { %s13_s14 = sadd.s32 1, %s1795_s14   ;;  %s2134_s12 = smov %s1791_s13 }
 0x154   : > { %p10_p5 = scmp.ge.s32.totalorder %s13_s14, 6   ;;  %s2135_s13 = smov %s2137_s15 }
 0x156   :  { %12 = sbr.rel (!%p10_p5) target bundleno = 2 (0x2), region = 77 }

// kernel: forward_pallas.32
= control target key start
LH: loop header
LB: loop body
LE: loop exit
PB: predicated region body
PF: predicated region fallthrough
CT: control target
= control target key end

     0   :  { %s1931_s15 = smov 0   ;;  %s1933_s16 = smov 0   ;;  %s2265_s0 = inlined_call_operand.vmem [shape: bf16[512,576], index: 0, kind: input, shape index: {}]   ;;  %s2266_s1 = inlined_call_operand.vmem [shape: bf16[1,576,128], index: 1, kind: input, shape index: {}]   ;;  %s2267_s2 = inlined_call_operand.vmem [shape: f32[1,128], index: 2, kind: input, shape index: {}]   ;;  %s2268_s3 = inlined_call_operand.vmem [shape: f32[512,128], index: 3, kind: input, shape index: {}]   ;;  %s2269_s4 = inlined_call_operand.vmem [shape: f32[512,128], index: 4, kind: output, shape index: {}]  }
   0x1   :  { %s1935_s17 = smov 0  }
   0x2 LB: > { %s29_s18 = sadd.s32 1, %s1900_s16  ;;  %p1435_p0 = scmp.ge.s32.totalorder %s1904_s17, 1  ;;  %s1904_s17 = sphi %s1935_s17, %s14_s17   ;;  %s1900_s16 = sphi %s1933_s16, %s2271_s16   ;;  %s1896_s15 = sphi %s1931_s15, %s2270_s15  }
   0x3   : > { %p31_p1 = scmp.ge.s32.totalorder %s29_s18, 4  ;;  %p238_p2 = scmp.lt.s32.totalorder %s1904_s17, 5 }
   0x5   : > { %s2273_s18 = smov (%p31_p1, %s29_s18), 0  ;;  %p239_p3 = pnand %p1435_p0, %p238_p2 }
   0x6   : > { %s1436_s25 = sshll.u32 (!%p239_p3), %s1896_s15, 4 }
   0x7   : > { %242 = sbr.rel (%p239_p3) target bundleno = 341 (0x155), region = 36  ;;  %p293_p4 = scmp.lt.s32.totalorder (!%p239_p3), %s1436_s25, 63 }
   0xc   : > { %v1803_v0 = vld [vmem:[%s2266_s1 + $0x38] sm:$0xff]  ;;  %v1802_v1 = vld [vmem:[%s2266_s1 + $0x30] sm:$0xff]  ;;  %v1801_v2 = vld [vmem:[%s2266_s1 + $0x28] sm:$0xff]  ;;  %s2275_s25 = smov (!%p293_p4, %s1436_s25), 63  ;;  %vm872_vm0 = vcmask 523264  }
   0xd   : > { %1832 = vmatpush.bf16.msra.mxu1 %v1803_v0  ;;  %1833 = vmatpush.bf16.msra.mxu2 %v1803_v0  ;;  %v1800_v3 = vld [vmem:[%s2266_s1 + $0x20] sm:$0xff]  ;;  %v1799_v4 = vld [vmem:[%s2266_s1 + $0x18] sm:$0xff]  ;;  %v1798_v5 = vld [vmem:[%s2266_s1 + $0x10] sm:$0xff]  ;;  %s1856_s6 = smul.u32 20, %s2275_s25 }
   0xe   : > { %1834 = vmatpush.bf16.msra.mxu3 %v1803_v0  ;;  %897 = vmatpush.bf16.msra.mxu0 %v1803_v0  ;;  %v1797_v6 = vld [vmem:[%s2266_s1 + $0x8] sm:$0xff]  ;;  %v1796_v7 = vld [vmem:[%s2266_s1] sm:$0xff]  ;;  %v1819_v16 = vld [vmem:[%s2266_s1 + $0xb8] sm:$0xff] }
   0xf   : > { %s1979_s11 = scalar_lea.vmem %s2265_s0, %s1856_s6  ;;  %v1811_v17 = vld [vmem:[%s2266_s1 + $0x78] sm:$0xff]  ;;  %v1818_v24 = vld [vmem:[%s2266_s1 + $0xb0] sm:$0xff]  ;;  %v1817_v28 = vld [vmem:[%s2266_s1 + $0xa8] sm:$0xff] }
  0x10   : > { %v1484_v8 = vld [vmem:[%s1979_s11 + $0x50] sm:$0xf]  ;;  %v1768_v9 = vld [vmem:[%s1979_s11 + $0x60] sm:$0xf0]  ;;  %v1524_v10 = vld [vmem:[%s1979_s11 + $0xa0] sm:$0xf] }
  0x11   : > { %1835 = vmatpush.bf16.msra.mxu1 %v1802_v1  ;;  %1836 = vmatpush.bf16.msra.mxu2 %v1802_v1  ;;  %v1778_v11 = vld [vmem:[%s1979_s11 + $0xb0] sm:$0xf0]  ;;  %v1564_v12 = vld [vmem:[%s1979_s11 + $0xf0] sm:$0xf]  ;;  %v1788_v13 = vld [vmem:[%s1979_s11 + $0x100] sm:$0xf0]  ;;  %v1485_v18 = vor.u32 %v1768_v9, %v1484_v8 }
  0x12   : > { %1837 = vmatpush.bf16.msra.mxu3 %v1802_v1  ;;  %898 = vmatpush.bf16.msra.mxu0 %v1802_v1  ;;  %v1444_v14 = vld [vmem:[%s1979_s11] sm:$0xf]  ;;  %v1758_v15 = vld [vmem:[%s1979_s11 + $0x10] sm:$0xf0]  ;;  %v1525_v19 = vor.u32 %v1778_v11, %v1524_v10  ;;  %v1565_v20 = vor.u32 %v1788_v13, %v1564_v12  ;;  %v1827_v22 = vld [vmem:[%s2266_s1 + $0xf8] sm:$0xff] }
  0x13   : > { %v1445_v21 = vor.u32 %v1758_v15, %v1444_v14  ;;  %v1831_v23 = vld [vmem:[%s2266_s1 + $0x118] sm:$0xff]  ;;  %v1810_v25 = vld [vmem:[%s2266_s1 + $0x70] sm:$0xff]  ;;  %v1809_v29 = vld [vmem:[%s2266_s1 + $0x68] sm:$0xff] }
  0x14   : > { %v1826_v26 = vld [vmem:[%s2266_s1 + $0xf0] sm:$0xff]  ;;  %v1825_v30 = vld [vmem:[%s2266_s1 + $0xe8] sm:$0xff]  ;;  %v1816_v32 = vld [vmem:[%s2266_s1 + $0xa0] sm:$0xff] }
  0x15   : > { %1838 = vmatpush.bf16.msra.mxu1 %v1801_v2  ;;  %1839 = vmatpush.bf16.msra.mxu2 %v1801_v2  ;;  %v1830_v27 = vld [vmem:[%s2266_s1 + $0x110] sm:$0xff]  ;;  %v1829_v31 = vld [vmem:[%s2266_s1 + $0x108] sm:$0xff]  ;;  %v1808_v33 = vld [vmem:[%s2266_s1 + $0x60] sm:$0xff] }
  0x16   : > { %1840 = vmatpush.bf16.msra.mxu3 %v1801_v2  ;;  %899 = vmatpush.bf16.msra.mxu0 %v1801_v2  ;;  %v1824_v34 = vld [vmem:[%s2266_s1 + $0xe0] sm:$0xff]  ;;  %v1504_v35 = vld [vmem:[%s1979_s11 + $0x78] sm:$0xf]  ;;  %v1773_v36 = vld [vmem:[%s1979_s11 + $0x88] sm:$0xf0] }
  0x17   : > { %v1544_v37 = vld [vmem:[%s1979_s11 + $0xc8] sm:$0xf]  ;;  %v1783_v38 = vld [vmem:[%s1979_s11 + $0xd8] sm:$0xf0]  ;;  %v1584_v39 = vld [vmem:[%s1979_s11 + $0x118] sm:$0xf]  ;;  %v1505_v46 = vor.u32 %v1773_v36, %v1504_v35 }
  0x18   : > { %v1793_v40 = vld [vmem:[%s1979_s11 + $0x128] sm:$0xf0]  ;;  %v1464_v41 = vld [vmem:[%s1979_s11 + $0x28] sm:$0xf]  ;;  %v1763_v42 = vld [vmem:[%s1979_s11 + $0x38] sm:$0xf0]  ;;  %v1545_v47 = vor.u32 %v1783_v38, %v1544_v37 }
  0x19   : > { %1841 = vmatpush.bf16.msra.mxu1 %v1800_v3  ;;  %1842 = vmatpush.bf16.msra.mxu2 %v1800_v3  ;;  %v1828_v43 = vld [vmem:[%s2266_s1 + $0x100] sm:$0xff]  ;;  %v1815_v44 = vld [vmem:[%s2266_s1 + $0x98] sm:$0xff]  ;;  %v1585_v48 = vor.u32 %v1793_v40, %v1584_v39  ;;  %v1465_v49 = vor.u32 %v1763_v42, %v1464_v41  ;;  %v1814_v51 = vld [vmem:[%s2266_s1 + $0x90] sm:$0xff] }
  0x1a   : > { %1843 = vmatpush.bf16.msra.mxu3 %v1800_v3  ;;  %900 = vmatpush.bf16.msra.mxu0 %v1800_v3  ;;  %v1807_v45 = vld [vmem:[%s2266_s1 + $0x58] sm:$0xff]  ;;  %v1806_v52 = vld [vmem:[%s2266_s1 + $0x50] sm:$0xff]  ;;  %v1813_v54 = vld [vmem:[%s2266_s1 + $0x88] sm:$0xff] }
  0x1b   : > { %v1823_v50 = vld [vmem:[%s2266_s1 + $0xd8] sm:$0xff]  ;;  %v1822_v53 = vld [vmem:[%s2266_s1 + $0xd0] sm:$0xff]  ;;  %v1805_v55 = vld [vmem:[%s2266_s1 + $0x48] sm:$0xff] }
  0x1c   : > { %v1821_v56 = vld [vmem:[%s2266_s1 + $0xc8] sm:$0xff]  ;;  %v1812_v57 = vld [vmem:[%s2266_s1 + $0x80] sm:$0xff]  ;;  %v1446_v61 = vld [vmem:[%s1979_s11 + $0x14] sm:$0xf0] }
  0x1d   : > { %1844 = vmatpush.bf16.msra.mxu1 %v1799_v4  ;;  %1845 = vmatpush.bf16.msra.mxu2 %v1799_v4  ;;  %v1804_v58 = vld [vmem:[%s2266_s1 + $0x40] sm:$0xff]  ;;  %v1452_v62 = vld [vmem:[%s1979_s11 + $0x8] sm:$0xf]  ;;  %v1759_v63 = vld [vmem:[%s1979_s11 + $0x18] sm:$0xf0] }
  0x1e   : > { %1846 = vmatpush.bf16.msra.mxu3 %v1799_v4  ;;  %901 = vmatpush.bf16.msra.mxu0 %v1799_v4  ;;  %v1820_v59 = vld [vmem:[%s2266_s1 + $0xc0] sm:$0xff]  ;;  %v1757_v0 = vld [vmem:[%s1979_s11 + $0xc] sm:$0xf]  ;;  %v1460_v2 = vld [vmem:[%s1979_s11 + $0x10] sm:$0xf] }
  0x1f   : > { %v1756_v60 = vld [vmem:[%s1979_s11 + $0x4] sm:$0xf]  ;;  %v1454_v1 = vld [vmem:[%s1979_s11 + $0x1c] sm:$0xf0]  ;;  %v1761_v8 = vld [vmem:[%s1979_s11 + $0x2c] sm:$0xf] }
  0x20   : > { %v1760_v3 = vld [vmem:[%s1979_s11 + $0x20] sm:$0xf0]  ;;  %v1449_v4 = vor.u32 %v1756_v60, %v1446_v61  ;;  %v1466_v9 = vld [vmem:[%s1979_s11 + $0x3c] sm:$0xf0]  ;;  %v1472_v10 = vld [vmem:[%s1979_s11 + $0x30] sm:$0xf] }
  0x21   : > { %1847 = vmatpush.bf16.msra.mxu1 %v1798_v5  ;;  %1848 = vmatpush.bf16.msra.mxu2 %v1798_v5  ;;  %v1764_v11 = vld [vmem:[%s1979_s11 + $0x40] sm:$0xf0]  ;;  %v1762_v12 = vld [vmem:[%s1979_s11 + $0x34] sm:$0xf]  ;;  %v1474_v13 = vld [vmem:[%s1979_s11 + $0x44] sm:$0xf0] }
  0x22   : > { %1849 = vmatpush.bf16.msra.mxu3 %v1798_v5  ;;  %902 = vmatpush.bf16.msra.mxu0 %v1798_v5  ;;  %v1453_v5 = vor.u32 %v1759_v63, %v1452_v62  ;;  %v1480_v14 = vld [vmem:[%s1979_s11 + $0x38] sm:$0xf]  ;;  %v1765_v15 = vld [vmem:[%s1979_s11 + $0x48] sm:$0xf0]  ;;  %v1774_v35 = vld [vmem:[%s1979_s11 + $0x90] sm:$0xf0] }
  0x23   : > { %v1772_v36 = vld [vmem:[%s1979_s11 + $0x84] sm:$0xf]  ;;  %v1514_v37 = vld [vmem:[%s1979_s11 + $0x94] sm:$0xf0]  ;;  %v1520_v38 = vld [vmem:[%s1979_s11 + $0x88] sm:$0xf] }
  0x24   : > { %v1775_v39 = vld [vmem:[%s1979_s11 + $0x98] sm:$0xf0]  ;;  %v1517_v42 = vor.u32 %v1772_v36, %v1514_v37  ;;  %v1782_v60 = vld [vmem:[%s1979_s11 + $0xd4] sm:$0xf]  ;;  %v1554_v61 = vld [vmem:[%s1979_s11 + $0xe4] sm:$0xf0] }
  0x25   : > { %1850 = vmatpush.bf16.msra.mxu1 %v1797_v6  ;;  %1851 = vmatpush.bf16.msra.mxu2 %v1797_v6  ;;  %v1560_v62 = vld [vmem:[%s1979_s11 + $0xd8] sm:$0xf]  ;;  %v1785_v63 = vld [vmem:[%s1979_s11 + $0xe8] sm:$0xf0] }
  0x26   : > { %1852 = vmatpush.bf16.msra.mxu3 %v1797_v6  ;;  %903 = vmatpush.bf16.msra.mxu0 %v1797_v6  ;;  %v1457_v6 = vor.u32 %v1757_v0, %v1454_v1 }
  0x29   : > { %1853 = vmatpush.bf16.msra.mxu1 %v1796_v7  ;;  %1854 = vmatpush.bf16.msra.mxu2 %v1796_v7 }
  0x2a   : > { %1855 = vmatpush.bf16.msra.mxu3 %v1796_v7  ;;  %904 = vmatpush.bf16.msra.mxu0 %v1796_v7  ;;  %v1461_v7 = vor.u32 %v1760_v3, %v1460_v2  ;;  %v1557_v2 = vor.u32 %v1782_v60, %v1554_v61  ;;  %v1561_v3 = vor.u32 %v1785_v63, %v1560_v62 }
  0x2c   : > { %915 = vmatmul.bf16.vlgmr.msra.gmra.mxu1 %v1485_v18  ;;  %925 = vmatmul.bf16.vlgmr.msra.gmra.mxu2 %v1525_v19  ;;  %v1477_v18 = vor.u32 %v1762_v12, %v1474_v13  ;;  %v1481_v19 = vor.u32 %v1765_v15, %v1480_v14 }
  0x2d   : > { %995 = vmatpush.bf16.msrb.mxu2 %v1819_v16  ;;  %946 = vmatpush.bf16.msrb.mxu1 %v1811_v17  ;;  %v1469_v16 = vor.u32 %v1761_v8, %v1466_v9  ;;  %v1473_v17 = vor.u32 %v1764_v11, %v1472_v10  ;;  %v1787_v8 = vld [vmem:[%s1979_s11 + $0xfc] sm:$0xf]  ;;  %v1574_v9 = vld [vmem:[%s1979_s11 + $0x10c] sm:$0xf0]  ;;  %v1580_v10 = vld [vmem:[%s1979_s11 + $0x100] sm:$0xf] }
  0x2e   : > { %935 = vmatmul.bf16.vlgmr.msra.gmra.mxu3 %v1565_v20  ;;  %905 = vmatmul.bf16.vlgmr.msra.gmra.mxu0 %v1445_v21  ;;  %v1766_v20 = vld [vmem:[%s1979_s11 + $0x54] sm:$0xf]  ;;  %v1486_v21 = vld [vmem:[%s1979_s11 + $0x64] sm:$0xf0]  ;;  %v1577_v15 = vor.u32 %v1787_v8, %v1574_v9 }
  0x2f   : > { %1044 = vmatpush.bf16.msrb.mxu3 %v1827_v22  ;;  %1097 = vmatpush.bf16.msrb.mxu0 %v1831_v23  ;;  %v1492_v22 = vld [vmem:[%s1979_s11 + $0x58] sm:$0xf]  ;;  %v1769_v23 = vld [vmem:[%s1979_s11 + $0x68] sm:$0xf0]  ;;  %v1790_v11 = vld [vmem:[%s1979_s11 + $0x110] sm:$0xf0] }
  0x31   : > { %996 = vmatpush.bf16.msrb.mxu2 %v1818_v24  ;;  %947 = vmatpush.bf16.msrb.mxu1 %v1810_v25  ;;  %v1767_v24 = vld [vmem:[%s1979_s11 + $0x5c] sm:$0xf]  ;;  %v1494_v25 = vld [vmem:[%s1979_s11 + $0x6c] sm:$0xf0] }
  0x33   : > { %1045 = vmatpush.bf16.msrb.mxu3 %v1826_v26  ;;  %1098 = vmatpush.bf16.msrb.mxu0 %v1830_v27  ;;  %v1500_v26 = vld [vmem:[%s1979_s11 + $0x60] sm:$0xf]  ;;  %v1770_v27 = vld [vmem:[%s1979_s11 + $0x70] sm:$0xf0] }
  0x35   : > { %997 = vmatpush.bf16.msrb.mxu2 %v1817_v28  ;;  %948 = vmatpush.bf16.msrb.mxu1 %v1809_v29  ;;  %v1489_v28 = vor.u32 %v1766_v20, %v1486_v21  ;;  %v1493_v29 = vor.u32 %v1769_v23, %v1492_v22  ;;  %v1791_v22 = vld [vmem:[%s1979_s11 + $0x11c] sm:$0xf]  ;;  %v1586_v23 = vld [vmem:[%s1979_s11 + $0x12c] sm:$0xf0] }
  0x37   : > { %1046 = vmatpush.bf16.msrb.mxu3 %v1825_v30  ;;  %1099 = vmatpush.bf16.msrb.mxu0 %v1829_v31  ;;  %v1497_v30 = vor.u32 %v1767_v24, %v1494_v25  ;;  %v1501_v31 = vor.u32 %v1770_v27, %v1500_v26  ;;  %v1592_v24 = vld [vmem:[%s1979_s11 + $0x120] sm:$0xf]  ;;  %v1794_v25 = vld [vmem:[%s1979_s11 + $0x130] sm:$0xf0]  ;;  %v1792_v26 = vld [vmem:[%s1979_s11 + $0x124] sm:$0xf] }
  0x38   : > { %v1594_v27 = vld [vmem:[%s1979_s11 + $0x134] sm:$0xf0] }
  0x39   : > { %998 = vmatpush.bf16.msrb.mxu2 %v1816_v32  ;;  %949 = vmatpush.bf16.msrb.mxu1 %v1808_v33  ;;  %v1771_v32 = vld [vmem:[%s1979_s11 + $0x7c] sm:$0xf]  ;;  %v1506_v33 = vld [vmem:[%s1979_s11 + $0x8c] sm:$0xf0] }
  0x3a   : > { %v1509_v40 = vor.u32 %v1771_v32, %v1506_v33  ;;  %v1589_v32 = vor.u32 %v1791_v22, %v1586_v23  ;;  %v1593_v33 = vor.u32 %v1794_v25, %v1592_v24 }
  0x3b   : > { %1047 = vmatpush.bf16.msrb.mxu3 %v1824_v34  ;;  %1100 = vmatpush.bf16.msrb.mxu0 %v1828_v43  ;;  %v1512_v34 = vld [vmem:[%s1979_s11 + $0x80] sm:$0xf]  ;;  %v1521_v43 = vor.u32 %v1775_v39, %v1520_v38 }
  0x3c   : > { %920 = vmatmul.bf16.gmra.mxu1 %v1505_v46  ;;  %930 = vmatmul.bf16.gmra.mxu2 %v1545_v47  ;;  %v1513_v41 = vor.u32 %v1774_v35, %v1512_v34  ;;  %v1532_v46 = vld [vmem:[%s1979_s11 + $0xa8] sm:$0xf]  ;;  %v1779_v47 = vld [vmem:[%s1979_s11 + $0xb8] sm:$0xf0]  ;;  %v1597_v35 = vor.u32 %v1792_v26, %v1594_v27 }
  0x3d   : > { %999 = vmatpush.bf16.msrb.mxu2 %v1815_v44  ;;  %950 = vmatpush.bf16.msrb.mxu1 %v1807_v45  ;;  %v1776_v44 = vld [vmem:[%s1979_s11 + $0xa4] sm:$0xf]  ;;  %v1526_v45 = vld [vmem:[%s1979_s11 + $0xb4] sm:$0xf0] }
  0x3e   : > { %940 = vmatmul.bf16.gmra.mxu3 %v1585_v48  ;;  %910 = vmatmul.bf16.gmra.mxu0 %v1465_v49  ;;  %v1777_v48 = vld [vmem:[%s1979_s11 + $0xac] sm:$0xf]  ;;  %v1534_v49 = vld [vmem:[%s1979_s11 + $0xbc] sm:$0xf0] }
  0x3f   : > { %1048 = vmatpush.bf16.msrb.mxu3 %v1823_v50  ;;  %v1540_v50 = vld [vmem:[%s1979_s11 + $0xb0] sm:$0xf] }
  0x41   : > { %1000 = vmatpush.bf16.msrb.mxu2 %v1814_v51  ;;  %951 = vmatpush.bf16.msrb.mxu1 %v1806_v52  ;;  %v1780_v51 = vld [vmem:[%s1979_s11 + $0xc0] sm:$0xf0]  ;;  %v1529_v52 = vor.u32 %v1776_v44, %v1526_v45 }
  0x43   : > { %1049 = vmatpush.bf16.msrb.mxu3 %v1822_v53  ;;  %v1533_v53 = vor.u32 %v1779_v47, %v1532_v46 }
  0x45   : > { %1001 = vmatpush.bf16.msrb.mxu2 %v1813_v54  ;;  %952 = vmatpush.bf16.msrb.mxu1 %v1805_v55  ;;  %v1537_v54 = vor.u32 %v1777_v48, %v1534_v49  ;;  %v1541_v55 = vor.u32 %v1780_v51, %v1540_v50 }
  0x47   : > { %1050 = vmatpush.bf16.msrb.mxu3 %v1821_v56  ;;  %v1781_v56 = vld [vmem:[%s1979_s11 + $0xcc] sm:$0xf] }
  0x49   : > { %1002 = vmatpush.bf16.msrb.mxu2 %v1812_v57  ;;  %953 = vmatpush.bf16.msrb.mxu1 %v1804_v58  ;;  %v1546_v57 = vld [vmem:[%s1979_s11 + $0xdc] sm:$0xf0]  ;;  %v1552_v58 = vld [vmem:[%s1979_s11 + $0xd0] sm:$0xf] }
  0x4a   : > { %v1549_v0 = vor.u32 %v1781_v56, %v1546_v57 }
  0x4b   : > { %1051 = vmatpush.bf16.msrb.mxu3 %v1820_v59  ;;  %v1784_v59 = vld [vmem:[%s1979_s11 + $0xe0] sm:$0xf0] }
  0x4c   : > { %954 = vmatmul.bf16.vlgmr.msrb.gmra.mxu1 %v1449_v4  ;;  %1003 = vmatmul.bf16.vlgmr.msrb.gmra.mxu2 %v1453_v5  ;;  %v1553_v1 = vor.u32 %v1784_v59, %v1552_v58  ;;  %v1786_v4 = vld [vmem:[%s1979_s11 + $0xf4] sm:$0xf]  ;;  %v1566_v5 = vld [vmem:[%s1979_s11 + $0x104] sm:$0xf0] }
  0x4d   : > { %v1569_v12 = vor.u32 %v1786_v4, %v1566_v5 }
  0x4e   : > { %1052 = vmatmul.bf16.vlgmr.msrb.gmra.mxu3 %v1457_v6  ;;  %1746 = vmatmul.msk.bf16.vlgmr.msrb.gmra.mxu0 %vm872_vm0, %v1461_v7  ;;  %v1572_v6 = vld [vmem:[%s1979_s11 + $0xf8] sm:$0xf]  ;;  %v1789_v7 = vld [vmem:[%s1979_s11 + $0x108] sm:$0xf0] }
  0x4f   : > { %v1573_v13 = vor.u32 %v1789_v7, %v1572_v6 }
  0x5c   : > { %959 = vmatmul.bf16.gmra.mxu1 %v1469_v16  ;;  %1008 = vmatmul.bf16.gmra.mxu2 %v1473_v17  ;;  %v1581_v16 = vor.u32 %v1790_v11, %v1580_v10 }
  0x5e   : > { %1057 = vmatmul.bf16.gmra.mxu3 %v1477_v18  ;;  %1747 = vmatmul.msk.bf16.gmra.mxu0 %vm872_vm0, %v1481_v19 }
  0x6c   : > { %964 = vmatmul.bf16.gmra.mxu1 %v1489_v28  ;;  %1013 = vmatmul.bf16.gmra.mxu2 %v1493_v29  ;;  %v1600_v28 = vld [vmem:[%s1979_s11 + $0x128] sm:$0xf]  ;;  %v1795_v29 = vld [vmem:[%s1979_s11 + $0x138] sm:$0xf0]  ;;  %s1439_s11 = sshll.u32 %s2275_s25, 3 }
  0x6d   : > { %v1601_v36 = vor.u32 %v1795_v29, %v1600_v28  ;;  %s2184_s8 = scalar_lea.vmem %s2268_s3, %s1439_s11  ;;  %s2196_s13 = scalar_lea.vmem %s2269_s4, %s1439_s11 }
  0x6e   : > { %1062 = vmatmul.bf16.gmra.mxu3 %v1497_v30  ;;  %1748 = vmatmul.msk.bf16.gmra.mxu0 %vm872_vm0, %v1501_v31 }
  0x7c   : > { %969 = vmatmul.bf16.gmra.mxu1 %v1509_v40  ;;  %1018 = vmatmul.bf16.gmra.mxu2 %v1513_v41 }
  0x7e   : > { %1067 = vmatmul.bf16.gmra.mxu3 %v1517_v42  ;;  %1749 = vmatmul.msk.bf16.gmra.mxu0 %vm872_vm0, %v1521_v43 }
  0x8c   : > { %974 = vmatmul.bf16.gmra.mxu1 %v1529_v52  ;;  %1023 = vmatmul.bf16.gmra.mxu2 %v1533_v53  ;;  %v2189_v52 = vld [vmem:[%s2267_s2] ss:$0 sm:$0xff] }
  0x8e   : > { %1072 = vmatmul.bf16.gmra.mxu3 %v1537_v54  ;;  %1750 = vmatmul.msk.bf16.gmra.mxu0 %vm872_vm0, %v1541_v55  ;;  %v1253_v55 = vld [vmem:[%s2184_s8] sm:$0xff] }
  0x9c   : > { %979 = vmatmul.bf16.gmra.mxu1 %v1549_v0  ;;  %1028 = vmatmul.bf16.gmra.mxu2 %v1553_v1 }
  0x9e   : > { %1077 = vmatmul.bf16.gmra.mxu3 %v1557_v2  ;;  %1751 = vmatmul.msk.bf16.gmra.mxu0 %vm872_vm0, %v1561_v3  ;;  %v1254_v3 = vld [vmem:[%s2184_s8 + $0x8] sm:$0xff] }
  0xa9   : > { %v2146_v14 = vpop.f32.mrf.mxu1 }
  0xab   : > { %v906_v17 = vpop.f32.mrf.mxu0 }
  0xac   : > { %984 = vmatmul.bf16.gmra.mxu1 %v1569_v12  ;;  %1033 = vmatmul.bf16.gmra.mxu2 %v1573_v13 }
  0xae   : > { %1082 = vmatmul.bf16.gmra.mxu3 %v1577_v15  ;;  %1752 = vmatmul.msk.bf16.gmra.mxu0 %vm872_vm0, %v1581_v16  ;;  %v1255_v16 = vld [vmem:[%s2184_s8 + $0x10] sm:$0xff] }
  0xaf   : > { %v2149_v18 = vpop.f32.mrf.mxu2 }
  0xb1   : > { %v2151_v19 = vpop.f32.mrf.mxu3  ;;  %v2153_v20 = vpop.f32.mrf.mxu1 }
  0xb3   : > { %v908_v21 = vpop.f32.mrf.mxu0 }
  0xb7   : > { %v2163_v30 = vpop.f32.mrf.mxu2 }
  0xb9   : > { %v2165_v31 = vpop.f32.mrf.mxu3  ;;  %v2167_v34 = vpop.f32.mrf.mxu1 }
  0xbb   : > { %v911_v37 = vpop.f32.mrf.mxu0 }
  0xbc   : > { %989 = vmatmul.bf16.gmra.mxu1 %v1589_v32  ;;  %1038 = vmatmul.bf16.gmra.mxu2 %v1593_v33  ;;  %v1256_v33 = vld [vmem:[%s2184_s8 + $0x18] sm:$0xff] }
  0xbe   : > { %1087 = vmatmul.bf16.gmra.mxu3 %v1597_v35  ;;  %1753 = vmatmul.msk.bf16.gmra.mxu0 %vm872_vm0, %v1601_v36 }
  0xbf   : > { %v2170_v38 = vpop.f32.mrf.mxu2 }
  0xc1   : > { %v2172_v39 = vpop.f32.mrf.mxu3  ;;  %v2174_v40 = vpop.f32.mrf.mxu1 }
  0xc3   : > { %v913_v41 = vpop.f32.mrf.mxu0 }
  0xc7   : > { %v2176_v42 = vpop.f32.mrf.mxu2 }
  0xc9   : > { %v2178_v43 = vpop.f32.mrf.mxu3  ;;  %v955_v44 = vpop.f32.mrf.mxu1 }
  0xca   : > { %v956_v46 = vadd.f32 %v955_v44, %v906_v17 }
  0xcb   : > { %v1102_v45 = vpop.f32.mrf.mxu0 }
  0xcf   : > { %v1004_v47 = vpop.f32.mrf.mxu2 }
  0xd0   : > { %v1005_v48 = vadd.f32 %v1004_v47, %v956_v46 }
  0xd1   : > { %v1053_v49 = vpop.f32.mrf.mxu3  ;;  %v957_v50 = vpop.f32.mrf.mxu1 }
  0xd2   : > { %v1054_v51 = vadd.f32 %v1053_v49, %v1005_v48  ;;  %v958_v57 = vadd.f32 %v957_v50, %v908_v21 }
  0xd3   : > { %v1104_v53 = vpop.f32.mrf.mxu0 }
  0xd4   : > { %v1103_v54 = vadd.f32 %v1102_v45, %v1054_v51  ;;  %v1257_v51 = vld [vmem:[%s2184_s8 + $0x20] sm:$0xff] }
  0xd6   : > { %v1237_v56 = vadd.f32 %v2189_v52, %v1103_v54 }
  0xd7   : > { %v1006_v58 = vpop.f32.mrf.mxu2 }
  0xd8   : > { %v1269_v59 = vadd.f32 %v1253_v55, %v1237_v56  ;;  %v1007_v60 = vadd.f32 %v1006_v58, %v958_v57 }
  0xd9   : > { %v1055_v61 = vpop.f32.mrf.mxu3  ;;  %v960_v62 = vpop.f32.mrf.mxu1 }
  0xda   : > { %v1285_v63 = vmax.f32 %v1269_v59, 0.0  ;;  %v1056_v0 = vadd.f32 %v1055_v61, %v1007_v60  ;;  %v961_v5 = vadd.f32 %v960_v62, %v911_v37 }
  0xdb   : > { %v1107_v1 = vpop.f32.mrf.mxu0 }
  0xdc   : > { %1301 = vst [vmem:[%s2196_s13] sm:$0xff] %v1285_v63  ;;  %v1105_v2 = vadd.f32 %v1104_v53, %v1056_v0  ;;  %v1258_v63 = vld [vmem:[%s2184_s8 + $0x28] sm:$0xff] }
  0xde   : > { %v1238_v4 = vadd.f32 %v2189_v52, %v1105_v2 }
  0xdf   : > { %v1009_v6 = vpop.f32.mrf.mxu2 }
  0xe0   : > { %v1270_v7 = vadd.f32 %v1254_v3, %v1238_v4  ;;  %v1010_v8 = vadd.f32 %v1009_v6, %v961_v5 }
  0xe1   : > { %v1058_v9 = vpop.f32.mrf.mxu3  ;;  %v962_v10 = vpop.f32.mrf.mxu1 }
  0xe2   : > { %v1286_v11 = vmax.f32 %v1270_v7, 0.0  ;;  %v1059_v12 = vadd.f32 %v1058_v9, %v1010_v8  ;;  %v963_v21 = vadd.f32 %v962_v10, %v913_v41  ;;  %v1259_v10 = vld [vmem:[%s2184_s8 + $0x30] sm:$0xff] }
  0xe3   : > { %v1109_v13 = vpop.f32.mrf.mxu0 }
  0xe4   : > { %1302 = vst [vmem:[%s2196_s13 + $0x8] sm:$0xff] %v1286_v11  ;;  %v1108_v15 = vadd.f32 %v1107_v1, %v1059_v12 }
  0xe6   : > { %v1239_v17 = vadd.f32 %v2189_v52, %v1108_v15 }
  0xe7   : > { %v1011_v22 = vpop.f32.mrf.mxu2 }
  0xe8   : > { %v1271_v23 = vadd.f32 %v1255_v16, %v1239_v17  ;;  %v1012_v24 = vadd.f32 %v1011_v22, %v963_v21 }
  0xe9   : > { %v1060_v25 = vpop.f32.mrf.mxu3  ;;  %v965_v26 = vpop.f32.mrf.mxu1 }
  0xea   : > { %v1287_v27 = vmax.f32 %v1271_v23, 0.0  ;;  %v1061_v28 = vadd.f32 %v1060_v25, %v1012_v24  ;;  %v966_v36 = vadd.f32 %v965_v26, %v2146_v14  ;;  %v1260_v25 = vld [vmem:[%s2184_s8 + $0x38] sm:$0xff] }
  0xeb   : > { %v1112_v29 = vpop.f32.mrf.mxu0 }
  0xec   : > { %1303 = vst [vmem:[%s2196_s13 + $0x10] sm:$0xff] %v1287_v27  ;;  %v1110_v32 = vadd.f32 %v1109_v13, %v1061_v28 }
  0xee   : > { %v1240_v35 = vadd.f32 %v2189_v52, %v1110_v32 }
  0xef   : > { %v1014_v37 = vpop.f32.mrf.mxu2 }
  0xf0   : > { %v1272_v44 = vadd.f32 %v1256_v33, %v1240_v35  ;;  %v1015_v41 = vadd.f32 %v1014_v37, %v966_v36 }
  0xf1   : > { %v1063_v45 = vpop.f32.mrf.mxu3  ;;  %v967_v46 = vpop.f32.mrf.mxu1 }
  0xf2   : > { %v1288_v47 = vmax.f32 %v1272_v44, 0.0  ;;  %v1064_v48 = vadd.f32 %v1063_v45, %v1015_v41  ;;  %v968_v54 = vadd.f32 %v967_v46, %v2153_v20  ;;  %v1261_v41 = vld [vmem:[%s2184_s8 + $0x40] sm:$0xff] }
  0xf3   : > { %v1114_v49 = vpop.f32.mrf.mxu0 }
  0xf4   : > { %1304 = vst [vmem:[%s2196_s13 + $0x18] sm:$0xff] %v1288_v47  ;;  %v1113_v50 = vadd.f32 %v1112_v29, %v1064_v48 }
  0xf6   : > { %v1241_v53 = vadd.f32 %v2189_v52, %v1113_v50 }
  0xf7   : > { %v1016_v55 = vpop.f32.mrf.mxu2 }
  0xf8   : > { %v1273_v56 = vadd.f32 %v1257_v51, %v1241_v53  ;;  %v1017_v14 = vadd.f32 %v1016_v55, %v968_v54 }
  0xf9   : > { %v1065_v57 = vpop.f32.mrf.mxu3  ;;  %v970_v58 = vpop.f32.mrf.mxu1 }
  0xfa   : > { %v1289_v59 = vmax.f32 %v1273_v56, 0.0  ;;  %v1066_v60 = vadd.f32 %v1065_v57, %v1017_v14  ;;  %v971_v1 = vadd.f32 %v970_v58, %v2167_v34  ;;  %v1262_v56 = vld [vmem:[%s2184_s8 + $0x48] sm:$0xff] }
  0xfb   : > { %v1117_v61 = vpop.f32.mrf.mxu0 }
  0xfc   : > { %1305 = vst [vmem:[%s2196_s13 + $0x20] sm:$0xff] %v1289_v59  ;;  %v1115_v62 = vadd.f32 %v1114_v49, %v1066_v60 }
  0xfe   : > { %v1242_v0 = vadd.f32 %v2189_v52, %v1115_v62 }
  0xff   : > { %v1019_v2 = vpop.f32.mrf.mxu2 }
 0x100   : > { %v1274_v3 = vadd.f32 %v1258_v63, %v1242_v0  ;;  %v1020_v20 = vadd.f32 %v1019_v2, %v971_v1  ;;  %v1263_v2 = vld [vmem:[%s2184_s8 + $0x50] sm:$0xff] }
 0x101   : > { %v1068_v4 = vpop.f32.mrf.mxu3  ;;  %v972_v5 = vpop.f32.mrf.mxu1 }
 0x102   : > { %v1290_v6 = vmax.f32 %v1274_v3, 0.0  ;;  %v1069_v7 = vadd.f32 %v1068_v4, %v1020_v20  ;;  %v973_v12 = vadd.f32 %v972_v5, %v2174_v40 }
 0x103   : > { %v1119_v8 = vpop.f32.mrf.mxu0 }
 0x104   : > { %1306 = vst [vmem:[%s2196_s13 + $0x28] sm:$0xff] %v1290_v6  ;;  %v1118_v9 = vadd.f32 %v1117_v61, %v1069_v7 }
 0x106   : > { %v1243_v11 = vadd.f32 %v2189_v52, %v1118_v9 }
 0x107   : > { %v1021_v13 = vpop.f32.mrf.mxu2 }
 0x108   : > { %v1275_v15 = vadd.f32 %v1259_v10, %v1243_v11  ;;  %v1022_v34 = vadd.f32 %v1021_v13, %v973_v12  ;;  %v1264_v11 = vld [vmem:[%s2184_s8 + $0x58] sm:$0xff] }
 0x109   : > { %v1070_v16 = vpop.f32.mrf.mxu3  ;;  %v975_v17 = vpop.f32.mrf.mxu1 }
 0x10a   : > { %v1291_v21 = vmax.f32 %v1275_v15, 0.0  ;;  %v1071_v22 = vadd.f32 %v1070_v16, %v1022_v34  ;;  %v976_v27 = vadd.f32 %v975_v17, %v2149_v18 }
 0x10b   : > { %v1122_v23 = vpop.f32.mrf.mxu0 }
 0x10c   : > { %1307 = vst [vmem:[%s2196_s13 + $0x30] sm:$0xff] %v1291_v21  ;;  %v1120_v24 = vadd.f32 %v1119_v8, %v1071_v22 }
 0x10e   : > { %v1244_v26 = vadd.f32 %v2189_v52, %v1120_v24 }
 0x10f   : > { %v1024_v28 = vpop.f32.mrf.mxu2 }
 0x110   : > { %v1276_v29 = vadd.f32 %v1260_v25, %v1244_v26  ;;  %v1025_v40 = vadd.f32 %v1024_v28, %v976_v27  ;;  %v1265_v25 = vld [vmem:[%s2184_s8 + $0x60] sm:$0xff] }
 0x111   : > { %v1073_v32 = vpop.f32.mrf.mxu3  ;;  %v977_v33 = vpop.f32.mrf.mxu1 }
 0x112   : > { %v1292_v35 = vmax.f32 %v1276_v29, 0.0  ;;  %v1074_v36 = vadd.f32 %v1073_v32, %v1025_v40  ;;  %v978_v46 = vadd.f32 %v977_v33, %v2163_v30 }
 0x113   : > { %v1124_v37 = vpop.f32.mrf.mxu0 }
 0x114   : > { %1308 = vst [vmem:[%s2196_s13 + $0x38] sm:$0xff] %v1292_v35  ;;  %v1123_v44 = vadd.f32 %v1122_v23, %v1074_v36 }
 0x116   : > { %v1245_v45 = vadd.f32 %v2189_v52, %v1123_v44  ;;  %v1266_v44 = vld [vmem:[%s2184_s8 + $0x68] sm:$0xff] }
 0x117   : > { %v1026_v47 = vpop.f32.mrf.mxu2 }
 0x118   : > { %v1277_v48 = vadd.f32 %v1261_v41, %v1245_v45  ;;  %v1027_v18 = vadd.f32 %v1026_v47, %v978_v46 }
 0x119   : > { %v1075_v49 = vpop.f32.mrf.mxu3  ;;  %v980_v50 = vpop.f32.mrf.mxu1 }
 0x11a   : > { %v1293_v51 = vmax.f32 %v1277_v48, 0.0  ;;  %v1076_v53 = vadd.f32 %v1075_v49, %v1027_v18  ;;  %v981_v57 = vadd.f32 %v980_v50, %v2170_v38 }
 0x11b   : > { %v1127_v54 = vpop.f32.mrf.mxu0 }
 0x11c   : > { %1309 = vst [vmem:[%s2196_s13 + $0x40] sm:$0xff] %v1293_v51  ;;  %v1125_v55 = vadd.f32 %v1124_v37, %v1076_v53 }
 0x11e   : > { %v1246_v14 = vadd.f32 %v2189_v52, %v1125_v55 }
 0x11f   : > { %v1029_v58 = vpop.f32.mrf.mxu2 }
 0x120   : > { %v1278_v59 = vadd.f32 %v1262_v56, %v1246_v14  ;;  %v1030_v30 = vadd.f32 %v1029_v58, %v981_v57 }
 0x121   : > { %v1078_v60 = vpop.f32.mrf.mxu3  ;;  %v982_v61 = vpop.f32.mrf.mxu1 }
 0x122   : > { %v1294_v62 = vmax.f32 %v1278_v59, 0.0  ;;  %v1079_v63 = vadd.f32 %v1078_v60, %v1030_v30  ;;  %v983_v20 = vadd.f32 %v982_v61, %v2176_v42 }
 0x123   : > { %v1129_v0 = vpop.f32.mrf.mxu0 }
 0x124   : > { %1310 = vst [vmem:[%s2196_s13 + $0x48] sm:$0xff] %v1294_v62  ;;  %v1128_v1 = vadd.f32 %v1127_v54, %v1079_v63  ;;  %v1267_v54 = vld [vmem:[%s2184_s8 + $0x70] sm:$0xff]  ;;  %v1268_v62 = vld [vmem:[%s2184_s8 + $0x78] sm:$0xff] }
 0x126   : > { %v1247_v3 = vadd.f32 %v2189_v52, %v1128_v1 }
 0x127   : > { %v1031_v4 = vpop.f32.mrf.mxu2 }
 0x128   : > { %v1279_v5 = vadd.f32 %v1263_v2, %v1247_v3  ;;  %v1032_v38 = vadd.f32 %v1031_v4, %v983_v20 }
 0x129   : > { %v1080_v6 = vpop.f32.mrf.mxu3  ;;  %v985_v7 = vpop.f32.mrf.mxu1 }
 0x12a   : > { %v1295_v8 = vmax.f32 %v1279_v5, 0.0  ;;  %v1081_v9 = vadd.f32 %v1080_v6, %v1032_v38  ;;  %v986_v15 = vadd.f32 %v985_v7, %v2151_v19 }
 0x12b   : > { %v1132_v12 = vpop.f32.mrf.mxu0 }
 0x12c   : > { %1311 = vst [vmem:[%s2196_s13 + $0x50] sm:$0xff] %v1295_v8  ;;  %v1130_v10 = vadd.f32 %v1129_v0, %v1081_v9 }
 0x12e   : > { %v1248_v13 = vadd.f32 %v2189_v52, %v1130_v10 }
 0x12f   : > { %v1034_v34 = vpop.f32.mrf.mxu2 }
 0x130   : > { %v1280_v16 = vadd.f32 %v1264_v11, %v1248_v13  ;;  %v1035_v42 = vadd.f32 %v1034_v34, %v986_v15 }
 0x131   : > { %v1083_v17 = vpop.f32.mrf.mxu3  ;;  %v987_v21 = vpop.f32.mrf.mxu1 }
 0x132   : > { %v1296_v22 = vmax.f32 %v1280_v16, 0.0  ;;  %v1084_v23 = vadd.f32 %v1083_v17, %v1035_v42  ;;  %v988_v27 = vadd.f32 %v987_v21, %v2165_v31 }
 0x133   : > { %v1134_v28 = vpop.f32.mrf.mxu0 }
 0x134   : > { %1312 = vst [vmem:[%s2196_s13 + $0x58] sm:$0xff] %v1296_v22  ;;  %v1133_v24 = vadd.f32 %v1132_v12, %v1084_v23 }
 0x136   : > { %v1249_v26 = vadd.f32 %v2189_v52, %v1133_v24 }
 0x137   : > { %v1036_v29 = vpop.f32.mrf.mxu2 }
 0x138   : > { %v1281_v40 = vadd.f32 %v1265_v25, %v1249_v26  ;;  %v1037_v19 = vadd.f32 %v1036_v29, %v988_v27 }
 0x139   : > { %v1085_v32 = vpop.f32.mrf.mxu3  ;;  %v990_v33 = vpop.f32.mrf.mxu1 }
 0x13a   : > { %v1297_v35 = vmax.f32 %v1281_v40, 0.0  ;;  %v1086_v36 = vadd.f32 %v1085_v32, %v1037_v19  ;;  %v991_v45 = vadd.f32 %v990_v33, %v2172_v39 }
 0x13b   : > { %v1137_v18 = vpop.f32.mrf.mxu0 }
 0x13c   : > { %1313 = vst [vmem:[%s2196_s13 + $0x60] sm:$0xff] %v1297_v35  ;;  %v1135_v37 = vadd.f32 %v1134_v28, %v1086_v36 }
 0x13e   : > { %v1250_v41 = vadd.f32 %v2189_v52, %v1135_v37 }
 0x13f   : > { %v1039_v46 = vpop.f32.mrf.mxu2 }
 0x140   : > { %v1282_v47 = vadd.f32 %v1266_v44, %v1250_v41  ;;  %v1040_v31 = vadd.f32 %v1039_v46, %v991_v45 }
 0x141   : > { %v1088_v48 = vpop.f32.mrf.mxu3  ;;  %v992_v51 = vpop.f32.mrf.mxu1 }
 0x142   : > { %v1298_v49 = vmax.f32 %v1282_v47, 0.0  ;;  %v1089_v50 = vadd.f32 %v1088_v48, %v1040_v31  ;;  %v993_v56 = vadd.f32 %v992_v51, %v2178_v43 }
 0x143   : > { %v1139_v60 = vpop.f32.mrf.mxu0 }
 0x144   : > { %1314 = vst [vmem:[%s2196_s13 + $0x68] sm:$0xff] %v1298_v49  ;;  %v1138_v53 = vadd.f32 %v1137_v18, %v1089_v50 }
 0x146   : > { %v1251_v55 = vadd.f32 %v2189_v52, %v1138_v53 }
 0x147   : > { %v1041_v14 = vpop.f32.mrf.mxu2 }
 0x148   : > { %v1283_v39 = vadd.f32 %v1267_v54, %v1251_v55  ;;  %v1042_v57 = vadd.f32 %v1041_v14, %v993_v56 }
 0x149   : > { %v1090_v58 = vpop.f32.mrf.mxu3 }
 0x14a   : > { %v1299_v59 = vmax.f32 %v1283_v39, 0.0  ;;  %v1091_v30 = vadd.f32 %v1090_v58, %v1042_v57 }
 0x14c   : > { %1315 = vst [vmem:[%s2196_s13 + $0x70] sm:$0xff] %v1299_v59  ;;  %v1140_v61 = vadd.f32 %v1139_v60, %v1091_v30 }
 0x14e   : > { %v1252_v63 = vadd.f32 %v2189_v52, %v1140_v61 }
 0x150   : > { %v1284_v0 = vadd.f32 %v1268_v62, %v1252_v63 }
 0x152   : > { %v1300_v1 = vmax.f32 %v1284_v0, 0.0 }
 0x154   : > { %1316 = vst [vmem:[%s2196_s13 + $0x78] sm:$0xff] %v1300_v1 }
 0x155 PF: > { %s14_s17 = sadd.s32 1, %s1904_s17   ;;  %s2270_s15 = smov %s1900_s16 }
 0x156   : > { %p11_p5 = scmp.ge.s32.totalorder %s14_s17, 6   ;;  %s2271_s16 = smov %s2273_s18 }
 0x158   :  { %13 = sbr.rel (!%p11_p5) target bundleno = 2 (0x2), region = 84 }

// kernel: forward_pallas.35
= control target key start
LH: loop header
LB: loop body
LE: loop exit
PB: predicated region body
PF: predicated region fallthrough
CT: control target
= control target key end

     0   :  { %s1945_s12 = smov 0   ;;  %s1947_s13 = smov 0   ;;  %s2258_s0 = inlined_call_operand.vmem [shape: bf16[512,576], index: 0, kind: input, shape index: {}]   ;;  %s2259_s1 = inlined_call_operand.vmem [shape: bf16[1,576,128], index: 1, kind: input, shape index: {}]   ;;  %s2260_s2 = inlined_call_operand.vmem [shape: f32[1,128], index: 2, kind: input, shape index: {}]   ;;  %s2261_s3 = inlined_call_operand.vmem [shape: f32[512,128], index: 3, kind: output, shape index: {}]  }
   0x1   :  { %s1949_s14 = smov 0  }
   0x2 LB: > { %s28_s15 = sadd.s32 1, %s1919_s13  ;;  %p1392_p0 = scmp.ge.s32.totalorder %s1923_s14, 1  ;;  %s1923_s14 = sphi %s1949_s14, %s13_s14   ;;  %s1919_s13 = sphi %s1947_s13, %s2263_s13   ;;  %s1915_s12 = sphi %s1945_s12, %s2262_s12  }
   0x3   : > { %p30_p1 = scmp.ge.s32.totalorder %s28_s15, 4  ;;  %p194_p2 = scmp.lt.s32.totalorder %s1923_s14, 5 }
   0x5   : > { %s2265_s15 = smov (%p30_p1, %s28_s15), 0  ;;  %p195_p3 = pnand %p1392_p0, %p194_p2 }
   0x6   : > { %s1393_s22 = sshll.u32 (!%p195_p3), %s1915_s12, 4 }
   0x7   : > { %198 = sbr.rel (%p195_p3) target bundleno = 357 (0x165), region = 32  ;;  %p240_p4 = scmp.lt.s32.totalorder (!%p195_p3), %s1393_s22, 63 }
   0xc   : > { %v1758_v0 = vld [vmem:[%s2259_s1 + $0x38] sm:$0xff]  ;;  %v1757_v1 = vld [vmem:[%s2259_s1 + $0x30] sm:$0xff]  ;;  %v1756_v2 = vld [vmem:[%s2259_s1 + $0x28] sm:$0xff]  ;;  %s2267_s22 = smov (!%p240_p4, %s1393_s22), 63  ;;  %vm809_vm0 = vcmask 523264  }
   0xd   : > { %1787 = vmatpush.bf16.msra.mxu1 %v1758_v0  ;;  %1788 = vmatpush.bf16.msra.mxu2 %v1758_v0  ;;  %v1755_v3 = vld [vmem:[%s2259_s1 + $0x20] sm:$0xff]  ;;  %v1754_v4 = vld [vmem:[%s2259_s1 + $0x18] sm:$0xff]  ;;  %v1753_v5 = vld [vmem:[%s2259_s1 + $0x10] sm:$0xff]  ;;  %s1811_s29 = smul.u32 20, %s2267_s22  ;;  %s1396_s27 = sshll.u32 %s2267_s22, 3 }
   0xe   : > { %1789 = vmatpush.bf16.msra.mxu3 %v1758_v0  ;;  %834 = vmatpush.bf16.msra.mxu0 %v1758_v0  ;;  %v1752_v6 = vld [vmem:[%s2259_s1 + $0x8] sm:$0xff]  ;;  %v1751_v7 = vld [vmem:[%s2259_s1] sm:$0xff]  ;;  %v1774_v16 = vld [vmem:[%s2259_s1 + $0xb8] sm:$0xff]  ;;  %s2206_s30 = scalar_lea.vmem %s2261_s3, %s1396_s27 }
   0xf   : > { %s1993_s7 = scalar_lea.vmem %s2258_s0, %s1811_s29  ;;  %v1766_v17 = vld [vmem:[%s2259_s1 + $0x78] sm:$0xff]  ;;  %v1773_v24 = vld [vmem:[%s2259_s1 + $0xb0] sm:$0xff]  ;;  %v1772_v28 = vld [vmem:[%s2259_s1 + $0xa8] sm:$0xff] }
  0x10   : > { %v1439_v8 = vld [vmem:[%s1993_s7 + $0x50] sm:$0xf]  ;;  %v1723_v9 = vld [vmem:[%s1993_s7 + $0x60] sm:$0xf0]  ;;  %v1479_v10 = vld [vmem:[%s1993_s7 + $0xa0] sm:$0xf] }
  0x11   : > { %1790 = vmatpush.bf16.msra.mxu1 %v1757_v1  ;;  %1791 = vmatpush.bf16.msra.mxu2 %v1757_v1  ;;  %v1733_v11 = vld [vmem:[%s1993_s7 + $0xb0] sm:$0xf0]  ;;  %v1519_v12 = vld [vmem:[%s1993_s7 + $0xf0] sm:$0xf]  ;;  %v1743_v13 = vld [vmem:[%s1993_s7 + $0x100] sm:$0xf0]  ;;  %v1440_v18 = vor.u32 %v1723_v9, %v1439_v8 }
  0x12   : > { %1792 = vmatpush.bf16.msra.mxu3 %v1757_v1  ;;  %835 = vmatpush.bf16.msra.mxu0 %v1757_v1  ;;  %v1399_v14 = vld [vmem:[%s1993_s7] sm:$0xf]  ;;  %v1713_v15 = vld [vmem:[%s1993_s7 + $0x10] sm:$0xf0]  ;;  %v1480_v19 = vor.u32 %v1733_v11, %v1479_v10  ;;  %v1520_v20 = vor.u32 %v1743_v13, %v1519_v12  ;;  %v1782_v22 = vld [vmem:[%s2259_s1 + $0xf8] sm:$0xff] }
  0x13   : > { %v1400_v21 = vor.u32 %v1713_v15, %v1399_v14  ;;  %v1786_v23 = vld [vmem:[%s2259_s1 + $0x118] sm:$0xff]  ;;  %v1765_v25 = vld [vmem:[%s2259_s1 + $0x70] sm:$0xff]  ;;  %v1764_v29 = vld [vmem:[%s2259_s1 + $0x68] sm:$0xff] }
  0x14   : > { %v1781_v26 = vld [vmem:[%s2259_s1 + $0xf0] sm:$0xff]  ;;  %v1780_v30 = vld [vmem:[%s2259_s1 + $0xe8] sm:$0xff]  ;;  %v1771_v32 = vld [vmem:[%s2259_s1 + $0xa0] sm:$0xff] }
  0x15   : > { %1793 = vmatpush.bf16.msra.mxu1 %v1756_v2  ;;  %1794 = vmatpush.bf16.msra.mxu2 %v1756_v2  ;;  %v1785_v27 = vld [vmem:[%s2259_s1 + $0x110] sm:$0xff]  ;;  %v1784_v31 = vld [vmem:[%s2259_s1 + $0x108] sm:$0xff]  ;;  %v1763_v33 = vld [vmem:[%s2259_s1 + $0x60] sm:$0xff] }
  0x16   : > { %1795 = vmatpush.bf16.msra.mxu3 %v1756_v2  ;;  %836 = vmatpush.bf16.msra.mxu0 %v1756_v2  ;;  %v1779_v34 = vld [vmem:[%s2259_s1 + $0xe0] sm:$0xff]  ;;  %v1459_v35 = vld [vmem:[%s1993_s7 + $0x78] sm:$0xf]  ;;  %v1728_v36 = vld [vmem:[%s1993_s7 + $0x88] sm:$0xf0] }
  0x17   : > { %v1499_v37 = vld [vmem:[%s1993_s7 + $0xc8] sm:$0xf]  ;;  %v1738_v38 = vld [vmem:[%s1993_s7 + $0xd8] sm:$0xf0]  ;;  %v1539_v39 = vld [vmem:[%s1993_s7 + $0x118] sm:$0xf]  ;;  %v1460_v46 = vor.u32 %v1728_v36, %v1459_v35 }
  0x18   : > { %v1748_v40 = vld [vmem:[%s1993_s7 + $0x128] sm:$0xf0]  ;;  %v1419_v41 = vld [vmem:[%s1993_s7 + $0x28] sm:$0xf]  ;;  %v1718_v42 = vld [vmem:[%s1993_s7 + $0x38] sm:$0xf0]  ;;  %v1500_v47 = vor.u32 %v1738_v38, %v1499_v37 }
  0x19   : > { %1796 = vmatpush.bf16.msra.mxu1 %v1755_v3  ;;  %1797 = vmatpush.bf16.msra.mxu2 %v1755_v3  ;;  %v1783_v43 = vld [vmem:[%s2259_s1 + $0x100] sm:$0xff]  ;;  %v1770_v44 = vld [vmem:[%s2259_s1 + $0x98] sm:$0xff]  ;;  %v1540_v48 = vor.u32 %v1748_v40, %v1539_v39  ;;  %v1420_v49 = vor.u32 %v1718_v42, %v1419_v41  ;;  %v1769_v51 = vld [vmem:[%s2259_s1 + $0x90] sm:$0xff] }
  0x1a   : > { %1798 = vmatpush.bf16.msra.mxu3 %v1755_v3  ;;  %837 = vmatpush.bf16.msra.mxu0 %v1755_v3  ;;  %v1762_v45 = vld [vmem:[%s2259_s1 + $0x58] sm:$0xff]  ;;  %v1761_v52 = vld [vmem:[%s2259_s1 + $0x50] sm:$0xff]  ;;  %v1768_v54 = vld [vmem:[%s2259_s1 + $0x88] sm:$0xff] }
  0x1b   : > { %v1778_v50 = vld [vmem:[%s2259_s1 + $0xd8] sm:$0xff]  ;;  %v1777_v53 = vld [vmem:[%s2259_s1 + $0xd0] sm:$0xff]  ;;  %v1760_v55 = vld [vmem:[%s2259_s1 + $0x48] sm:$0xff] }
  0x1c   : > { %v1776_v56 = vld [vmem:[%s2259_s1 + $0xc8] sm:$0xff]  ;;  %v1767_v57 = vld [vmem:[%s2259_s1 + $0x80] sm:$0xff]  ;;  %v1401_v61 = vld [vmem:[%s1993_s7 + $0x14] sm:$0xf0] }
  0x1d   : > { %1799 = vmatpush.bf16.msra.mxu1 %v1754_v4  ;;  %1800 = vmatpush.bf16.msra.mxu2 %v1754_v4  ;;  %v1759_v58 = vld [vmem:[%s2259_s1 + $0x40] sm:$0xff]  ;;  %v1407_v62 = vld [vmem:[%s1993_s7 + $0x8] sm:$0xf]  ;;  %v1714_v63 = vld [vmem:[%s1993_s7 + $0x18] sm:$0xf0] }
  0x1e   : > { %1801 = vmatpush.bf16.msra.mxu3 %v1754_v4  ;;  %838 = vmatpush.bf16.msra.mxu0 %v1754_v4  ;;  %v1775_v59 = vld [vmem:[%s2259_s1 + $0xc0] sm:$0xff]  ;;  %v1712_v0 = vld [vmem:[%s1993_s7 + $0xc] sm:$0xf]  ;;  %v1415_v2 = vld [vmem:[%s1993_s7 + $0x10] sm:$0xf] }
  0x1f   : > { %v1711_v60 = vld [vmem:[%s1993_s7 + $0x4] sm:$0xf]  ;;  %v1409_v1 = vld [vmem:[%s1993_s7 + $0x1c] sm:$0xf0]  ;;  %v1716_v8 = vld [vmem:[%s1993_s7 + $0x2c] sm:$0xf] }
  0x20   : > { %v1715_v3 = vld [vmem:[%s1993_s7 + $0x20] sm:$0xf0]  ;;  %v1404_v4 = vor.u32 %v1711_v60, %v1401_v61  ;;  %v1421_v9 = vld [vmem:[%s1993_s7 + $0x3c] sm:$0xf0]  ;;  %v1427_v10 = vld [vmem:[%s1993_s7 + $0x30] sm:$0xf] }
  0x21   : > { %1802 = vmatpush.bf16.msra.mxu1 %v1753_v5  ;;  %1803 = vmatpush.bf16.msra.mxu2 %v1753_v5  ;;  %v1719_v11 = vld [vmem:[%s1993_s7 + $0x40] sm:$0xf0]  ;;  %v1717_v12 = vld [vmem:[%s1993_s7 + $0x34] sm:$0xf]  ;;  %v1429_v13 = vld [vmem:[%s1993_s7 + $0x44] sm:$0xf0] }
  0x22   : > { %1804 = vmatpush.bf16.msra.mxu3 %v1753_v5  ;;  %839 = vmatpush.bf16.msra.mxu0 %v1753_v5  ;;  %v1408_v5 = vor.u32 %v1714_v63, %v1407_v62  ;;  %v1435_v14 = vld [vmem:[%s1993_s7 + $0x38] sm:$0xf]  ;;  %v1720_v15 = vld [vmem:[%s1993_s7 + $0x48] sm:$0xf0]  ;;  %v1729_v35 = vld [vmem:[%s1993_s7 + $0x90] sm:$0xf0] }
  0x23   : > { %v1727_v36 = vld [vmem:[%s1993_s7 + $0x84] sm:$0xf]  ;;  %v1469_v37 = vld [vmem:[%s1993_s7 + $0x94] sm:$0xf0]  ;;  %v1475_v38 = vld [vmem:[%s1993_s7 + $0x88] sm:$0xf] }
  0x24   : > { %v1730_v39 = vld [vmem:[%s1993_s7 + $0x98] sm:$0xf0]  ;;  %v1472_v42 = vor.u32 %v1727_v36, %v1469_v37  ;;  %v1737_v60 = vld [vmem:[%s1993_s7 + $0xd4] sm:$0xf]  ;;  %v1509_v61 = vld [vmem:[%s1993_s7 + $0xe4] sm:$0xf0] }
  0x25   : > { %1805 = vmatpush.bf16.msra.mxu1 %v1752_v6  ;;  %1806 = vmatpush.bf16.msra.mxu2 %v1752_v6  ;;  %v1515_v62 = vld [vmem:[%s1993_s7 + $0xd8] sm:$0xf]  ;;  %v1740_v63 = vld [vmem:[%s1993_s7 + $0xe8] sm:$0xf0] }
  0x26   : > { %1807 = vmatpush.bf16.msra.mxu3 %v1752_v6  ;;  %840 = vmatpush.bf16.msra.mxu0 %v1752_v6  ;;  %v1412_v6 = vor.u32 %v1712_v0, %v1409_v1 }
  0x29   : > { %1808 = vmatpush.bf16.msra.mxu1 %v1751_v7  ;;  %1809 = vmatpush.bf16.msra.mxu2 %v1751_v7 }
  0x2a   : > { %1810 = vmatpush.bf16.msra.mxu3 %v1751_v7  ;;  %841 = vmatpush.bf16.msra.mxu0 %v1751_v7  ;;  %v1416_v7 = vor.u32 %v1715_v3, %v1415_v2  ;;  %v1512_v2 = vor.u32 %v1737_v60, %v1509_v61  ;;  %v1516_v3 = vor.u32 %v1740_v63, %v1515_v62 }
  0x2c   : > { %852 = vmatmul.bf16.vlgmr.msra.gmra.mxu1 %v1440_v18  ;;  %862 = vmatmul.bf16.vlgmr.msra.gmra.mxu2 %v1480_v19  ;;  %v1432_v18 = vor.u32 %v1717_v12, %v1429_v13  ;;  %v1436_v19 = vor.u32 %v1720_v15, %v1435_v14 }
  0x2d   : > { %932 = vmatpush.bf16.msrb.mxu2 %v1774_v16  ;;  %883 = vmatpush.bf16.msrb.mxu1 %v1766_v17  ;;  %v1424_v16 = vor.u32 %v1716_v8, %v1421_v9  ;;  %v1428_v17 = vor.u32 %v1719_v11, %v1427_v10  ;;  %v1742_v8 = vld [vmem:[%s1993_s7 + $0xfc] sm:$0xf]  ;;  %v1529_v9 = vld [vmem:[%s1993_s7 + $0x10c] sm:$0xf0]  ;;  %v1535_v10 = vld [vmem:[%s1993_s7 + $0x100] sm:$0xf] }
  0x2e   : > { %872 = vmatmul.bf16.vlgmr.msra.gmra.mxu3 %v1520_v20  ;;  %842 = vmatmul.bf16.vlgmr.msra.gmra.mxu0 %v1400_v21  ;;  %v1721_v20 = vld [vmem:[%s1993_s7 + $0x54] sm:$0xf]  ;;  %v1441_v21 = vld [vmem:[%s1993_s7 + $0x64] sm:$0xf0]  ;;  %v1532_v15 = vor.u32 %v1742_v8, %v1529_v9 }
  0x2f   : > { %981 = vmatpush.bf16.msrb.mxu3 %v1782_v22  ;;  %1034 = vmatpush.bf16.msrb.mxu0 %v1786_v23  ;;  %v1447_v22 = vld [vmem:[%s1993_s7 + $0x58] sm:$0xf]  ;;  %v1724_v23 = vld [vmem:[%s1993_s7 + $0x68] sm:$0xf0]  ;;  %v1745_v11 = vld [vmem:[%s1993_s7 + $0x110] sm:$0xf0] }
  0x31   : > { %933 = vmatpush.bf16.msrb.mxu2 %v1773_v24  ;;  %884 = vmatpush.bf16.msrb.mxu1 %v1765_v25  ;;  %v1722_v24 = vld [vmem:[%s1993_s7 + $0x5c] sm:$0xf]  ;;  %v1449_v25 = vld [vmem:[%s1993_s7 + $0x6c] sm:$0xf0] }
  0x33   : > { %982 = vmatpush.bf16.msrb.mxu3 %v1781_v26  ;;  %1035 = vmatpush.bf16.msrb.mxu0 %v1785_v27  ;;  %v1455_v26 = vld [vmem:[%s1993_s7 + $0x60] sm:$0xf]  ;;  %v1725_v27 = vld [vmem:[%s1993_s7 + $0x70] sm:$0xf0] }
  0x35   : > { %934 = vmatpush.bf16.msrb.mxu2 %v1772_v28  ;;  %885 = vmatpush.bf16.msrb.mxu1 %v1764_v29  ;;  %v1444_v28 = vor.u32 %v1721_v20, %v1441_v21  ;;  %v1448_v29 = vor.u32 %v1724_v23, %v1447_v22  ;;  %v1746_v22 = vld [vmem:[%s1993_s7 + $0x11c] sm:$0xf]  ;;  %v1541_v23 = vld [vmem:[%s1993_s7 + $0x12c] sm:$0xf0] }
  0x37   : > { %983 = vmatpush.bf16.msrb.mxu3 %v1780_v30  ;;  %1036 = vmatpush.bf16.msrb.mxu0 %v1784_v31  ;;  %v1452_v30 = vor.u32 %v1722_v24, %v1449_v25  ;;  %v1456_v31 = vor.u32 %v1725_v27, %v1455_v26  ;;  %v1547_v24 = vld [vmem:[%s1993_s7 + $0x120] sm:$0xf]  ;;  %v1749_v25 = vld [vmem:[%s1993_s7 + $0x130] sm:$0xf0]  ;;  %v1747_v26 = vld [vmem:[%s1993_s7 + $0x124] sm:$0xf] }
  0x38   : > { %v1549_v27 = vld [vmem:[%s1993_s7 + $0x134] sm:$0xf0] }
  0x39   : > { %935 = vmatpush.bf16.msrb.mxu2 %v1771_v32  ;;  %886 = vmatpush.bf16.msrb.mxu1 %v1763_v33  ;;  %v1726_v32 = vld [vmem:[%s1993_s7 + $0x7c] sm:$0xf]  ;;  %v1461_v33 = vld [vmem:[%s1993_s7 + $0x8c] sm:$0xf0] }
  0x3a   : > { %v1464_v40 = vor.u32 %v1726_v32, %v1461_v33  ;;  %v1544_v32 = vor.u32 %v1746_v22, %v1541_v23  ;;  %v1548_v33 = vor.u32 %v1749_v25, %v1547_v24 }
  0x3b   : > { %984 = vmatpush.bf16.msrb.mxu3 %v1779_v34  ;;  %1037 = vmatpush.bf16.msrb.mxu0 %v1783_v43  ;;  %v1467_v34 = vld [vmem:[%s1993_s7 + $0x80] sm:$0xf]  ;;  %v1476_v43 = vor.u32 %v1730_v39, %v1475_v38 }
  0x3c   : > { %857 = vmatmul.bf16.gmra.mxu1 %v1460_v46  ;;  %867 = vmatmul.bf16.gmra.mxu2 %v1500_v47  ;;  %v1468_v41 = vor.u32 %v1729_v35, %v1467_v34  ;;  %v1487_v46 = vld [vmem:[%s1993_s7 + $0xa8] sm:$0xf]  ;;  %v1734_v47 = vld [vmem:[%s1993_s7 + $0xb8] sm:$0xf0]  ;;  %v1552_v35 = vor.u32 %v1747_v26, %v1549_v27 }
  0x3d   : > { %936 = vmatpush.bf16.msrb.mxu2 %v1770_v44  ;;  %887 = vmatpush.bf16.msrb.mxu1 %v1762_v45  ;;  %v1731_v44 = vld [vmem:[%s1993_s7 + $0xa4] sm:$0xf]  ;;  %v1481_v45 = vld [vmem:[%s1993_s7 + $0xb4] sm:$0xf0] }
  0x3e   : > { %877 = vmatmul.bf16.gmra.mxu3 %v1540_v48  ;;  %847 = vmatmul.bf16.gmra.mxu0 %v1420_v49  ;;  %v1732_v48 = vld [vmem:[%s1993_s7 + $0xac] sm:$0xf]  ;;  %v1489_v49 = vld [vmem:[%s1993_s7 + $0xbc] sm:$0xf0] }
  0x3f   : > { %985 = vmatpush.bf16.msrb.mxu3 %v1778_v50  ;;  %v1495_v50 = vld [vmem:[%s1993_s7 + $0xb0] sm:$0xf] }
  0x41   : > { %937 = vmatpush.bf16.msrb.mxu2 %v1769_v51  ;;  %888 = vmatpush.bf16.msrb.mxu1 %v1761_v52  ;;  %v1735_v51 = vld [vmem:[%s1993_s7 + $0xc0] sm:$0xf0]  ;;  %v1484_v52 = vor.u32 %v1731_v44, %v1481_v45 }
  0x43   : > { %986 = vmatpush.bf16.msrb.mxu3 %v1777_v53  ;;  %v1488_v53 = vor.u32 %v1734_v47, %v1487_v46 }
  0x45   : > { %938 = vmatpush.bf16.msrb.mxu2 %v1768_v54  ;;  %889 = vmatpush.bf16.msrb.mxu1 %v1760_v55  ;;  %v1492_v54 = vor.u32 %v1732_v48, %v1489_v49  ;;  %v1496_v55 = vor.u32 %v1735_v51, %v1495_v50 }
  0x47   : > { %987 = vmatpush.bf16.msrb.mxu3 %v1776_v56  ;;  %v1736_v56 = vld [vmem:[%s1993_s7 + $0xcc] sm:$0xf] }
  0x49   : > { %939 = vmatpush.bf16.msrb.mxu2 %v1767_v57  ;;  %890 = vmatpush.bf16.msrb.mxu1 %v1759_v58  ;;  %v1501_v57 = vld [vmem:[%s1993_s7 + $0xdc] sm:$0xf0]  ;;  %v1507_v58 = vld [vmem:[%s1993_s7 + $0xd0] sm:$0xf] }
  0x4a   : > { %v1504_v0 = vor.u32 %v1736_v56, %v1501_v57 }
  0x4b   : > { %988 = vmatpush.bf16.msrb.mxu3 %v1775_v59  ;;  %v1739_v59 = vld [vmem:[%s1993_s7 + $0xe0] sm:$0xf0] }
  0x4c   : > { %891 = vmatmul.bf16.vlgmr.msrb.gmra.mxu1 %v1404_v4  ;;  %940 = vmatmul.bf16.vlgmr.msrb.gmra.mxu2 %v1408_v5  ;;  %v1508_v1 = vor.u32 %v1739_v59, %v1507_v58  ;;  %v1741_v4 = vld [vmem:[%s1993_s7 + $0xf4] sm:$0xf]  ;;  %v1521_v5 = vld [vmem:[%s1993_s7 + $0x104] sm:$0xf0] }
  0x4d   : > { %v1524_v12 = vor.u32 %v1741_v4, %v1521_v5 }
  0x4e   : > { %989 = vmatmul.bf16.vlgmr.msrb.gmra.mxu3 %v1412_v6  ;;  %1701 = vmatmul.msk.bf16.vlgmr.msrb.gmra.mxu0 %vm809_vm0, %v1416_v7  ;;  %v1527_v6 = vld [vmem:[%s1993_s7 + $0xf8] sm:$0xf]  ;;  %v1744_v7 = vld [vmem:[%s1993_s7 + $0x108] sm:$0xf0] }
  0x4f   : > { %v1528_v13 = vor.u32 %v1744_v7, %v1527_v6 }
  0x5c   : > { %896 = vmatmul.bf16.gmra.mxu1 %v1424_v16  ;;  %945 = vmatmul.bf16.gmra.mxu2 %v1428_v17  ;;  %v1536_v16 = vor.u32 %v1745_v11, %v1535_v10 }
  0x5e   : > { %994 = vmatmul.bf16.gmra.mxu3 %v1432_v18  ;;  %1702 = vmatmul.msk.bf16.gmra.mxu0 %vm809_vm0, %v1436_v19 }
  0x6c   : > { %901 = vmatmul.bf16.gmra.mxu1 %v1444_v28  ;;  %950 = vmatmul.bf16.gmra.mxu2 %v1448_v29  ;;  %v1555_v28 = vld [vmem:[%s1993_s7 + $0x128] sm:$0xf]  ;;  %v1750_v29 = vld [vmem:[%s1993_s7 + $0x138] sm:$0xf0] }
  0x6d   : > { %v1556_v36 = vor.u32 %v1750_v29, %v1555_v28 }
  0x6e   : > { %999 = vmatmul.bf16.gmra.mxu3 %v1452_v30  ;;  %1703 = vmatmul.msk.bf16.gmra.mxu0 %vm809_vm0, %v1456_v31 }
  0x7c   : > { %906 = vmatmul.bf16.gmra.mxu1 %v1464_v40  ;;  %955 = vmatmul.bf16.gmra.mxu2 %v1468_v41 }
  0x7e   : > { %1004 = vmatmul.bf16.gmra.mxu3 %v1472_v42  ;;  %1704 = vmatmul.msk.bf16.gmra.mxu0 %vm809_vm0, %v1476_v43 }
  0x8c   : > { %911 = vmatmul.bf16.gmra.mxu1 %v1484_v52  ;;  %960 = vmatmul.bf16.gmra.mxu2 %v1488_v53  ;;  %v2197_v52 = vld [vmem:[%s2260_s2] ss:$0 sm:$0xff] }
  0x8e   : > { %1009 = vmatmul.bf16.gmra.mxu3 %v1492_v54  ;;  %1705 = vmatmul.msk.bf16.gmra.mxu0 %vm809_vm0, %v1496_v55 }
  0x9c   : > { %916 = vmatmul.bf16.gmra.mxu1 %v1504_v0  ;;  %965 = vmatmul.bf16.gmra.mxu2 %v1508_v1 }
  0x9e   : > { %1014 = vmatmul.bf16.gmra.mxu3 %v1512_v2  ;;  %1706 = vmatmul.msk.bf16.gmra.mxu0 %vm809_vm0, %v1516_v3 }
  0xa9   : > { %v2160_v14 = vpop.f32.mrf.mxu1 }
  0xab   : > { %v843_v17 = vpop.f32.mrf.mxu0 }
  0xac   : > { %921 = vmatmul.bf16.gmra.mxu1 %v1524_v12  ;;  %970 = vmatmul.bf16.gmra.mxu2 %v1528_v13 }
  0xae   : > { %1019 = vmatmul.bf16.gmra.mxu3 %v1532_v15  ;;  %1707 = vmatmul.msk.bf16.gmra.mxu0 %vm809_vm0, %v1536_v16 }
  0xaf   : > { %v2163_v18 = vpop.f32.mrf.mxu2 }
  0xb1   : > { %v2165_v19 = vpop.f32.mrf.mxu3  ;;  %v2167_v20 = vpop.f32.mrf.mxu1 }
  0xb3   : > { %v845_v21 = vpop.f32.mrf.mxu0 }
  0xb7   : > { %v2177_v30 = vpop.f32.mrf.mxu2 }
  0xb9   : > { %v2179_v31 = vpop.f32.mrf.mxu3  ;;  %v2181_v34 = vpop.f32.mrf.mxu1 }
  0xbb   : > { %v848_v37 = vpop.f32.mrf.mxu0 }
  0xbc   : > { %926 = vmatmul.bf16.gmra.mxu1 %v1544_v32  ;;  %975 = vmatmul.bf16.gmra.mxu2 %v1548_v33 }
  0xbe   : > { %1024 = vmatmul.bf16.gmra.mxu3 %v1552_v35  ;;  %1708 = vmatmul.msk.bf16.gmra.mxu0 %vm809_vm0, %v1556_v36 }
  0xbf   : > { %v2184_v38 = vpop.f32.mrf.mxu2 }
  0xc1   : > { %v2186_v39 = vpop.f32.mrf.mxu3  ;;  %v2188_v40 = vpop.f32.mrf.mxu1 }
  0xc3   : > { %v850_v41 = vpop.f32.mrf.mxu0 }
  0xc7   : > { %v2190_v42 = vpop.f32.mrf.mxu2 }
  0xc9   : > { %v2192_v43 = vpop.f32.mrf.mxu3  ;;  %v892_v44 = vpop.f32.mrf.mxu1 }
  0xca   : > { %v893_v46 = vadd.f32 %v892_v44, %v843_v17 }
  0xcb   : > { %v1039_v45 = vpop.f32.mrf.mxu0 }
  0xcf   : > { %v941_v47 = vpop.f32.mrf.mxu2 }
  0xd0   : > { %v942_v48 = vadd.f32 %v941_v47, %v893_v46 }
  0xd1   : > { %v990_v49 = vpop.f32.mrf.mxu3  ;;  %v894_v50 = vpop.f32.mrf.mxu1 }
  0xd2   : > { %v991_v51 = vadd.f32 %v990_v49, %v942_v48  ;;  %v895_v56 = vadd.f32 %v894_v50, %v845_v21 }
  0xd3   : > { %v1041_v53 = vpop.f32.mrf.mxu0 }
  0xd4   : > { %v1040_v54 = vadd.f32 %v1039_v45, %v991_v51 }
  0xd6   : > { %v1174_v55 = vadd.f32 %v2197_v52, %v1040_v54 }
  0xd7   : > { %v943_v57 = vpop.f32.mrf.mxu2 }
  0xd8   : > { %v1190_v58 = vsub.f32 0.0, %v1174_v55  ;;  %v944_v59 = vadd.f32 %v943_v57, %v895_v56 }
  0xd9   : > { %v992_v60 = vpop.f32.mrf.mxu3  ;;  %v897_v61 = vpop.f32.mrf.mxu1 }
  0xda   : > { %v1206_v62 = vmul.f32 1.442695, %v1190_v58  ;;  %v993_v63 = vadd.f32 %v992_v60, %v944_v59  ;;  %v898_v3 = vadd.f32 %v897_v61, %v848_v37 }
  0xdb   : > { %v1044_v0 = vpop.f32.mrf.mxu0 }
  0xdc   : > { %1837 = vpow2.f32 %v1206_v62  ;;  %v1042_v1 = vadd.f32 %v1041_v53, %v993_v63 }
  0xde   : > { %v1175_v2 = vadd.f32 %v2197_v52, %v1042_v1 }
  0xdf   : > { %v946_v4 = vpop.f32.mrf.mxu2 }
  0xe0   : > { %v1191_v5 = vsub.f32 0.0, %v1175_v2  ;;  %v947_v6 = vadd.f32 %v946_v4, %v898_v3 }
  0xe1   : > { %v995_v7 = vpop.f32.mrf.mxu3  ;;  %v899_v8 = vpop.f32.mrf.mxu1 }
  0xe2   : > { %v1838_v9 = vpop.eup %1837  ;;  %v1208_v10 = vmul.f32 1.442695, %v1191_v5  ;;  %v996_v11 = vadd.f32 %v995_v7, %v947_v6  ;;  %v900_v17 = vadd.f32 %v899_v8, %v850_v41 }
  0xe3   : > { %v1046_v12 = vpop.f32.mrf.mxu0  ;;  %v1238_v13 = vadd.f32 1.0, %v1838_v9 }
  0xe4   : > { %1839 = vpow2.f32 %v1208_v10  ;;  %v1045_v15 = vadd.f32 %v1044_v0, %v996_v11 }
  0xe5   : > { %1841 = vrcp.f32 %v1238_v13 }
  0xe6   : > { %v1176_v16 = vadd.f32 %v2197_v52, %v1045_v15 }
  0xe7   : > { %v948_v21 = vpop.f32.mrf.mxu2 }
  0xe8   : > { %v1192_v22 = vsub.f32 0.0, %v1176_v16  ;;  %v949_v23 = vadd.f32 %v948_v21, %v900_v17 }
  0xe9   : > { %v997_v24 = vpop.f32.mrf.mxu3  ;;  %v902_v25 = vpop.f32.mrf.mxu1 }
  0xea   : > { %v1840_v26 = vpop.eup %1839  ;;  %v1210_v27 = vmul.f32 1.442695, %v1192_v22  ;;  %v998_v28 = vadd.f32 %v997_v24, %v949_v23  ;;  %v903_v37 = vadd.f32 %v902_v25, %v2160_v14 }
  0xeb   : > { %v1049_v29 = vpop.f32.mrf.mxu0  ;;  %v1842_v32 = vpop.eup %1841  ;;  %v1239_v33 = vadd.f32 1.0, %v1840_v26 }
  0xec   : > { %1270 = vst [vmem:[%s2206_s30] sm:$0xff] %v1842_v32  ;;  %1843 = vpow2.f32 %v1210_v27  ;;  %v1047_v35 = vadd.f32 %v1046_v12, %v998_v28 }
  0xed   : > { %1845 = vrcp.f32 %v1239_v33 }
  0xee   : > { %v1177_v36 = vadd.f32 %v2197_v52, %v1047_v35 }
  0xef   : > { %v951_v41 = vpop.f32.mrf.mxu2 }
  0xf0   : > { %v1193_v44 = vsub.f32 0.0, %v1177_v36  ;;  %v952_v45 = vadd.f32 %v951_v41, %v903_v37 }
  0xf1   : > { %v1000_v46 = vpop.f32.mrf.mxu3  ;;  %v904_v47 = vpop.f32.mrf.mxu1 }
  0xf2   : > { %v1844_v48 = vpop.eup %1843  ;;  %v1212_v49 = vmul.f32 1.442695, %v1193_v44  ;;  %v1001_v50 = vadd.f32 %v1000_v46, %v952_v45  ;;  %v905_v14 = vadd.f32 %v904_v47, %v2167_v20 }
  0xf3   : > { %v1051_v51 = vpop.f32.mrf.mxu0  ;;  %v1846_v53 = vpop.eup %1845  ;;  %v1240_v54 = vadd.f32 1.0, %v1844_v48 }
  0xf4   : > { %1271 = vst [vmem:[%s2206_s30 + $0x8] sm:$0xff] %v1846_v53  ;;  %1847 = vpow2.f32 %v1212_v49  ;;  %v1050_v55 = vadd.f32 %v1049_v29, %v1001_v50 }
  0xf5   : > { %1849 = vrcp.f32 %v1240_v54 }
  0xf6   : > { %v1178_v56 = vadd.f32 %v2197_v52, %v1050_v55 }
  0xf7   : > { %v953_v57 = vpop.f32.mrf.mxu2 }
  0xf8   : > { %v1194_v58 = vsub.f32 0.0, %v1178_v56  ;;  %v954_v59 = vadd.f32 %v953_v57, %v905_v14 }
  0xf9   : > { %v1002_v60 = vpop.f32.mrf.mxu3  ;;  %v907_v61 = vpop.f32.mrf.mxu1 }
  0xfa   : > { %v1848_v62 = vpop.eup %1847  ;;  %v1214_v63 = vmul.f32 1.442695, %v1194_v58  ;;  %v1003_v0 = vadd.f32 %v1002_v60, %v954_v59  ;;  %v908_v20 = vadd.f32 %v907_v61, %v2181_v34 }
  0xfb   : > { %v1054_v1 = vpop.f32.mrf.mxu0  ;;  %v1850_v2 = vpop.eup %1849  ;;  %v1241_v3 = vadd.f32 1.0, %v1848_v62 }
  0xfc   : > { %1272 = vst [vmem:[%s2206_s30 + $0x10] sm:$0xff] %v1850_v2  ;;  %1851 = vpow2.f32 %v1214_v63  ;;  %v1052_v4 = vadd.f32 %v1051_v51, %v1003_v0 }
  0xfd   : > { %1853 = vrcp.f32 %v1241_v3 }
  0xfe   : > { %v1179_v5 = vadd.f32 %v2197_v52, %v1052_v4 }
  0xff   : > { %v956_v6 = vpop.f32.mrf.mxu2 }
 0x100   : > { %v1195_v7 = vsub.f32 0.0, %v1179_v5  ;;  %v957_v8 = vadd.f32 %v956_v6, %v908_v20 }
 0x101   : > { %v1005_v9 = vpop.f32.mrf.mxu3  ;;  %v909_v10 = vpop.f32.mrf.mxu1 }
 0x102   : > { %v1852_v11 = vpop.eup %1851  ;;  %v1216_v12 = vmul.f32 1.442695, %v1195_v7  ;;  %v1006_v13 = vadd.f32 %v1005_v9, %v957_v8  ;;  %v910_v34 = vadd.f32 %v909_v10, %v2188_v40 }
 0x103   : > { %v1056_v15 = vpop.f32.mrf.mxu0  ;;  %v1854_v16 = vpop.eup %1853  ;;  %v1242_v17 = vadd.f32 1.0, %v1852_v11 }
 0x104   : > { %1273 = vst [vmem:[%s2206_s30 + $0x18] sm:$0xff] %v1854_v16  ;;  %1855 = vpow2.f32 %v1216_v12  ;;  %v1055_v21 = vadd.f32 %v1054_v1, %v1006_v13 }
 0x105   : > { %1857 = vrcp.f32 %v1242_v17 }
 0x106   : > { %v1180_v22 = vadd.f32 %v2197_v52, %v1055_v21 }
 0x107   : > { %v958_v23 = vpop.f32.mrf.mxu2 }
 0x108   : > { %v1196_v24 = vsub.f32 0.0, %v1180_v22  ;;  %v959_v25 = vadd.f32 %v958_v23, %v910_v34 }
 0x109   : > { %v1007_v26 = vpop.f32.mrf.mxu3  ;;  %v912_v27 = vpop.f32.mrf.mxu1 }
 0x10a   : > { %v1856_v28 = vpop.eup %1855  ;;  %v1218_v29 = vmul.f32 1.442695, %v1196_v24  ;;  %v1008_v32 = vadd.f32 %v1007_v26, %v959_v25  ;;  %v913_v40 = vadd.f32 %v912_v27, %v2163_v18 }
 0x10b   : > { %v1059_v33 = vpop.f32.mrf.mxu0  ;;  %v1858_v35 = vpop.eup %1857  ;;  %v1243_v36 = vadd.f32 1.0, %v1856_v28 }
 0x10c   : > { %1274 = vst [vmem:[%s2206_s30 + $0x20] sm:$0xff] %v1858_v35  ;;  %1859 = vpow2.f32 %v1218_v29  ;;  %v1057_v37 = vadd.f32 %v1056_v15, %v1008_v32 }
 0x10d   : > { %1861 = vrcp.f32 %v1243_v36 }
 0x10e   : > { %v1181_v41 = vadd.f32 %v2197_v52, %v1057_v37 }
 0x10f   : > { %v961_v44 = vpop.f32.mrf.mxu2 }
 0x110   : > { %v1197_v45 = vsub.f32 0.0, %v1181_v41  ;;  %v962_v46 = vadd.f32 %v961_v44, %v913_v40 }
 0x111   : > { %v1010_v47 = vpop.f32.mrf.mxu3  ;;  %v914_v48 = vpop.f32.mrf.mxu1 }
 0x112   : > { %v1860_v49 = vpop.eup %1859  ;;  %v1220_v50 = vmul.f32 1.442695, %v1197_v45  ;;  %v1011_v51 = vadd.f32 %v1010_v47, %v962_v46  ;;  %v915_v18 = vadd.f32 %v914_v48, %v2177_v30 }
 0x113   : > { %v1061_v53 = vpop.f32.mrf.mxu0  ;;  %v1862_v54 = vpop.eup %1861  ;;  %v1244_v55 = vadd.f32 1.0, %v1860_v49 }
 0x114   : > { %1275 = vst [vmem:[%s2206_s30 + $0x28] sm:$0xff] %v1862_v54  ;;  %1863 = vpow2.f32 %v1220_v50  ;;  %v1060_v56 = vadd.f32 %v1059_v33, %v1011_v51 }
 0x115   : > { %1865 = vrcp.f32 %v1244_v55 }
 0x116   : > { %v1182_v14 = vadd.f32 %v2197_v52, %v1060_v56 }
 0x117   : > { %v963_v57 = vpop.f32.mrf.mxu2 }
 0x118   : > { %v1198_v58 = vsub.f32 0.0, %v1182_v14  ;;  %v964_v59 = vadd.f32 %v963_v57, %v915_v18 }
 0x119   : > { %v1012_v60 = vpop.f32.mrf.mxu3  ;;  %v917_v61 = vpop.f32.mrf.mxu1 }
 0x11a   : > { %v1864_v62 = vpop.eup %1863  ;;  %v1222_v63 = vmul.f32 1.442695, %v1198_v58  ;;  %v1013_v0 = vadd.f32 %v1012_v60, %v964_v59  ;;  %v918_v30 = vadd.f32 %v917_v61, %v2184_v38 }
 0x11b   : > { %v1064_v1 = vpop.f32.mrf.mxu0  ;;  %v1866_v2 = vpop.eup %1865  ;;  %v1245_v3 = vadd.f32 1.0, %v1864_v62 }
 0x11c   : > { %1276 = vst [vmem:[%s2206_s30 + $0x30] sm:$0xff] %v1866_v2  ;;  %1867 = vpow2.f32 %v1222_v63  ;;  %v1062_v4 = vadd.f32 %v1061_v53, %v1013_v0 }
 0x11d   : > { %1869 = vrcp.f32 %v1245_v3 }
 0x11e   : > { %v1183_v5 = vadd.f32 %v2197_v52, %v1062_v4 }
 0x11f   : > { %v966_v20 = vpop.f32.mrf.mxu2 }
 0x120   : > { %v1199_v6 = vsub.f32 0.0, %v1183_v5  ;;  %v967_v7 = vadd.f32 %v966_v20, %v918_v30 }
 0x121   : > { %v1015_v8 = vpop.f32.mrf.mxu3  ;;  %v919_v9 = vpop.f32.mrf.mxu1 }
 0x122   : > { %v1868_v10 = vpop.eup %1867  ;;  %v1224_v11 = vmul.f32 1.442695, %v1199_v6  ;;  %v1016_v12 = vadd.f32 %v1015_v8, %v967_v7  ;;  %v920_v38 = vadd.f32 %v919_v9, %v2190_v42 }
 0x123   : > { %v1870_v13 = vpop.eup %1869  ;;  %v1246_v15 = vadd.f32 1.0, %v1868_v10  ;;  %v1066_v16 = vpop.f32.mrf.mxu0 }
 0x124   : > { %1277 = vst [vmem:[%s2206_s30 + $0x38] sm:$0xff] %v1870_v13  ;;  %1871 = vpow2.f32 %v1224_v11  ;;  %v1065_v17 = vadd.f32 %v1064_v1, %v1016_v12 }
 0x125   : > { %1873 = vrcp.f32 %v1246_v15 }
 0x126   : > { %v1184_v21 = vadd.f32 %v2197_v52, %v1065_v17 }
 0x127   : > { %v968_v22 = vpop.f32.mrf.mxu2 }
 0x128   : > { %v1200_v34 = vsub.f32 0.0, %v1184_v21  ;;  %v969_v23 = vadd.f32 %v968_v22, %v920_v38 }
 0x129   : > { %v1017_v24 = vpop.f32.mrf.mxu3  ;;  %v922_v25 = vpop.f32.mrf.mxu1 }
 0x12a   : > { %v1872_v26 = vpop.eup %1871  ;;  %v1226_v27 = vmul.f32 1.442695, %v1200_v34  ;;  %v1018_v28 = vadd.f32 %v1017_v24, %v969_v23  ;;  %v923_v42 = vadd.f32 %v922_v25, %v2165_v19 }
 0x12b   : > { %v1874_v29 = vpop.eup %1873  ;;  %v1247_v32 = vadd.f32 1.0, %v1872_v26  ;;  %v1069_v35 = vpop.f32.mrf.mxu0 }
 0x12c   : > { %1278 = vst [vmem:[%s2206_s30 + $0x40] sm:$0xff] %v1874_v29  ;;  %1875 = vpow2.f32 %v1226_v27  ;;  %v1067_v33 = vadd.f32 %v1066_v16, %v1018_v28 }
 0x12d   : > { %1877 = vrcp.f32 %v1247_v32 }
 0x12e   : > { %v1185_v36 = vadd.f32 %v2197_v52, %v1067_v33 }
 0x12f   : > { %v971_v37 = vpop.f32.mrf.mxu2 }
 0x130   : > { %v1201_v41 = vsub.f32 0.0, %v1185_v36  ;;  %v972_v40 = vadd.f32 %v971_v37, %v923_v42 }
 0x131   : > { %v1020_v44 = vpop.f32.mrf.mxu3  ;;  %v924_v45 = vpop.f32.mrf.mxu1 }
 0x132   : > { %v1876_v46 = vpop.eup %1875  ;;  %v1228_v47 = vmul.f32 1.442695, %v1201_v41  ;;  %v1021_v48 = vadd.f32 %v1020_v44, %v972_v40  ;;  %v925_v54 = vadd.f32 %v924_v45, %v2179_v31 }
 0x133   : > { %v1878_v49 = vpop.eup %1877  ;;  %v1248_v50 = vadd.f32 1.0, %v1876_v46  ;;  %v1071_v19 = vpop.f32.mrf.mxu0 }
 0x134   : > { %1279 = vst [vmem:[%s2206_s30 + $0x48] sm:$0xff] %v1878_v49  ;;  %1879 = vpow2.f32 %v1228_v47  ;;  %v1070_v51 = vadd.f32 %v1069_v35, %v1021_v48 }
 0x135   : > { %1881 = vrcp.f32 %v1248_v50 }
 0x136   : > { %v1186_v53 = vadd.f32 %v2197_v52, %v1070_v51 }
 0x137   : > { %v973_v55 = vpop.f32.mrf.mxu2 }
 0x138   : > { %v1202_v56 = vsub.f32 0.0, %v1186_v53  ;;  %v974_v14 = vadd.f32 %v973_v55, %v925_v54 }
 0x139   : > { %v1022_v18 = vpop.f32.mrf.mxu3  ;;  %v927_v57 = vpop.f32.mrf.mxu1 }
 0x13a   : > { %v1880_v58 = vpop.eup %1879  ;;  %v1230_v59 = vmul.f32 1.442695, %v1202_v56  ;;  %v1023_v60 = vadd.f32 %v1022_v18, %v974_v14  ;;  %v928_v31 = vadd.f32 %v927_v57, %v2186_v39 }
 0x13b   : > { %v1882_v61 = vpop.eup %1881  ;;  %v1249_v62 = vadd.f32 1.0, %v1880_v58  ;;  %v1074_v5 = vpop.f32.mrf.mxu0 }
 0x13c   : > { %1280 = vst [vmem:[%s2206_s30 + $0x50] sm:$0xff] %v1882_v61  ;;  %1883 = vpow2.f32 %v1230_v59  ;;  %v1072_v63 = vadd.f32 %v1071_v19, %v1023_v60 }
 0x13d   : > { %1885 = vrcp.f32 %v1249_v62 }
 0x13e   : > { %v1187_v0 = vadd.f32 %v2197_v52, %v1072_v63 }
 0x13f   : > { %v976_v1 = vpop.f32.mrf.mxu2 }
 0x140   : > { %v1203_v2 = vsub.f32 0.0, %v1187_v0  ;;  %v977_v3 = vadd.f32 %v976_v1, %v928_v31 }
 0x141   : > { %v1025_v4 = vpop.f32.mrf.mxu3  ;;  %v929_v9 = vpop.f32.mrf.mxu1 }
 0x142   : > { %v1884_v30 = vpop.eup %1883  ;;  %v1232_v20 = vmul.f32 1.442695, %v1203_v2  ;;  %v1026_v6 = vadd.f32 %v1025_v4, %v977_v3  ;;  %v930_v39 = vadd.f32 %v929_v9, %v2192_v43 }
 0x143   : > { %v1886_v7 = vpop.eup %1885  ;;  %v1250_v8 = vadd.f32 1.0, %v1884_v30  ;;  %v1076_v23 = vpop.f32.mrf.mxu0 }
 0x144   : > { %1281 = vst [vmem:[%s2206_s30 + $0x58] sm:$0xff] %v1886_v7  ;;  %1887 = vpow2.f32 %v1232_v20  ;;  %v1075_v10 = vadd.f32 %v1074_v5, %v1026_v6 }
 0x145   : > { %1889 = vrcp.f32 %v1250_v8 }
 0x146   : > { %v1188_v11 = vadd.f32 %v2197_v52, %v1075_v10 }
 0x147   : > { %v978_v12 = vpop.f32.mrf.mxu2 }
 0x148   : > { %v1204_v13 = vsub.f32 0.0, %v1188_v11  ;;  %v979_v15 = vadd.f32 %v978_v12, %v930_v39 }
 0x149   : > { %v1027_v16 = vpop.f32.mrf.mxu3 }
 0x14a   : > { %v1888_v17 = vpop.eup %1887  ;;  %v1234_v21 = vmul.f32 1.442695, %v1204_v13  ;;  %v1028_v38 = vadd.f32 %v1027_v16, %v979_v15 }
 0x14b   : > { %v1890_v22 = vpop.eup %1889  ;;  %v1251_v34 = vadd.f32 1.0, %v1888_v17 }
 0x14c   : > { %1282 = vst [vmem:[%s2206_s30 + $0x60] sm:$0xff] %v1890_v22  ;;  %1891 = vpow2.f32 %v1234_v21  ;;  %v1077_v24 = vadd.f32 %v1076_v23, %v1028_v38 }
 0x14d   : > { %1893 = vrcp.f32 %v1251_v34 }
 0x14e   : > { %v1189_v25 = vadd.f32 %v2197_v52, %v1077_v24 }
 0x150   : > { %v1205_v43 = vsub.f32 0.0, %v1189_v25 }
 0x152   : > { %v1892_v26 = vpop.eup %1891  ;;  %v1236_v27 = vmul.f32 1.442695, %v1205_v43 }
 0x153   : > { %v1894_v28 = vpop.eup %1893  ;;  %v1252_v29 = vadd.f32 1.0, %v1892_v26 }
 0x154   : > { %1283 = vst [vmem:[%s2206_s30 + $0x68] sm:$0xff] %v1894_v28  ;;  %1895 = vpow2.f32 %v1236_v27 }
 0x155   : > { %1897 = vrcp.f32 %v1252_v29 }
 0x15a   : > { %v1896_v32 = vpop.eup %1895 }
 0x15b   : > { %v1898_v33 = vpop.eup %1897  ;;  %v1253_v35 = vadd.f32 1.0, %v1896_v32 }
 0x15c   : > { %1284 = vst [vmem:[%s2206_s30 + $0x70] sm:$0xff] %v1898_v33 }
 0x15d   : > { %1899 = vrcp.f32 %v1253_v35 }
 0x163   : > { %v1900_v36 = vpop.eup %1899 }
 0x164   : > { %1285 = vst [vmem:[%s2206_s30 + $0x78] sm:$0xff] %v1900_v36 }
 0x165 PF: > { %s13_s14 = sadd.s32 1, %s1923_s14   ;;  %s2262_s12 = smov %s1919_s13 }
 0x166   : > { %p10_p5 = scmp.ge.s32.totalorder %s13_s14, 6   ;;  %s2263_s13 = smov %s2265_s15 }
 0x168   :  { %12 = sbr.rel (!%p10_p5) target bundleno = 2 (0x2), region = 77 }

</bundles_post_ra>
